<compile_context>
chip_gen: v7x
topology: tpu7x:2x2x1
jax: 0.10.0
libtpu: 0.0.40
codegen_flags: <defaults>
</compile_context>

<pallas_src>
import math

import jax
import jax.numpy as jnp
from jax.experimental import pallas as pl
from jax.experimental.pallas import tpu as pltpu


def _round_up(v, m):
    return (v + m - 1) // m * m


def _padded_vmem_bytes(shape, dtype):
    """Approximate Mosaic VMEM footprint of one buffer: trailing dim padded to
    128 lanes, second-to-last padded to the dtype's sublane granule."""
    itemsize = jnp.dtype(dtype).itemsize
    sublane = {4: 8, 2: 16, 1: 32}.get(itemsize, 8)
    dims = list(shape)
    if not dims:
        return itemsize
    if len(dims) == 1:
        return _round_up(dims[0], 128) * itemsize
    dims[-1] = _round_up(dims[-1], 128)
    dims[-2] = _round_up(dims[-2], sublane)
    total = 1
    for d in dims:
        total *= d
    return total * itemsize


def _make_rdb_kernel(H, W, nf, gc):
    """Fused ResidualDenseBlock kernel for one batch element."""
    HW = H * W
    cin = [nf + i * gc for i in range(5)]                 # conv_i fan-in
    base = [9 * c for c in (0, nf, nf + gc, nf + 2 * gc, nf + 3 * gc)]

    def lrelu(v):
        return jnp.where(v >= 0.0, v, 0.2 * v)

    def kernel(x_ref, w1, b1, w2, b2, w3, b3, w4, b4, w5, b5, o_ref,
               cols, pad_x, pad_g):
        # Zero ONLY the 1-pixel halo border of the padded staging buffers.
        # The interiors are fully overwritten for every source, and the
        # borders are never touched afterwards.  Unconditional every grid
        # step (scratch is per-core; batch may be split across TensorCores).
        for buf, c in ((pad_x, nf), (pad_g, gc)):
            buf[0:1, :, :] = jnp.zeros((1, W + 2, c), jnp.bfloat16)
            buf[H + 1:H + 2, :, :] = jnp.zeros((1, W + 2, c), jnp.bfloat16)
            buf[:, 0:1, :] = jnp.zeros((H + 2, 1, c), jnp.bfloat16)
            buf[:, W + 1:W + 2, :] = jnp.zeros((H + 2, 1, c), jnp.bfloat16)

        def emit_cols(buf, src_hwc, C, col0):
            # Stage one source through its zero-halo buffer and write its 9
            # shifted tap patches into the persistent im2col scratch ONCE;
            # every later conv re-reads them from `cols` (no re-slicing).
            buf[1:H + 1, 1:W + 1, :] = src_hwc
            for t in range(9):
                dy, dx = divmod(t, 3)
                patch = buf[dy:dy + H, dx:dx + W, :].reshape(HW, C)
                cols[:, col0 + t * C:col0 + (t + 1) * C] = patch

        def conv(i, w_ref, b_ref):
            # ONE large-K MXU matmul per conv (bf16 x bf16 -> f32 accumulate):
            #   (H*W, 9*cin_i) @ (9*cin_i, cout_i)
            k = 9 * cin[i]
            return jnp.dot(cols[:, :k], w_ref[...],
                           preferred_element_type=jnp.float32) + b_ref[0, :]

        x_f32 = x_ref[0]                                    # (H, W, nf) f32
        emit_cols(pad_x, x_f32.astype(jnp.bfloat16), nf, base[0])

        x1 = lrelu(conv(0, w1, b1))                         # (HW, gc) f32
        emit_cols(pad_g, x1.astype(jnp.bfloat16).reshape(H, W, gc), gc, base[1])
        x2 = lrelu(conv(1, w2, b2))
        emit_cols(pad_g, x2.astype(jnp.bfloat16).reshape(H, W, gc), gc, base[2])
        x3 = lrelu(conv(2, w3, b3))
        emit_cols(pad_g, x3.astype(jnp.bfloat16).reshape(H, W, gc), gc, base[3])
        x4 = lrelu(conv(3, w4, b4))
        emit_cols(pad_g, x4.astype(jnp.bfloat16).reshape(H, W, gc), gc, base[4])

        x5 = conv(4, w5, b5)                                # (HW, nf) f32

        # Fused residual: out = conv5(cat(...)) * 0.2 + x   (all f32)
        o_ref[...] = (x5.reshape(1, H, W, nf) * 0.2
                      + x_ref[...]).astype(o_ref.dtype)

    return kernel


def _pack_weights(params, nf, gc):
    """HWIO f32 weights -> per-conv matmul-ready (9*cin_i, cout_i) bf16,
    ordered (source, tap, channel) to match the im2col column layout."""
    src_w = [nf, gc, gc, gc, gc]
    packed, biases = [], []
    for i in range(1, 6):
        w = params[f"w{i}"]                 # (3, 3, cin_i, cout_i)
        cout = w.shape[-1]
        chunks, off = [], 0
        for s in range(i):
            c = src_w[s]
            chunks.append(w[:, :, off:off + c, :].reshape(9 * c, cout))
            off += c
        packed.append(jnp.concatenate(chunks, axis=0).astype(jnp.bfloat16))
        biases.append(params[f"b{i}"].reshape(1, cout).astype(jnp.float32))
    return packed, biases


def residual_dense_block_pallas(x, params):
    """x: (N, H, W, num_feat) NHWC float32. params: w1..w5 (HWIO), b1..b5.

    NOTE: nf and gc are assumed to be multiples of 8 (sublane-friendly); other
    values remain correct but may trigger extra relayouts.
    """
    N, H, W, nf = x.shape
    gc = params["w1"].shape[-1]
    HW = H * W
    Ct = nf + 4 * gc                          # total concatenated channels

    packed_ws, biases = _pack_weights(params, nf, gc)
    kernel = _make_rdb_kernel(H, W, nf, gc)

    in_specs = [pl.BlockSpec((1, H, W, nf), lambda n: (n, 0, 0, 0))]
    args = [x]
    for wp, b in zip(packed_ws, biases):
        in_specs.append(pl.BlockSpec(wp.shape, lambda n: (0, 0)))
        in_specs.append(pl.BlockSpec(b.shape, lambda n: (0, 0)))
        args += [wp, b]

    scratch_shapes = [
        pltpu.VMEM((HW, 9 * Ct), jnp.bfloat16),        # persistent im2col
        pltpu.VMEM((H + 2, W + 2, nf), jnp.bfloat16),  # zero-halo buf for x
        pltpu.VMEM((H + 2, W + 2, gc), jnp.bfloat16),  # zero-halo buf x1..x4
    ]

    # VMEM budget from the *padded* footprint, capped at ~85% of physical.
    need = 2 * 2 * _padded_vmem_bytes((1, H, W, nf), jnp.float32)  # in+out dbl-buf
    for wp, b in zip(packed_ws, biases):
        need += 2 * _padded_vmem_bytes(wp.shape, jnp.bfloat16)
        need += 2 * _padded_vmem_bytes(b.shape, jnp.float32)
    need += _padded_vmem_bytes((HW, 9 * Ct), jnp.bfloat16)
    need += _padded_vmem_bytes((H + 2, W + 2, nf), jnp.bfloat16)
    need += _padded_vmem_bytes((H + 2, W + 2, gc), jnp.bfloat16)
    try:
        phys = int(pltpu.get_tpu_info().vmem_capacity_bytes)
    except Exception:
        phys = 64 * 1024 * 1024               # conservative (v7x per-TC VMEM)
    vmem_limit = min(int(phys * 0.85), max(need + (4 << 20), 16 << 20))

    cins = [nf + i * gc for i in range(5)]
    couts = [gc, gc, gc, gc, nf]
    flops = 2 * N * HW * 9 * sum(ci * co for ci, co in zip(cins, couts))
    bytes_accessed = (2 * N * HW * nf * 4
                      + sum(int(w.size) * 2 for w in packed_ws)
                      + sum(int(b.size) * 4 for b in biases))

    return pl.pallas_call(
        kernel,
        out_shape=jax.ShapeDtypeStruct((N, H, W, nf), jnp.float32),
        grid=(N,),
        in_specs=in_specs,
        out_specs=pl.BlockSpec((1, H, W, nf), lambda n: (n, 0, 0, 0)),
        scratch_shapes=scratch_shapes,
        compiler_params=pltpu.CompilerParams(
            dimension_semantics=("parallel",),
            vmem_limit_bytes=int(vmem_limit)),
        cost_estimate=pl.CostEstimate(flops=int(flops), transcendentals=0,
                                      bytes_accessed=int(bytes_accessed)),
    )(*args)


residual_dense_block = jax.jit(residual_dense_block_pallas)


def init_rdb_params(key, num_feat, num_grow_ch, scale=0.1):
    """Deterministic kaiming_normal_ (fan_in, a=0) * scale, bias=0 — matches
    ResidualDenseBlock.default_init_weights."""
    shapes_oihw = [
        (num_grow_ch, num_feat, 3, 3),
        (num_grow_ch, num_feat + num_grow_ch, 3, 3),
        (num_grow_ch, num_feat + 2 * num_grow_ch, 3, 3),
        (num_grow_ch, num_feat + 3 * num_grow_ch, 3, 3),
        (num_feat, num_feat + 4 * num_grow_ch, 3, 3),
    ]
    params = {}
    keys = jax.random.split(key, len(shapes_oihw))
    for i, (k, s) in enumerate(zip(keys, shapes_oihw), start=1):
        fan_in = s[1] * s[2] * s[3]
        std = math.sqrt(2.0 / fan_in)
        w_oihw = jax.random.normal(k, s, dtype=jnp.float32) * std * scale
        # OIHW -> HWIO for the NHWC kernel.
        params[f"w{i}"] = jnp.transpose(w_oihw, (2, 3, 1, 0))
        params[f"b{i}"] = jnp.zeros((s[0],), jnp.float32)
    return params


def _reference_rdb(x, params):
    """Pure-JAX f32 reference (lax.conv) for the correctness check."""
    def conv(h, w, b):
        y = jax.lax.conv_general_dilated(
            h, w, window_strides=(1, 1), padding="SAME",
            dimension_numbers=("NHWC", "HWIO", "NHWC"))
        return y + b[None, None, None, :]

    lrelu = lambda v: jnp.where(v >= 0, v, 0.2 * v)
    x1 = lrelu(conv(x, params["w1"], params["b1"]))
    x2 = lrelu(conv(jnp.concatenate([x, x1], -1), params["w2"], params["b2"]))
    x3 = lrelu(conv(jnp.concatenate([x, x1, x2], -1), params["w3"], params["b3"]))
    x4 = lrelu(conv(jnp.concatenate([x, x1, x2, x3], -1), params["w4"], params["b4"]))
    x5 = conv(jnp.concatenate([x, x1, x2, x3, x4], -1), params["w5"], params["b5"])
    return x5 * 0.2 + x


if __name__ == "__main__":
    # Small, module-consistent shapes: batch=2, num_feat=16, num_grow_ch=8,
    # 8x8 spatial, NHWC layout.
    N, H, W = 2, 8, 8
    num_feat, num_grow_ch = 16, 8

    key = jax.random.PRNGKey(0)
    kx, kp = jax.random.split(key)
    x = jax.random.normal(kx, (N, H, W, num_feat), dtype=jnp.float32)  # NHWC
    params = init_rdb_params(kp, num_feat, num_grow_ch, scale=0.1)

    out = residual_dense_block(x, params)
    out = jax.block_until_ready(out)

    ref = _reference_rdb(x, params)
    assert out.shape == (N, H, W, num_feat)
    # bf16 activation/weight storage with f32 accumulation: slightly looser
    # tolerance than a pure-f32 kernel, still far below the bf16 error floor.
    max_err = float(jnp.max(jnp.abs(out - ref)))
    assert jnp.allclose(out, ref, atol=1e-2, rtol=1e-2), max_err

    print("KERNEL_OK")
</pallas_src>

<mosaic_0001>
module attributes {stable_mosaic.version = 11 : i64} {
  func.func @kernel(%arg0: i32, %arg1: memref<1x8x8x16xf32, #tpu.memory_space<vmem>>, %arg2: memref<144x8xbf16, #tpu.memory_space<vmem>>, %arg3: memref<1x8xf32, #tpu.memory_space<vmem>>, %arg4: memref<216x8xbf16, #tpu.memory_space<vmem>>, %arg5: memref<1x8xf32, #tpu.memory_space<vmem>>, %arg6: memref<288x8xbf16, #tpu.memory_space<vmem>>, %arg7: memref<1x8xf32, #tpu.memory_space<vmem>>, %arg8: memref<360x8xbf16, #tpu.memory_space<vmem>>, %arg9: memref<1x8xf32, #tpu.memory_space<vmem>>, %arg10: memref<432x16xbf16, #tpu.memory_space<vmem>>, %arg11: memref<1x16xf32, #tpu.memory_space<vmem>>, %arg12: memref<1x8x8x16xf32, #tpu.memory_space<vmem>>, %arg13: memref<64x432xbf16, #tpu.memory_space<vmem>>, %arg14: memref<10x10x16xbf16, #tpu.memory_space<vmem>>, %arg15: memref<10x10x8xbf16, #tpu.memory_space<vmem>>) attributes {dimension_semantics = [#tpu.dimension_semantics<parallel>], iteration_bounds = array<i64: 2>, scalar_prefetch = 0 : i64, scratch_operands = 3 : i64, tpu.core_type = #tpu.core_type<tc>, window_params = [{transform_indices = @transform_0, window_bounds = array<i64: 1, 8, 8, 16>}, {pipeline_mode = #tpu.pipeline_mode<synchronous>, transform_indices = @transform_1, window_bounds = array<i64: 144, 8>}, {pipeline_mode = #tpu.pipeline_mode<synchronous>, transform_indices = @transform_2, window_bounds = array<i64: 1, 8>}, {pipeline_mode = #tpu.pipeline_mode<synchronous>, transform_indices = @transform_3, window_bounds = array<i64: 216, 8>}, {pipeline_mode = #tpu.pipeline_mode<synchronous>, transform_indices = @transform_4, window_bounds = array<i64: 1, 8>}, {pipeline_mode = #tpu.pipeline_mode<synchronous>, transform_indices = @transform_5, window_bounds = array<i64: 288, 8>}, {pipeline_mode = #tpu.pipeline_mode<synchronous>, transform_indices = @transform_6, window_bounds = array<i64: 1, 8>}, {pipeline_mode = #tpu.pipeline_mode<synchronous>, transform_indices = @transform_7, window_bounds = array<i64: 360, 8>}, {pipeline_mode = #tpu.pipeline_mode<synchronous>, transform_indices = @transform_8, window_bounds = array<i64: 1, 8>}, {pipeline_mode = #tpu.pipeline_mode<synchronous>, transform_indices = @transform_9, window_bounds = array<i64: 432, 16>}, {pipeline_mode = #tpu.pipeline_mode<synchronous>, transform_indices = @transform_10, window_bounds = array<i64: 1, 16>}, {transform_indices = @transform_11, window_bounds = array<i64: 1, 8, 8, 16>}]} {
    %cst = arith.constant 0.000000e+00 : bf16
    %0 = vector.broadcast %cst : bf16 to vector<1x10x16xbf16>
    %c0 = arith.constant 0 : index
    %c0_0 = arith.constant 0 : index
    %c0_1 = arith.constant 0 : index
    %1 = vector.load %arg14[%c0, %c0_0, %c0_1] : memref<10x10x16xbf16, #tpu.memory_space<vmem>>, vector<1x10x16xbf16>
    tpu.vector_store %arg14[%c0, %c0_0, %c0_1], %0 {strides = array<i32>} : memref<10x10x16xbf16, #tpu.memory_space<vmem>>, vector<1x10x16xbf16>,
    %cst_2 = arith.constant 0.000000e+00 : bf16
    %2 = vector.broadcast %cst_2 : bf16 to vector<1x10x16xbf16>
    %c9 = arith.constant 9 : index
    %c0_3 = arith.constant 0 : index
    %c0_4 = arith.constant 0 : index
    %3 = vector.load %arg14[%c9, %c0_3, %c0_4] : memref<10x10x16xbf16, #tpu.memory_space<vmem>>, vector<1x10x16xbf16>
    tpu.vector_store %arg14[%c9, %c0_3, %c0_4], %2 {strides = array<i32>} : memref<10x10x16xbf16, #tpu.memory_space<vmem>>, vector<1x10x16xbf16>,
    %cst_5 = arith.constant 0.000000e+00 : bf16
    %4 = vector.broadcast %cst_5 : bf16 to vector<10x1x16xbf16>
    %c0_6 = arith.constant 0 : index
    %c0_7 = arith.constant 0 : index
    %c0_8 = arith.constant 0 : index
    %5 = vector.load %arg14[%c0_6, %c0_7, %c0_8] : memref<10x10x16xbf16, #tpu.memory_space<vmem>>, vector<10x1x16xbf16>
    tpu.vector_store %arg14[%c0_6, %c0_7, %c0_8], %4 {strides = array<i32>} : memref<10x10x16xbf16, #tpu.memory_space<vmem>>, vector<10x1x16xbf16>,
    %cst_9 = arith.constant 0.000000e+00 : bf16
    %6 = vector.broadcast %cst_9 : bf16 to vector<10x1x16xbf16>
    %c0_10 = arith.constant 0 : index
    %c9_11 = arith.constant 9 : index
    %c0_12 = arith.constant 0 : index
    %7 = vector.load %arg14[%c0_10, %c9_11, %c0_12] : memref<10x10x16xbf16, #tpu.memory_space<vmem>>, vector<10x1x16xbf16>
    tpu.vector_store %arg14[%c0_10, %c9_11, %c0_12], %6 {strides = array<i32>} : memref<10x10x16xbf16, #tpu.memory_space<vmem>>, vector<10x1x16xbf16>,
    %cst_13 = arith.constant 0.000000e+00 : bf16
    %8 = vector.broadcast %cst_13 : bf16 to vector<1x10x8xbf16>
    %c0_14 = arith.constant 0 : index
    %c0_15 = arith.constant 0 : index
    %c0_16 = arith.constant 0 : index
    %9 = vector.load %arg15[%c0_14, %c0_15, %c0_16] : memref<10x10x8xbf16, #tpu.memory_space<vmem>>, vector<1x10x8xbf16>
    tpu.vector_store %arg15[%c0_14, %c0_15, %c0_16], %8 {strides = array<i32>} : memref<10x10x8xbf16, #tpu.memory_space<vmem>>, vector<1x10x8xbf16>,
    %cst_17 = arith.constant 0.000000e+00 : bf16
    %10 = vector.broadcast %cst_17 : bf16 to vector<1x10x8xbf16>
    %c9_18 = arith.constant 9 : index
    %c0_19 = arith.constant 0 : index
    %c0_20 = arith.constant 0 : index
    %11 = vector.load %arg15[%c9_18, %c0_19, %c0_20] : memref<10x10x8xbf16, #tpu.memory_space<vmem>>, vector<1x10x8xbf16>
    tpu.vector_store %arg15[%c9_18, %c0_19, %c0_20], %10 {strides = array<i32>} : memref<10x10x8xbf16, #tpu.memory_space<vmem>>, vector<1x10x8xbf16>,
    %cst_21 = arith.constant 0.000000e+00 : bf16
    %12 = vector.broadcast %cst_21 : bf16 to vector<10x1x8xbf16>
    %c0_22 = arith.constant 0 : index
    %c0_23 = arith.constant 0 : index
    %c0_24 = arith.constant 0 : index
    %13 = vector.load %arg15[%c0_22, %c0_23, %c0_24] : memref<10x10x8xbf16, #tpu.memory_space<vmem>>, vector<10x1x8xbf16>
    tpu.vector_store %arg15[%c0_22, %c0_23, %c0_24], %12 {strides = array<i32>} : memref<10x10x8xbf16, #tpu.memory_space<vmem>>, vector<10x1x8xbf16>,
    %cst_25 = arith.constant 0.000000e+00 : bf16
    %14 = vector.broadcast %cst_25 : bf16 to vector<10x1x8xbf16>
    %c0_26 = arith.constant 0 : index
    %c9_27 = arith.constant 9 : index
    %c0_28 = arith.constant 0 : index
    %15 = vector.load %arg15[%c0_26, %c9_27, %c0_28] : memref<10x10x8xbf16, #tpu.memory_space<vmem>>, vector<10x1x8xbf16>
    tpu.vector_store %arg15[%c0_26, %c9_27, %c0_28], %14 {strides = array<i32>} : memref<10x10x8xbf16, #tpu.memory_space<vmem>>, vector<10x1x8xbf16>,
    %c0_29 = arith.constant 0 : index
    %c0_30 = arith.constant 0 : index
    %c0_31 = arith.constant 0 : index
    %c0_32 = arith.constant 0 : index
    %16 = vector.load %arg1[%c0_29, %c0_30, %c0_31, %c0_32] : memref<1x8x8x16xf32, #tpu.memory_space<vmem>>, vector<1x8x8x16xf32>
    %17 = vector.shape_cast %16 : vector<1x8x8x16xf32> to vector<8x8x16xf32>
    %18 = arith.truncf %17 : vector<8x8x16xf32> to vector<8x8x16xbf16>
    %c1 = arith.constant 1 : index
    %c1_33 = arith.constant 1 : index
    %c0_34 = arith.constant 0 : index
    %19 = vector.load %arg14[%c1, %c1_33, %c0_34] : memref<10x10x16xbf16, #tpu.memory_space<vmem>>, vector<8x8x16xbf16>
    tpu.vector_store %arg14[%c1, %c1_33, %c0_34], %18 {strides = array<i32>} : memref<10x10x16xbf16, #tpu.memory_space<vmem>>, vector<8x8x16xbf16>,
    %c0_35 = arith.constant 0 : index
    %c0_36 = arith.constant 0 : index
    %c0_37 = arith.constant 0 : index
    %20 = vector.load %arg14[%c0_35, %c0_36, %c0_37] : memref<10x10x16xbf16, #tpu.memory_space<vmem>>, vector<8x8x16xbf16>
    %21 = vector.shape_cast %20 : vector<8x8x16xbf16> to vector<64x16xbf16>
    %c0_38 = arith.constant 0 : index
    %c0_39 = arith.constant 0 : index
    %22 = vector.load %arg13[%c0_38, %c0_39] : memref<64x432xbf16, #tpu.memory_space<vmem>>, vector<64x16xbf16>
    tpu.vector_store %arg13[%c0_38, %c0_39], %21 {strides = array<i32>} : memref<64x432xbf16, #tpu.memory_space<vmem>>, vector<64x16xbf16>,
    %c0_40 = arith.constant 0 : index
    %c1_41 = arith.constant 1 : index
    %c0_42 = arith.constant 0 : index
    %23 = vector.load %arg14[%c0_40, %c1_41, %c0_42] : memref<10x10x16xbf16, #tpu.memory_space<vmem>>, vector<8x8x16xbf16>
    %24 = vector.shape_cast %23 : vector<8x8x16xbf16> to vector<64x16xbf16>
    %c0_43 = arith.constant 0 : index
    %c16 = arith.constant 16 : index
    %25 = vector.load %arg13[%c0_43, %c16] : memref<64x432xbf16, #tpu.memory_space<vmem>>, vector<64x16xbf16>
    tpu.vector_store %arg13[%c0_43, %c16], %24 {strides = array<i32>} : memref<64x432xbf16, #tpu.memory_space<vmem>>, vector<64x16xbf16>,
    %c0_44 = arith.constant 0 : index
    %c2 = arith.constant 2 : index
    %c0_45 = arith.constant 0 : index
    %26 = vector.load %arg14[%c0_44, %c2, %c0_45] : memref<10x10x16xbf16, #tpu.memory_space<vmem>>, vector<8x8x16xbf16>
    %27 = vector.shape_cast %26 : vector<8x8x16xbf16> to vector<64x16xbf16>
    %c0_46 = arith.constant 0 : index
    %c32 = arith.constant 32 : index
    %28 = vector.load %arg13[%c0_46, %c32] : memref<64x432xbf16, #tpu.memory_space<vmem>>, vector<64x16xbf16>
    tpu.vector_store %arg13[%c0_46, %c32], %27 {strides = array<i32>} : memref<64x432xbf16, #tpu.memory_space<vmem>>, vector<64x16xbf16>,
    %c1_47 = arith.constant 1 : index
    %c0_48 = arith.constant 0 : index
    %c0_49 = arith.constant 0 : index
    %29 = vector.load %arg14[%c1_47, %c0_48, %c0_49] : memref<10x10x16xbf16, #tpu.memory_space<vmem>>, vector<8x8x16xbf16>
    %30 = vector.shape_cast %29 : vector<8x8x16xbf16> to vector<64x16xbf16>
    %c0_50 = arith.constant 0 : index
    %c48 = arith.constant 48 : index
    %31 = vector.load %arg13[%c0_50, %c48] : memref<64x432xbf16, #tpu.memory_space<vmem>>, vector<64x16xbf16>
    tpu.vector_store %arg13[%c0_50, %c48], %30 {strides = array<i32>} : memref<64x432xbf16, #tpu.memory_space<vmem>>, vector<64x16xbf16>,
    %c1_51 = arith.constant 1 : index
    %c1_52 = arith.constant 1 : index
    %c0_53 = arith.constant 0 : index
    %32 = vector.load %arg14[%c1_51, %c1_52, %c0_53] : memref<10x10x16xbf16, #tpu.memory_space<vmem>>, vector<8x8x16xbf16>
    %33 = vector.shape_cast %32 : vector<8x8x16xbf16> to vector<64x16xbf16>
    %c0_54 = arith.constant 0 : index
    %c64 = arith.constant 64 : index
    %34 = vector.load %arg13[%c0_54, %c64] : memref<64x432xbf16, #tpu.memory_space<vmem>>, vector<64x16xbf16>
    tpu.vector_store %arg13[%c0_54, %c64], %33 {strides = array<i32>} : memref<64x432xbf16, #tpu.memory_space<vmem>>, vector<64x16xbf16>,
    %c1_55 = arith.constant 1 : index
    %c2_56 = arith.constant 2 : index
    %c0_57 = arith.constant 0 : index
    %35 = vector.load %arg14[%c1_55, %c2_56, %c0_57] : memref<10x10x16xbf16, #tpu.memory_space<vmem>>, vector<8x8x16xbf16>
    %36 = vector.shape_cast %35 : vector<8x8x16xbf16> to vector<64x16xbf16>
    %c0_58 = arith.constant 0 : index
    %c80 = arith.constant 80 : index
    %37 = vector.load %arg13[%c0_58, %c80] : memref<64x432xbf16, #tpu.memory_space<vmem>>, vector<64x16xbf16>
    tpu.vector_store %arg13[%c0_58, %c80], %36 {strides = array<i32>} : memref<64x432xbf16, #tpu.memory_space<vmem>>, vector<64x16xbf16>,
    %c2_59 = arith.constant 2 : index
    %c0_60 = arith.constant 0 : index
    %c0_61 = arith.constant 0 : index
    %38 = vector.load %arg14[%c2_59, %c0_60, %c0_61] : memref<10x10x16xbf16, #tpu.memory_space<vmem>>, vector<8x8x16xbf16>
    %39 = vector.shape_cast %38 : vector<8x8x16xbf16> to vector<64x16xbf16>
    %c0_62 = arith.constant 0 : index
    %c96 = arith.constant 96 : index
    %40 = vector.load %arg13[%c0_62, %c96] : memref<64x432xbf16, #tpu.memory_space<vmem>>, vector<64x16xbf16>
    tpu.vector_store %arg13[%c0_62, %c96], %39 {strides = array<i32>} : memref<64x432xbf16, #tpu.memory_space<vmem>>, vector<64x16xbf16>,
    %c2_63 = arith.constant 2 : index
    %c1_64 = arith.constant 1 : index
    %c0_65 = arith.constant 0 : index
    %41 = vector.load %arg14[%c2_63, %c1_64, %c0_65] : memref<10x10x16xbf16, #tpu.memory_space<vmem>>, vector<8x8x16xbf16>
    %42 = vector.shape_cast %41 : vector<8x8x16xbf16> to vector<64x16xbf16>
    %c0_66 = arith.constant 0 : index
    %c112 = arith.constant 112 : index
    %43 = vector.load %arg13[%c0_66, %c112] : memref<64x432xbf16, #tpu.memory_space<vmem>>, vector<64x16xbf16>
    tpu.vector_store %arg13[%c0_66, %c112], %42 {strides = array<i32>} : memref<64x432xbf16, #tpu.memory_space<vmem>>, vector<64x16xbf16>,
    %c2_67 = arith.constant 2 : index
    %c2_68 = arith.constant 2 : index
    %c0_69 = arith.constant 0 : index
    %44 = vector.load %arg14[%c2_67, %c2_68, %c0_69] : memref<10x10x16xbf16, #tpu.memory_space<vmem>>, vector<8x8x16xbf16>
    %45 = vector.shape_cast %44 : vector<8x8x16xbf16> to vector<64x16xbf16>
    %c0_70 = arith.constant 0 : index
    %c128 = arith.constant 128 : index
    %46 = vector.load %arg13[%c0_70, %c128] : memref<64x432xbf16, #tpu.memory_space<vmem>>, vector<64x16xbf16>
    tpu.vector_store %arg13[%c0_70, %c128], %45 {strides = array<i32>} : memref<64x432xbf16, #tpu.memory_space<vmem>>, vector<64x16xbf16>,
    %c0_71 = arith.constant 0 : index
    %c0_72 = arith.constant 0 : index
    %47 = vector.load %arg13[%c0_71, %c0_72] : memref<64x432xbf16, #tpu.memory_space<vmem>>, vector<64x144xbf16>
    %c0_73 = arith.constant 0 : index
    %c0_74 = arith.constant 0 : index
    %48 = vector.load %arg2[%c0_73, %c0_74] : memref<144x8xbf16, #tpu.memory_space<vmem>>, vector<144x8xbf16>
    %cst_75 = arith.constant dense<0.000000e+00> : vector<64x8xf32>
    %49 = tpu.matmul %47, %48, %cst_75 {dimension_numbers = #tpu.dot_dimension_numbers<[1], [0], [0], [1], [0, 0, 1, 1], [], []>} : vector<64x144xbf16>, vector<144x8xbf16>, vector<64x8xf32> -> vector<64x8xf32>
    %c0_76 = arith.constant 0 : index
    %c0_77 = arith.constant 0 : index
    %50 = vector.load %arg3[%c0_76, %c0_77] : memref<1x8xf32, #tpu.memory_space<vmem>>, vector<1x8xf32>
    %51 = vector.shape_cast %50 : vector<1x8xf32> to vector<8xf32>
    %52 = vector.shape_cast %51 : vector<8xf32> to vector<1x8xf32>
    %53 = vector.broadcast %52 : vector<1x8xf32> to vector<64x8xf32>
    %54 = arith.addf %49, %53 : vector<64x8xf32>
    %cst_78 = arith.constant 0.000000e+00 : f32
    %55 = vector.broadcast %cst_78 : f32 to vector<64x8xf32>
    %56 = arith.cmpf oge, %54, %55 : vector<64x8xf32>
    %cst_79 = arith.constant 2.000000e-01 : f32
    %57 = vector.broadcast %cst_79 : f32 to vector<64x8xf32>
    %58 = arith.mulf %57, %54 : vector<64x8xf32>
    %59 = arith.select %56, %54, %58 : vector<64x8xi1>, vector<64x8xf32>
    %60 = arith.truncf %59 : vector<64x8xf32> to vector<64x8xbf16>
    %61 = vector.shape_cast %60 : vector<64x8xbf16> to vector<8x8x8xbf16>
    %c1_80 = arith.constant 1 : index
    %c1_81 = arith.constant 1 : index
    %c0_82 = arith.constant 0 : index
    %62 = vector.load %arg15[%c1_80, %c1_81, %c0_82] : memref<10x10x8xbf16, #tpu.memory_space<vmem>>, vector<8x8x8xbf16>
    tpu.vector_store %arg15[%c1_80, %c1_81, %c0_82], %61 {strides = array<i32>} : memref<10x10x8xbf16, #tpu.memory_space<vmem>>, vector<8x8x8xbf16>,
    %c0_83 = arith.constant 0 : index
    %c0_84 = arith.constant 0 : index
    %c0_85 = arith.constant 0 : index
    %63 = vector.load %arg15[%c0_83, %c0_84, %c0_85] : memref<10x10x8xbf16, #tpu.memory_space<vmem>>, vector<8x8x8xbf16>
    %64 = vector.shape_cast %63 : vector<8x8x8xbf16> to vector<64x8xbf16>
    %c0_86 = arith.constant 0 : index
    %c144 = arith.constant 144 : index
    %65 = vector.load %arg13[%c0_86, %c144] : memref<64x432xbf16, #tpu.memory_space<vmem>>, vector<64x8xbf16>
    tpu.vector_store %arg13[%c0_86, %c144], %64 {strides = array<i32>} : memref<64x432xbf16, #tpu.memory_space<vmem>>, vector<64x8xbf16>,
    %c0_87 = arith.constant 0 : index
    %c1_88 = arith.constant 1 : index
    %c0_89 = arith.constant 0 : index
    %66 = vector.load %arg15[%c0_87, %c1_88, %c0_89] : memref<10x10x8xbf16, #tpu.memory_space<vmem>>, vector<8x8x8xbf16>
    %67 = vector.shape_cast %66 : vector<8x8x8xbf16> to vector<64x8xbf16>
    %c0_90 = arith.constant 0 : index
    %c152 = arith.constant 152 : index
    %68 = vector.load %arg13[%c0_90, %c152] : memref<64x432xbf16, #tpu.memory_space<vmem>>, vector<64x8xbf16>
    tpu.vector_store %arg13[%c0_90, %c152], %67 {strides = array<i32>} : memref<64x432xbf16, #tpu.memory_space<vmem>>, vector<64x8xbf16>,
    %c0_91 = arith.constant 0 : index
    %c2_92 = arith.constant 2 : index
    %c0_93 = arith.constant 0 : index
    %69 = vector.load %arg15[%c0_91, %c2_92, %c0_93] : memref<10x10x8xbf16, #tpu.memory_space<vmem>>, vector<8x8x8xbf16>
    %70 = vector.shape_cast %69 : vector<8x8x8xbf16> to vector<64x8xbf16>
    %c0_94 = arith.constant 0 : index
    %c160 = arith.constant 160 : index
    %71 = vector.load %arg13[%c0_94, %c160] : memref<64x432xbf16, #tpu.memory_space<vmem>>, vector<64x8xbf16>
    tpu.vector_store %arg13[%c0_94, %c160], %70 {strides = array<i32>} : memref<64x432xbf16, #tpu.memory_space<vmem>>, vector<64x8xbf16>,
    %c1_95 = arith.constant 1 : index
    %c0_96 = arith.constant 0 : index
    %c0_97 = arith.constant 0 : index
    %72 = vector.load %arg15[%c1_95, %c0_96, %c0_97] : memref<10x10x8xbf16, #tpu.memory_space<vmem>>, vector<8x8x8xbf16>
    %73 = vector.shape_cast %72 : vector<8x8x8xbf16> to vector<64x8xbf16>
    %c0_98 = arith.constant 0 : index
    %c168 = arith.constant 168 : index
    %74 = vector.load %arg13[%c0_98, %c168] : memref<64x432xbf16, #tpu.memory_space<vmem>>, vector<64x8xbf16>
    tpu.vector_store %arg13[%c0_98, %c168], %73 {strides = array<i32>} : memref<64x432xbf16, #tpu.memory_space<vmem>>, vector<64x8xbf16>,
    %c1_99 = arith.constant 1 : index
    %c1_100 = arith.constant 1 : index
    %c0_101 = arith.constant 0 : index
    %75 = vector.load %arg15[%c1_99, %c1_100, %c0_101] : memref<10x10x8xbf16, #tpu.memory_space<vmem>>, vector<8x8x8xbf16>
    %76 = vector.shape_cast %75 : vector<8x8x8xbf16> to vector<64x8xbf16>
    %c0_102 = arith.constant 0 : index
    %c176 = arith.constant 176 : index
    %77 = vector.load %arg13[%c0_102, %c176] : memref<64x432xbf16, #tpu.memory_space<vmem>>, vector<64x8xbf16>
    tpu.vector_store %arg13[%c0_102, %c176], %76 {strides = array<i32>} : memref<64x432xbf16, #tpu.memory_space<vmem>>, vector<64x8xbf16>,
    %c1_103 = arith.constant 1 : index
    %c2_104 = arith.constant 2 : index
    %c0_105 = arith.constant 0 : index
    %78 = vector.load %arg15[%c1_103, %c2_104, %c0_105] : memref<10x10x8xbf16, #tpu.memory_space<vmem>>, vector<8x8x8xbf16>
    %79 = vector.shape_cast %78 : vector<8x8x8xbf16> to vector<64x8xbf16>
    %c0_106 = arith.constant 0 : index
    %c184 = arith.constant 184 : index
    %80 = vector.load %arg13[%c0_106, %c184] : memref<64x432xbf16, #tpu.memory_space<vmem>>, vector<64x8xbf16>
    tpu.vector_store %arg13[%c0_106, %c184], %79 {strides = array<i32>} : memref<64x432xbf16, #tpu.memory_space<vmem>>, vector<64x8xbf16>,
    %c2_107 = arith.constant 2 : index
    %c0_108 = arith.constant 0 : index
    %c0_109 = arith.constant 0 : index
    %81 = vector.load %arg15[%c2_107, %c0_108, %c0_109] : memref<10x10x8xbf16, #tpu.memory_space<vmem>>, vector<8x8x8xbf16>
    %82 = vector.shape_cast %81 : vector<8x8x8xbf16> to vector<64x8xbf16>
    %c0_110 = arith.constant 0 : index
    %c192 = arith.constant 192 : index
    %83 = vector.load %arg13[%c0_110, %c192] : memref<64x432xbf16, #tpu.memory_space<vmem>>, vector<64x8xbf16>
    tpu.vector_store %arg13[%c0_110, %c192], %82 {strides = array<i32>} : memref<64x432xbf16, #tpu.memory_space<vmem>>, vector<64x8xbf16>,
    %c2_111 = arith.constant 2 : index
    %c1_112 = arith.constant 1 : index
    %c0_113 = arith.constant 0 : index
    %84 = vector.load %arg15[%c2_111, %c1_112, %c0_113] : memref<10x10x8xbf16, #tpu.memory_space<vmem>>, vector<8x8x8xbf16>
    %85 = vector.shape_cast %84 : vector<8x8x8xbf16> to vector<64x8xbf16>
    %c0_114 = arith.constant 0 : index
    %c200 = arith.constant 200 : index
    %86 = vector.load %arg13[%c0_114, %c200] : memref<64x432xbf16, #tpu.memory_space<vmem>>, vector<64x8xbf16>
    tpu.vector_store %arg13[%c0_114, %c200], %85 {strides = array<i32>} : memref<64x432xbf16, #tpu.memory_space<vmem>>, vector<64x8xbf16>,
    %c2_115 = arith.constant 2 : index
    %c2_116 = arith.constant 2 : index
    %c0_117 = arith.constant 0 : index
    %87 = vector.load %arg15[%c2_115, %c2_116, %c0_117] : memref<10x10x8xbf16, #tpu.memory_space<vmem>>, vector<8x8x8xbf16>
    %88 = vector.shape_cast %87 : vector<8x8x8xbf16> to vector<64x8xbf16>
    %c0_118 = arith.constant 0 : index
    %c208 = arith.constant 208 : index
    %89 = vector.load %arg13[%c0_118, %c208] : memref<64x432xbf16, #tpu.memory_space<vmem>>, vector<64x8xbf16>
    tpu.vector_store %arg13[%c0_118, %c208], %88 {strides = array<i32>} : memref<64x432xbf16, #tpu.memory_space<vmem>>, vector<64x8xbf16>,
    %c0_119 = arith.constant 0 : index
    %c0_120 = arith.constant 0 : index
    %90 = vector.load %arg13[%c0_119, %c0_120] : memref<64x432xbf16, #tpu.memory_space<vmem>>, vector<64x216xbf16>
    %c0_121 = arith.constant 0 : index
    %c0_122 = arith.constant 0 : index
    %91 = vector.load %arg4[%c0_121, %c0_122] : memref<216x8xbf16, #tpu.memory_space<vmem>>, vector<216x8xbf16>
    %cst_123 = arith.constant dense<0.000000e+00> : vector<64x8xf32>
    %92 = tpu.matmul %90, %91, %cst_123 {dimension_numbers = #tpu.dot_dimension_numbers<[1], [0], [0], [1], [0, 0, 1, 1], [], []>} : vector<64x216xbf16>, vector<216x8xbf16>, vector<64x8xf32> -> vector<64x8xf32>
    %c0_124 = arith.constant 0 : index
    %c0_125 = arith.constant 0 : index
    %93 = vector.load %arg5[%c0_124, %c0_125] : memref<1x8xf32, #tpu.memory_space<vmem>>, vector<1x8xf32>
    %94 = vector.shape_cast %93 : vector<1x8xf32> to vector<8xf32>
    %95 = vector.shape_cast %94 : vector<8xf32> to vector<1x8xf32>
    %96 = vector.broadcast %95 : vector<1x8xf32> to vector<64x8xf32>
    %97 = arith.addf %92, %96 : vector<64x8xf32>
    %cst_126 = arith.constant 0.000000e+00 : f32
    %98 = vector.broadcast %cst_126 : f32 to vector<64x8xf32>
    %99 = arith.cmpf oge, %97, %98 : vector<64x8xf32>
    %cst_127 = arith.constant 2.000000e-01 : f32
    %100 = vector.broadcast %cst_127 : f32 to vector<64x8xf32>
    %101 = arith.mulf %100, %97 : vector<64x8xf32>
    %102 = arith.select %99, %97, %101 : vector<64x8xi1>, vector<64x8xf32>
    %103 = arith.truncf %102 : vector<64x8xf32> to vector<64x8xbf16>
    %104 = vector.shape_cast %103 : vector<64x8xbf16> to vector<8x8x8xbf16>
    %c1_128 = arith.constant 1 : index
    %c1_129 = arith.constant 1 : index
    %c0_130 = arith.constant 0 : index
    %105 = vector.load %arg15[%c1_128, %c1_129, %c0_130] : memref<10x10x8xbf16, #tpu.memory_space<vmem>>, vector<8x8x8xbf16>
    tpu.vector_store %arg15[%c1_128, %c1_129, %c0_130], %104 {strides = array<i32>} : memref<10x10x8xbf16, #tpu.memory_space<vmem>>, vector<8x8x8xbf16>,
    %c0_131 = arith.constant 0 : index
    %c0_132 = arith.constant 0 : index
    %c0_133 = arith.constant 0 : index
    %106 = vector.load %arg15[%c0_131, %c0_132, %c0_133] : memref<10x10x8xbf16, #tpu.memory_space<vmem>>, vector<8x8x8xbf16>
    %107 = vector.shape_cast %106 : vector<8x8x8xbf16> to vector<64x8xbf16>
    %c0_134 = arith.constant 0 : index
    %c216 = arith.constant 216 : index
    %108 = vector.load %arg13[%c0_134, %c216] : memref<64x432xbf16, #tpu.memory_space<vmem>>, vector<64x8xbf16>
    tpu.vector_store %arg13[%c0_134, %c216], %107 {strides = array<i32>} : memref<64x432xbf16, #tpu.memory_space<vmem>>, vector<64x8xbf16>,
    %c0_135 = arith.constant 0 : index
    %c1_136 = arith.constant 1 : index
    %c0_137 = arith.constant 0 : index
    %109 = vector.load %arg15[%c0_135, %c1_136, %c0_137] : memref<10x10x8xbf16, #tpu.memory_space<vmem>>, vector<8x8x8xbf16>
    %110 = vector.shape_cast %109 : vector<8x8x8xbf16> to vector<64x8xbf16>
    %c0_138 = arith.constant 0 : index
    %c224 = arith.constant 224 : index
    %111 = vector.load %arg13[%c0_138, %c224] : memref<64x432xbf16, #tpu.memory_space<vmem>>, vector<64x8xbf16>
    tpu.vector_store %arg13[%c0_138, %c224], %110 {strides = array<i32>} : memref<64x432xbf16, #tpu.memory_space<vmem>>, vector<64x8xbf16>,
    %c0_139 = arith.constant 0 : index
    %c2_140 = arith.constant 2 : index
    %c0_141 = arith.constant 0 : index
    %112 = vector.load %arg15[%c0_139, %c2_140, %c0_141] : memref<10x10x8xbf16, #tpu.memory_space<vmem>>, vector<8x8x8xbf16>
    %113 = vector.shape_cast %112 : vector<8x8x8xbf16> to vector<64x8xbf16>
    %c0_142 = arith.constant 0 : index
    %c232 = arith.constant 232 : index
    %114 = vector.load %arg13[%c0_142, %c232] : memref<64x432xbf16, #tpu.memory_space<vmem>>, vector<64x8xbf16>
    tpu.vector_store %arg13[%c0_142, %c232], %113 {strides = array<i32>} : memref<64x432xbf16, #tpu.memory_space<vmem>>, vector<64x8xbf16>,
    %c1_143 = arith.constant 1 : index
    %c0_144 = arith.constant 0 : index
    %c0_145 = arith.constant 0 : index
    %115 = vector.load %arg15[%c1_143, %c0_144, %c0_145] : memref<10x10x8xbf16, #tpu.memory_space<vmem>>, vector<8x8x8xbf16>
    %116 = vector.shape_cast %115 : vector<8x8x8xbf16> to vector<64x8xbf16>
    %c0_146 = arith.constant 0 : index
    %c240 = arith.constant 240 : index
    %117 = vector.load %arg13[%c0_146, %c240] : memref<64x432xbf16, #tpu.memory_space<vmem>>, vector<64x8xbf16>
    tpu.vector_store %arg13[%c0_146, %c240], %116 {strides = array<i32>} : memref<64x432xbf16, #tpu.memory_space<vmem>>, vector<64x8xbf16>,
    %c1_147 = arith.constant 1 : index
    %c1_148 = arith.constant 1 : index
    %c0_149 = arith.constant 0 : index
    %118 = vector.load %arg15[%c1_147, %c1_148, %c0_149] : memref<10x10x8xbf16, #tpu.memory_space<vmem>>, vector<8x8x8xbf16>
    %119 = vector.shape_cast %118 : vector<8x8x8xbf16> to vector<64x8xbf16>
    %c0_150 = arith.constant 0 : index
    %c248 = arith.constant 248 : index
    %120 = vector.load %arg13[%c0_150, %c248] : memref<64x432xbf16, #tpu.memory_space<vmem>>, vector<64x8xbf16>
    tpu.vector_store %arg13[%c0_150, %c248], %119 {strides = array<i32>} : memref<64x432xbf16, #tpu.memory_space<vmem>>, vector<64x8xbf16>,
    %c1_151 = arith.constant 1 : index
    %c2_152 = arith.constant 2 : index
    %c0_153 = arith.constant 0 : index
    %121 = vector.load %arg15[%c1_151, %c2_152, %c0_153] : memref<10x10x8xbf16, #tpu.memory_space<vmem>>, vector<8x8x8xbf16>
    %122 = vector.shape_cast %121 : vector<8x8x8xbf16> to vector<64x8xbf16>
    %c0_154 = arith.constant 0 : index
    %c256 = arith.constant 256 : index
    %123 = vector.load %arg13[%c0_154, %c256] : memref<64x432xbf16, #tpu.memory_space<vmem>>, vector<64x8xbf16>
    tpu.vector_store %arg13[%c0_154, %c256], %122 {strides = array<i32>} : memref<64x432xbf16, #tpu.memory_space<vmem>>, vector<64x8xbf16>,
    %c2_155 = arith.constant 2 : index
    %c0_156 = arith.constant 0 : index
    %c0_157 = arith.constant 0 : index
    %124 = vector.load %arg15[%c2_155, %c0_156, %c0_157] : memref<10x10x8xbf16, #tpu.memory_space<vmem>>, vector<8x8x8xbf16>
    %125 = vector.shape_cast %124 : vector<8x8x8xbf16> to vector<64x8xbf16>
    %c0_158 = arith.constant 0 : index
    %c264 = arith.constant 264 : index
    %126 = vector.load %arg13[%c0_158, %c264] : memref<64x432xbf16, #tpu.memory_space<vmem>>, vector<64x8xbf16>
    tpu.vector_store %arg13[%c0_158, %c264], %125 {strides = array<i32>} : memref<64x432xbf16, #tpu.memory_space<vmem>>, vector<64x8xbf16>,
    %c2_159 = arith.constant 2 : index
    %c1_160 = arith.constant 1 : index
    %c0_161 = arith.constant 0 : index
    %127 = vector.load %arg15[%c2_159, %c1_160, %c0_161] : memref<10x10x8xbf16, #tpu.memory_space<vmem>>, vector<8x8x8xbf16>
    %128 = vector.shape_cast %127 : vector<8x8x8xbf16> to vector<64x8xbf16>
    %c0_162 = arith.constant 0 : index
    %c272 = arith.constant 272 : index
    %129 = vector.load %arg13[%c0_162, %c272] : memref<64x432xbf16, #tpu.memory_space<vmem>>, vector<64x8xbf16>
    tpu.vector_store %arg13[%c0_162, %c272], %128 {strides = array<i32>} : memref<64x432xbf16, #tpu.memory_space<vmem>>, vector<64x8xbf16>,
    %c2_163 = arith.constant 2 : index
    %c2_164 = arith.constant 2 : index
    %c0_165 = arith.constant 0 : index
    %130 = vector.load %arg15[%c2_163, %c2_164, %c0_165] : memref<10x10x8xbf16, #tpu.memory_space<vmem>>, vector<8x8x8xbf16>
    %131 = vector.shape_cast %130 : vector<8x8x8xbf16> to vector<64x8xbf16>
    %c0_166 = arith.constant 0 : index
    %c280 = arith.constant 280 : index
    %132 = vector.load %arg13[%c0_166, %c280] : memref<64x432xbf16, #tpu.memory_space<vmem>>, vector<64x8xbf16>
    tpu.vector_store %arg13[%c0_166, %c280], %131 {strides = array<i32>} : memref<64x432xbf16, #tpu.memory_space<vmem>>, vector<64x8xbf16>,
    %c0_167 = arith.constant 0 : index
    %c0_168 = arith.constant 0 : index
    %133 = vector.load %arg13[%c0_167, %c0_168] : memref<64x432xbf16, #tpu.memory_space<vmem>>, vector<64x288xbf16>
    %c0_169 = arith.constant 0 : index
    %c0_170 = arith.constant 0 : index
    %134 = vector.load %arg6[%c0_169, %c0_170] : memref<288x8xbf16, #tpu.memory_space<vmem>>, vector<288x8xbf16>
    %cst_171 = arith.constant dense<0.000000e+00> : vector<64x8xf32>
    %135 = tpu.matmul %133, %134, %cst_171 {dimension_numbers = #tpu.dot_dimension_numbers<[1], [0], [0], [1], [0, 0, 1, 1], [], []>} : vector<64x288xbf16>, vector<288x8xbf16>, vector<64x8xf32> -> vector<64x8xf32>
    %c0_172 = arith.constant 0 : index
    %c0_173 = arith.constant 0 : index
    %136 = vector.load %arg7[%c0_172, %c0_173] : memref<1x8xf32, #tpu.memory_space<vmem>>, vector<1x8xf32>
    %137 = vector.shape_cast %136 : vector<1x8xf32> to vector<8xf32>
    %138 = vector.shape_cast %137 : vector<8xf32> to vector<1x8xf32>
    %139 = vector.broadcast %138 : vector<1x8xf32> to vector<64x8xf32>
    %140 = arith.addf %135, %139 : vector<64x8xf32>
    %cst_174 = arith.constant 0.000000e+00 : f32
    %141 = vector.broadcast %cst_174 : f32 to vector<64x8xf32>
    %142 = arith.cmpf oge, %140, %141 : vector<64x8xf32>
    %cst_175 = arith.constant 2.000000e-01 : f32
    %143 = vector.broadcast %cst_175 : f32 to vector<64x8xf32>
    %144 = arith.mulf %143, %140 : vector<64x8xf32>
    %145 = arith.select %142, %140, %144 : vector<64x8xi1>, vector<64x8xf32>
    %146 = arith.truncf %145 : vector<64x8xf32> to vector<64x8xbf16>
    %147 = vector.shape_cast %146 : vector<64x8xbf16> to vector<8x8x8xbf16>
    %c1_176 = arith.constant 1 : index
    %c1_177 = arith.constant 1 : index
    %c0_178 = arith.constant 0 : index
    %148 = vector.load %arg15[%c1_176, %c1_177, %c0_178] : memref<10x10x8xbf16, #tpu.memory_space<vmem>>, vector<8x8x8xbf16>
    tpu.vector_store %arg15[%c1_176, %c1_177, %c0_178], %147 {strides = array<i32>} : memref<10x10x8xbf16, #tpu.memory_space<vmem>>, vector<8x8x8xbf16>,
    %c0_179 = arith.constant 0 : index
    %c0_180 = arith.constant 0 : index
    %c0_181 = arith.constant 0 : index
    %149 = vector.load %arg15[%c0_179, %c0_180, %c0_181] : memref<10x10x8xbf16, #tpu.memory_space<vmem>>, vector<8x8x8xbf16>
    %150 = vector.shape_cast %149 : vector<8x8x8xbf16> to vector<64x8xbf16>
    %c0_182 = arith.constant 0 : index
    %c288 = arith.constant 288 : index
    %151 = vector.load %arg13[%c0_182, %c288] : memref<64x432xbf16, #tpu.memory_space<vmem>>, vector<64x8xbf16>
    tpu.vector_store %arg13[%c0_182, %c288], %150 {strides = array<i32>} : memref<64x432xbf16, #tpu.memory_space<vmem>>, vector<64x8xbf16>,
    %c0_183 = arith.constant 0 : index
    %c1_184 = arith.constant 1 : index
    %c0_185 = arith.constant 0 : index
    %152 = vector.load %arg15[%c0_183, %c1_184, %c0_185] : memref<10x10x8xbf16, #tpu.memory_space<vmem>>, vector<8x8x8xbf16>
    %153 = vector.shape_cast %152 : vector<8x8x8xbf16> to vector<64x8xbf16>
    %c0_186 = arith.constant 0 : index
    %c296 = arith.constant 296 : index
    %154 = vector.load %arg13[%c0_186, %c296] : memref<64x432xbf16, #tpu.memory_space<vmem>>, vector<64x8xbf16>
    tpu.vector_store %arg13[%c0_186, %c296], %153 {strides = array<i32>} : memref<64x432xbf16, #tpu.memory_space<vmem>>, vector<64x8xbf16>,
    %c0_187 = arith.constant 0 : index
    %c2_188 = arith.constant 2 : index
    %c0_189 = arith.constant 0 : index
    %155 = vector.load %arg15[%c0_187, %c2_188, %c0_189] : memref<10x10x8xbf16, #tpu.memory_space<vmem>>, vector<8x8x8xbf16>
    %156 = vector.shape_cast %155 : vector<8x8x8xbf16> to vector<64x8xbf16>
    %c0_190 = arith.constant 0 : index
    %c304 = arith.constant 304 : index
    %157 = vector.load %arg13[%c0_190, %c304] : memref<64x432xbf16, #tpu.memory_space<vmem>>, vector<64x8xbf16>
    tpu.vector_store %arg13[%c0_190, %c304], %156 {strides = array<i32>} : memref<64x432xbf16, #tpu.memory_space<vmem>>, vector<64x8xbf16>,
    %c1_191 = arith.constant 1 : index
    %c0_192 = arith.constant 0 : index
    %c0_193 = arith.constant 0 : index
    %158 = vector.load %arg15[%c1_191, %c0_192, %c0_193] : memref<10x10x8xbf16, #tpu.memory_space<vmem>>, vector<8x8x8xbf16>
    %159 = vector.shape_cast %158 : vector<8x8x8xbf16> to vector<64x8xbf16>
    %c0_194 = arith.constant 0 : index
    %c312 = arith.constant 312 : index
    %160 = vector.load %arg13[%c0_194, %c312] : memref<64x432xbf16, #tpu.memory_space<vmem>>, vector<64x8xbf16>
    tpu.vector_store %arg13[%c0_194, %c312], %159 {strides = array<i32>} : memref<64x432xbf16, #tpu.memory_space<vmem>>, vector<64x8xbf16>,
    %c1_195 = arith.constant 1 : index
    %c1_196 = arith.constant 1 : index
    %c0_197 = arith.constant 0 : index
    %161 = vector.load %arg15[%c1_195, %c1_196, %c0_197] : memref<10x10x8xbf16, #tpu.memory_space<vmem>>, vector<8x8x8xbf16>
    %162 = vector.shape_cast %161 : vector<8x8x8xbf16> to vector<64x8xbf16>
    %c0_198 = arith.constant 0 : index
    %c320 = arith.constant 320 : index
    %163 = vector.load %arg13[%c0_198, %c320] : memref<64x432xbf16, #tpu.memory_space<vmem>>, vector<64x8xbf16>
    tpu.vector_store %arg13[%c0_198, %c320], %162 {strides = array<i32>} : memref<64x432xbf16, #tpu.memory_space<vmem>>, vector<64x8xbf16>,
    %c1_199 = arith.constant 1 : index
    %c2_200 = arith.constant 2 : index
    %c0_201 = arith.constant 0 : index
    %164 = vector.load %arg15[%c1_199, %c2_200, %c0_201] : memref<10x10x8xbf16, #tpu.memory_space<vmem>>, vector<8x8x8xbf16>
    %165 = vector.shape_cast %164 : vector<8x8x8xbf16> to vector<64x8xbf16>
    %c0_202 = arith.constant 0 : index
    %c328 = arith.constant 328 : index
    %166 = vector.load %arg13[%c0_202, %c328] : memref<64x432xbf16, #tpu.memory_space<vmem>>, vector<64x8xbf16>
    tpu.vector_store %arg13[%c0_202, %c328], %165 {strides = array<i32>} : memref<64x432xbf16, #tpu.memory_space<vmem>>, vector<64x8xbf16>,
    %c2_203 = arith.constant 2 : index
    %c0_204 = arith.constant 0 : index
    %c0_205 = arith.constant 0 : index
    %167 = vector.load %arg15[%c2_203, %c0_204, %c0_205] : memref<10x10x8xbf16, #tpu.memory_space<vmem>>, vector<8x8x8xbf16>
    %168 = vector.shape_cast %167 : vector<8x8x8xbf16> to vector<64x8xbf16>
    %c0_206 = arith.constant 0 : index
    %c336 = arith.constant 336 : index
    %169 = vector.load %arg13[%c0_206, %c336] : memref<64x432xbf16, #tpu.memory_space<vmem>>, vector<64x8xbf16>
    tpu.vector_store %arg13[%c0_206, %c336], %168 {strides = array<i32>} : memref<64x432xbf16, #tpu.memory_space<vmem>>, vector<64x8xbf16>,
    %c2_207 = arith.constant 2 : index
    %c1_208 = arith.constant 1 : index
    %c0_209 = arith.constant 0 : index
    %170 = vector.load %arg15[%c2_207, %c1_208, %c0_209] : memref<10x10x8xbf16, #tpu.memory_space<vmem>>, vector<8x8x8xbf16>
    %171 = vector.shape_cast %170 : vector<8x8x8xbf16> to vector<64x8xbf16>
    %c0_210 = arith.constant 0 : index
    %c344 = arith.constant 344 : index
    %172 = vector.load %arg13[%c0_210, %c344] : memref<64x432xbf16, #tpu.memory_space<vmem>>, vector<64x8xbf16>
    tpu.vector_store %arg13[%c0_210, %c344], %171 {strides = array<i32>} : memref<64x432xbf16, #tpu.memory_space<vmem>>, vector<64x8xbf16>,
    %c2_211 = arith.constant 2 : index
    %c2_212 = arith.constant 2 : index
    %c0_213 = arith.constant 0 : index
    %173 = vector.load %arg15[%c2_211, %c2_212, %c0_213] : memref<10x10x8xbf16, #tpu.memory_space<vmem>>, vector<8x8x8xbf16>
    %174 = vector.shape_cast %173 : vector<8x8x8xbf16> to vector<64x8xbf16>
    %c0_214 = arith.constant 0 : index
    %c352 = arith.constant 352 : index
    %175 = vector.load %arg13[%c0_214, %c352] : memref<64x432xbf16, #tpu.memory_space<vmem>>, vector<64x8xbf16>
    tpu.vector_store %arg13[%c0_214, %c352], %174 {strides = array<i32>} : memref<64x432xbf16, #tpu.memory_space<vmem>>, vector<64x8xbf16>,
    %c0_215 = arith.constant 0 : index
    %c0_216 = arith.constant 0 : index
    %176 = vector.load %arg13[%c0_215, %c0_216] : memref<64x432xbf16, #tpu.memory_space<vmem>>, vector<64x360xbf16>
    %c0_217 = arith.constant 0 : index
    %c0_218 = arith.constant 0 : index
    %177 = vector.load %arg8[%c0_217, %c0_218] : memref<360x8xbf16, #tpu.memory_space<vmem>>, vector<360x8xbf16>
    %cst_219 = arith.constant dense<0.000000e+00> : vector<64x8xf32>
    %178 = tpu.matmul %176, %177, %cst_219 {dimension_numbers = #tpu.dot_dimension_numbers<[1], [0], [0], [1], [0, 0, 1, 1], [], []>} : vector<64x360xbf16>, vector<360x8xbf16>, vector<64x8xf32> -> vector<64x8xf32>
    %c0_220 = arith.constant 0 : index
    %c0_221 = arith.constant 0 : index
    %179 = vector.load %arg9[%c0_220, %c0_221] : memref<1x8xf32, #tpu.memory_space<vmem>>, vector<1x8xf32>
    %180 = vector.shape_cast %179 : vector<1x8xf32> to vector<8xf32>
    %181 = vector.shape_cast %180 : vector<8xf32> to vector<1x8xf32>
    %182 = vector.broadcast %181 : vector<1x8xf32> to vector<64x8xf32>
    %183 = arith.addf %178, %182 : vector<64x8xf32>
    %cst_222 = arith.constant 0.000000e+00 : f32
    %184 = vector.broadcast %cst_222 : f32 to vector<64x8xf32>
    %185 = arith.cmpf oge, %183, %184 : vector<64x8xf32>
    %cst_223 = arith.constant 2.000000e-01 : f32
    %186 = vector.broadcast %cst_223 : f32 to vector<64x8xf32>
    %187 = arith.mulf %186, %183 : vector<64x8xf32>
    %188 = arith.select %185, %183, %187 : vector<64x8xi1>, vector<64x8xf32>
    %189 = arith.truncf %188 : vector<64x8xf32> to vector<64x8xbf16>
    %190 = vector.shape_cast %189 : vector<64x8xbf16> to vector<8x8x8xbf16>
    %c1_224 = arith.constant 1 : index
    %c1_225 = arith.constant 1 : index
    %c0_226 = arith.constant 0 : index
    %191 = vector.load %arg15[%c1_224, %c1_225, %c0_226] : memref<10x10x8xbf16, #tpu.memory_space<vmem>>, vector<8x8x8xbf16>
    tpu.vector_store %arg15[%c1_224, %c1_225, %c0_226], %190 {strides = array<i32>} : memref<10x10x8xbf16, #tpu.memory_space<vmem>>, vector<8x8x8xbf16>,
    %c0_227 = arith.constant 0 : index
    %c0_228 = arith.constant 0 : index
    %c0_229 = arith.constant 0 : index
    %192 = vector.load %arg15[%c0_227, %c0_228, %c0_229] : memref<10x10x8xbf16, #tpu.memory_space<vmem>>, vector<8x8x8xbf16>
    %193 = vector.shape_cast %192 : vector<8x8x8xbf16> to vector<64x8xbf16>
    %c0_230 = arith.constant 0 : index
    %c360 = arith.constant 360 : index
    %194 = vector.load %arg13[%c0_230, %c360] : memref<64x432xbf16, #tpu.memory_space<vmem>>, vector<64x8xbf16>
    tpu.vector_store %arg13[%c0_230, %c360], %193 {strides = array<i32>} : memref<64x432xbf16, #tpu.memory_space<vmem>>, vector<64x8xbf16>,
    %c0_231 = arith.constant 0 : index
    %c1_232 = arith.constant 1 : index
    %c0_233 = arith.constant 0 : index
    %195 = vector.load %arg15[%c0_231, %c1_232, %c0_233] : memref<10x10x8xbf16, #tpu.memory_space<vmem>>, vector<8x8x8xbf16>
    %196 = vector.shape_cast %195 : vector<8x8x8xbf16> to vector<64x8xbf16>
    %c0_234 = arith.constant 0 : index
    %c368 = arith.constant 368 : index
    %197 = vector.load %arg13[%c0_234, %c368] : memref<64x432xbf16, #tpu.memory_space<vmem>>, vector<64x8xbf16>
    tpu.vector_store %arg13[%c0_234, %c368], %196 {strides = array<i32>} : memref<64x432xbf16, #tpu.memory_space<vmem>>, vector<64x8xbf16>,
    %c0_235 = arith.constant 0 : index
    %c2_236 = arith.constant 2 : index
    %c0_237 = arith.constant 0 : index
    %198 = vector.load %arg15[%c0_235, %c2_236, %c0_237] : memref<10x10x8xbf16, #tpu.memory_space<vmem>>, vector<8x8x8xbf16>
    %199 = vector.shape_cast %198 : vector<8x8x8xbf16> to vector<64x8xbf16>
    %c0_238 = arith.constant 0 : index
    %c376 = arith.constant 376 : index
    %200 = vector.load %arg13[%c0_238, %c376] : memref<64x432xbf16, #tpu.memory_space<vmem>>, vector<64x8xbf16>
    tpu.vector_store %arg13[%c0_238, %c376], %199 {strides = array<i32>} : memref<64x432xbf16, #tpu.memory_space<vmem>>, vector<64x8xbf16>,
    %c1_239 = arith.constant 1 : index
    %c0_240 = arith.constant 0 : index
    %c0_241 = arith.constant 0 : index
    %201 = vector.load %arg15[%c1_239, %c0_240, %c0_241] : memref<10x10x8xbf16, #tpu.memory_space<vmem>>, vector<8x8x8xbf16>
    %202 = vector.shape_cast %201 : vector<8x8x8xbf16> to vector<64x8xbf16>
    %c0_242 = arith.constant 0 : index
    %c384 = arith.constant 384 : index
    %203 = vector.load %arg13[%c0_242, %c384] : memref<64x432xbf16, #tpu.memory_space<vmem>>, vector<64x8xbf16>
    tpu.vector_store %arg13[%c0_242, %c384], %202 {strides = array<i32>} : memref<64x432xbf16, #tpu.memory_space<vmem>>, vector<64x8xbf16>,
    %c1_243 = arith.constant 1 : index
    %c1_244 = arith.constant 1 : index
    %c0_245 = arith.constant 0 : index
    %204 = vector.load %arg15[%c1_243, %c1_244, %c0_245] : memref<10x10x8xbf16, #tpu.memory_space<vmem>>, vector<8x8x8xbf16>
    %205 = vector.shape_cast %204 : vector<8x8x8xbf16> to vector<64x8xbf16>
    %c0_246 = arith.constant 0 : index
    %c392 = arith.constant 392 : index
    %206 = vector.load %arg13[%c0_246, %c392] : memref<64x432xbf16, #tpu.memory_space<vmem>>, vector<64x8xbf16>
    tpu.vector_store %arg13[%c0_246, %c392], %205 {strides = array<i32>} : memref<64x432xbf16, #tpu.memory_space<vmem>>, vector<64x8xbf16>,
    %c1_247 = arith.constant 1 : index
    %c2_248 = arith.constant 2 : index
    %c0_249 = arith.constant 0 : index
    %207 = vector.load %arg15[%c1_247, %c2_248, %c0_249] : memref<10x10x8xbf16, #tpu.memory_space<vmem>>, vector<8x8x8xbf16>
    %208 = vector.shape_cast %207 : vector<8x8x8xbf16> to vector<64x8xbf16>
    %c0_250 = arith.constant 0 : index
    %c400 = arith.constant 400 : index
    %209 = vector.load %arg13[%c0_250, %c400] : memref<64x432xbf16, #tpu.memory_space<vmem>>, vector<64x8xbf16>
    tpu.vector_store %arg13[%c0_250, %c400], %208 {strides = array<i32>} : memref<64x432xbf16, #tpu.memory_space<vmem>>, vector<64x8xbf16>,
    %c2_251 = arith.constant 2 : index
    %c0_252 = arith.constant 0 : index
    %c0_253 = arith.constant 0 : index
    %210 = vector.load %arg15[%c2_251, %c0_252, %c0_253] : memref<10x10x8xbf16, #tpu.memory_space<vmem>>, vector<8x8x8xbf16>
    %211 = vector.shape_cast %210 : vector<8x8x8xbf16> to vector<64x8xbf16>
    %c0_254 = arith.constant 0 : index
    %c408 = arith.constant 408 : index
    %212 = vector.load %arg13[%c0_254, %c408] : memref<64x432xbf16, #tpu.memory_space<vmem>>, vector<64x8xbf16>
    tpu.vector_store %arg13[%c0_254, %c408], %211 {strides = array<i32>} : memref<64x432xbf16, #tpu.memory_space<vmem>>, vector<64x8xbf16>,
    %c2_255 = arith.constant 2 : index
    %c1_256 = arith.constant 1 : index
    %c0_257 = arith.constant 0 : index
    %213 = vector.load %arg15[%c2_255, %c1_256, %c0_257] : memref<10x10x8xbf16, #tpu.memory_space<vmem>>, vector<8x8x8xbf16>
    %214 = vector.shape_cast %213 : vector<8x8x8xbf16> to vector<64x8xbf16>
    %c0_258 = arith.constant 0 : index
    %c416 = arith.constant 416 : index
    %215 = vector.load %arg13[%c0_258, %c416] : memref<64x432xbf16, #tpu.memory_space<vmem>>, vector<64x8xbf16>
    tpu.vector_store %arg13[%c0_258, %c416], %214 {strides = array<i32>} : memref<64x432xbf16, #tpu.memory_space<vmem>>, vector<64x8xbf16>,
    %c2_259 = arith.constant 2 : index
    %c2_260 = arith.constant 2 : index
    %c0_261 = arith.constant 0 : index
    %216 = vector.load %arg15[%c2_259, %c2_260, %c0_261] : memref<10x10x8xbf16, #tpu.memory_space<vmem>>, vector<8x8x8xbf16>
    %217 = vector.shape_cast %216 : vector<8x8x8xbf16> to vector<64x8xbf16>
    %c0_262 = arith.constant 0 : index
    %c424 = arith.constant 424 : index
    %218 = vector.load %arg13[%c0_262, %c424] : memref<64x432xbf16, #tpu.memory_space<vmem>>, vector<64x8xbf16>
    tpu.vector_store %arg13[%c0_262, %c424], %217 {strides = array<i32>} : memref<64x432xbf16, #tpu.memory_space<vmem>>, vector<64x8xbf16>,
    %c0_263 = arith.constant 0 : index
    %c0_264 = arith.constant 0 : index
    %219 = vector.load %arg13[%c0_263, %c0_264] : memref<64x432xbf16, #tpu.memory_space<vmem>>, vector<64x432xbf16>
    %c0_265 = arith.constant 0 : index
    %c0_266 = arith.constant 0 : index
    %220 = vector.load %arg10[%c0_265, %c0_266] : memref<432x16xbf16, #tpu.memory_space<vmem>>, vector<432x16xbf16>
    %cst_267 = arith.constant dense<0.000000e+00> : vector<64x16xf32>
    %221 = tpu.matmul %219, %220, %cst_267 {dimension_numbers = #tpu.dot_dimension_numbers<[1], [0], [0], [1], [0, 0, 1, 1], [], []>} : vector<64x432xbf16>, vector<432x16xbf16>, vector<64x16xf32> -> vector<64x16xf32>
    %c0_268 = arith.constant 0 : index
    %c0_269 = arith.constant 0 : index
    %222 = vector.load %arg11[%c0_268, %c0_269] : memref<1x16xf32, #tpu.memory_space<vmem>>, vector<1x16xf32>
    %223 = vector.shape_cast %222 : vector<1x16xf32> to vector<16xf32>
    %224 = vector.shape_cast %223 : vector<16xf32> to vector<1x16xf32>
    %225 = vector.broadcast %224 : vector<1x16xf32> to vector<64x16xf32>
    %226 = arith.addf %221, %225 : vector<64x16xf32>
    %227 = vector.shape_cast %226 : vector<64x16xf32> to vector<1x8x8x16xf32>
    %cst_270 = arith.constant 2.000000e-01 : f32
    %228 = vector.broadcast %cst_270 : f32 to vector<1x8x8x16xf32>
    %229 = arith.mulf %227, %228 : vector<1x8x8x16xf32>
    %c0_271 = arith.constant 0 : index
    %c0_272 = arith.constant 0 : index
    %c0_273 = arith.constant 0 : index
    %c0_274 = arith.constant 0 : index
    %230 = vector.load %arg1[%c0_271, %c0_272, %c0_273, %c0_274] : memref<1x8x8x16xf32, #tpu.memory_space<vmem>>, vector<1x8x8x16xf32>
    %231 = arith.addf %229, %230 : vector<1x8x8x16xf32>
    %c0_275 = arith.constant 0 : index
    %c0_276 = arith.constant 0 : index
    %c0_277 = arith.constant 0 : index
    %c0_278 = arith.constant 0 : index
    %232 = vector.load %arg12[%c0_275, %c0_276, %c0_277, %c0_278] : memref<1x8x8x16xf32, #tpu.memory_space<vmem>>, vector<1x8x8x16xf32>
    tpu.vector_store %arg12[%c0_275, %c0_276, %c0_277, %c0_278], %231 {strides = array<i32>} : memref<1x8x8x16xf32, #tpu.memory_space<vmem>>, vector<1x8x8x16xf32>,
    return
  }
  func.func @transform_0(%arg0: i32) -> (i32, i32, i32, i32) {
    %c0_i32 = arith.constant 0 : i32
    %c0_i32_0 = arith.constant 0 : i32
    %c0_i32_1 = arith.constant 0 : i32
    %c0_i32_2 = arith.constant 0 : i32
    return %arg0, %c0_i32, %c0_i32_0, %c0_i32_1 : i32, i32, i32, i32
  }
  func.func @transform_1(%arg0: i32) -> (i32, i32) {
    %c0_i32 = arith.constant 0 : i32
    %c0_i32_0 = arith.constant 0 : i32
    %c0_i32_1 = arith.constant 0 : i32
    return %c0_i32, %c0_i32_0 : i32, i32
  }
  func.func @transform_2(%arg0: i32) -> (i32, i32) {
    %c0_i32 = arith.constant 0 : i32
    %c0_i32_0 = arith.constant 0 : i32
    %c0_i32_1 = arith.constant 0 : i32
    return %c0_i32, %c0_i32_0 : i32, i32
  }
  func.func @transform_3(%arg0: i32) -> (i32, i32) {
    %c0_i32 = arith.constant 0 : i32
    %c0_i32_0 = arith.constant 0 : i32
    %c0_i32_1 = arith.constant 0 : i32
    return %c0_i32, %c0_i32_0 : i32, i32
  }
  func.func @transform_4(%arg0: i32) -> (i32, i32) {
    %c0_i32 = arith.constant 0 : i32
    %c0_i32_0 = arith.constant 0 : i32
    %c0_i32_1 = arith.constant 0 : i32
    return %c0_i32, %c0_i32_0 : i32, i32
  }
  func.func @transform_5(%arg0: i32) -> (i32, i32) {
    %c0_i32 = arith.constant 0 : i32
    %c0_i32_0 = arith.constant 0 : i32
    %c0_i32_1 = arith.constant 0 : i32
    return %c0_i32, %c0_i32_0 : i32, i32
  }
  func.func @transform_6(%arg0: i32) -> (i32, i32) {
    %c0_i32 = arith.constant 0 : i32
    %c0_i32_0 = arith.constant 0 : i32
    %c0_i32_1 = arith.constant 0 : i32
    return %c0_i32, %c0_i32_0 : i32, i32
  }
  func.func @transform_7(%arg0: i32) -> (i32, i32) {
    %c0_i32 = arith.constant 0 : i32
    %c0_i32_0 = arith.constant 0 : i32
    %c0_i32_1 = arith.constant 0 : i32
    return %c0_i32, %c0_i32_0 : i32, i32
  }
  func.func @transform_8(%arg0: i32) -> (i32, i32) {
    %c0_i32 = arith.constant 0 : i32
    %c0_i32_0 = arith.constant 0 : i32
    %c0_i32_1 = arith.constant 0 : i32
    return %c0_i32, %c0_i32_0 : i32, i32
  }
  func.func @transform_9(%arg0: i32) -> (i32, i32) {
    %c0_i32 = arith.constant 0 : i32
    %c0_i32_0 = arith.constant 0 : i32
    %c0_i32_1 = arith.constant 0 : i32
    return %c0_i32, %c0_i32_0 : i32, i32
  }
  func.func @transform_10(%arg0: i32) -> (i32, i32) {
    %c0_i32 = arith.constant 0 : i32
    %c0_i32_0 = arith.constant 0 : i32
    %c0_i32_1 = arith.constant 0 : i32
    return %c0_i32, %c0_i32_0 : i32, i32
  }
  func.func @transform_11(%arg0: i32) -> (i32, i32, i32, i32) {
    %c0_i32 = arith.constant 0 : i32
    %c0_i32_0 = arith.constant 0 : i32
    %c0_i32_1 = arith.constant 0 : i32
    %c0_i32_2 = arith.constant 0 : i32
    return %arg0, %c0_i32, %c0_i32_0, %c0_i32_1 : i32, i32, i32, i32
  }
}

</mosaic_0001>

<bundles_post_ra>
// kernel: residual_dense_block_pallas.1
= control target key start
LH: loop header
LB: loop body
LE: loop exit
PB: predicated region body
PF: predicated region fallthrough
CT: control target
= control target key end

     0   :  { %s10402_s0 = inlined_call_operand.vmem [shape: f32[2,8,8,16], index: 0, kind: input, shape index: {}]   ;;  %s10403_s1 = inlined_call_operand.vmem [shape: bf16[144,8], index: 1, kind: input, shape index: {}]   ;;  %s10404_s2 = inlined_call_operand.vmem [shape: f32[1,8], index: 2, kind: input, shape index: {}]   ;;  %s10405_s3 = inlined_call_operand.vmem [shape: bf16[216,8], index: 3, kind: input, shape index: {}]   ;;  %s10406_s4 = inlined_call_operand.vmem [shape: f32[1,8], index: 4, kind: input, shape index: {}]   ;;  %s10407_s5 = inlined_call_operand.vmem [shape: bf16[288,8], index: 5, kind: input, shape index: {}]   ;;  %s10408_s6 = inlined_call_operand.vmem [shape: f32[1,8], index: 6, kind: input, shape index: {}]   ;;  %s10409_s7 = inlined_call_operand.vmem [shape: bf16[360,8], index: 7, kind: input, shape index: {}]   ;;  %s10410_s8 = inlined_call_operand.vmem [shape: f32[1,8], index: 8, kind: input, shape index: {}]   ;;  %s10411_s9 = inlined_call_operand.vmem [shape: bf16[432,16], index: 9, kind: input, shape index: {}]   ;;  %s10412_s10 = inlined_call_operand.vmem [shape: f32[1,16], index: 10, kind: input, shape index: {}]   ;;  %s10413_s11 = inlined_call_operand.hbm [shape: f32[2,8,8,16], index: 11, kind: output, shape index: {}]  }
   0x1   :  { %10467 = sst [smem:[#allocation15_spill]] %s10402_s0 }
   0x2   :  { %10468 = sst [smem:[#allocation16_spill]] %s10403_s1 }
   0x3   :  { %10469 = sst [smem:[#allocation17_spill]] %s10404_s2 }
   0x4   :  { %10470 = sst [smem:[#allocation18_spill]] %s10405_s3 }
   0x5   :  { %10471 = sst [smem:[#allocation19_spill]] %s10406_s4 }
   0x6   :  { %10472 = sst [smem:[#allocation20_spill]] %s10407_s5 }
   0x7   :  { %10473 = sst [smem:[#allocation21_spill]] %s10413_s11 }
   0x8   :  { %16 = vsyncpa [#allocation6], 0 }
   0x9   :  { %18 = vsyncpa [#allocation6 + $0x1], 0  ;;  %s8349_s17 = smov 0   ;;  %s8351_s18 = smov 0  }
   0xa   :  { %s8353_s19 = smov 0   ;;  %s8355_s20 = smov 0  }
   0xb LB: > { %10474 = sst [smem:[#allocation8_spill]] %s8257_s17  ;;  %s8370_s21 = sadd.s32 4294967295, %s8269_s20   ;;  %s8269_s20 = sphi %s8355_s20, %s10583_s20   ;;  %s8265_s19 = sphi %s8353_s19, %s10585_s19   ;;  %s8261_s18 = sphi %s8351_s18, %s10587_s18   ;;  %s8257_s17 = sphi %s8349_s17, %s10586_s17  }
   0xc   : > { %10475 = sst [smem:[#allocation9_spill]] %s8265_s19  ;;  %s7296_s22 = sadd.s32 4294967294, %s8269_s20  }
   0xd   : > { %10476 = sst [smem:[#allocation10_spill]] %s8269_s20  ;;  %s8374_s23 = sadd.s32 1, %s8269_s20  }
   0xe   : > { %10477 = sst [smem:[#allocation11_spill]] %s8374_s23  ;;  %s267_s24 = sadd.s32 1, %s8265_s19 }
   0xf   : > { %s264_s25 = ssub.s32 %s8269_s20, %s8374_s23  ;;  %p277_p0 = scmp.ne.s32.totalorder %s8265_s19, %s8261_s18 }
  0x10   : > { %p265_p1 = scmp.eq.s32.totalorder %s264_s25, 0  ;;  %p278_p2 = scmp.eq.s32.totalorder %s8370_s21, 1 }
  0x11   : > { %p283_p3 = scmp.ne.s32.totalorder %s8261_s18, %s8257_s17  ;;  %p284_p4 = scmp.eq.s32.totalorder %s7296_s22, 1 }
  0x12   : > { %s8385_s26 = scalar_select %p265_p1, %s8265_s19, %s267_s24  }
  0x13   : > { %p8387_p5 = por %p278_p2, %p277_p0  ;;  %p8391_p6 = por %p284_p4, %p283_p3 }
  0x14   : > { %10478 = sst [smem:[#allocation12_spill]] %s8385_s26  ;;  %p7299_p7 = scmp.ge.s32.totalorder %s8269_s20, 1 }
  0x15   : > { %s10479_s27 = scalar_select %p8387_p5, 1, 0 }
  0x16   : > { %s10481_s28 = scalar_select %p8391_p6, 1, 0 }
  0x17   : > { %10480 = sst [smem:[#allocation13_spill]] %s10479_s27  ;;  %p340_p8 = scmp.lt.s32.totalorder %s8269_s20, 3 }
  0x18   : > { %10482 = sst [smem:[#allocation14_spill]] %s10481_s28 }
  0x19   : > { %p341_p9 = pnand %p7299_p7, %p340_p8 }
  0x1a   : > { %p380_p10 = scmp.lt.s32.totalorder (!%p341_p9), %s8370_s21, 1  ;;  %vm386_vm0 = vcmask (!%p341_p9), 125952   ;;  %vm388_vm1 = vcmask (!%p341_p9), 122880   ;;  %vm394_vm2 = vsmask.f32 (!%p341_p9), 256  ;;  %v8271_v10 = vmov (!%p341_p9), 0  }
  0x1b   : > { %344 = sbr.rel (%p341_p9) target bundleno = 2175 (0x87f), region = 64  ;;  %vm8400_vm3 = vmand (!%p341_p9), %vm388_vm1, %vm394_vm2  ;;  %v408_v1 = vld [vmem:[#allocation3 + $0x20] sm:$0x1] (!%p341_p9)  ;;  %v411_v2 = vld [vmem:[#allocation3 + $0x28] sm:$0x1] (!%p341_p9)  ;;  %1673 = vmatprep.subr.bf16.mxu0 (!%p341_p9), %v8271_v10  ;;  %2943 = vmatprep.subr.bf16.mxu1 (!%p341_p9), %v8271_v10  ;;  %s10487_s0 = sld [smem:[#allocation15_spill]] (!%p341_p9) }
  0x1c   : > { %vm426_vm4 = vsmask.f32 (!%p341_p9), 7938  ;;  %v409_v3 = vsel (!%p341_p9), %vm8400_vm3, 0, %v408_v1  ;;  %v412_v4 = vsel (!%p341_p9), %vm8400_vm3, 0, %v411_v2  ;;  %v399_v5 = vld [vmem:[#allocation3 + $0x8] sm:$0x1] (!%p341_p9) }
  0x1d   : > { %410 = vst [vmem:[#allocation3 + $0x20] sm:$0x1] (!%p341_p9), %v409_v3  ;;  %413 = vst [vmem:[#allocation3 + $0x28] sm:$0x1] (!%p341_p9), %v412_v4  ;;  %v400_v7 = vsel (!%p341_p9), %vm8400_vm3, 0, %v399_v5  ;;  %s10488_s1 = sld [smem:[#allocation16_spill]] (!%p341_p9) }
  0x1e   : > { %vm8411_vm5 = vmand (!%p341_p9), %vm388_vm1, %vm426_vm4  ;;  %v402_v8 = vld [vmem:[#allocation3 + $0x10] sm:$0x1] (!%p341_p9)  ;;  %387 = vst.msk [vmem:[#allocation3] sm:$0xf] (!%p341_p9), %vm386_vm0, %v8271_v10  ;;  %v405_v13 = vld [vmem:[#allocation3 + $0x18] sm:$0x1] (!%p341_p9) }
  0x1f   : > { %v414_v9 = vld [vmem:[#allocation3 + $0x30] sm:$0x1] (!%p341_p9)  ;;  %389 = vst.msk [vmem:[#allocation3 + $0x4] sm:$0x1] (!%p341_p9), %vm388_vm1, %v8271_v10  ;;  %392 = vst.msk [vmem:[#allocation3 + $0x4c] sm:$0x1] (!%p341_p9), %vm388_vm1, %v8271_v10 }
  0x20   : > { %391 = vst.msk [vmem:[#allocation3 + $0x48] sm:$0xf] (!%p341_p9), %vm386_vm0, %v8271_v10  ;;  %401 = vst [vmem:[#allocation3 + $0x8] sm:$0x1] (!%p341_p9), %v400_v7  ;;  %v403_v11 = vsel (!%p341_p9), %vm8400_vm3, 0, %v402_v8  ;;  %v415_v12 = vsel (!%p341_p9), %vm8400_vm3, 0, %v414_v9 }
  0x21   : > { %404 = vst [vmem:[#allocation3 + $0x10] sm:$0x1] (!%p341_p9), %v403_v11  ;;  %416 = vst [vmem:[#allocation3 + $0x30] sm:$0x1] (!%p341_p9), %v415_v12  ;;  %v406_v14 = vsel (!%p341_p9), %vm8400_vm3, 0, %v405_v13  ;;  %vm928_vm7 = vcmask (!%p341_p9), 1042432  }
  0x22   : > { %s381_s29 = scalar_select %p380_p10, %s8370_s21, 1  ;;  %v431_v15 = vld [vmem:[#allocation3 + $0xc] sm:$0x1]  ;;  %407 = vst [vmem:[#allocation3 + $0x18] sm:$0x1] %v406_v14  ;;  %vm8456_vm6 = vmand %vm386_vm0, %vm426_vm4  ;;  %vm929_vm8 = vcmask 1046532  }
  0x23   : > { %v8064_v16 = vld [vmem:[%s10488_s1] sm:$0xff]   ;;  %v432_v20 = vsel %vm8411_vm5, 0, %v431_v15  ;;  %v437_v58 = vld [vmem:[#allocation3 + $0x1c] sm:$0x1]  ;;  %v434_v60 = vld [vmem:[#allocation3 + $0x14] sm:$0x1] }
  0x24   : > { %s7764_s30 = sshll.u32 %s381_s29, 6  ;;  %433 = vst [vmem:[#allocation3 + $0xc] sm:$0x1] %v432_v20  ;;  %1674 = vmatpush1.bf16.msra.mxu0 %v8064_v16  ;;  %v669_v34 = vld [vmem:[#allocation3 + $0x20] sm:$0xf]  ;;  %s10414_s13 = smov 96   ;;  %vm8539_vm9 = vmor %vm928_vm7, %vm929_vm8 }
  0x25   : > { %s8434_s14 = scalar_lea.vmem %s10487_s0, %s7764_s30  ;;  %1675 = vmatprep.subr.bf16.mxu0 %v8271_v10  ;;  %v675_v39 = vld [vmem:[#allocation3 + $0x28] sm:$0xf]  ;;  %v440_v59 = vld [vmem:[#allocation3 + $0x24] sm:$0x1]  ;;  %v8473_v3 = vld [vmem:[#allocation3] sm:$0xe] }
  0x26   : > { %v531_v17 = vld [vmem:[%s8434_s14 + $0x18] sm:$0xff]  ;;  %v532_v18 = vld [vmem:[%s8434_s14 + $0x20] sm:$0xff]  ;;  %v529_v23 = vld [vmem:[%s8434_s14 + $0x8] sm:$0xff]  ;;  %v7319_v20 = vrot.slane %v8473_v3, 9  ;;  %s10418_s15 = smov 48   ;;  %s10424_s16 = smov 32  }
  0x27   : > { %v528_v19 = vld [vmem:[%s8434_s14] sm:$0xff]  ;;  %v7768_v21 = vpack.c.bf16 %v531_v17, %v531_v17  ;;  %v7769_v22 = vpack.c.bf16 %v532_v18, %v532_v18  ;;  %v533_v25 = vld [vmem:[%s8434_s14 + $0x28] sm:$0xff]  ;;  %v530_v26 = vld [vmem:[%s8434_s14 + $0x10] sm:$0xff]  ;;  %v7766_v27 = vpack.c.bf16 %v529_v23, %v529_v23  ;;  %vm752_vm10 = vsmask.f32 3328  ;;  %s10420_s25 = smov 80  }
  0x28   : > { %v7765_v24 = vpack.c.bf16 %v528_v19, %v528_v19  ;;  %v7770_v28 = vpack.c.bf16 %v533_v25, %v533_v25  ;;  %v7767_v29 = vpack.c.bf16 %v530_v26, %v530_v26  ;;  %v651_v44 = vld [vmem:[#allocation3 + $0x8] sm:$0xf]  ;;  %v657_v51 = vld [vmem:[#allocation3 + $0x10] sm:$0xf]  ;;  %v428_v57 = vld [vmem:[#allocation3 + $0x4] sm:$0x1] }
  0x29   : > { %v593_v30 = vshrl.u32 %v7768_v21, 16  ;;  %v596_v31 = vshll.u32 %v7768_v21, 16  ;;  %v601_v32 = vshrl.u32 %v7769_v22, 16  ;;  %v604_v33 = vshll.u32 %v7769_v22, 16  ;;  %v681_v52 = vld [vmem:[#allocation3 + $0x30] sm:$0xf] }
  0x2a   : > { %v569_v35 = vshrl.u32 %v7765_v24, 16  ;;  %v572_v36 = vshll.u32 %v7765_v24, 16  ;;  %v577_v40 = vshrl.u32 %v7766_v27, 16  ;;  %v580_v41 = vshll.u32 %v7766_v27, 16  ;;  %v663_v9 = vld [vmem:[#allocation3 + $0x18] sm:$0xf] }
  0x2b   : > { %v8450_v37 = vrot.slane %v593_v30, 7  ;;  %v8452_v38 = vrot.slane %v601_v32, 7  ;;  %v609_v45 = vshrl.u32 %v7770_v28, 16  ;;  %v612_v46 = vshll.u32 %v7770_v28, 16  ;;  %v654_v2 = vld [vmem:[#allocation3 + $0xc] sm:$0x1] }
  0x2c   : > { %v571_v43 = vrot.slane %v569_v35, 7  ;;  %v585_v47 = vshrl.u32 %v7767_v29, 16  ;;  %v8463_v55 = vrot.slane %v577_v40, 7  ;;  %v588_v1 = vshll.u32 %v7767_v29, 16  ;;  %v443_v11 = vld [vmem:[#allocation3 + $0x2c] sm:$0x1] }
  0x2d   : > { %v598_v48 = vor.u32 %v596_v31, %v8450_v37  ;;  %v599_v49 = vrot.slane %v8450_v37, 4  ;;  %v606_v50 = vor.u32 %v604_v33, %v8452_v38  ;;  %v8465_v56 = vrot.slane %v609_v45, 7  ;;  %v396_v15 = vld [vmem:[#allocation3] sm:$0x1]  ;;  %v446_v16 = vld [vmem:[#allocation3 + $0x34] sm:$0x1] }
  0x2e   : > { %v574_v53 = vor.u32 %v572_v36, %v571_v43  ;;  %v575_v54 = vrot.slane %v571_v43, 4  ;;  %v8471_v63 = vrot.slane %v585_v47, 7  ;;  %v607_v4 = vrot.slane %v8452_v38, 4  ;;  %v417_v21 = vld [vmem:[#allocation3 + $0x38] sm:$0x1]  ;;  %v8065_v23 = vld [vmem:[%s10488_s1 + $0x8] sm:$0xff]  }
  0x2f   : > { %v670_v61 = vsel %vm8456_vm6, %v598_v48, %v669_v34  ;;  %v676_v62 = vsel %vm8456_vm6, %v606_v50, %v675_v39  ;;  %v582_v5 = vor.u32 %v580_v41, %v8463_v55  ;;  %v614_v8 = vor.u32 %v612_v46, %v8465_v56  ;;  %v449_v22 = vld [vmem:[#allocation3 + $0x3c] sm:$0x1]  ;;  %v420_v28 = vld [vmem:[#allocation3 + $0x40] sm:$0x1]  ;;  %v8066_v29 = vld [vmem:[%s10488_s1 + $0x10] sm:$0xff]   ;;  %1676 = vmatpush1.bf16.msra.mxu0 %v8065_v23  ;;  %s10422_s24 = smov 64  }
  0x30   : > { %671 = vst [vmem:[#allocation3 + $0x20] sm:$0xf] %v670_v61  ;;  %677 = vst [vmem:[#allocation3 + $0x28] sm:$0xf] %v676_v62  ;;  %v652_v7 = vsel %vm8456_vm6, %v574_v53, %v651_v44  ;;  %v590_v12 = vor.u32 %v588_v1, %v8471_v63  ;;  %v591_v13 = vrot.slane %v8471_v63, 4  ;;  %v429_v14 = vsel %vm8411_vm5, 0, %v428_v57  ;;  %1677 = vmatprep.subr.bf16.mxu0 %v8271_v10 }
  0x31   : > { %653 = vst [vmem:[#allocation3 + $0x8] sm:$0xf] %v652_v7  ;;  %v658_v17 = vsel %vm8456_vm6, %v582_v5, %v657_v51  ;;  %v682_v18 = vsel %vm8456_vm6, %v614_v8, %v681_v52  ;;  %430 = vst [vmem:[#allocation3 + $0x4] sm:$0x1] %v429_v14  ;;  %v655_v19 = vsel %vm8400_vm3, %v575_v54, %v654_v2  ;;  %v438_v25 = vsel %vm8411_vm5, 0, %v437_v58  ;;  %v534_v41 = vld [vmem:[%s8434_s14 + $0x30] sm:$0xff] }
  0x32   : > { %659 = vst [vmem:[#allocation3 + $0x10] sm:$0xf] %v658_v17  ;;  %683 = vst [vmem:[#allocation3 + $0x30] sm:$0xf] %v682_v18  ;;  %v664_v24 = vsel %vm8456_vm6, %v590_v12, %v663_v9  ;;  %v441_v26 = vsel %vm8411_vm5, 0, %v440_v59  ;;  %v435_v27 = vsel %vm8411_vm5, 0, %v434_v60  ;;  %v8532_v53 = vpack.c.bf16 %v534_v41, %v534_v41 }
  0x33   : > { %656 = vst [vmem:[#allocation3 + $0xc] sm:$0x1] %v655_v19  ;;  %665 = vst [vmem:[#allocation3 + $0x18] sm:$0xf] %v664_v24  ;;  %v444_v30 = vsel %vm8411_vm5, 0, %v443_v11  ;;  %v397_v31 = vsel %vm8400_vm3, 0, %v396_v15  ;;  %1678 = vmatpush1.bf16.msra.mxu0 %v8066_v29 }
  0x34   : > { %439 = vst [vmem:[#allocation3 + $0x1c] sm:$0x1] %v438_v25  ;;  %442 = vst [vmem:[#allocation3 + $0x24] sm:$0x1] %v441_v26  ;;  %v447_v32 = vsel %vm8411_vm5, 0, %v446_v16  ;;  %v418_v33 = vsel %vm8400_vm3, 0, %v417_v21  ;;  %1679 = vmatprep.subr.bf16.mxu0 %v8271_v10 }
  0x35   : > { %436 = vst [vmem:[#allocation3 + $0x14] sm:$0x1] %v435_v27  ;;  %v452_v34 = vld [vmem:[#allocation3 + $0x44] sm:$0x1]  ;;  %445 = vst [vmem:[#allocation3 + $0x2c] sm:$0x1] %v444_v30 }
  0x36   : > { %398 = vst [vmem:[#allocation3] sm:$0x1] %v397_v31  ;;  %448 = vst [vmem:[#allocation3 + $0x34] sm:$0x1] %v447_v32  ;;  %v450_v35 = vsel %vm8411_vm5, 0, %v449_v22  ;;  %v421_v36 = vsel %vm8400_vm3, 0, %v420_v28 }
  0x37   : > { %419 = vst [vmem:[#allocation3 + $0x38] sm:$0x1] %v418_v33  ;;  %v423_v39 = vld [vmem:[#allocation3 + $0x48] sm:$0x1]  ;;  %v455_v40 = vld [vmem:[#allocation3 + $0x4c] sm:$0x1] }
  0x38   : > { %451 = vst [vmem:[#allocation3 + $0x3c] sm:$0x1] %v450_v35  ;;  %422 = vst [vmem:[#allocation3 + $0x40] sm:$0x1] %v421_v36  ;;  %v453_v43 = vsel %vm8411_vm5, 0, %v452_v34  ;;  %v424_v44 = vsel %vm8400_vm3, 0, %v423_v39 }
  0x39   : > { %v456_v45 = vsel %vm8411_vm5, 0, %v455_v40  ;;  %v8067_v46 = vld [vmem:[%s10488_s1 + $0x18] sm:$0xff]   ;;  %v8056_v47 = vld [vmem:[#allocation3 + $0x20] ss:$8 sps:$4 sm:$0xff]   ;;  %454 = vst [vmem:[#allocation3 + $0x44] sm:$0x1] %v453_v43 }
  0x3a   : > { %425 = vst [vmem:[#allocation3 + $0x48] sm:$0x1] %v424_v44  ;;  %457 = vst [vmem:[#allocation3 + $0x4c] sm:$0x1] %v456_v45  ;;  %1318 = vrot.lane.b32.xlu0 %v8056_v47, %s10414_s13  ;;  %v897_v48 = vld [vmem:[#allocation3 + $0x4] sm:$0x1]  ;;  %1680 = vmatpush1.bf16.msra.mxu0 %v8067_v46 }
  0x3b   : > { %v898_v50 = vld [vmem:[#allocation3 + $0x8] sm:$0xe]  ;;  %v8529_v51 = vld [vmem:[#allocation3 + $0x20] sm:$0xe]  ;;  %v583_v54 = vrot.slane %v8463_v55, 4  ;;  %v615_v57 = vrot.slane %v8465_v56, 4  ;;  %1681 = vmatprep.subr.bf16.mxu0 %v8271_v10 }
  0x3c   : > { %v8057_v6 = vld [vmem:[#allocation3 + $0x8] ss:$8 sps:$4 sm:$0xff]   ;;  %v899_v60 = vld [vmem:[#allocation3 + $0xc] sm:$0x1]  ;;  %v933_v61 = vrot.slane %v897_v48, 5  ;;  %v7320_v62 = vrot.slane %v898_v50, 9 }
  0x3d   : > { %v8058_v52 = vld [vmem:[#allocation3 + $0x28] ss:$8 sps:$4 sm:$0xff]   ;;  %1020 = vrot.lane.b32.xlu1 %v8057_v6, %s10418_s15  ;;  %v666_v1 = vld [vmem:[#allocation3 + $0x1c] sm:$0x1]  ;;  %v8060_v55 = vld [vmem:[#allocation3 + $0x18] ss:$8 sps:$4 sm:$0xff]  }
  0x3e   : > { %v8059_v58 = vld [vmem:[#allocation3 + $0x10] ss:$8 sps:$4 sm:$0xff]   ;;  %1024 = vrot.lane.b32.xlu0 %v8058_v52, %s10418_s15  ;;  %v937_v2 = vrot.slane %v899_v60, 5  ;;  %v667_v5 = vsel %vm8400_vm3, %v591_v13, %v666_v1  ;;  %v672_v7 = vld [vmem:[#allocation3 + $0x24] sm:$0x1]  ;;  %v7342_v9 = vrot.slane %v8529_v51, 9  ;;  %v934_v11 = vsel %vm8539_vm9, %v7319_v20, %v933_v61 }
  0x3f   : > { %v8549_v8 = vld [vmem:[#allocation3 + $0x18] sm:$0xe]  ;;  %668 = vst [vmem:[#allocation3 + $0x1c] sm:$0x1] %v667_v5  ;;  %v673_v12 = vsel %vm8400_vm3, %v599_v49, %v672_v7  ;;  %v660_v14 = vld [vmem:[#allocation3 + $0x14] sm:$0x1] }
  0x40   : > { %v7341_v63 = vrot.slane %v8549_v8, 9  ;;  %v1194_v13 = vld [vmem:[#allocation3 + $0x8] sm:$0xe]  ;;  %v617_v15 = vshrl.u32 %v8532_v53, 16  ;;  %v938_v3 = vsel %vm8539_vm9, %v7320_v62, %v937_v2  ;;  %674 = vst [vmem:[#allocation3 + $0x24] sm:$0x1] %v673_v12  ;;  %v661_v16 = vsel %vm8400_vm3, %v583_v54, %v660_v14 }
  0x41   : > { %1316 = vrot.lane.b32.xlu1 %v8059_v58, %s10414_s13  ;;  %v1195_v17 = vld [vmem:[#allocation3 + $0xc] sm:$0x1]  ;;  %v1196_v37 = vld [vmem:[#allocation3 + $0x10] sm:$0xe]  ;;  %v7339_v18 = vrot.slane %v1194_v13, 9  ;;  %v620_v49 = vshll.u32 %v8532_v53, 16  ;;  %v7327_v19 = vcombine.low %v934_v11, %v938_v3 }
  0x42   : > { %662 = vst [vmem:[#allocation3 + $0x14] sm:$0x1] %v661_v16  ;;  %v1228_v20 = vrot.slane %v1195_v17, 5  ;;  %v7340_v21 = vrot.slane %v1196_v37, 9  ;;  %v678_v22 = vld [vmem:[#allocation3 + $0x2c] sm:$0x1] }
  0x43   : > { %v904_v23 = vld [vmem:[#allocation3 + $0x20] sm:$0xe]  ;;  %v679_v24 = vsel %vm8400_vm3, %v607_v4, %v678_v22  ;;  %v906_v25 = vld [vmem:[#allocation3 + $0x28] sm:$0xe]  ;;  %v900_v27 = vld [vmem:[#allocation3 + $0x10] sm:$0xe]  ;;  %975 = vrot.lane.b32.xlu0 %v7327_v19, %s10424_s16 }
  0x44   : > { %v7323_v26 = vrot.slane %v904_v23, 9  ;;  %vm753_vm11 = vsmask.f32 7440  ;;  %v8572_v28 = vrot.slane %v617_v15, 7  ;;  %680 = vst [vmem:[#allocation3 + $0x2c] sm:$0x1] %v679_v24  ;;  %v1229_v54 = vsel %vm8539_vm9, %v7339_v18, %v1228_v20 }
  0x45   : > { %v7324_v29 = vrot.slane %v906_v25, 9  ;;  %v902_v30 = vld [vmem:[#allocation3 + $0x18] sm:$0xe]  ;;  %v7321_v31 = vrot.slane %v900_v27, 9  ;;  %v1037_v32 = vld [vmem:[#allocation3 + $0x8] sm:$0xf]  ;;  %1022 = vrot.lane.b32.xlu1 %v8060_v55, %s10418_s15  ;;  %vm8603_vm12 = vmor %vm752_vm10, %vm753_vm11 }
  0x46   : > { %v7322_v38 = vrot.slane %v902_v30, 9  ;;  %v1038_v33 = vld [vmem:[#allocation3 + $0xc] sm:$0x1]  ;;  %v1039_v4 = vld [vmem:[#allocation3 + $0x10] sm:$0xf]  ;;  %v1054_v34 = vshrl.u32 %v1037_v32, 16  ;;  %v8579_v61 = vor.u32 %v620_v49, %v8572_v28 }
  0x47   : > { %v1057_v35 = vshll.u32 %v1037_v32, 16  ;;  %v1063_v36 = vshll.u32 %v1038_v33, 16  ;;  %v1068_v39 = vshrl.u32 %v1039_v4, 16  ;;  %v1071_v40 = vshll.u32 %v1039_v4, 16  ;;  %v736_v41 = vld [vmem:[#allocation3] sm:$0xf] }
  0x48   : > { %v1199_v43 = vld [vmem:[#allocation3 + $0x1c] sm:$0x1]  ;;  %v1056_v45 = vrot.slane %v1054_v34, 4  ;;  %v756_v46 = vshrl.u32 %v736_v41, 16  ;;  %v1201_v47 = vld [vmem:[#allocation3 + $0x24] sm:$0x1] }
  0x49   : > { %v903_v44 = vld [vmem:[#allocation3 + $0x1c] sm:$0x1]  ;;  %v1236_v48 = vrot.slane %v1199_v43, 5  ;;  %v905_v50 = vld [vmem:[#allocation3 + $0x24] sm:$0x1]  ;;  %v1240_v52 = vrot.slane %v1201_v47, 5 }
  0x4a   : > { %v945_v6 = vrot.slane %v903_v44, 5  ;;  %v1197_v53 = vld [vmem:[#allocation3 + $0x14] sm:$0x1]  ;;  %v949_v58 = vrot.slane %v905_v50, 5  ;;  %v1059_v12 = vrot.slane %v1057_v35, 5  ;;  %v1065_v14 = vrot.slane %v1063_v36, 5 }
  0x4b   : > { %v901_v60 = vld [vmem:[#allocation3 + $0x14] sm:$0x1]  ;;  %v1237_v62 = vsel %vm8539_vm9, %v7341_v63, %v1236_v48  ;;  %v1232_v1 = vrot.slane %v1197_v53, 5  ;;  %v1241_v5 = vsel %vm8539_vm9, %v7342_v9, %v1240_v52  ;;  %v907_v7 = vld [vmem:[#allocation3 + $0x2c] sm:$0x1]  ;;  %v8068_v51 = vld [vmem:[%s10488_s1 + $0x20] sm:$0xff]  }
  0x4c   : > { %v941_v55 = vrot.slane %v901_v60, 5  ;;  %v946_v2 = vsel %vm8539_vm9, %v7322_v38, %v945_v6  ;;  %v950_v8 = vsel %vm8539_vm9, %v7323_v26, %v949_v58  ;;  %v1040_v11 = vld [vmem:[#allocation3 + $0x14] sm:$0x1]  ;;  %v7348_v13 = vcombine.low %v1237_v62, %v1241_v5  ;;  %v737_v16 = vld [vmem:[#allocation3 + $0x4] sm:$0x1]  ;;  %1682 = vmatpush1.bf16.msra.mxu0 %v8068_v51  ;;  %v8069_v25 = vld [vmem:[%s10488_s1 + $0x28] sm:$0xff]  }
  0x4d   : > { %v1233_v63 = vsel %vm8539_vm9, %v7340_v21, %v1232_v1  ;;  %v953_v15 = vrot.slane %v907_v7, 5  ;;  %v1060_v37 = vor.u32 %v1059_v12, %v1056_v45  ;;  %v1070_v18 = vrot.slane %v1068_v39, 4  ;;  %v738_v49 = vld [vmem:[#allocation3 + $0x8] sm:$0xf]  ;;  %v739_v23 = vld [vmem:[#allocation3 + $0xc] sm:$0x1]  ;;  %1683 = vmatprep.subr.bf16.mxu0 %v8271_v10 }
  0x4e   : > { %v942_v3 = vsel %vm8539_vm9, %v7321_v31, %v941_v55  ;;  %v7347_v9 = vcombine.low %v1229_v54, %v1233_v63  ;;  %1272 = vrot.lane.b32.xlu1 %v7348_v13, %s10420_s25  ;;  %v1073_v21 = vrot.slane %v1071_v40, 5  ;;  %v1077_v22 = vshll.u32 %v1040_v11, 16  ;;  %v740_v31 = vld [vmem:[#allocation3 + $0x10] sm:$0xf]  ;;  %v741_v34 = vld [vmem:[#allocation3 + $0x14] sm:$0x1] }
  0x4f   : > { %v7328_v17 = vcombine.low %v942_v3, %v946_v2  ;;  %v954_v19 = vsel %vm8539_vm9, %v7324_v29, %v953_v15  ;;  %v758_v24 = vrot.slane %v756_v46, 4  ;;  %v1061_v27 = vrot.slane %v1060_v37, 4  ;;  %v742_v43 = vld [vmem:[#allocation3 + $0x18] sm:$0xf]  ;;  %v8071_v47 = vld [vmem:[%s10488_s1 + $0x30] sm:$0xff]   ;;  %s10430_s12 = smov 16  }
  0x50   : > { %1270 = vrot.lane.b32.xlu0 %v7347_v9, %s10420_s25  ;;  %v7329_v26 = vcombine.low %v950_v8, %v954_v19  ;;  %v759_v29 = vshll.u32 %v736_v41, 16  ;;  %v765_v30 = vshll.u32 %v737_v16, 16  ;;  %v1074_v32 = vor.u32 %v1073_v21, %v1070_v18  ;;  %1684 = vmatpush1.bf16.msra.mxu0 %v8069_v25  ;;  %v743_v6 = vld [vmem:[#allocation3 + $0x1c] sm:$0x1]  ;;  %v1333_v1 = vld [vmem:[#allocation3 + $0x10] sm:$0xf] }
  0x51   : > { %v1079_v38 = vrot.slane %v1077_v22, 5  ;;  %v770_v33 = vshrl.u32 %v738_v49, 16  ;;  %v773_v4 = vshll.u32 %v738_v49, 16  ;;  %v1066_v35 = vsel %vm8603_vm12, %v1061_v27, %v1065_v14  ;;  %1685 = vmatprep.subr.bf16.mxu0 %v8271_v10  ;;  %v1334_v8 = vld [vmem:[#allocation3 + $0x14] sm:$0x1]  ;;  %v8073_v21 = vld [vmem:[%s10488_s1 + $0x38] sm:$0xff]  }
  0x52   : > { %v761_v36 = vrot.slane %v759_v29, 5  ;;  %v767_v39 = vrot.slane %v765_v30, 5  ;;  %v779_v40 = vshll.u32 %v739_v23, 16  ;;  %979 = vrot.lane.b32.xlu1 %v7329_v26, %s10424_s16  ;;  %v1075_v44 = vrot.slane %v1074_v32, 4  ;;  %v1335_v3 = vld [vmem:[#allocation3 + $0x18] sm:$0xf] }
  0x53   : > { %v772_v41 = vrot.slane %v770_v33, 4  ;;  %v775_v45 = vrot.slane %v773_v4, 5  ;;  %v784_v46 = vshrl.u32 %v740_v31, 16  ;;  %v787_v52 = vshll.u32 %v740_v31, 16  ;;  %v1336_v16 = vld [vmem:[#allocation3 + $0x1c] sm:$0x1] }
  0x54   : > { %977 = vrot.lane.b32.xlu0 %v7328_v17, %s10424_s16  ;;  %v762_v48 = vor.u32 %v761_v36, %v758_v24  ;;  %v781_v50 = vrot.slane %v779_v40, 5  ;;  %v793_v53 = vshll.u32 %v741_v34, 16  ;;  %v1080_v54 = vsel %vm8603_vm12, %v1075_v44, %v1079_v38  ;;  %1686 = vmatpush1.bf16.msra.mxu0 %v8071_v47  ;;  %v1041_v19 = vld [vmem:[#allocation3 + $0x18] sm:$0xf]  ;;  %v1042_v31 = vld [vmem:[#allocation3 + $0x1c] sm:$0x1] }
  0x55   : > { %v776_v58 = vor.u32 %v775_v45, %v772_v41  ;;  %v786_v60 = vrot.slane %v784_v46, 4  ;;  %v798_v62 = vshrl.u32 %v742_v43, 16  ;;  %v7335_v55 = vcombine.low %v1066_v35, %v1080_v54  ;;  %1687 = vmatprep.subr.bf16.mxu0 %v8271_v10  ;;  %v1043_v4 = vld [vmem:[#allocation3 + $0x20] sm:$0xf]  ;;  %v1044_v41 = vld [vmem:[#allocation3 + $0x24] sm:$0x1] }
  0x56   : > { %v763_v2 = vrot.slane %v762_v48, 4  ;;  %v789_v5 = vrot.slane %v787_v52, 5  ;;  %v795_v7 = vrot.slane %v793_v53, 5  ;;  %v801_v14 = vshll.u32 %v742_v43, 16  ;;  %v1337_v52 = vld [vmem:[#allocation3 + $0x20] sm:$0xf] }
  0x57   : > { %v777_v11 = vrot.slane %v776_v58, 4  ;;  %v800_v12 = vrot.slane %v798_v62, 4  ;;  %v807_v13 = vshll.u32 %v743_v6, 16  ;;  %1177 = vrot.lane.b32.xlu1 %v7335_v55, %s10422_s24  ;;  %v1350_v51 = vshrl.u32 %v1333_v1, 16  ;;  %v1338_v53 = vld [vmem:[#allocation3 + $0x24] sm:$0x1] }
  0x58   : > { %v768_v63 = vsel %vm8603_vm12, %v763_v2, %v767_v39  ;;  %v790_v15 = vor.u32 %v789_v5, %v786_v60  ;;  %v1353_v9 = vshll.u32 %v1333_v1, 16  ;;  %v803_v37 = vrot.slane %v801_v14, 5  ;;  %1688 = vmatpush1.bf16.msra.mxu0 %v8073_v21  ;;  %v1339_v1 = vld [vmem:[#allocation3 + $0x28] sm:$0xf]  ;;  %s10416_s30 = smov 112   ;;  %s10499_s3 = sld [smem:[#allocation18_spill]] }
  0x59   : > { %v782_v17 = vsel %vm8603_vm12, %v777_v11, %v781_v50  ;;  %v809_v18 = vrot.slane %v807_v13, 5  ;;  %v1359_v49 = vshll.u32 %v1334_v8, 16  ;;  %v1352_v24 = vrot.slane %v1350_v51, 4  ;;  %1689 = vmatprep.subr.bf16.mxu0 %v8271_v10  ;;  %v1340_v8 = vld [vmem:[#allocation3 + $0x2c] sm:$0x1]  ;;  %s10500_s2 = sld [smem:[#allocation17_spill]] }
  0x5a   : > { %v7315_v22 = vcombine.low %v768_v63, %v782_v17  ;;  %v791_v23 = vrot.slane %v790_v15, 4  ;;  %v1355_v25 = vrot.slane %v1353_v9, 5  ;;  %v804_v26 = vor.u32 %v803_v37, %v800_v12  ;;  %v744_v63 = vld [vmem:[#allocation3 + $0x20] sm:$0xf]  ;;  %v746_v21 = vld [vmem:[#allocation3 + $0x28] sm:$0xf] }
  0x5b   : > { %v1361_v27 = vrot.slane %v1359_v49, 5  ;;  %v1364_v29 = vshrl.u32 %v1335_v3, 16  ;;  %v1367_v30 = vshll.u32 %v1335_v3, 16  ;;  %v1373_v33 = vshll.u32 %v1336_v16, 16  ;;  %v8074_v9 = vld [vmem:[%s10488_s1 + $0x40] sm:$0xff]   ;;  %s10434_s22 = smov 56  }
  0x5c   : > { %879 = vrot.lane.b32.xlu0 %v7315_v22, %s10430_s12  ;;  %v796_v32 = vsel %vm8603_vm12, %v791_v23, %v795_v7  ;;  %v1356_v38 = vor.u32 %v1355_v25, %v1352_v24  ;;  %v1082_v34 = vshrl.u32 %v1041_v19, 16  ;;  %v805_v35 = vrot.slane %v804_v26, 4  ;;  %v747_v26 = vld [vmem:[#allocation3 + $0x2c] sm:$0x1]  ;;  %1690 = vmatpush1.bf16.msra.mxu0 %v8074_v9  ;;  %v690_v9 = vld [vmem:[#allocation3 + $0x3c] sm:$0x1] }
  0x5d   : > { %v1366_v36 = vrot.slane %v1364_v29, 4  ;;  %v1369_v39 = vrot.slane %v1367_v30, 5  ;;  %v1085_v40 = vshll.u32 %v1041_v19, 16  ;;  %v1375_v44 = vrot.slane %v1373_v33, 5  ;;  %v745_v19 = vld [vmem:[#allocation3 + $0x24] sm:$0x1] }
  0x5e   : > { %v1357_v43 = vrot.slane %v1356_v38, 4  ;;  %v1084_v45 = vrot.slane %v1082_v34, 4  ;;  %v1091_v46 = vshll.u32 %v1042_v31, 16  ;;  %v810_v47 = vsel %vm8603_vm12, %v805_v35, %v809_v18  ;;  %v1045_v35 = vld [vmem:[#allocation3 + $0x28] sm:$0xf]  ;;  %s10504_s29 = smov 64  }
  0x5f   : > { %v1370_v48 = vor.u32 %v1369_v39, %v1366_v36  ;;  %v1087_v50 = vrot.slane %v1085_v40, 5  ;;  %v1096_v6 = vshrl.u32 %v1043_v4, 16  ;;  %v7316_v54 = vcombine.low %v796_v32, %v810_v47  ;;  %v684_v32 = vld [vmem:[#allocation3 + $0x34] sm:$0x1]  ;;  %v1490_v0 = vld [vmem:[#allocation3 + $0x10] sm:$0xe] }
  0x60   : > { %v1362_v58 = vsel %vm8603_vm12, %v1357_v43, %v1361_v27  ;;  %v1093_v60 = vrot.slane %v1091_v46, 5  ;;  %v1099_v62 = vshll.u32 %v1043_v4, 16  ;;  %v1105_v7 = vshll.u32 %v1044_v41, 16  ;;  %s10510_s0 = smov 56   ;;  %s10512_s4 = sld [smem:[#allocation19_spill]] }
  0x61   : > { %v1371_v55 = vrot.slane %v1370_v48, 4  ;;  %v1088_v2 = vor.u32 %v1087_v50, %v1084_v45  ;;  %v1098_v5 = vrot.slane %v1096_v6, 4  ;;  %881 = vrot.lane.b32.xlu1 %v7316_v54, %s10430_s12  ;;  %v1378_v12 = vshrl.u32 %v1337_v52, 16  ;;  %v1047_v48 = vld [vmem:[#allocation3 + $0x30] sm:$0xf]  ;;  %s10513_s5 = sld [smem:[#allocation20_spill]] }
  0x62   : > { %v1101_v11 = vrot.slane %v1099_v62, 5  ;;  %v1381_v14 = vshll.u32 %v1337_v52, 16  ;;  %v1387_v13 = vshll.u32 %v1338_v53, 16  ;;  %v1107_v16 = vrot.slane %v1105_v7, 5  ;;  %v1202_v54 = vld [vmem:[#allocation3 + $0x28] sm:$0xe] }
  0x63   : > { %v1376_v15 = vsel %vm8603_vm12, %v1371_v55, %v1375_v44  ;;  %v1089_v3 = vrot.slane %v1088_v2, 4  ;;  %v1392_v51 = vshrl.u32 %v1339_v1, 16  ;;  %v1380_v18 = vrot.slane %v1378_v12, 4  ;;  %v1046_v44 = vld [vmem:[#allocation3 + $0x2c] sm:$0x1]  ;;  %s10440_s1 = smov 8  }
  0x64   : > { %v7355_v17 = vcombine.low %v1362_v58, %v1376_v15  ;;  %v1102_v37 = vor.u32 %v1101_v11, %v1098_v5  ;;  %v1383_v49 = vrot.slane %v1381_v14, 5  ;;  %v1389_v23 = vrot.slane %v1387_v13, 5  ;;  %v1203_v55 = vld [vmem:[#allocation3 + $0x2c] sm:$0x1]  ;;  %v1204_v2 = vld [vmem:[#allocation3 + $0x30] sm:$0xe] }
  0x65   : > { %v1094_v22 = vsel %vm8603_vm12, %v1089_v3, %v1093_v60  ;;  %v1394_v24 = vrot.slane %v1392_v51, 4  ;;  %v1395_v25 = vshll.u32 %v1339_v1, 16  ;;  %v1401_v30 = vshll.u32 %v1340_v8, 16  ;;  %v687_v12 = vld [vmem:[#allocation3 + $0x38] sm:$0xf]  ;;  %s10519_s26 = smov 88  }
  0x66   : > { %1473 = vrot.lane.b32.xlu0 %v7355_v17, %s10416_s30  ;;  %v1103_v27 = vrot.slane %v1102_v37, 4  ;;  %v1384_v29 = vor.u32 %v1383_v49, %v1380_v18  ;;  %v812_v31 = vshrl.u32 %v744_v63, 16  ;;  %v815_v33 = vshll.u32 %v744_v63, 16  ;;  %v1341_v14 = vld [vmem:[#allocation3 + $0x30] sm:$0xf]  ;;  %s10575_s17 = sld [smem:[#allocation21_spill]] }
  0x67   : > { %v1397_v38 = vrot.slane %v1395_v25, 5  ;;  %v821_v4 = vshll.u32 %v745_v19, 16  ;;  %v826_v34 = vshrl.u32 %v746_v21, 16  ;;  %v1403_v40 = vrot.slane %v1401_v30, 5 }
  0x68   : > { %v1108_v36 = vsel %vm8603_vm12, %v1103_v27, %v1107_v16  ;;  %v1385_v39 = vrot.slane %v1384_v29, 4  ;;  %v814_v43 = vrot.slane %v812_v31, 4  ;;  %v817_v46 = vrot.slane %v815_v33, 5 }
  0x69   : > { %v7336_v41 = vcombine.low %v1094_v22, %v1108_v36  ;;  %v1398_v45 = vor.u32 %v1397_v38, %v1394_v24  ;;  %v823_v47 = vrot.slane %v821_v4, 5  ;;  %v828_v6 = vrot.slane %v826_v34, 4  ;;  %v748_v24 = vld [vmem:[#allocation3 + $0x30] sm:$0xf] }
  0x6a   : > { %v1390_v50 = vsel %vm8603_vm12, %v1385_v39, %v1389_v23  ;;  %v829_v52 = vshll.u32 %v746_v21, 16  ;;  %v835_v53 = vshll.u32 %v747_v26, 16  ;;  %v818_v60 = vor.u32 %v817_v46, %v814_v43 }
  0x6b   : > { %1179 = vrot.lane.b32.xlu0 %v7336_v41, %s10422_s24  ;;  %v1399_v58 = vrot.slane %v1398_v45, 4  ;;  %v685_v62 = vsel %vm8400_vm3, %v615_v57, %v684_v32  ;;  %v1110_v1 = vshrl.u32 %v1045_v35, 16  ;;  %v1113_v8 = vshll.u32 %v1045_v35, 16 }
  0x6c   : > { %v831_v5 = vrot.slane %v829_v52, 5  ;;  %v837_v7 = vrot.slane %v835_v53, 5  ;;  %686 = vst [vmem:[#allocation3 + $0x34] sm:$0x1] %v685_v62  ;;  %v1119_v11 = vshll.u32 %v1046_v44, 16  ;;  %v819_v63 = vrot.slane %v818_v60, 4 }
  0x6d   : > { %v1404_v13 = vsel %vm8603_vm12, %v1399_v58, %v1403_v40  ;;  %v1112_v15 = vrot.slane %v1110_v1, 4  ;;  %v1124_v3 = vshrl.u32 %v1047_v48, 16  ;;  %v1115_v51 = vrot.slane %v1113_v8, 5 }
  0x6e   : > { %v7356_v56 = vcombine.low %v1390_v50, %v1404_v13  ;;  %v832_v16 = vor.u32 %v831_v5, %v828_v6  ;;  %v1121_v57 = vrot.slane %v1119_v11, 5  ;;  %v824_v17 = vsel %vm8603_vm12, %v819_v63, %v823_v47 }
  0x6f   : > { %v1126_v37 = vrot.slane %v1124_v3, 4  ;;  %v1127_v18 = vshll.u32 %v1047_v48, 16  ;;  %v7343_v49 = vrot.slane %v1202_v54, 9  ;;  %v1116_v21 = vor.u32 %v1115_v51, %v1112_v15  ;;  %v8675_v48 = vld [vmem:[#allocation3 + $0x30] sm:$0xe] }
  0x70   : > { %1475 = vrot.lane.b32.xlu1 %v7356_v56, %s10416_s30  ;;  %v833_v19 = vrot.slane %v832_v16, 4  ;;  %v1244_v22 = vrot.slane %v1203_v55, 5  ;;  %v7344_v23 = vrot.slane %v1204_v2, 9  ;;  %v623_v26 = vrot.slane %v8572_v28, 4  ;;  %v535_v2 = vld [vmem:[%s8434_s14 + $0x38] sm:$0xff] }
  0x71   : > { %v1129_v25 = vrot.slane %v1127_v18, 5  ;;  %v688_v27 = vsel %vm8456_vm6, %v8579_v61, %v687_v12  ;;  %v1406_v29 = vshrl.u32 %v1341_v14, 16  ;;  %v1117_v31 = vrot.slane %v1116_v21, 4 }
  0x72   : > { %v838_v30 = vsel %vm8603_vm12, %v833_v19, %v837_v7  ;;  %689 = vst [vmem:[#allocation3 + $0x38] sm:$0xf] %v688_v27  ;;  %v1409_v32 = vshll.u32 %v1341_v14, 16  ;;  %v1245_v35 = vsel %vm8539_vm9, %v7343_v49, %v1244_v22  ;;  %v691_v28 = vsel %vm8400_vm3, %v623_v26, %v690_v9 }
  0x73   : > { %v7317_v38 = vcombine.low %v824_v17, %v838_v30  ;;  %v1048_v33 = vld [vmem:[#allocation3 + $0x34] sm:$0x1]  ;;  %v1130_v4 = vor.u32 %v1129_v25, %v1126_v37  ;;  %v1122_v61 = vsel %vm8603_vm12, %v1117_v31, %v1121_v57  ;;  %692 = vst [vmem:[#allocation3 + $0x3c] sm:$0x1] %v691_v28  ;;  %v1408_v43 = vrot.slane %v1406_v29, 4 }
  0x74   : > { %v1205_v34 = vld [vmem:[#allocation3 + $0x34] sm:$0x1]  ;;  %v1133_v39 = vshll.u32 %v1048_v33, 16  ;;  %v1411_v45 = vrot.slane %v1409_v32, 5  ;;  %v840_v47 = vshrl.u32 %v748_v24, 16  ;;  %v843_v52 = vshll.u32 %v748_v24, 16 }
  0x75   : > { %v1342_v36 = vld [vmem:[#allocation3 + $0x34] sm:$0x1]  ;;  %v1248_v40 = vrot.slane %v1205_v34, 5  ;;  %883 = vrot.lane.b32.xlu0 %v7317_v38, %s10430_s12  ;;  %v1131_v41 = vrot.slane %v1130_v4, 4  ;;  %v7325_v12 = vrot.slane %v8675_v48, 9  ;;  %v7772_v9 = vpack.c.bf16 %v535_v2, %v535_v2 }
  0x76   : > { %v749_v44 = vld [vmem:[#allocation3 + $0x34] sm:$0x1]  ;;  %v1415_v46 = vshll.u32 %v1342_v36, 16  ;;  %v1135_v50 = vrot.slane %v1133_v39, 5  ;;  %v842_v58 = vrot.slane %v840_v47, 4  ;;  %v1412_v62 = vor.u32 %v1411_v45, %v1408_v43 }
  0x77   : > { %v1249_v6 = vsel %vm8539_vm9, %v7344_v23, %v1248_v40  ;;  %v849_v53 = vshll.u32 %v749_v44, 16  ;;  %v845_v55 = vrot.slane %v843_v52, 5  ;;  %v909_v11 = vld [vmem:[#allocation3 + $0x34] sm:$0x1]  ;;  %v628_v28 = vshll.u32 %v7772_v9, 16 }
  0x78   : > { %v7349_v54 = vcombine.low %v1245_v35, %v1249_v6  ;;  %v1136_v60 = vsel %vm8603_vm12, %v1131_v41, %v1135_v50  ;;  %v1417_v1 = vrot.slane %v1415_v46, 5  ;;  %v1413_v17 = vrot.slane %v1412_v62, 4  ;;  %v1347_v36 = vld [vmem:[#allocation3 + $0x48] sm:$0xf]  ;;  %v693_v40 = vld [vmem:[#allocation3 + $0x40] sm:$0xf] }
  0x79   : > { %v7337_v5 = vcombine.low %v1122_v61, %v1136_v60  ;;  %v1343_v7 = vld [vmem:[#allocation3 + $0x38] sm:$0xf]  ;;  %v851_v8 = vrot.slane %v849_v53, 5  ;;  %v846_v3 = vor.u32 %v845_v55, %v842_v58  ;;  %v957_v29 = vrot.slane %v909_v11, 5  ;;  %v696_v43 = vld [vmem:[#allocation3 + $0x44] sm:$0x1] }
  0x7a   : > { %1274 = vrot.lane.b32.xlu0 %v7349_v54, %s10420_s25  ;;  %v8061_v14 = vld [vmem:[#allocation3 + $0x30] ss:$8 sps:$4 sm:$0xff]   ;;  %v1420_v13 = vshrl.u32 %v1343_v7, 16  ;;  %v1423_v63 = vshll.u32 %v1343_v7, 16  ;;  %v1344_v56 = vld [vmem:[#allocation3 + $0x3c] sm:$0x1]  ;;  %v1418_v4 = vsel %vm8603_vm12, %v1413_v17, %v1417_v1 }
  0x7b   : > { %v750_v15 = vld [vmem:[#allocation3 + $0x38] sm:$0xf]  ;;  %1181 = vrot.lane.b32.xlu1 %v7337_v5, %s10422_s24  ;;  %v751_v16 = vld [vmem:[#allocation3 + $0x3c] sm:$0x1]  ;;  %v1429_v49 = vshll.u32 %v1344_v56, 16  ;;  %v847_v21 = vrot.slane %v846_v3, 4  ;;  %v958_v47 = vsel %vm8539_vm9, %v7325_v12, %v957_v29 }
  0x7c   : > { %v854_v51 = vshrl.u32 %v750_v15, 16  ;;  %v857_v57 = vshll.u32 %v750_v15, 16  ;;  %v1422_v37 = vrot.slane %v1420_v13, 4  ;;  %v1425_v18 = vrot.slane %v1423_v63, 5  ;;  %v910_v19 = vld [vmem:[#allocation3 + $0x38] sm:$0xe] }
  0x7d   : > { %v863_v24 = vshll.u32 %v751_v16, 16  ;;  %v911_v25 = vld [vmem:[#allocation3 + $0x3c] sm:$0x1]  ;;  %v1431_v27 = vrot.slane %v1429_v49, 5  ;;  %v7326_v30 = vrot.slane %v910_v19, 9  ;;  %v625_v35 = vshrl.u32 %v7772_v9, 16 }
  0x7e   : > { %v856_v22 = vrot.slane %v854_v51, 4  ;;  %v859_v23 = vrot.slane %v857_v57, 5  ;;  %v1426_v26 = vor.u32 %v1425_v18, %v1422_v37  ;;  %v961_v38 = vrot.slane %v911_v25, 5  ;;  %v1049_v33 = vld [vmem:[#allocation3 + $0x38] sm:$0xf] }
  0x7f   : > { %1320 = vrot.lane.b32.xlu1 %v8061_v14, %s10414_s13  ;;  %v865_v32 = vrot.slane %v863_v24, 5  ;;  %v852_v61 = vsel %vm8603_vm12, %v847_v21, %v851_v8  ;;  %v1050_v44 = vld [vmem:[#allocation3 + $0x3c] sm:$0x1]  ;;  %v1138_v41 = vshrl.u32 %v1049_v33, 16  ;;  %v1141_v45 = vshll.u32 %v1049_v33, 16 }
  0x80   : > { %v860_v31 = vor.u32 %v859_v23, %v856_v22  ;;  %v1427_v34 = vrot.slane %v1426_v26, 4  ;;  %v962_v48 = vsel %vm8539_vm9, %v7326_v30, %v961_v38  ;;  %v627_v50 = vrot.slane %v625_v35, 7  ;;  %v1348_v6 = vld [vmem:[#allocation3 + $0x4c] sm:$0x1]  ;;  %v8070_v52 = vld [vmem:[#allocation3] ss:$8 sps:$4 sm:$0xff]  }
  0x81   : > { %v1140_v58 = vrot.slane %v1138_v41, 4  ;;  %v1143_v60 = vrot.slane %v1141_v45, 5  ;;  %v8072_v62 = vld [vmem:[#allocation3 + $0x10] ss:$8 sps:$4 sm:$0xff]   ;;  %v7330_v7 = vcombine.low %v958_v47, %v962_v48  ;;  %v1147_v8 = vshll.u32 %v1050_v44, 16 }
  0x82   : > { %v861_v39 = vrot.slane %v860_v31, 4  ;;  %v1432_v46 = vsel %vm8603_vm12, %v1427_v34, %v1431_v27  ;;  %v630_v55 = vor.u32 %v628_v28, %v627_v50  ;;  %v631_v2 = vrot.slane %v627_v50, 4  ;;  %v1206_v5 = vld [vmem:[#allocation3 + $0x38] sm:$0xe]  ;;  %v1207_v11 = vld [vmem:[#allocation3 + $0x3c] sm:$0x1] }
  0x83   : > { %v7357_v53 = vcombine.low %v1418_v4, %v1432_v46  ;;  %v1448_v12 = vshrl.u32 %v1347_v36, 16  ;;  %v1144_v63 = vor.u32 %v1143_v60, %v1140_v58  ;;  %v1451_v15 = vshll.u32 %v1347_v36, 16  ;;  %v8075_v51 = vld [vmem:[#allocation3 + $0x20] ss:$8 sps:$4 sm:$0xff]   ;;  %v1491_v18 = vld [vmem:[#allocation3 + $0x14] sm:$0x1] }
  0x84   : > { %v866_v54 = vsel %vm8603_vm12, %v861_v39, %v865_v32  ;;  %v694_v14 = vsel %vm8456_vm6, %v630_v55, %v693_v40  ;;  %v697_v13 = vsel %vm8400_vm3, %v631_v2, %v696_v43  ;;  %v1457_v56 = vshll.u32 %v1348_v6, 16  ;;  %v1492_v49 = vld [vmem:[#allocation3 + $0x18] sm:$0xe]  ;;  %v1493_v21 = vld [vmem:[#allocation3 + $0x1c] sm:$0x1] }
  0x85   : > { %v7318_v1 = vcombine.low %v852_v61, %v866_v54  ;;  %1477 = vrot.lane.b32.xlu0 %v7357_v53, %s10416_s30  ;;  %695 = vst [vmem:[#allocation3 + $0x40] sm:$0xf] %v694_v14  ;;  %698 = vst [vmem:[#allocation3 + $0x44] sm:$0x1] %v697_v13  ;;  %v1450_v3 = vrot.slane %v1448_v12, 4  ;;  %vm10436_vm13 = vcmask 130048  }
  0x86   : > { %v1453_v16 = vrot.slane %v1451_v15, 5  ;;  %732 = vst.msk [vmem:[#allocation2] sm:$0xff] %vm10436_vm13, %v8070_v52  ;;  %733 = vst.msk [vmem:[#allocation2 + $0x20] sm:$0xff] %vm10436_vm13, %v8072_v62  ;;  %v8707_v42 = vrot.slane %v1147_v8, 5  ;;  %v7345_v57 = vrot.slane %v1206_v5, 9  ;;  %v8709_v9 = vrot.slane %v1144_v63, 4 }
  0x87   : > { %885 = vrot.lane.b32.xlu1 %v7318_v1, %s10430_s12  ;;  %v1252_v17 = vrot.slane %v1207_v11, 5  ;;  %734 = vst.msk [vmem:[#allocation2 + $0x40] sm:$0xff] %vm10436_vm13, %v8075_v51  ;;  %v8712_v19 = vrot.slane %v1457_v56, 5  ;;  %v7359_v22 = vrot.slane %v1490_v0, 9  ;;  %v1524_v23 = vrot.slane %v1491_v18, 5 }
  0x88   : > { %v1454_v37 = vor.u32 %v1453_v16, %v1450_v3  ;;  %v7360_v24 = vrot.slane %v1492_v49, 9  ;;  %v1528_v26 = vrot.slane %v1493_v21, 5  ;;  %v8076_v29 = vld [vmem:[#allocation3 + $0x30] ss:$8 sps:$4 sm:$0xff]   ;;  %v1494_v30 = vld [vmem:[#allocation3 + $0x20] sm:$0xe]  ;;  %v1150_v47 = vsel %vm8603_vm12, %v8709_v9, %v8707_v42 }
  0x89   : > { %981 = vrot.lane.b32.xlu0 %v7330_v7, %s10424_s16  ;;  %v1525_v27 = vsel %vm8539_vm9, %v7359_v22, %v1524_v23  ;;  %v1495_v31 = vld [vmem:[#allocation3 + $0x24] sm:$0x1]  ;;  %735 = vst.msk [vmem:[#allocation2 + $0x60] sm:$0xff] %vm10436_vm13, %v8076_v29  ;;  %v1253_v40 = vsel %vm8539_vm9, %v7345_v57, %v1252_v17  ;;  %v7361_v46 = vrot.slane %v1494_v30, 9  ;;  %v1496_v1 = vld [vmem:[#allocation3 + $0x28] sm:$0xe] }
  0x8a   : > { %v8714_v25 = vrot.slane %v1454_v37, 4  ;;  %v1529_v33 = vsel %vm8539_vm9, %v7360_v24, %v1528_v26  ;;  %v1532_v53 = vrot.slane %v1495_v31, 5  ;;  %v1497_v55 = vld [vmem:[#allocation3 + $0x2c] sm:$0x1]  ;;  %v7362_v8 = vrot.slane %v1496_v1, 9  ;;  %s10505_s16 = smov 80  }
  0x8b   : > { %v7367_v36 = vcombine.low %v1525_v27, %v1529_v33  ;;  %v1498_v11 = vld [vmem:[#allocation3 + $0x30] sm:$0xe]  ;;  %v1499_v12 = vld [vmem:[#allocation3 + $0x34] sm:$0x1]  ;;  %v1536_v15 = vrot.slane %v1497_v55, 5  ;;  %vm458_vm14 = vcmask 60416  }
  0x8c   : > { %v8062_v32 = vld [vmem:[#allocation3 + $0x38] ss:$8 sps:$4 sm:$0xff]   ;;  %v1052_v4 = vld [vmem:[#allocation3 + $0x44] sm:$0x1]  ;;  %v1460_v52 = vsel %vm8603_vm12, %v8714_v25, %v8712_v19  ;;  %v1533_v7 = vsel %vm8539_vm9, %v7361_v46, %v1532_v53  ;;  %v1501_v16 = vld [vmem:[#allocation3 + $0x3c] sm:$0x1] }
  0x8d   : > { %v1051_v38 = vld [vmem:[#allocation3 + $0x40] sm:$0xf]  ;;  %1026 = vrot.lane.b32.xlu1 %v8062_v32, %s10418_s15  ;;  %v1161_v61 = vshll.u32 %v1052_v4, 16  ;;  %v1209_v39 = vld [vmem:[#allocation3 + $0x44] sm:$0x1]  ;;  %1570 = vst.msk [vmem:[#allocation2 + $0x8] sm:$0xff] %vm10436_vm13, %v7367_v36  ;;  %v1537_v17 = vsel %vm8539_vm9, %v7362_v8, %v1536_v15 }
  0x8e   : > { %v1152_v34 = vshrl.u32 %v1051_v38, 16  ;;  %v1155_v35 = vshll.u32 %v1051_v38, 16  ;;  %v1208_v28 = vld [vmem:[#allocation3 + $0x40] sm:$0xe]  ;;  %v1256_v45 = vrot.slane %v1209_v39, 5  ;;  %v7363_v51 = vrot.slane %v1498_v11, 9 }
  0x8f   : > { %v7346_v43 = vrot.slane %v1208_v28, 9  ;;  %v1163_v48 = vrot.slane %v1161_v61, 5  ;;  %v1345_v50 = vld [vmem:[#allocation3 + $0x40] sm:$0xf]  ;;  %v1346_v6 = vld [vmem:[#allocation3 + $0x44] sm:$0x1]  ;;  %v7368_v23 = vcombine.low %v1533_v7, %v1537_v17 }
  0x90   : > { %v1154_v44 = vrot.slane %v1152_v34, 4  ;;  %v1157_v41 = vrot.slane %v1155_v35, 5  ;;  %v1434_v60 = vshrl.u32 %v1345_v50, 16  ;;  %v1437_v62 = vshll.u32 %v1345_v50, 16  ;;  %v1500_v3 = vld [vmem:[#allocation3 + $0x38] sm:$0xe] }
  0x91   : > { %v1257_v58 = vsel %vm8539_vm9, %v7346_v43, %v1256_v45  ;;  %v1443_v5 = vshll.u32 %v1346_v6, 16  ;;  %v1540_v42 = vrot.slane %v1499_v12, 5  ;;  %v7364_v57 = vrot.slane %v1500_v3, 9  ;;  %v1502_v18 = vld [vmem:[#allocation3 + $0x40] sm:$0xe]  ;;  %1571 = vst.msk [vmem:[#allocation2 + $0x28] sm:$0xff] %vm10436_vm13, %v7368_v23 }
  0x92   : > { %v1158_v54 = vor.u32 %v1157_v41, %v1154_v44  ;;  %v7350_v2 = vcombine.low %v1253_v40, %v1257_v58  ;;  %v1436_v13 = vrot.slane %v1434_v60, 4  ;;  %v1439_v63 = vrot.slane %v1437_v62, 5  ;;  %v1503_v49 = vld [vmem:[#allocation3 + $0x44] sm:$0x1]  ;;  %v8063_v21 = vld [vmem:[#allocation3 + $0x40] ss:$8 sps:$4 sm:$0xff]  }
  0x93   : > { %v1445_v56 = vrot.slane %v1443_v5, 5  ;;  %v1544_v37 = vrot.slane %v1501_v16, 5  ;;  %v1541_v24 = vsel %vm8539_vm9, %v7363_v51, %v1540_v42  ;;  %v1504_v25 = vld [vmem:[#allocation3 + $0x48] sm:$0xe]  ;;  %v1505_v26 = vld [vmem:[#allocation3 + $0x4c] sm:$0x1] }
  0x94   : > { %v1159_v14 = vrot.slane %v1158_v54, 4  ;;  %1276 = vrot.lane.b32.xlu1 %v7350_v2, %s10420_s25  ;;  %v1440_v9 = vor.u32 %v1439_v63, %v1436_v13  ;;  %v1575_v22 = vld [vmem:[#allocation2 + $0x8] sm:$0xff]  ;;  %v7365_v27 = vrot.slane %v1502_v18, 9  ;;  %v1548_v31 = vrot.slane %v1503_v49, 5  ;;  %v470_v4 = vld [vmem:[#allocation4 + $0x8] sm:$0x1] }
  0x95   : > { %7381 = vmatprep.mubr.msk.bf16.mxu0 %vm10436_vm13, %v1575_v22  ;;  %v1545_v30 = vsel %vm8539_vm9, %v7364_v57, %v1544_v37  ;;  %v7366_v32 = vrot.slane %v1504_v25, 9  ;;  %v1552_v33 = vrot.slane %v1505_v26, 5  ;;  %vm460_vm15 = vcmask 57344   ;;  %v501_v36 = vld [vmem:[#allocation4 + $0xc] sm:$0x1]  ;;  %v8091_v43 = vld [vmem:[%s10499_s3 + $0x10] sm:$0xff]  }
  0x96   : > { %v1164_v0 = vsel %vm8603_vm12, %v1159_v14, %v1163_v48  ;;  %v1441_v29 = vrot.slane %v1440_v9, 4  ;;  %v7369_v38 = vcombine.low %v1541_v24, %v1545_v30  ;;  %v1549_v35 = vsel %vm8539_vm9, %v7365_v27, %v1548_v31  ;;  %vm8754_vm0 = vmand %vm460_vm15, %vm394_vm2  ;;  %459 = vst.msk [vmem:[#allocation4] sm:$0xf] %vm458_vm14, %v8271_v10  ;;  %v473_v49 = vld [vmem:[#allocation4 + $0x10] sm:$0x1]  ;;  %s10503_s25 = smov 32  }
  0x97   : > { %v7338_v19 = vcombine.low %v1150_v47, %v1164_v0  ;;  %461 = vst.msk [vmem:[#allocation4 + $0x4] sm:$0x1] %vm460_vm15, %v8271_v10  ;;  %464 = vst.msk [vmem:[#allocation4 + $0x4c] sm:$0x1] %vm460_vm15, %v8271_v10  ;;  %v1553_v39 = vsel %vm8539_vm9, %v7366_v32, %v1552_v33  ;;  %v471_v40 = vsel %vm8754_vm0, 0, %v470_v4  ;;  %vm891_vm2 = vcmask 261248  }
  0x98   : > { %v1446_v34 = vsel %vm8603_vm12, %v1441_v29, %v1445_v56  ;;  %463 = vst.msk [vmem:[#allocation4 + $0x48] sm:$0xf] %vm458_vm14, %v8271_v10  ;;  %vm8770_vm1 = vmand %vm460_vm15, %vm426_vm4  ;;  %v7370_v44 = vcombine.low %v1549_v35, %v1553_v39  ;;  %vm987_vm3 = vcmask 392448   ;;  %vm1032_vm5 = vcmask 523648   ;;  %v1577_v5 = vld [vmem:[#allocation2 + $0x28] sm:$0xff]  ;;  %s10428_s15 = smov 24  }
  0x99   : > { %1183 = vrot.lane.b32.xlu0 %v7338_v19, %s10422_s24  ;;  %v7358_v61 = vcombine.low %v1446_v34, %v1460_v52  ;;  %1572 = vst.msk [vmem:[#allocation2 + $0x48] sm:$0xff] %vm10436_vm13, %v7369_v38  ;;  %472 = vst [vmem:[#allocation4 + $0x8] sm:$0x1] %v471_v40  ;;  %v502_v41 = vsel %vm8770_vm1, 0, %v501_v36  ;;  %vm1189_vm6 = vcmask 654848   ;;  %vm1282_vm7 = vcmask 786048  }
  0x9a   : > { %503 = vst [vmem:[#allocation4 + $0xc] sm:$0x1] %v502_v41  ;;  %1573 = vst.msk [vmem:[#allocation2 + $0x68] sm:$0xff] %vm10436_vm13, %v7370_v44  ;;  %vm1328_vm8 = vcmask 917248   ;;  %vm1485_vm10 = vcmask 1048448   ;;  %s10432_s24 = smov 72  }
  0x9b   : > { %1479 = vrot.lane.b32.xlu1 %v7358_v61, %s10416_s30  ;;  %v504_v19 = vld [vmem:[#allocation4 + $0x14] sm:$0x1]  ;;  %v476_v23 = vld [vmem:[#allocation4 + $0x18] sm:$0x1]  ;;  %v507_v24 = vld [vmem:[#allocation4 + $0x1c] sm:$0x1] }
  0x9c   : > { %v505_v22 = vsel %vm8770_vm1, 0, %v504_v19  ;;  %v477_v25 = vsel %vm8754_vm0, 0, %v476_v23  ;;  %v508_v26 = vsel %vm8770_vm1, 0, %v507_v24  ;;  %v479_v27 = vld [vmem:[#allocation4 + $0x20] sm:$0x1]  ;;  %s10509_s30 = smov 40  }
  0x9d   : > { %1322 = vrot.lane.b32.xlu0 %v8063_v21, %s10414_s13  ;;  %v474_v21 = vsel %vm8754_vm0, 0, %v473_v49  ;;  %506 = vst [vmem:[#allocation4 + $0x14] sm:$0x1] %v505_v22  ;;  %478 = vst [vmem:[#allocation4 + $0x18] sm:$0x1] %v477_v25  ;;  %v480_v30 = vsel %vm8754_vm0, 0, %v479_v27 }
  0x9e   : > { %475 = vst [vmem:[#allocation4 + $0x10] sm:$0x1] %v474_v21  ;;  %509 = vst [vmem:[#allocation4 + $0x1c] sm:$0x1] %v508_v26  ;;  %v510_v29 = vld [vmem:[#allocation4 + $0x24] sm:$0x1] }
  0x9f   : > { %v511_v31 = vsel %vm8770_vm1, 0, %v510_v29  ;;  %481 = vst [vmem:[#allocation4 + $0x20] sm:$0x1] %v480_v30  ;;  %v482_v32 = vld [vmem:[#allocation4 + $0x28] sm:$0x1]  ;;  %v8093_v27 = vld [vmem:[%s10499_s3 + $0x20] sm:$0xff]  }
  0xa0   : > { %v1579_v12 = vld [vmem:[#allocation2 + $0x48] sm:$0xff]  ;;  %512 = vst [vmem:[#allocation4 + $0x24] sm:$0x1] %v511_v31  ;;  %v513_v38 = vld [vmem:[#allocation4 + $0x2c] sm:$0x1]  ;;  %v483_v33 = vsel %vm8754_vm0, 0, %v482_v32 }
  0xa1   : > { %v1581_v51 = vld [vmem:[#allocation2 + $0x68] sm:$0xff]  ;;  %v514_v4 = vsel %vm8770_vm1, 0, %v513_v38  ;;  %484 = vst [vmem:[#allocation4 + $0x28] sm:$0x1] %v483_v33  ;;  %v467_v34 = vld [vmem:[#allocation4] sm:$0x1] }
  0xa2   : > { %515 = vst [vmem:[#allocation4 + $0x2c] sm:$0x1] %v514_v4  ;;  %v498_v35 = vld [vmem:[#allocation4 + $0x4] sm:$0x1]  ;;  %v468_v36 = vsel %vm8754_vm0, 0, %v467_v34  ;;  %s10426_s13 = smov 40  }
  0xa3   : > { %v499_v61 = vsel %vm8770_vm1, 0, %v498_v35  ;;  %469 = vst [vmem:[#allocation4] sm:$0x1] %v468_v36  ;;  %v485_v39 = vld [vmem:[#allocation4 + $0x30] sm:$0x1] }
  0xa4   : > { %500 = vst [vmem:[#allocation4 + $0x4] sm:$0x1] %v499_v61  ;;  %v516_v40 = vld [vmem:[#allocation4 + $0x34] sm:$0x1]  ;;  %v486_v44 = vsel %vm8754_vm0, 0, %v485_v39 }
  0xa5   : > { %v517_v41 = vsel %vm8770_vm1, 0, %v516_v40  ;;  %487 = vst [vmem:[#allocation4 + $0x30] sm:$0x1] %v486_v44  ;;  %v1872_v49 = vld [vmem:[#allocation4 + $0xc] sm:$0x1] }
  0xa6   : > { %518 = vst [vmem:[#allocation4 + $0x34] sm:$0x1] %v517_v41  ;;  %v1875_v23 = vld [vmem:[#allocation4 + $0x10] sm:$0xf]  ;;  %v1878_v38 = vld [vmem:[#allocation4 + $0x14] sm:$0x1] }
  0xab   : > { %v1963_v41 = vld [vmem:[#allocation4 + $0x4] sm:$0x1] }
  0xac   : > { %v1319_v45 = vpop.permute.xlu0 %1318 }
  0xaf   : > { %v1021_v46 = vpop.permute.xlu1 %1020 }
  0xb0   : > { %v1025_v47 = vpop.permute.xlu0 %1024 }
  0xb3   : > { %v1317_v48 = vpop.permute.xlu1 %1316 }
  0xb5   : > { %v976_v6 = vpop.permute.xlu0 %975 }
  0xb7   : > { %v1023_v50 = vpop.permute.xlu1 %1022 }
  0xc0   : > { %v1273_v52 = vpop.permute.xlu1 %1272 }
  0xc2   : > { %v1271_v53 = vpop.permute.xlu0 %1270 }
  0xc4   : > { %v980_v54 = vpop.permute.xlu1 %979 }
  0xc6   : > { %v978_v58 = vpop.permute.xlu0 %977 }
  0xc9   : > { %v1178_v60 = vpop.permute.xlu1 %1177 }
  0xce   : > { %v880_v62 = vpop.permute.xlu0 %879 }
  0xcf   : > { %892 = vst.msk [vmem:[#allocation2] sm:$0xff] %vm891_vm2, %v880_v62 }
  0xd0   : > { %988 = vst.msk [vmem:[#allocation2] sm:$0xff] %vm987_vm3, %v976_v6 }
  0xd1   : > { %1033 = vst.msk [vmem:[#allocation2] sm:$0xff] %vm1032_vm5, %v1021_v46  ;;  %v519_v46 = vld [vmem:[#allocation4 + $0x3c] sm:$0x1] }
  0xd2   : > { %1190 = vst.msk [vmem:[#allocation2] sm:$0xff] %vm1189_vm6, %v1178_v60  ;;  %v525_v60 = vld [vmem:[#allocation4 + $0x4c] sm:$0x1] }
  0xd3   : > { %1283 = vst.msk [vmem:[#allocation2] sm:$0xff] %vm1282_vm7, %v1271_v53  ;;  %v882_v1 = vpop.permute.xlu1 %881  ;;  %v526_v62 = vsel %vm8770_vm1, 0, %v525_v60  ;;  %v1988_v60 = vshll.u32 %v1963_v41, 16 }
  0xd4   : > { %1329 = vst.msk [vmem:[#allocation2] sm:$0xff] %vm1328_vm8, %v1317_v48  ;;  %v520_v48 = vsel %vm8770_vm1, 0, %v519_v46  ;;  %527 = vst [vmem:[#allocation4 + $0x4c] sm:$0x1] %v526_v62 }
  0xd5   : > { %893 = vst.msk [vmem:[#allocation2 + $0x20] sm:$0xff] %vm891_vm2, %v882_v1  ;;  %521 = vst [vmem:[#allocation4 + $0x3c] sm:$0x1] %v520_v48  ;;  %v8089_v1 = vld [vmem:[%s10499_s3] sm:$0xff]  }
  0xd6   : > { %989 = vst.msk [vmem:[#allocation2 + $0x20] sm:$0xff] %vm987_vm3, %v978_v58  ;;  %2944 = vmatpush1.bf16.msra.mxu1 %v8089_v1 }
  0xd7   : > { %1034 = vst.msk [vmem:[#allocation2 + $0x20] sm:$0xff] %vm1032_vm5, %v1023_v50  ;;  %v491_v50 = vld [vmem:[#allocation4 + $0x40] sm:$0x1]  ;;  %2945 = vmatprep.subr.bf16.mxu1 %v8271_v10 }
  0xd8   : > { %v1474_v55 = vpop.permute.xlu0 %1473  ;;  %v492_v6 = vsel %vm8754_vm0, 0, %v491_v50 }
  0xd9   : > { %1486 = vst.msk [vmem:[#allocation2] sm:$0xff] %vm1485_vm10, %v1474_v55  ;;  %493 = vst [vmem:[#allocation4 + $0x40] sm:$0x1] %v492_v6  ;;  %v8090_v55 = vld [vmem:[%s10499_s3 + $0x8] sm:$0xff]   ;;  %v2119_v6 = vld [vmem:[#allocation4] sm:$0xe] }
  0xda   : > { %2946 = vmatpush1.bf16.msra.mxu1 %v8090_v55 }
  0xdb   : > { %2947 = vmatprep.subr.bf16.mxu1 %v8271_v10 }
  0xdd   : > { %v1180_v2 = vpop.permute.xlu0 %1179 }
  0xde   : > { %1191 = vst.msk [vmem:[#allocation2 + $0x20] sm:$0xff] %vm1189_vm6, %v1180_v2  ;;  %v8856_v2 = vld [vmem:[%s10500_s2] ss:$0 sm:$0xff]  ;;  %2948 = vmatpush1.bf16.msra.mxu1 %v8091_v43  ;;  %v1884_v43 = vld [vmem:[#allocation4 + $0x1c] sm:$0x1]  ;;  %s10444_s2 = smov 88  }
  0xdf   : > { %1284 = vst.msk [vmem:[#allocation2 + $0x20] sm:$0xff] %vm1282_vm7, %v1273_v52  ;;  %v522_v52 = vld [vmem:[#allocation4 + $0x44] sm:$0x1]  ;;  %2949 = vmatprep.subr.bf16.mxu1 %v8271_v10 }
  0xe0   : > { %1330 = vst.msk [vmem:[#allocation2 + $0x20] sm:$0xff] %vm1328_vm8, %v1319_v45  ;;  %v1574_v7 = vld [vmem:[#allocation2] sm:$0xff]  ;;  %v488_v45 = vld [vmem:[#allocation4 + $0x38] sm:$0x1]  ;;  %v523_v53 = vsel %vm8770_vm1, 0, %v522_v52  ;;  %vm8871_vm1 = vmand %vm458_vm14, %vm426_vm4 }
  0xe1   : > { %1706 = vmatmul.mubr.bf16.vlgmr.msra.gmra.mrb[0].mxu0 %v1574_v7  ;;  %524 = vst [vmem:[#allocation4 + $0x44] sm:$0x1] %v523_v53  ;;  %v8094_v52 = vld [vmem:[%s10499_s3 + $0x28] sm:$0xff]  }
  0xe2   : > { %v1476_v8 = vpop.permute.xlu1 %1475  ;;  %7382 = vmatprep.mubr.msk.bf16.mxu0 %vm10436_vm13, %v1577_v5 }
  0xe3   : > { %1487 = vst.msk [vmem:[#allocation2 + $0x20] sm:$0xff] %vm1485_vm10, %v1476_v8 }
  0xe7   : > { %v884_v11 = vpop.permute.xlu0 %883 }
  0xe8   : > { %894 = vst.msk [vmem:[#allocation2 + $0x40] sm:$0xff] %vm891_vm2, %v884_v11 }
  0xe9   : > { %990 = vst.msk [vmem:[#allocation2 + $0x40] sm:$0xff] %vm987_vm3, %v980_v54  ;;  %v494_v54 = vld [vmem:[#allocation4 + $0x48] sm:$0x1] }
  0xea   : > { %1035 = vst.msk [vmem:[#allocation2 + $0x40] sm:$0xff] %vm1032_vm5, %v1025_v47  ;;  %v1576_v14 = vld [vmem:[#allocation2 + $0x20] sm:$0xff]  ;;  %v489_v47 = vsel %vm8754_vm0, 0, %v488_v45  ;;  %v495_v58 = vsel %vm8754_vm0, 0, %v494_v54  ;;  %v2120_v54 = vld [vmem:[#allocation4 + $0x4] sm:$0x1] }
  0xeb   : > { %1714 = vmatmul.mubr.bf16.gmra.mrb[4].mxu0 %v1576_v14  ;;  %490 = vst [vmem:[#allocation4 + $0x38] sm:$0x1] %v489_v47  ;;  %496 = vst [vmem:[#allocation4 + $0x48] sm:$0x1] %v495_v58 }
  0xec   : > { %7383 = vmatprep.mubr.msk.bf16.mxu0 %vm10436_vm13, %v1579_v12  ;;  %v1275_v63 = vpop.permute.xlu0 %1274 }
  0xed   : > { %v1182_v13 = vpop.permute.xlu1 %1181 }
  0xee   : > { %1192 = vst.msk [vmem:[#allocation2 + $0x40] sm:$0xff] %vm1189_vm6, %v1182_v13 }
  0xef   : > { %1285 = vst.msk [vmem:[#allocation2 + $0x40] sm:$0xff] %vm1282_vm7, %v1275_v63  ;;  %v1962_v63 = vld [vmem:[#allocation4] sm:$0xf] }
  0xf1   : > { %v1321_v15 = vpop.permute.xlu1 %1320 }
  0xf2   : > { %1331 = vst.msk [vmem:[#allocation2 + $0x40] sm:$0xff] %vm1328_vm8, %v1321_v15  ;;  %v8092_v15 = vld [vmem:[%s10499_s3 + $0x18] sm:$0xff]  }
  0xf3   : > { %2950 = vmatpush1.bf16.msra.mxu1 %v8092_v15  ;;  %v8892_v55 = vld [vmem:[#allocation4 + $0x48] sm:$0xf]  ;;  %v1887_v15 = vld [vmem:[#allocation4 + $0x20] sm:$0xf] }
  0xf4   : > { %2951 = vmatprep.subr.bf16.mxu1 %v8271_v10 }
  0xf7   : > { %v1478_v3 = vpop.permute.xlu0 %1477  ;;  %2952 = vmatpush1.bf16.msra.mxu1 %v8093_v27 }
  0xf8   : > { %1488 = vst.msk [vmem:[#allocation2 + $0x40] sm:$0xff] %vm1485_vm10, %v1478_v3  ;;  %2953 = vmatprep.subr.bf16.mxu1 %v8271_v10 }
  0xf9   : > { %v886_v56 = vpop.permute.xlu1 %885 }
  0xfa   : > { %895 = vst.msk [vmem:[#allocation2 + $0x60] sm:$0xff] %vm891_vm2, %v886_v56 }
  0xfb   : > { %v982_v16 = vpop.permute.xlu0 %981  ;;  %2954 = vmatpush1.bf16.msra.mxu1 %v8094_v52 }
  0xfc   : > { %991 = vst.msk [vmem:[#allocation2 + $0x60] sm:$0xff] %vm987_vm3, %v982_v16  ;;  %2955 = vmatprep.subr.bf16.mxu1 %v8271_v10 }
  0xff   : > { %v1578_v42 = vld [vmem:[#allocation2 + $0x40] sm:$0xff]  ;;  %v1027_v57 = vpop.permute.xlu1 %1026 }
 0x100   : > { %1722 = vmatmul.mubr.bf16.gmra.mrb[8].mxu0 %v1578_v42  ;;  %1036 = vst.msk [vmem:[#allocation2 + $0x60] sm:$0xff] %vm1032_vm5, %v1027_v57  ;;  %v1979_v42 = vshrl.u32 %v1962_v63, 16 }
 0x101   : > { %7384 = vmatprep.mubr.msk.bf16.mxu0 %vm10436_vm13, %v1581_v51 }
 0x102   : > { %v1981_v26 = vrot.slane %v1979_v42, 4 }
 0x106   : > { %v1277_v0 = vpop.permute.xlu1 %1276 }
 0x10b   : > { %v1184_v9 = vpop.permute.xlu0 %1183 }
 0x10c   : > { %1193 = vst.msk [vmem:[#allocation2 + $0x60] sm:$0xff] %vm1189_vm6, %v1184_v9  ;;  %v1869_v9 = vld [vmem:[#allocation4 + $0x8] sm:$0xf] }
 0x10d   : > { %1286 = vst.msk [vmem:[#allocation2 + $0x60] sm:$0xff] %vm1282_vm7, %v1277_v0  ;;  %v1480_v37 = vpop.permute.xlu1 %1479  ;;  %vm2939_vm7 = vcmask 1043456  }
 0x10f   : > { %v1323_v17 = vpop.permute.xlu0 %1322 }
 0x110   : > { %1332 = vst.msk [vmem:[#allocation2 + $0x60] sm:$0xff] %vm1328_vm8, %v1323_v17  ;;  %v1982_v17 = vshll.u32 %v1962_v63, 16  ;;  %vm10463_vm8 = vcmask 195712  }
 0x111   : > { %1489 = vst.msk [vmem:[#allocation2 + $0x60] sm:$0xff] %vm1485_vm10, %v1480_v37  ;;  %vm10460_vm10 = vcmask 261312  }
 0x112   : > { %v1984_v36 = vrot.slane %v1982_v17, 5 }
 0x114   : > { %v1985_v58 = vor.u32 %v1984_v36, %v1981_v26 }
 0x118   : > { %v1580_v18 = vld [vmem:[#allocation2 + $0x60] sm:$0xff] }
 0x119   : > { %1730 = vmatmul.mubr.bf16.gmra.mrb[12].mxu0 %v1580_v18 }
 0x1b4   : > { %v1707_v5 = vpop.f32.mrb[0].mxu0 }
 0x1b5   : > { %v1708_v7 = vadd.f32 %v8856_v2, %v1707_v5  ;;  %v1709_v8 = vpop.f32.mrb[1].mxu0  ;;  %v1881_v5 = vld [vmem:[#allocation4 + $0x18] sm:$0xf] }
 0x1b6   : > { %v1710_v11 = vpop.f32.mrb[2].mxu0 }
 0x1b7   : > { %vm1738_vm11 = vcmp.ge.f32.partialorder %v1708_v7, 0.0  ;;  %v1746_v12 = vmul.f32 0.2, %v1708_v7  ;;  %v1711_v14 = vadd.f32 %v8856_v2, %v1710_v11  ;;  %v1712_v13 = vpop.f32.mrb[3].mxu0 }
 0x1b8   : > { %v8095_v13 = vld [vmem:[%s10499_s3 + $0x30] sm:$0xff]  }
 0x1b9   : > { %v1754_v3 = vsel %vm1738_vm11, %v1708_v7, %v1746_v12  ;;  %vm1739_vm15 = vcmp.ge.f32.partialorder %v1711_v14, 0.0  ;;  %v1747_v56 = vmul.f32 0.2, %v1711_v14  ;;  %v7401_v7 = vrot.slane %v2119_v6, 9  ;;  %2956 = vmatpush1.bf16.msra.mxu1 %v8095_v13  ;;  %v8096_v6 = vld [vmem:[%s10499_s3 + $0x38] sm:$0xff]  }
 0x1ba   : > { %v7773_v16 = vpack.c.bf16 %v1754_v3, %v1754_v3  ;;  %v1890_v3 = vld [vmem:[#allocation4 + $0x24] sm:$0x1]  ;;  %2957 = vmatprep.subr.bf16.mxu1 %v8271_v10  ;;  %vm10464_vm11 = vcmask 326912  }
 0x1bb   : > { %v1755_v51 = vsel %vm1739_vm15, %v1711_v14, %v1747_v56  ;;  %v2153_v14 = vrot.slane %v2120_v54, 5  ;;  %v8898_v56 = vrot.slane %v1985_v58, 4  ;;  %vm10466_vm15 = vcmask 392512  }
 0x1bc   : > { %v1787_v57 = vshrl.u32 %v7773_v16, 16  ;;  %v7774_v0 = vpack.c.bf16 %v1755_v51, %v1755_v51  ;;  %v1790_v18 = vshll.u32 %v7773_v16, 16  ;;  %v8900_v16 = vrot.slane %v1988_v60, 5 }
 0x1bd   : > { %v2668_v51 = vshrl.u32 %v8892_v55, 16  ;;  %2958 = vmatpush1.bf16.msra.mxu1 %v8096_v6 }
 0x1be   : > { %v1789_v37 = vrot.slane %v1787_v57, 7  ;;  %v1795_v19 = vshrl.u32 %v7774_v0, 16  ;;  %v1715_v21 = vpop.f32.mrb[4].mxu0  ;;  %v1798_v32 = vshll.u32 %v7774_v0, 16  ;;  %2959 = vmatprep.subr.bf16.mxu1 %v8271_v10 }
 0x1bf   : > { %v1716_v24 = vadd.f32 %v8856_v2, %v1715_v21  ;;  %v1717_v25 = vpop.f32.mrb[5].mxu0 }
 0x1c0   : > { %v1792_v29 = vor.u32 %v1790_v18, %v1789_v37  ;;  %v1793_v30 = vrot.slane %v1789_v37, 4  ;;  %v1797_v31 = vrot.slane %v1795_v19, 7  ;;  %v1718_v33 = vpop.f32.mrb[6].mxu0 }
 0x1c1   : > { %vm1740_vm2 = vcmp.ge.f32.partialorder %v1716_v24, 0.0  ;;  %v1748_v4 = vmul.f32 0.2, %v1716_v24  ;;  %v1719_v34 = vadd.f32 %v8856_v2, %v1718_v33  ;;  %v1720_v35 = vpop.f32.mrb[7].mxu0 }
 0x1c2   : > { %v1870_v61 = vsel %vm8871_vm1, %v1792_v29, %v1869_v9  ;;  %v1873_v39 = vsel %vm8754_vm0, %v1793_v30, %v1872_v49  ;;  %v1800_v40 = vor.u32 %v1798_v32, %v1797_v31  ;;  %v1801_v44 = vrot.slane %v1797_v31, 4 }
 0x1c3   : > { %1871 = vst [vmem:[#allocation4 + $0x8] sm:$0xf] %v1870_v61  ;;  %1874 = vst [vmem:[#allocation4 + $0xc] sm:$0x1] %v1873_v39  ;;  %v1756_v45 = vsel %vm1740_vm2, %v1716_v24, %v1748_v4  ;;  %vm1741_vm4 = vcmp.ge.f32.partialorder %v1719_v34, 0.0  ;;  %v2154_v24 = vsel %vm8539_vm9, %v7401_v7, %v2153_v14  ;;  %v8097_v7 = vld [vmem:[%s10499_s3 + $0x40] sm:$0xff]  }
 0x1c4   : > { %v1749_v46 = vmul.f32 0.2, %v1719_v34  ;;  %v1876_v47 = vsel %vm8871_vm1, %v1800_v40, %v1875_v23  ;;  %v1879_v48 = vsel %vm8754_vm0, %v1801_v44, %v1878_v38  ;;  %v7775_v50 = vpack.c.bf16 %v1756_v45, %v1756_v45  ;;  %2960 = vmatpush1.bf16.msra.mxu1 %v8097_v7 }
 0x1c5   : > { %1877 = vst [vmem:[#allocation4 + $0x10] sm:$0xf] %v1876_v47  ;;  %1880 = vst [vmem:[#allocation4 + $0x14] sm:$0x1] %v1879_v48  ;;  %2961 = vmatprep.subr.bf16.mxu1 %v8271_v10  ;;  %vm10456_vm2 = vcmask 458112  }
 0x1c6   : > { %v1757_v53 = vsel %vm1741_vm4, %v1719_v34, %v1749_v46  ;;  %v1803_v62 = vshrl.u32 %v7775_v50, 16  ;;  %v1806_v11 = vshll.u32 %v7775_v50, 16  ;;  %v2671_v50 = vshll.u32 %v8892_v55, 16 }
 0x1c7   : > { %v7776_v1 = vpack.c.bf16 %v1757_v53, %v1757_v53  ;;  %vm10451_vm4 = vcmask 523712  }
 0x1c8   : > { %v1805_v8 = vrot.slane %v1803_v62, 7 }
 0x1c9   : > { %v1811_v12 = vshrl.u32 %v7776_v1, 16  ;;  %v1814_v63 = vshll.u32 %v7776_v1, 16 }
 0x1ca   : > { %v1808_v42 = vor.u32 %v1806_v11, %v1805_v8  ;;  %v1809_v57 = vrot.slane %v1805_v8, 4  ;;  %v8077_v9 = vld [vmem:[#allocation4] ss:$8 sps:$4 sm:$0xff]   ;;  %v2122_v37 = vld [vmem:[#allocation4 + $0xc] sm:$0x1] }
 0x1cb   : > { %v1813_v0 = vrot.slane %v1811_v12, 7  ;;  %v2121_v17 = vld [vmem:[#allocation4 + $0x8] sm:$0xe]  ;;  %1945 = vrot.lane.b32.xlu0 %v8077_v9, %s10430_s12  ;;  %v2157_v26 = vrot.slane %v2122_v37, 5  ;;  %v2415_v29 = vld [vmem:[#allocation4 + $0xc] sm:$0x1] }
 0x1cc   : > { %v1882_v18 = vsel %vm8871_vm1, %v1808_v42, %v1881_v5  ;;  %v1885_v49 = vsel %vm8754_vm0, %v1809_v57, %v1884_v43  ;;  %v8078_v23 = vld [vmem:[#allocation4 + $0x8] ss:$8 sps:$4 sm:$0xff]   ;;  %v7402_v25 = vrot.slane %v2121_v17, 9  ;;  %v2417_v38 = vld [vmem:[#allocation4 + $0x14] sm:$0x1]  ;;  %v2448_v4 = vrot.slane %v2415_v29, 5 }
 0x1cd   : > { %v1816_v19 = vor.u32 %v1814_v63, %v1813_v0  ;;  %v1817_v21 = vrot.slane %v1813_v0, 4  ;;  %1883 = vst [vmem:[#allocation4 + $0x18] sm:$0xf] %v1882_v18  ;;  %1886 = vst [vmem:[#allocation4 + $0x1c] sm:$0x1] %v1885_v49  ;;  %2240 = vrot.lane.b32.xlu1 %v8078_v23, %s10426_s13  ;;  %v2452_v36 = vrot.slane %v2417_v38, 5 }
 0x1ce   : > { %v2414_v27 = vld [vmem:[#allocation4 + $0x8] sm:$0xe]  ;;  %v2416_v32 = vld [vmem:[#allocation4 + $0x10] sm:$0xe]  ;;  %v2158_v34 = vsel %vm8539_vm9, %v7402_v25, %v2157_v26  ;;  %v1965_v40 = vld [vmem:[#allocation4 + $0xc] sm:$0x1] }
 0x1cf   : > { %v1888_v30 = vsel %vm8871_vm1, %v1816_v19, %v1887_v15  ;;  %v1891_v31 = vsel %vm8754_vm0, %v1817_v21, %v1890_v3  ;;  %v7421_v33 = vrot.slane %v2414_v27, 9  ;;  %v7422_v35 = vrot.slane %v2416_v32, 9  ;;  %v1964_v61 = vld [vmem:[#allocation4 + $0x8] sm:$0xf]  ;;  %v2710_v48 = vld [vmem:[#allocation4 + $0x10] sm:$0xe] }
 0x1d0   : > { %1889 = vst [vmem:[#allocation4 + $0x20] sm:$0xf] %v1888_v30  ;;  %1892 = vst [vmem:[#allocation4 + $0x24] sm:$0x1] %v1891_v31  ;;  %v7409_v39 = vcombine.low %v2154_v24, %v2158_v34  ;;  %v1993_v44 = vshrl.u32 %v1964_v61, 16  ;;  %v1996_v41 = vshll.u32 %v1964_v61, 16  ;;  %v1991_v15 = vsel %vm8603_vm12, %v8898_v56, %v8900_v16 }
 0x1d1   : > { %v2449_v45 = vsel %vm8539_vm9, %v7421_v33, %v2448_v4  ;;  %v2453_v46 = vsel %vm8539_vm9, %v7422_v35, %v2452_v36  ;;  %v2002_v47 = vshll.u32 %v1965_v40, 16  ;;  %v2711_v58 = vld [vmem:[#allocation4 + $0x14] sm:$0x1]  ;;  %v2123_v60 = vld [vmem:[#allocation4 + $0x10] sm:$0xe]  ;;  %v7441_v1 = vrot.slane %v2710_v48, 9 }
 0x1d2   : > { %2195 = vrot.lane.b32.xlu0 %v7409_v39, %s10503_s25  ;;  %v7429_v52 = vcombine.low %v2449_v45, %v2453_v46  ;;  %v1995_v53 = vrot.slane %v1993_v44, 4  ;;  %v1998_v54 = vrot.slane %v1996_v41, 5  ;;  %v2124_v5 = vld [vmem:[#allocation4 + $0x14] sm:$0x1]  ;;  %v8927_v43 = vrot.slane %v2668_v51, 4 }
 0x1d3   : > { %v1723_v62 = vpop.f32.mrb[8].mxu0  ;;  %v2004_v13 = vrot.slane %v2002_v47, 5  ;;  %v2744_v3 = vrot.slane %v2711_v58, 5  ;;  %v7403_v51 = vrot.slane %v2123_v60, 9  ;;  %v2161_v42 = vrot.slane %v2124_v5, 5 }
 0x1d4   : > { %v1724_v8 = vadd.f32 %v8856_v2, %v1723_v62  ;;  %v1725_v11 = vpop.f32.mrb[9].mxu0  ;;  %2490 = vrot.lane.b32.xlu1 %v7429_v52, %s10434_s22  ;;  %v8079_v12 = vld [vmem:[#allocation4 + $0x10] ss:$8 sps:$4 sm:$0xff]   ;;  %v1999_v14 = vor.u32 %v1998_v54, %v1995_v53  ;;  %v2713_v49 = vld [vmem:[#allocation4 + $0x1c] sm:$0x1] }
 0x1d5   : > { %v1726_v63 = vpop.f32.mrb[10].mxu0  ;;  %v8080_v37 = vld [vmem:[#allocation4 + $0x10] ss:$8 sps:$4 sm:$0xff]   ;;  %v2748_v25 = vrot.slane %v2713_v49, 5  ;;  %v2745_v29 = vsel %vm8539_vm9, %v7441_v1, %v2744_v3  ;;  %v2126_v30 = vld [vmem:[#allocation4 + $0x1c] sm:$0x1]  ;;  %v2162_v31 = vsel %vm8539_vm9, %v7403_v51, %v2161_v42 }
 0x1d6   : > { %vm1742_vm14 = vcmp.ge.f32.partialorder %v1724_v8, 0.0  ;;  %v1750_v57 = vmul.f32 0.2, %v1724_v8  ;;  %v1727_v0 = vadd.f32 %v8856_v2, %v1726_v63  ;;  %v1728_v9 = vpop.f32.mrb[11].mxu0  ;;  %2536 = vrot.lane.b32.xlu0 %v8079_v12, %s10504_s29  ;;  %v2000_v17 = vrot.slane %v1999_v14, 4 }
 0x1d7   : > { %v2712_v18 = vld [vmem:[#allocation4 + $0x18] sm:$0xe]  ;;  %v2257_v38 = vld [vmem:[#allocation4 + $0x8] sm:$0xf]  ;;  %v2258_v36 = vld [vmem:[#allocation4 + $0xc] sm:$0x1] }
 0x1d8   : > { %v1758_v19 = vsel %vm1742_vm14, %v1724_v8, %v1750_v57  ;;  %vm1743_vm3 = vcmp.ge.f32.partialorder %v1727_v0, 0.0  ;;  %v1751_v21 = vmul.f32 0.2, %v1727_v0  ;;  %v2005_v56 = vsel %vm8603_vm12, %v2000_v17, %v2004_v13  ;;  %v2125_v26 = vld [vmem:[#allocation4 + $0x18] sm:$0xe] }
 0x1d9   : > { %v7777_v16 = vpack.c.bf16 %v1758_v19, %v1758_v19  ;;  %v7397_v23 = vcombine.low %v1991_v15, %v2005_v56  ;;  %v7442_v24 = vrot.slane %v2712_v18, 9  ;;  %v7404_v32 = vrot.slane %v2125_v26, 9  ;;  %v2259_v61 = vld [vmem:[#allocation4 + $0x10] sm:$0xf]  ;;  %v1893_v39 = vld [vmem:[#allocation4 + $0x28] sm:$0xf] }
 0x1da   : > { %v1759_v27 = vsel %vm1743_vm3, %v1727_v0, %v1751_v21  ;;  %1947 = vrot.lane.b32.xlu0 %v8080_v37, %s10430_s12  ;;  %v1896_v40 = vld [vmem:[#allocation4 + $0x2c] sm:$0x1]  ;;  %v8081_v41 = vld [vmem:[#allocation4 + $0x18] ss:$8 sps:$4 sm:$0xff]   ;;  %v2165_v45 = vrot.slane %v2126_v30, 5  ;;  %v2274_v46 = vshrl.u32 %v2257_v38, 16 }
 0x1db   : > { %v1819_v33 = vshrl.u32 %v7777_v16, 16  ;;  %v1822_v4 = vshll.u32 %v7777_v16, 16  ;;  %v7778_v34 = vpack.c.bf16 %v1759_v27, %v1759_v27  ;;  %2102 = vrot.lane.b32.xlu1 %v7397_v23, %s10428_s15  ;;  %v2749_v35 = vsel %vm8539_vm9, %v7442_v24, %v2748_v25  ;;  %v2260_v53 = vld [vmem:[#allocation4 + $0x14] sm:$0x1]  ;;  %v1899_v58 = vld [vmem:[#allocation4 + $0x30] sm:$0xf] }
 0x1dc   : > { %v7449_v44 = vcombine.low %v2745_v29, %v2749_v35  ;;  %v2277_v47 = vshll.u32 %v2257_v38, 16  ;;  %v2283_v54 = vshll.u32 %v2258_v36, 16  ;;  %v1902_v60 = vld [vmem:[#allocation4 + $0x34] sm:$0x1]  ;;  %v2166_v62 = vsel %vm8539_vm9, %v7404_v32, %v2165_v45  ;;  %v2418_v8 = vld [vmem:[#allocation4 + $0x18] sm:$0xe] }
 0x1dd   : > { %v1821_v48 = vrot.slane %v1819_v33, 7  ;;  %v1827_v6 = vshrl.u32 %v7778_v34, 16  ;;  %v1830_v52 = vshll.u32 %v7778_v34, 16  ;;  %v2276_v1 = vrot.slane %v2274_v46, 4  ;;  %v2419_v63 = vld [vmem:[#allocation4 + $0x1c] sm:$0x1] }
 0x1de   : > { %2242 = vrot.lane.b32.xlu0 %v8081_v41, %s10426_s13  ;;  %v2279_v5 = vrot.slane %v2277_v47, 5  ;;  %v2288_v7 = vshrl.u32 %v2259_v61, 16  ;;  %v7410_v13 = vcombine.low %v2162_v31, %v2166_v62  ;;  %v2420_v15 = vld [vmem:[#allocation4 + $0x20] sm:$0xe]  ;;  %v2285_v51 = vrot.slane %v2283_v54, 5  ;;  %v8098_v9 = vld [vmem:[%s10499_s3 + $0x48] sm:$0xff]  }
 0x1df   : > { %v1824_v11 = vor.u32 %v1822_v4, %v1821_v48  ;;  %v1825_v12 = vrot.slane %v1821_v48, 4  ;;  %v1829_v14 = vrot.slane %v1827_v6, 7  ;;  %2786 = vrot.lane.b32.xlu1 %v7449_v44, %s10505_s16  ;;  %v2291_v57 = vshll.u32 %v2259_v61, 16  ;;  %v2421_v0 = vld [vmem:[#allocation4 + $0x24] sm:$0x1]  ;;  %2962 = vmatpush1.bf16.msra.mxu1 %v8098_v9  ;;  %s10506_s12 = smov 48  }
 0x1e0   : > { %v2280_v3 = vor.u32 %v2279_v5, %v2276_v1  ;;  %v2290_v42 = vrot.slane %v2288_v7, 4  ;;  %v1966_v19 = vld [vmem:[#allocation4 + $0x10] sm:$0xf]  ;;  %v8099_v21 = vld [vmem:[%s10499_s3 + $0x50] sm:$0xff]   ;;  %v2297_v23 = vshll.u32 %v2260_v53, 16  ;;  %v7423_v24 = vrot.slane %v2418_v8, 9  ;;  %2963 = vmatprep.subr.bf16.mxu1 %v8271_v10 }
 0x1e1   : > { %v1894_v17 = vsel %vm8871_vm1, %v1824_v11, %v1893_v39  ;;  %v1897_v37 = vsel %vm8754_vm0, %v1825_v12, %v1896_v40  ;;  %v1832_v18 = vor.u32 %v1830_v52, %v1829_v14  ;;  %v1833_v49 = vrot.slane %v1829_v14, 4  ;;  %v1967_v25 = vld [vmem:[#allocation4 + $0x14] sm:$0x1]  ;;  %v1968_v31 = vld [vmem:[#allocation4 + $0x18] sm:$0xf]  ;;  %v8100_v1 = vld [vmem:[%s10499_s3 + $0x58] sm:$0xff]  }
 0x1e2   : > { %1895 = vst [vmem:[#allocation4 + $0x28] sm:$0xf] %v1894_v17  ;;  %1898 = vst [vmem:[#allocation4 + $0x2c] sm:$0x1] %v1897_v37  ;;  %v2281_v56 = vrot.slane %v2280_v3, 4  ;;  %v2293_v16 = vrot.slane %v2291_v57, 5 }
 0x1e3   : > { %v1900_v26 = vsel %vm8871_vm1, %v1832_v18, %v1899_v58  ;;  %v1903_v27 = vsel %vm8754_vm0, %v1833_v49, %v1902_v60  ;;  %2197 = vrot.lane.b32.xlu1 %v7410_v13, %s10503_s25  ;;  %v2456_v29 = vrot.slane %v2419_v63, 5  ;;  %v7424_v30 = vrot.slane %v2420_v15, 9  ;;  %v1969_v4 = vld [vmem:[#allocation4 + $0x1c] sm:$0x1]  ;;  %v2553_v40 = vld [vmem:[#allocation4 + $0x10] sm:$0xf]  ;;  %2964 = vmatpush1.bf16.msra.mxu1 %v8099_v21 }
 0x1e4   : > { %1901 = vst [vmem:[#allocation4 + $0x30] sm:$0xf] %v1900_v26  ;;  %1904 = vst [vmem:[#allocation4 + $0x34] sm:$0x1] %v1903_v27  ;;  %v2286_v32 = vsel %vm8603_vm12, %v2281_v56, %v2285_v51  ;;  %v2294_v38 = vor.u32 %v2293_v16, %v2290_v42  ;;  %v2460_v33 = vrot.slane %v2421_v0, 5  ;;  %v8976_v34 = vrot.slane %v2671_v50, 5  ;;  %2965 = vmatprep.subr.bf16.mxu1 %v8271_v10 }
 0x1e5   : > { %v2299_v35 = vrot.slane %v2297_v23, 5  ;;  %v2007_v36 = vshrl.u32 %v1966_v19, 16  ;;  %v2010_v61 = vshll.u32 %v1966_v19, 16  ;;  %v2016_v39 = vshll.u32 %v1967_v25, 16  ;;  %v2554_v47 = vld [vmem:[#allocation4 + $0x14] sm:$0x1] }
 0x1e6   : > { %v2295_v44 = vrot.slane %v2294_v38, 4  ;;  %v2461_v41 = vsel %vm8539_vm9, %v7424_v30, %v2460_v33  ;;  %v2021_v45 = vshrl.u32 %v1968_v31, 16  ;;  %v2024_v46 = vshll.u32 %v1968_v31, 16  ;;  %v2555_v52 = vld [vmem:[#allocation4 + $0x18] sm:$0xf]  ;;  %v8101_v51 = vld [vmem:[%s10499_s3 + $0x60] sm:$0xff]  }
 0x1e7   : > { %v2457_v48 = vsel %vm8539_vm9, %v7423_v24, %v2456_v29  ;;  %v2009_v6 = vrot.slane %v2007_v36, 4  ;;  %v2012_v55 = vrot.slane %v2010_v61, 5  ;;  %v2018_v50 = vrot.slane %v2016_v39, 5  ;;  %v2556_v62 = vld [vmem:[#allocation4 + $0x1c] sm:$0x1]  ;;  %2966 = vmatpush1.bf16.msra.mxu1 %v8100_v1  ;;  %s10507_s13 = smov 16  }
 0x1e8   : > { %v2300_v53 = vsel %vm8603_vm12, %v2295_v44, %v2299_v35  ;;  %v2023_v54 = vrot.slane %v2021_v45, 4  ;;  %v2026_v58 = vrot.slane %v2024_v46, 5  ;;  %v2030_v60 = vshll.u32 %v1969_v4, 16  ;;  %v2714_v15 = vld [vmem:[#allocation4 + $0x20] sm:$0xe]  ;;  %2967 = vmatprep.subr.bf16.mxu1 %v8271_v10  ;;  %s10508_s15 = smov 24  }
 0x1e9   : > { %v7417_v5 = vcombine.low %v2286_v32, %v2300_v53  ;;  %v8082_v7 = vld [vmem:[#allocation4 + $0x20] ss:$8 sps:$4 sm:$0xff]   ;;  %v7430_v8 = vcombine.low %v2457_v48, %v2461_v41  ;;  %v2013_v11 = vor.u32 %v2012_v55, %v2009_v6  ;;  %v2570_v13 = vshrl.u32 %v2553_v40, 16  ;;  %v2715_v3 = vld [vmem:[#allocation4 + $0x24] sm:$0x1] }
 0x1ea   : > { %v2027_v12 = vor.u32 %v2026_v58, %v2023_v54  ;;  %v2032_v14 = vrot.slane %v2030_v60, 5  ;;  %v2573_v63 = vshll.u32 %v2553_v40, 16  ;;  %2538 = vrot.lane.b32.xlu1 %v8082_v7, %s10504_s29  ;;  %v8083_v42 = vld [vmem:[#allocation4 + $0x20] ss:$8 sps:$4 sm:$0xff]   ;;  %v2579_v0 = vshll.u32 %v2554_v47, 16 }
 0x1eb   : > { %2397 = vrot.lane.b32.xlu0 %v7417_v5, %s10506_s12  ;;  %v2014_v57 = vrot.slane %v2013_v11, 4  ;;  %v2584_v9 = vshrl.u32 %v2555_v52, 16  ;;  %v2587_v17 = vshll.u32 %v2555_v52, 16  ;;  %v2572_v18 = vrot.slane %v2570_v13, 4  ;;  %v2716_v21 = vld [vmem:[#allocation4 + $0x28] sm:$0xe]  ;;  %2968 = vmatpush1.bf16.msra.mxu1 %v8101_v51 }
 0x1ec   : > { %v2028_v37 = vrot.slane %v2027_v12, 4  ;;  %v2575_v49 = vrot.slane %v2573_v63, 5  ;;  %v2593_v19 = vshll.u32 %v2556_v62, 16  ;;  %v1731_v56 = vpop.f32.mrb[12].mxu0  ;;  %v2581_v23 = vrot.slane %v2579_v0, 5  ;;  %2969 = vmatprep.subr.bf16.mxu1 %v8271_v10 }
 0x1ed   : > { %v2019_v16 = vsel %vm8603_vm12, %v2014_v57, %v2018_v50  ;;  %v2586_v24 = vrot.slane %v2584_v9, 4  ;;  %v2589_v25 = vrot.slane %v2587_v17, 5  ;;  %v1732_v26 = vadd.f32 %v8856_v2, %v1731_v56  ;;  %v1733_v27 = vpop.f32.mrb[13].mxu0  ;;  %v2717_v32 = vld [vmem:[#allocation4 + $0x2c] sm:$0x1] }
 0x1ee   : > { %v2033_v29 = vsel %vm8603_vm12, %v2028_v37, %v2032_v14  ;;  %v2576_v30 = vor.u32 %v2575_v49, %v2572_v18  ;;  %v2595_v31 = vrot.slane %v2593_v19, 5  ;;  %v1734_v38 = vpop.f32.mrb[14].mxu0  ;;  %1949 = vrot.lane.b32.xlu1 %v8083_v42, %s10507_s13  ;;  %v7443_v35 = vrot.slane %v2714_v15, 9  ;;  %v2127_v61 = vld [vmem:[#allocation4 + $0x20] sm:$0xe] }
 0x1ef   : > { %2492 = vrot.lane.b32.xlu0 %v7430_v8, %s10434_s22  ;;  %v7398_v33 = vcombine.low %v2019_v16, %v2033_v29  ;;  %v2590_v4 = vor.u32 %v2589_v25, %v2586_v24  ;;  %v2752_v36 = vrot.slane %v2715_v3, 5  ;;  %vm1744_vm5 = vcmp.ge.f32.partialorder %v1732_v26, 0.0  ;;  %v1736_v44 = vpop.f32.mrb[15].mxu0  ;;  %v2128_v6 = vld [vmem:[#allocation4 + $0x24] sm:$0x1] }
 0x1f0   : > { %v1752_v39 = vmul.f32 0.2, %v1732_v26  ;;  %v1735_v40 = vadd.f32 %v8856_v2, %v1734_v38  ;;  %v2577_v41 = vrot.slane %v2576_v30, 4  ;;  %v7444_v47 = vrot.slane %v2716_v21, 9  ;;  %v2129_v53 = vld [vmem:[#allocation4 + $0x28] sm:$0xe] }
 0x1f1   : > { %v2591_v45 = vrot.slane %v2590_v4, 4  ;;  %v2753_v46 = vsel %vm8539_vm9, %v7443_v35, %v2752_v36  ;;  %v2756_v48 = vrot.slane %v2717_v32, 5  ;;  %v2130_v60 = vld [vmem:[#allocation4 + $0x2c] sm:$0x1]  ;;  %v7405_v62 = vrot.slane %v2127_v61, 9 }
 0x1f2   : > { %v1760_v55 = vsel %vm1744_vm5, %v1732_v26, %v1752_v39  ;;  %vm1745_vm6 = vcmp.ge.f32.partialorder %v1735_v40, 0.0  ;;  %v1753_v50 = vmul.f32 0.2, %v1735_v40  ;;  %v2582_v52 = vsel %vm8603_vm12, %v2577_v41, %v2581_v23  ;;  %v2261_v1 = vld [vmem:[#allocation4 + $0x18] sm:$0xf] }
 0x1f3   : > { %v7779_v54 = vpack.c.bf16 %v1760_v55, %v1760_v55  ;;  %2104 = vrot.lane.b32.xlu0 %v7398_v33, %s10508_s15  ;;  %v2596_v2 = vsel %vm8603_vm12, %v2591_v45, %v2595_v31  ;;  %v2757_v58 = vsel %vm8539_vm9, %v7444_v47, %v2756_v48  ;;  %v2169_v11 = vrot.slane %v2128_v6, 5  ;;  %v2262_v12 = vld [vmem:[#allocation4 + $0x1c] sm:$0x1]  ;;  %v2263_v3 = vld [vmem:[#allocation4 + $0x20] sm:$0xf] }
 0x1f4   : > { %v1761_v5 = vsel %vm1745_vm6, %v1735_v40, %v1753_v50  ;;  %v7437_v7 = vcombine.low %v2582_v52, %v2596_v2  ;;  %v7450_v8 = vcombine.low %v2753_v46, %v2757_v58  ;;  %v7406_v15 = vrot.slane %v2129_v53, 9  ;;  %v1905_v51 = vld [vmem:[#allocation4 + $0x38] sm:$0xf]  ;;  %v1908_v42 = vld [vmem:[#allocation4 + $0x3c] sm:$0x1] }
 0x1f5   : > { %v1835_v14 = vshrl.u32 %v7779_v54, 16  ;;  %v1838_v13 = vshll.u32 %v7779_v54, 16  ;;  %v7780_v63 = vpack.c.bf16 %v1761_v5, %v1761_v5  ;;  %v2170_v57 = vsel %vm8539_vm9, %v7405_v62, %v2169_v11  ;;  %v8084_v19 = vld [vmem:[#allocation4 + $0x28] ss:$8 sps:$4 sm:$0xff]   ;;  %v1911_v56 = vld [vmem:[#allocation4 + $0x40] sm:$0xf] }
 0x1f6   : > { %2693 = vrot.lane.b32.xlu1 %v7437_v7, %s10432_s24  ;;  %v2173_v0 = vrot.slane %v2130_v60, 5  ;;  %v2302_v9 = vshrl.u32 %v2261_v1, 16  ;;  %v2305_v17 = vshll.u32 %v2261_v1, 16  ;;  %v2311_v21 = vshll.u32 %v2262_v12, 16  ;;  %v1914_v16 = vld [vmem:[#allocation4 + $0x44] sm:$0x1] }
 0x1f7   : > { %v1837_v37 = vrot.slane %v1835_v14, 7  ;;  %v1843_v18 = vshrl.u32 %v7780_v63, 16  ;;  %v1846_v49 = vshll.u32 %v7780_v63, 16  ;;  %2788 = vrot.lane.b32.xlu0 %v7450_v8, %s10505_s16  ;;  %v2264_v24 = vld [vmem:[#allocation4 + $0x24] sm:$0x1]  ;;  %v2316_v27 = vshrl.u32 %v2263_v3, 16 }
 0x1f8   : > { %v2174_v23 = vsel %vm8539_vm9, %v7406_v15, %v2173_v0  ;;  %v2304_v25 = vrot.slane %v2302_v9, 4  ;;  %v2307_v26 = vrot.slane %v2305_v17, 5  ;;  %v2422_v38 = vld [vmem:[#allocation4 + $0x28] sm:$0xe]  ;;  %v2423_v33 = vld [vmem:[#allocation4 + $0x2c] sm:$0x1] }
 0x1f9   : > { %v1840_v29 = vor.u32 %v1838_v13, %v1837_v37  ;;  %v1841_v30 = vrot.slane %v1837_v37, 4  ;;  %v1845_v31 = vrot.slane %v1843_v18, 7  ;;  %v7411_v32 = vcombine.low %v2170_v57, %v2174_v23  ;;  %v2424_v61 = vld [vmem:[#allocation4 + $0x30] sm:$0xe]  ;;  %v2425_v45 = vld [vmem:[#allocation4 + $0x34] sm:$0x1] }
 0x1fa   : > { %2244 = vrot.lane.b32.xlu1 %v8084_v19, %s10509_s30  ;;  %v2308_v4 = vor.u32 %v2307_v26, %v2304_v25  ;;  %v2318_v35 = vrot.slane %v2316_v27, 4  ;;  %v2319_v36 = vshll.u32 %v2263_v3, 16  ;;  %v2325_v48 = vshll.u32 %v2264_v24, 16  ;;  %v1970_v55 = vld [vmem:[#allocation4 + $0x20] sm:$0xf] }
 0x1fb   : > { %v1906_v39 = vsel %vm8871_vm1, %v1840_v29, %v1905_v51  ;;  %v1909_v40 = vsel %vm8754_vm0, %v1841_v30, %v1908_v42  ;;  %v1848_v44 = vor.u32 %v1846_v49, %v1845_v31  ;;  %v1849_v41 = vrot.slane %v1845_v31, 4  ;;  %2199 = vrot.lane.b32.xlu0 %v7411_v32, %s10503_s25  ;;  %v1972_v2 = vld [vmem:[#allocation4 + $0x28] sm:$0xf]  ;;  %v1971_v1 = vld [vmem:[#allocation4 + $0x24] sm:$0x1] }
 0x1fc   : > { %1907 = vst [vmem:[#allocation4 + $0x38] sm:$0xf] %v1906_v39  ;;  %1910 = vst [vmem:[#allocation4 + $0x3c] sm:$0x1] %v1909_v40  ;;  %v2309_v46 = vrot.slane %v2308_v4, 4  ;;  %v2321_v47 = vrot.slane %v2319_v36, 5  ;;  %v2674_v26 = vor.u32 %v8976_v34, %v8927_v43 }
 0x1fd   : > { %v7425_v6 = vrot.slane %v2422_v38, 9  ;;  %v1912_v50 = vsel %vm8871_vm1, %v1848_v44, %v1911_v56  ;;  %v1915_v52 = vsel %vm8754_vm0, %v1849_v41, %v1914_v16  ;;  %v2464_v53 = vrot.slane %v2423_v33, 5  ;;  %v1973_v5 = vld [vmem:[#allocation4 + $0x2c] sm:$0x1]  ;;  %v2557_v14 = vld [vmem:[#allocation4 + $0x20] sm:$0xf] }
 0x1fe   : > { %v7426_v54 = vrot.slane %v2424_v61, 9  ;;  %1913 = vst [vmem:[#allocation4 + $0x40] sm:$0xf] %v1912_v50  ;;  %1916 = vst [vmem:[#allocation4 + $0x44] sm:$0x1] %v1915_v52  ;;  %v2313_v58 = vrot.slane %v2311_v21, 5  ;;  %v2322_v60 = vor.u32 %v2321_v47, %v2318_v35 }
 0x1ff   : > { %v2468_v62 = vrot.slane %v2425_v45, 5  ;;  %v2327_v7 = vrot.slane %v2325_v48, 5  ;;  %v2465_v8 = vsel %vm8539_vm9, %v7425_v6, %v2464_v53  ;;  %v2035_v11 = vshrl.u32 %v1970_v55, 16  ;;  %v2558_v51 = vld [vmem:[#allocation4 + $0x24] sm:$0x1] }
 0x200   : > { %v2038_v12 = vshll.u32 %v1970_v55, 16  ;;  %v2323_v13 = vrot.slane %v2322_v60, 4  ;;  %v2049_v15 = vshrl.u32 %v1972_v2, 16  ;;  %v2052_v3 = vshll.u32 %v1972_v2, 16  ;;  %v2559_v17 = vld [vmem:[#allocation4 + $0x28] sm:$0xf] }
 0x201   : > { %v2469_v63 = vsel %vm8539_vm9, %v7426_v54, %v2468_v62  ;;  %v2314_v42 = vsel %vm8603_vm12, %v2309_v46, %v2313_v58  ;;  %v2037_v57 = vrot.slane %v2035_v11, 4  ;;  %v2044_v9 = vshll.u32 %v1971_v1, 16  ;;  %v2560_v21 = vld [vmem:[#allocation4 + $0x2c] sm:$0x1]  ;;  %v2718_v25 = vld [vmem:[#allocation4 + $0x30] sm:$0xe] }
 0x202   : > { %v2040_v0 = vrot.slane %v2038_v12, 5  ;;  %v2328_v37 = vsel %vm8603_vm12, %v2323_v13, %v2327_v7  ;;  %v2051_v18 = vrot.slane %v2049_v15, 4  ;;  %v2054_v49 = vrot.slane %v2052_v3, 5  ;;  %v2719_v32 = vld [vmem:[#allocation4 + $0x34] sm:$0x1] }
 0x203   : > { %v2058_v19 = vshll.u32 %v1973_v5, 16  ;;  %v7418_v56 = vcombine.low %v2314_v42, %v2328_v37  ;;  %v8085_v16 = vld [vmem:[#allocation4 + $0x30] ss:$8 sps:$4 sm:$0xff]   ;;  %v7431_v23 = vcombine.low %v2465_v8, %v2469_v63  ;;  %v2598_v30 = vshrl.u32 %v2557_v14, 16  ;;  %v2721_v46 = vld [vmem:[#allocation4 + $0x3c] sm:$0x1] }
 0x204   : > { %v2041_v24 = vor.u32 %v2040_v0, %v2037_v57  ;;  %v2055_v27 = vor.u32 %v2054_v49, %v2051_v18  ;;  %v2601_v31 = vshll.u32 %v2557_v14, 16  ;;  %2540 = vrot.lane.b32.xlu0 %v8085_v16, %s10504_s29  ;;  %v8086_v38 = vld [vmem:[#allocation4 + $0x30] ss:$8 sps:$4 sm:$0xff]   ;;  %v2607_v4 = vshll.u32 %v2558_v51, 16  ;;  %v2132_v1 = vld [vmem:[#allocation4 + $0x34] sm:$0x1] }
 0x205   : > { %v2060_v29 = vrot.slane %v2058_v19, 5  ;;  %2399 = vrot.lane.b32.xlu1 %v7418_v56, %s10506_s12  ;;  %v2612_v35 = vshrl.u32 %v2559_v17, 16  ;;  %v2615_v36 = vshll.u32 %v2559_v17, 16  ;;  %v2720_v61 = vld [vmem:[#allocation4 + $0x38] sm:$0xe]  ;;  %v2600_v44 = vrot.slane %v2598_v30, 4 }
 0x206   : > { %v2042_v33 = vrot.slane %v2041_v24, 4  ;;  %v2131_v39 = vld [vmem:[#allocation4 + $0x30] sm:$0xe]  ;;  %v2056_v40 = vrot.slane %v2055_v27, 4  ;;  %v2603_v41 = vrot.slane %v2601_v31, 5  ;;  %v2621_v45 = vshll.u32 %v2560_v21, 16 }
 0x207   : > { %v2046_v47 = vrot.slane %v2044_v9, 5  ;;  %v2609_v48 = vrot.slane %v2607_v4, 5  ;;  %v2614_v6 = vrot.slane %v2612_v35, 4  ;;  %v2617_v55 = vrot.slane %v2615_v36, 5  ;;  %v2133_v5 = vld [vmem:[#allocation4 + $0x38] sm:$0xe] }
 0x208   : > { %v2061_v50 = vsel %vm8603_vm12, %v2056_v40, %v2060_v29  ;;  %v2604_v52 = vor.u32 %v2603_v41, %v2600_v44  ;;  %v2623_v53 = vrot.slane %v2621_v45, 5  ;;  %v7445_v54 = vrot.slane %v2718_v25, 9  ;;  %1951 = vrot.lane.b32.xlu0 %v8086_v38, %s10507_s13  ;;  %v2134_v11 = vld [vmem:[#allocation4 + $0x3c] sm:$0x1]  ;;  %v2265_v51 = vld [vmem:[#allocation4 + $0x28] sm:$0xf] }
 0x209   : > { %2494 = vrot.lane.b32.xlu1 %v7431_v23, %s10434_s22  ;;  %v2047_v2 = vsel %vm8603_vm12, %v2042_v33, %v2046_v47  ;;  %v2618_v58 = vor.u32 %v2617_v55, %v2614_v6  ;;  %v2760_v60 = vrot.slane %v2719_v32, 5  ;;  %v7446_v62 = vrot.slane %v2720_v61, 9  ;;  %v2266_v17 = vld [vmem:[#allocation4 + $0x2c] sm:$0x1]  ;;  %v2267_v37 = vld [vmem:[#allocation4 + $0x30] sm:$0xf] }
 0x20a   : > { %v2605_v7 = vrot.slane %v2604_v52, 4  ;;  %v2764_v8 = vrot.slane %v2721_v46, 5  ;;  %v7407_v12 = vrot.slane %v2131_v39, 9  ;;  %v2177_v14 = vrot.slane %v2132_v1, 5  ;;  %v2268_v18 = vld [vmem:[#allocation4 + $0x34] sm:$0x1] }
 0x20b   : > { %v7399_v13 = vcombine.low %v2047_v2, %v2061_v50  ;;  %v2619_v63 = vrot.slane %v2618_v58, 4  ;;  %v7408_v15 = vrot.slane %v2133_v5, 9  ;;  %v2181_v3 = vrot.slane %v2134_v11, 5  ;;  %v2561_v16 = vld [vmem:[#allocation4 + $0x30] sm:$0xf]  ;;  %s10511_s22 = smov 72  }
 0x20c   : > { %v2610_v42 = vsel %vm8603_vm12, %v2605_v7, %v2609_v48  ;;  %v2761_v57 = vsel %vm8539_vm9, %v7445_v54, %v2760_v60  ;;  %v2765_v0 = vsel %vm8539_vm9, %v7446_v62, %v2764_v8  ;;  %v2178_v9 = vsel %vm8539_vm9, %v7407_v12, %v2177_v14  ;;  %v2562_v29 = vld [vmem:[#allocation4 + $0x34] sm:$0x1]  ;;  %v2563_v33 = vld [vmem:[#allocation4 + $0x38] sm:$0xf]  ;;  %v2564_v61 = vld [vmem:[#allocation4 + $0x3c] sm:$0x1] }
 0x20d   : > { %2106 = vrot.lane.b32.xlu1 %v7399_v13, %s10508_s15  ;;  %v2624_v49 = vsel %vm8603_vm12, %v2619_v63, %v2623_v53  ;;  %v7451_v19 = vcombine.low %v2761_v57, %v2765_v0  ;;  %v2182_v21 = vsel %vm8539_vm9, %v7408_v15, %v2181_v3  ;;  %v2330_v56 = vshrl.u32 %v2265_v51, 16  ;;  %v8087_v4 = vld [vmem:[#allocation4 + $0x38] ss:$8 sps:$4 sm:$0xff]   ;;  %v1974_v47 = vld [vmem:[#allocation4 + $0x30] sm:$0xf] }
 0x20e   : > { %v7438_v23 = vcombine.low %v2610_v42, %v2624_v49  ;;  %v7412_v24 = vcombine.low %v2178_v9, %v2182_v21  ;;  %v2333_v25 = vshll.u32 %v2265_v51, 16  ;;  %v2339_v27 = vshll.u32 %v2266_v17, 16  ;;  %v1975_v52 = vld [vmem:[#allocation4 + $0x34] sm:$0x1]  ;;  %v1976_v5 = vld [vmem:[#allocation4 + $0x38] sm:$0xf] }
 0x20f   : > { %v2332_v30 = vrot.slane %v2330_v56, 4  ;;  %v2344_v31 = vshrl.u32 %v2267_v37, 16  ;;  %v2347_v32 = vshll.u32 %v2267_v37, 16  ;;  %v2353_v38 = vshll.u32 %v2268_v18, 16  ;;  %v9063_v13 = vld [vmem:[#allocation4 + $0x4c] sm:$0x1] }
 0x210   : > { %2695 = vrot.lane.b32.xlu0 %v7438_v23, %s10432_s24  ;;  %v2335_v35 = vrot.slane %v2333_v25, 5  ;;  %v2341_v36 = vrot.slane %v2339_v27, 5  ;;  %v2626_v39 = vshrl.u32 %v2561_v16, 16  ;;  %v2629_v40 = vshll.u32 %v2561_v16, 16  ;;  %v1977_v3 = vld [vmem:[#allocation4 + $0x3c] sm:$0x1] }
 0x211   : > { %2790 = vrot.lane.b32.xlu1 %v7451_v19, %s10505_s16  ;;  %v2346_v44 = vrot.slane %v2344_v31, 4  ;;  %v2349_v41 = vrot.slane %v2347_v32, 5  ;;  %v2355_v45 = vrot.slane %v2353_v38, 5  ;;  %v2635_v46 = vshll.u32 %v2562_v29, 16  ;;  %v2426_v37 = vld [vmem:[#allocation4 + $0x38] sm:$0xe] }
 0x212   : > { %v2336_v48 = vor.u32 %v2335_v35, %v2332_v30  ;;  %v2628_v6 = vrot.slane %v2626_v39, 4  ;;  %v2631_v55 = vrot.slane %v2629_v40, 5  ;;  %v2640_v50 = vshrl.u32 %v2563_v33, 16  ;;  %v2427_v18 = vld [vmem:[#allocation4 + $0x3c] sm:$0x1] }
 0x213   : > { %v2350_v53 = vor.u32 %v2349_v41, %v2346_v44  ;;  %v2637_v54 = vrot.slane %v2635_v46, 5  ;;  %v2643_v2 = vshll.u32 %v2563_v33, 16  ;;  %v2649_v58 = vshll.u32 %v2564_v61, 16  ;;  %v2428_v56 = vld [vmem:[#allocation4 + $0x40] sm:$0xe] }
 0x214   : > { %2246 = vrot.lane.b32.xlu0 %v8087_v4, %s10509_s30  ;;  %v2337_v60 = vrot.slane %v2336_v48, 4  ;;  %v2632_v62 = vor.u32 %v2631_v55, %v2628_v6  ;;  %v2642_v1 = vrot.slane %v2640_v50, 4  ;;  %v2063_v7 = vshrl.u32 %v1974_v47, 16  ;;  %v2429_v16 = vld [vmem:[#allocation4 + $0x44] sm:$0x1] }
 0x215   : > { %2201 = vrot.lane.b32.xlu1 %v7412_v24, %s10503_s25  ;;  %v2351_v8 = vrot.slane %v2350_v53, 4  ;;  %v2645_v11 = vrot.slane %v2643_v2, 5  ;;  %v2651_v12 = vrot.slane %v2649_v58, 5  ;;  %v2066_v14 = vshll.u32 %v1974_v47, 16  ;;  %v2269_v30 = vld [vmem:[#allocation4 + $0x38] sm:$0xf] }
 0x216   : > { %v2342_v63 = vsel %vm8603_vm12, %v2337_v60, %v2341_v36  ;;  %v2633_v15 = vrot.slane %v2632_v62, 4  ;;  %v2065_v51 = vrot.slane %v2063_v7, 4  ;;  %v2072_v42 = vshll.u32 %v1975_v52, 16  ;;  %v2270_v4 = vld [vmem:[#allocation4 + $0x3c] sm:$0x1] }
 0x217   : > { %v2356_v57 = vsel %vm8603_vm12, %v2351_v8, %v2355_v45  ;;  %v2646_v0 = vor.u32 %v2645_v11, %v2642_v1  ;;  %v2068_v9 = vrot.slane %v2066_v14, 5  ;;  %v2077_v17 = vshrl.u32 %v1976_v5, 16  ;;  %v2271_v40 = vld [vmem:[#allocation4 + $0x40] sm:$0xf]  ;;  %v2272_v46 = vld [vmem:[#allocation4 + $0x44] sm:$0x1] }
 0x218   : > { %v7419_v49 = vcombine.low %v2342_v63, %v2356_v57  ;;  %v2638_v19 = vsel %vm8603_vm12, %v2633_v15, %v2637_v54  ;;  %v2080_v21 = vshll.u32 %v1976_v5, 16  ;;  %v2677_v23 = vshll.u32 %v9063_v13, 16  ;;  %v2565_v50 = vld [vmem:[#allocation4 + $0x40] sm:$0xf]  ;;  %v2724_v60 = vld [vmem:[#allocation4 + $0x48] sm:$0xe] }
 0x219   : > { %v2647_v24 = vrot.slane %v2646_v0, 4  ;;  %v2069_v25 = vor.u32 %v2068_v9, %v2065_v51  ;;  %v2079_v27 = vrot.slane %v2077_v17, 4  ;;  %v2086_v29 = vshll.u32 %v1977_v3, 16  ;;  %v2566_v8 = vld [vmem:[#allocation4 + $0x44] sm:$0x1] }
 0x21a   : > { %2401 = vrot.lane.b32.xlu0 %v7419_v49, %s10506_s12  ;;  %v2074_v31 = vrot.slane %v2072_v42, 5  ;;  %v2082_v32 = vrot.slane %v2080_v21, 5  ;;  %v7427_v38 = vrot.slane %v2426_v37, 9  ;;  %v2472_v33 = vrot.slane %v2427_v18, 5  ;;  %v8088_v34 = vld [vmem:[#allocation4 + $0x40] ss:$8 sps:$4 sm:$0xff]  }
 0x21b   : > { %v2652_v35 = vsel %vm8603_vm12, %v2647_v24, %v2651_v12  ;;  %v2070_v36 = vrot.slane %v2069_v25, 4  ;;  %v7428_v61 = vrot.slane %v2428_v56, 9  ;;  %v2476_v39 = vrot.slane %v2429_v16, 5  ;;  %v2722_v3 = vld [vmem:[#allocation4 + $0x40] sm:$0xe] }
 0x21c   : > { %v7439_v44 = vcombine.low %v2638_v19, %v2652_v35  ;;  %v2083_v41 = vor.u32 %v2082_v32, %v2079_v27  ;;  %v2088_v45 = vrot.slane %v2086_v29, 5  ;;  %v2358_v47 = vshrl.u32 %v2269_v30, 16  ;;  %v2725_v51 = vld [vmem:[#allocation4 + $0x4c] sm:$0x1]  ;;  %v2723_v17 = vld [vmem:[#allocation4 + $0x44] sm:$0x1] }
 0x21d   : > { %v2473_v48 = vsel %vm8539_vm9, %v7427_v38, %v2472_v33  ;;  %v2361_v6 = vshll.u32 %v2269_v30, 16  ;;  %v2367_v55 = vshll.u32 %v2270_v4, 16  ;;  %v2675_v52 = vrot.slane %v2674_v26, 4  ;;  %v8102_v21 = vld [vmem:[%s10499_s3 + $0x68] ss:$0 sps:$4 sm:$0xff]   ;;  %s10514_s3 = smov 112  }
 0x21e   : > { %2697 = vrot.lane.b32.xlu1 %v7439_v44, %s10432_s24  ;;  %v2075_v53 = vsel %vm8603_vm12, %v2070_v36, %v2074_v31  ;;  %v2084_v54 = vrot.slane %v2083_v41, 4  ;;  %v2360_v2 = vrot.slane %v2358_v47, 4  ;;  %v2372_v58 = vshrl.u32 %v2271_v40, 16  ;;  %s10517_s24 = smov 8  }
 0x21f   : > { %v2477_v62 = vsel %vm8539_vm9, %v7428_v61, %v2476_v39  ;;  %v2363_v1 = vrot.slane %v2361_v6, 5  ;;  %v2375_v5 = vshll.u32 %v2271_v40, 16  ;;  %v2381_v7 = vshll.u32 %v2272_v46, 16 }
 0x220   : > { %v2089_v43 = vsel %vm8603_vm12, %v2084_v54, %v2088_v45  ;;  %v2374_v26 = vrot.slane %v2372_v58, 4  ;;  %v2654_v11 = vshrl.u32 %v2565_v50, 16  ;;  %v2657_v12 = vshll.u32 %v2565_v50, 16 }
 0x221   : > { %v7400_v14 = vcombine.low %v2075_v53, %v2089_v43  ;;  %v2364_v13 = vor.u32 %v2363_v1, %v2360_v2  ;;  %v2369_v63 = vrot.slane %v2367_v55, 5  ;;  %v2377_v15 = vrot.slane %v2375_v5, 5  ;;  %v2803_v43 = vld [vmem:[#allocation2] sm:$0xff] }
 0x222   : > { %2542 = vrot.lane.b32.xlu1 %v8088_v34, %s10504_s29  ;;  %v2656_v42 = vrot.slane %v2654_v11, 4  ;;  %v2659_v57 = vrot.slane %v2657_v12, 5  ;;  %v2663_v0 = vshll.u32 %v2566_v8, 16  ;;  %v2679_v9 = vrot.slane %v2677_v23, 5 }
 0x223   : > { %2108 = vrot.lane.b32.xlu0 %v7400_v14, %s10508_s15  ;;  %v2365_v37 = vrot.slane %v2364_v13, 4  ;;  %v2378_v18 = vor.u32 %v2377_v15, %v2374_v26  ;;  %v2383_v49 = vrot.slane %v2381_v7, 5  ;;  %v7448_v19 = vrot.slane %v2724_v60, 9 }
 0x224   : > { %v7432_v56 = vcombine.low %v2473_v48, %v2477_v62  ;;  %v2660_v16 = vor.u32 %v2659_v57, %v2656_v42  ;;  %v2665_v24 = vrot.slane %v2663_v0, 5  ;;  %v2772_v25 = vrot.slane %v2725_v51, 5  ;;  %v2805_v57 = vld [vmem:[#allocation2 + $0x20] sm:$0xff] }
 0x225   : > { %v2370_v27 = vsel %vm8603_vm12, %v2365_v37, %v2369_v63  ;;  %v2379_v29 = vrot.slane %v2378_v18, 4  ;;  %v7447_v23 = vrot.slane %v2722_v3, 9  ;;  %v2768_v30 = vrot.slane %v2723_v17, 5 }
 0x226   : > { %v2661_v31 = vrot.slane %v2660_v16, 4  ;;  %v2680_v32 = vsel %vm8603_vm12, %v2675_v52, %v2679_v9  ;;  %v2941_v33 = vsel %vm2939_vm7, %v8102_v21, 0  ;;  %v2773_v39 = vsel %vm8539_vm9, %v7448_v19, %v2772_v25  ;;  %v9152_v25 = vld [vmem:[%s10512_s4] ss:$0 sm:$0xff]  ;;  %s10438_s4 = smov 104  }
 0x227   : > { %2496 = vrot.lane.b32.xlu0 %v7432_v56, %s10510_s0  ;;  %v2384_v38 = vsel %vm8603_vm12, %v2379_v29, %v2383_v49  ;;  %2970 = vmatpush1.bf16.msra.mxu1 %v2941_v33  ;;  %v2769_v61 = vsel %vm8539_vm9, %v7447_v23, %v2768_v30  ;;  %vm10450_vm14 = vcmask 589312   ;;  %vm10449_vm3 = vcmask 654912   ;;  %v2807_v49 = vld [vmem:[#allocation2 + $0x40] sm:$0xff] }
 0x228   : > { %v7420_v4 = vcombine.low %v2370_v27, %v2384_v38  ;;  %v2666_v35 = vsel %vm8603_vm12, %v2661_v31, %v2665_v24  ;;  %v7452_v40 = vcombine.low %v2769_v61, %v2773_v39  ;;  %vm10437_vm5 = vcmask 720512   ;;  %v2809_v24 = vld [vmem:[#allocation2 + $0x60] sm:$0xff] }
 0x229   : > { %v7440_v36 = vcombine.low %v2666_v35, %v2680_v32  ;;  %vm2926_vm6 = vcmask 719872  }
 0x22a   : > { %2403 = vrot.lane.b32.xlu1 %v7420_v4, %s10506_s12 }
 0x22b   : > { %2699 = vrot.lane.b32.xlu0 %v7440_v36, %s10511_s22 }
 0x22e   : > { %2792 = vrot.lane.b32.xlu1 %v7452_v40, %s10505_s16 }
 0x23d   : > { %v1946_v44 = vpop.permute.xlu0 %1945 }
 0x23e   : > { %1958 = vst.msk [vmem:[#allocation2 + $0x8] sm:$0xff] %vm10463_vm8, %v1946_v44 }
 0x23f   : > { %v2241_v41 = vpop.permute.xlu1 %2240 }
 0x244   : > { %v2196_v45 = vpop.permute.xlu0 %2195 }
 0x246   : > { %v2491_v46 = vpop.permute.xlu1 %2490 }
 0x248   : > { %v2537_v47 = vpop.permute.xlu0 %2536 }
 0x24c   : > { %v1948_v48 = vpop.permute.xlu0 %1947 }
 0x24d   : > { %v2103_v6 = vpop.permute.xlu1 %2102  ;;  %1959 = vst.msk [vmem:[#allocation2 + $0x28] sm:$0xff] %vm10463_vm8, %v1948_v48 }
 0x24e   : > { %2115 = vst.msk [vmem:[#allocation2 + $0x8] sm:$0xff] %vm10460_vm10, %v2103_v6  ;;  %v3136_v6 = vld [vmem:[#allocation4 + $0x8] sm:$0xf] }
 0x24f   : > { %2208 = vst.msk [vmem:[#allocation2 + $0x8] sm:$0xff] %vm10464_vm11, %v2196_v45 }
 0x250   : > { %2253 = vst.msk [vmem:[#allocation2 + $0x8] sm:$0xff] %vm10466_vm15, %v2241_v41  ;;  %v2243_v50 = vpop.permute.xlu0 %2242 }
 0x251   : > { %v2787_v55 = vpop.permute.xlu1 %2786 }
 0x255   : > { %v2198_v52 = vpop.permute.xlu1 %2197 }
 0x25c   : > { %v2539_v54 = vpop.permute.xlu1 %2538 }
 0x25d   : > { %v2398_v53 = vpop.permute.xlu0 %2397 }
 0x25e   : > { %2410 = vst.msk [vmem:[#allocation2 + $0x8] sm:$0xff] %vm10456_vm2, %v2398_v53 }
 0x25f   : > { %2503 = vst.msk [vmem:[#allocation2 + $0x8] sm:$0xff] %vm10451_vm4, %v2491_v46 }
 0x260   : > { %2549 = vst.msk [vmem:[#allocation2 + $0x8] sm:$0xff] %vm10450_vm14, %v2537_v47  ;;  %v1950_v58 = vpop.permute.xlu1 %1949 }
 0x261   : > { %v2493_v2 = vpop.permute.xlu0 %2492  ;;  %1960 = vst.msk [vmem:[#allocation2 + $0x48] sm:$0xff] %vm10463_vm8, %v1950_v58  ;;  %v3142_v58 = vld [vmem:[#allocation4 + $0x10] sm:$0xf] }
 0x265   : > { %v2105_v60 = vpop.permute.xlu0 %2104 }
 0x266   : > { %2116 = vst.msk [vmem:[#allocation2 + $0x28] sm:$0xff] %vm10460_vm10, %v2105_v60  ;;  %v3145_v60 = vld [vmem:[#allocation4 + $0x14] sm:$0x1] }
 0x267   : > { %2209 = vst.msk [vmem:[#allocation2 + $0x28] sm:$0xff] %vm10464_vm11, %v2198_v52 }
 0x268   : > { %2254 = vst.msk [vmem:[#allocation2 + $0x28] sm:$0xff] %vm10466_vm15, %v2243_v50  ;;  %v2694_v62 = vpop.permute.xlu1 %2693  ;;  %v3229_v50 = vld [vmem:[#allocation4] sm:$0xf] }
 0x269   : > { %2706 = vst.msk [vmem:[#allocation2 + $0x8] sm:$0xff] %vm10449_vm3, %v2694_v62  ;;  %v2789_v1 = vpop.permute.xlu0 %2788  ;;  %v8115_v62 = vld [vmem:[%s10513_s5 + $0x40] sm:$0xff]  }
 0x26a   : > { %2799 = vst.msk [vmem:[#allocation2 + $0x8] sm:$0xff] %vm10437_vm5, %v2787_v55  ;;  %v3139_v55 = vld [vmem:[#allocation4 + $0xc] sm:$0x1]  ;;  %7806 = vmatprep.subr.bf16.mxu0 %v8115_v62 }
 0x26c   : > { %v2245_v5 = vpop.permute.xlu1 %2244 }
 0x26d   : > { %v2200_v7 = vpop.permute.xlu0 %2199 }
 0x271   : > { %v2804_v8 = vld [vmem:[#allocation2 + $0x8] sm:$0xff] }
 0x272   : > { %7468 = vmatprep.mubr.msk.bf16.mxu1 %vm2926_vm6, %v2804_v8 }
 0x273   : > { %2976 = vmatmul.mubr.bf16.vlgmr.msra.gmra.mrb[0].mxu1 %v2803_v43  ;;  %v3386_v43 = vld [vmem:[#allocation4] sm:$0xe] }
 0x276   : > { %v2541_v26 = vpop.permute.xlu0 %2540 }
 0x277   : > { %v2400_v34 = vpop.permute.xlu1 %2399 }
 0x278   : > { %2411 = vst.msk [vmem:[#allocation2 + $0x28] sm:$0xff] %vm10456_vm2, %v2400_v34  ;;  %v3246_v34 = vshrl.u32 %v3229_v50, 16 }
 0x279   : > { %2504 = vst.msk [vmem:[#allocation2 + $0x28] sm:$0xff] %vm10451_vm4, %v2493_v2 }
 0x27a   : > { %2550 = vst.msk [vmem:[#allocation2 + $0x28] sm:$0xff] %vm10450_vm14, %v2539_v54  ;;  %v1952_v12 = vpop.permute.xlu0 %1951 }
 0x27b   : > { %v2495_v11 = vpop.permute.xlu1 %2494  ;;  %1961 = vst.msk [vmem:[#allocation2 + $0x68] sm:$0xff] %vm10463_vm8, %v1952_v12  ;;  %v3249_v12 = vshll.u32 %v3229_v50, 16 }
 0x27f   : > { %v2107_v14 = vpop.permute.xlu1 %2106 }
 0x280   : > { %2117 = vst.msk [vmem:[#allocation2 + $0x48] sm:$0xff] %vm10460_vm10, %v2107_v14  ;;  %v3825_v14 = vld [vmem:[#allocation4 + $0x48] sm:$0xf] }
 0x281   : > { %2210 = vst.msk [vmem:[#allocation2 + $0x48] sm:$0xff] %vm10464_vm11, %v2200_v7 }
 0x282   : > { %2255 = vst.msk [vmem:[#allocation2 + $0x48] sm:$0xff] %vm10466_vm15, %v2245_v5  ;;  %v2696_v13 = vpop.permute.xlu0 %2695  ;;  %v8117_v5 = vld [vmem:[%s10513_s5 + $0x48] sm:$0xff]  }
 0x283   : > { %2707 = vst.msk [vmem:[#allocation2 + $0x28] sm:$0xff] %vm10449_vm3, %v2696_v13  ;;  %v2791_v63 = vpop.permute.xlu1 %2790  ;;  %v8118_v13 = vld [vmem:[%s10513_s5 + $0x8] sm:$0xff]  }
 0x284   : > { %2800 = vst.msk [vmem:[#allocation2 + $0x28] sm:$0xff] %vm10437_vm5, %v2789_v1  ;;  %v8116_v1 = vld [vmem:[%s10513_s5] sm:$0xff]  }
 0x285   : > { %7807 = vmatpush3.bf16.msra.mxu0 %v8116_v1 }
 0x286   : > { %v2247_v15 = vpop.permute.xlu0 %2246  ;;  %7808 = vmatprep.subr.bf16.mxu0 %v8117_v5 }
 0x287   : > { %v2202_v3 = vpop.permute.xlu1 %2201 }
 0x289   : > { %7809 = vmatpush3.bf16.msra.mxu0 %v8118_v13 }
 0x28b   : > { %v2806_v51 = vld [vmem:[#allocation2 + $0x28] sm:$0xff] }
 0x28c   : > { %v2402_v42 = vpop.permute.xlu0 %2401  ;;  %7469 = vmatprep.mubr.msk.bf16.mxu1 %vm2926_vm6, %v2806_v51  ;;  %v3248_v51 = vrot.slane %v3246_v34, 4 }
 0x28d   : > { %2412 = vst.msk [vmem:[#allocation2 + $0x48] sm:$0xff] %vm10456_vm2, %v2402_v42  ;;  %2984 = vmatmul.mubr.bf16.gmra.mrb[4].mxu1 %v2805_v57  ;;  %v3251_v57 = vrot.slane %v3249_v12, 5 }
 0x28e   : > { %2505 = vst.msk [vmem:[#allocation2 + $0x48] sm:$0xff] %vm10451_vm4, %v2495_v11  ;;  %v3230_v11 = vld [vmem:[#allocation4 + $0x4] sm:$0x1] }
 0x28f   : > { %2551 = vst.msk [vmem:[#allocation2 + $0x48] sm:$0xff] %vm10450_vm14, %v2541_v26  ;;  %v3387_v26 = vld [vmem:[#allocation4 + $0x4] sm:$0x1]  ;;  %v3255_v42 = vshll.u32 %v3230_v11, 16 }
 0x290   : > { %v2698_v0 = vpop.permute.xlu1 %2697 }
 0x291   : > { %2708 = vst.msk [vmem:[#allocation2 + $0x48] sm:$0xff] %vm10449_vm3, %v2698_v0  ;;  %v3826_v0 = vld [vmem:[#allocation4 + $0x4c] sm:$0x1] }
 0x292   : > { %2801 = vst.msk [vmem:[#allocation2 + $0x48] sm:$0xff] %vm10437_vm5, %v2791_v63  ;;  %v8119_v63 = vld [vmem:[%s10513_s5 + $0x50] sm:$0xff]  }
 0x293   : > { %7810 = vmatprep.subr.bf16.mxu0 %v8119_v63 }
 0x294   : > { %v2543_v17 = vpop.permute.xlu1 %2542 }
 0x295   : > { %v2109_v9 = vpop.permute.xlu0 %2108 }
 0x296   : > { %2118 = vst.msk [vmem:[#allocation2 + $0x68] sm:$0xff] %vm10460_vm10, %v2109_v9  ;;  %v3926_v9 = vshrl.u32 %v3825_v14, 16 }
 0x297   : > { %2211 = vst.msk [vmem:[#allocation2 + $0x68] sm:$0xff] %vm10464_vm11, %v2202_v3  ;;  %v3420_v3 = vrot.slane %v3387_v26, 5 }
 0x298   : > { %2256 = vst.msk [vmem:[#allocation2 + $0x68] sm:$0xff] %vm10466_vm15, %v2247_v15  ;;  %v7488_v15 = vrot.slane %v3386_v43, 9 }
 0x299   : > { %v2497_v37 = vpop.permute.xlu0 %2496  ;;  %v2808_v18 = vld [vmem:[#allocation2 + $0x48] sm:$0xff] }
 0x29a   : > { %7470 = vmatprep.mubr.msk.bf16.mxu1 %vm2926_vm6, %v2808_v18 }
 0x29b   : > { %2992 = vmatmul.mubr.bf16.gmra.mrb[8].mxu1 %v2807_v49 }
 0x29c   : > { %v2404_v19 = vpop.permute.xlu1 %2403 }
 0x29d   : > { %2413 = vst.msk [vmem:[#allocation2 + $0x68] sm:$0xff] %vm10456_vm2, %v2404_v19  ;;  %v2700_v21 = vpop.permute.xlu0 %2699  ;;  %vm4222_vm2 = vcmask 261120  }
 0x29e   : > { %2506 = vst.msk [vmem:[#allocation2 + $0x68] sm:$0xff] %vm10451_vm4, %v2497_v37  ;;  %v8120_v37 = vld [vmem:[%s10513_s5 + $0x10] sm:$0xff]   ;;  %vm10462_vm4 = vcmask 982912  }
 0x29f   : > { %2552 = vst.msk [vmem:[#allocation2 + $0x68] sm:$0xff] %vm10450_vm14, %v2543_v17  ;;  %v3929_v17 = vshll.u32 %v3825_v14, 16  ;;  %7811 = vmatpush3.bf16.msra.mxu0 %v8120_v37  ;;  %vm3474_vm14 = vcmask 917312  }
 0x2a0   : > { %2709 = vst.msk [vmem:[#allocation2 + $0x68] sm:$0xff] %vm10449_vm3, %v2700_v21  ;;  %v2793_v56 = vpop.permute.xlu1 %2792  ;;  %vm3381_vm3 = vcmask 851712  }
 0x2a1   : > { %2802 = vst.msk [vmem:[#allocation2 + $0x68] sm:$0xff] %vm10437_vm5, %v2793_v56 }
 0x2a8   : > { %v2810_v16 = vld [vmem:[#allocation2 + $0x68] sm:$0xff] }
 0x2a9   : > { %7471 = vmatprep.mubr.msk.bf16.mxu1 %vm2926_vm6, %v2810_v16  ;;  %v3421_v16 = vsel %vm8539_vm9, %v7488_v15, %v3420_v3 }
 0x2aa   : > { %3000 = vmatmul.mubr.bf16.gmra.mrb[12].mxu1 %v2809_v24 }
 0x346   : > { %v2977_v27 = vpop.f32.mrb[0].mxu1 }
 0x347   : > { %v2978_v29 = vadd.f32 %v9152_v25, %v2977_v27  ;;  %v2979_v23 = vpop.f32.mrb[1].mxu1 }
 0x348   : > { %v2980_v30 = vpop.f32.mrb[2].mxu1  ;;  %v3935_v23 = vshll.u32 %v3826_v0, 16 }
 0x349   : > { %vm3008_vm13 = vcmp.ge.f32.partialorder %v2978_v29, 0.0  ;;  %v3016_v31 = vmul.f32 0.2, %v2978_v29  ;;  %v2981_v32 = vadd.f32 %v9152_v25, %v2980_v30  ;;  %v2982_v38 = vpop.f32.mrb[3].mxu1 }
 0x34b   : > { %v3024_v33 = vsel %vm3008_vm13, %v2978_v29, %v3016_v31  ;;  %vm3009_vm5 = vcmp.ge.f32.partialorder %v2981_v32, 0.0  ;;  %v3017_v4 = vmul.f32 0.2, %v2981_v32  ;;  %v3252_v29 = vor.u32 %v3251_v57, %v3248_v51 }
 0x34c   : > { %v7781_v35 = vpack.c.bf16 %v3024_v33, %v3024_v33  ;;  %v3928_v33 = vrot.slane %v3926_v9, 4 }
 0x34d   : > { %v3025_v36 = vsel %vm3009_vm5, %v2981_v32, %v3017_v4  ;;  %v3931_v4 = vrot.slane %v3929_v17, 5 }
 0x34e   : > { %v3057_v61 = vshrl.u32 %v7781_v35, 16  ;;  %v7782_v39 = vpack.c.bf16 %v3025_v36, %v3025_v36  ;;  %v3060_v44 = vshll.u32 %v7781_v35, 16 }
 0x350   : > { %v3059_v40 = vrot.slane %v3057_v61, 7  ;;  %v3065_v41 = vshrl.u32 %v7782_v39, 16  ;;  %v3068_v48 = vshll.u32 %v7782_v39, 16 }
 0x352   : > { %v3062_v45 = vor.u32 %v3060_v44, %v3059_v40  ;;  %v3063_v46 = vrot.slane %v3059_v40, 4  ;;  %v3067_v47 = vrot.slane %v3065_v41, 7  ;;  %v9189_v44 = vrot.slane %v3255_v42, 5 }
 0x354   : > { %v3137_v52 = vsel %vm8871_vm1, %v3062_v45, %v3136_v6  ;;  %v3140_v53 = vsel %vm8754_vm0, %v3063_v46, %v3139_v55  ;;  %v3070_v54 = vor.u32 %v3068_v48, %v3067_v47  ;;  %v3071_v2 = vrot.slane %v3067_v47, 4 }
 0x355   : > { %3141 = vst [vmem:[#allocation4 + $0xc] sm:$0x1] %v3140_v53  ;;  %3138 = vst [vmem:[#allocation4 + $0x8] sm:$0xf] %v3137_v52 }
 0x356   : > { %v3143_v7 = vsel %vm8871_vm1, %v3070_v54, %v3142_v58  ;;  %v3146_v8 = vsel %vm8754_vm0, %v3071_v2, %v3145_v60  ;;  %v9193_v54 = vrot.slane %v3252_v29, 4  ;;  %v3932_v2 = vor.u32 %v3931_v4, %v3928_v33  ;;  %v9197_v60 = vld [vmem:[#allocation4 + $0x48] sm:$0xe]  ;;  %v3154_v4 = vld [vmem:[#allocation4 + $0x20] sm:$0xf] }
 0x357   : > { %3144 = vst [vmem:[#allocation4 + $0x10] sm:$0xf] %v3143_v7  ;;  %3147 = vst [vmem:[#allocation4 + $0x14] sm:$0x1] %v3146_v8  ;;  %v9195_v58 = vrot.slane %v3935_v23, 5  ;;  %v7535_v3 = vrot.slane %v9197_v60, 9 }
 0x358   : > { %v9199_v7 = vld [vmem:[#allocation4 + $0x4c] sm:$0x1]  ;;  %v9211_v9 = vrot.slane %v3932_v2, 4 }
 0x359   : > { %v4029_v51 = vrot.slane %v9199_v7, 5  ;;  %v8121_v29 = vld [vmem:[%s10513_s5 + $0x58] sm:$0xff]  }
 0x35a   : > { %v8122_v23 = vld [vmem:[%s10513_s5 + $0x18] sm:$0xff]   ;;  %7812 = vmatprep.subr.bf16.mxu0 %v8121_v29 }
 0x35b   : > { %7813 = vmatpush3.bf16.msra.mxu0 %v8122_v23 }
 0x35c   : > { %v8103_v18 = vld [vmem:[#allocation4] ss:$8 sps:$4 sm:$0xff]   ;;  %v3389_v19 = vld [vmem:[#allocation4 + $0xc] sm:$0x1] }
 0x35d   : > { %v3388_v49 = vld [vmem:[#allocation4 + $0x8] sm:$0xe]  ;;  %3212 = vrot.lane.b32.xlu0 %v8103_v18, %s10444_s2  ;;  %v3424_v27 = vrot.slane %v3389_v19, 5  ;;  %v3525_v39 = vld [vmem:[#allocation4 + $0xc] sm:$0x1] }
 0x35e   : > { %v3524_v21 = vld [vmem:[#allocation4 + $0x8] sm:$0xf]  ;;  %v7489_v24 = vrot.slane %v3388_v49, 9  ;;  %v3526_v32 = vld [vmem:[#allocation4 + $0x10] sm:$0xf]  ;;  %v3550_v5 = vshll.u32 %v3525_v39, 16 }
 0x35f   : > { %v8104_v56 = vld [vmem:[#allocation4 + $0x8] ss:$8 sps:$4 sm:$0xff]   ;;  %v3541_v38 = vshrl.u32 %v3524_v21, 16  ;;  %v3544_v40 = vshll.u32 %v3524_v21, 16  ;;  %v3527_v45 = vld [vmem:[#allocation4 + $0x14] sm:$0x1] }
 0x360   : > { %v2985_v30 = vpop.f32.mrb[4].mxu1  ;;  %3507 = vrot.lane.b32.xlu1 %v8104_v56, %s10514_s3  ;;  %v3425_v31 = vsel %vm8539_vm9, %v7489_v24, %v3424_v27  ;;  %v3555_v47 = vshrl.u32 %v3526_v32, 16  ;;  %v3558_v48 = vshll.u32 %v3526_v32, 16  ;;  %v3231_v53 = vld [vmem:[#allocation4 + $0x8] sm:$0xf]  ;;  %v3564_v26 = vshll.u32 %v3527_v45, 16 }
 0x361   : > { %v2986_v35 = vadd.f32 %v9152_v25, %v2985_v30  ;;  %v2987_v36 = vpop.f32.mrb[5].mxu1  ;;  %v7496_v61 = vcombine.low %v3421_v16, %v3425_v31  ;;  %v3543_v46 = vrot.slane %v3541_v38, 4  ;;  %v3546_v52 = vrot.slane %v3544_v40, 5  ;;  %v3232_v57 = vld [vmem:[#allocation4 + $0xc] sm:$0x1] }
 0x362   : > { %v2988_v41 = vpop.f32.mrb[6].mxu1  ;;  %v9201_v43 = vrot.slane %v3555_v47, 4  ;;  %v9203_v34 = vrot.slane %v3558_v48, 5  ;;  %v3260_v14 = vshrl.u32 %v3231_v53, 16  ;;  %v3263_v13 = vshll.u32 %v3231_v53, 16 }
 0x363   : > { %vm3010_vm13 = vcmp.ge.f32.partialorder %v2986_v35, 0.0  ;;  %v3018_v6 = vmul.f32 0.2, %v2986_v35  ;;  %v2989_v55 = vadd.f32 %v9152_v25, %v2988_v41  ;;  %v2990_v50 = vpop.f32.mrb[7].mxu1  ;;  %3462 = vrot.lane.b32.xlu0 %v7496_v61, %s10438_s4  ;;  %v3547_v12 = vor.u32 %v3546_v52, %v3543_v46  ;;  %v9209_v0 = vld [vmem:[#allocation4 + $0x10] sm:$0xe] }
 0x364   : > { %v9207_v42 = vrot.slane %v3550_v5, 5  ;;  %v9213_v49 = vrot.slane %v3564_v26, 5  ;;  %v3233_v19 = vld [vmem:[#allocation4 + $0x10] sm:$0xf]  ;;  %v3148_v21 = vld [vmem:[#allocation4 + $0x18] sm:$0xf]  ;;  %v3561_v16 = vor.u32 %v9203_v34, %v9201_v43 }
 0x365   : > { %v3026_v62 = vsel %vm3010_vm13, %v2986_v35, %v3018_v6  ;;  %vm3011_vm5 = vcmp.ge.f32.partialorder %v2989_v55, 0.0  ;;  %v3019_v1 = vmul.f32 0.2, %v2989_v55  ;;  %v9215_v56 = vrot.slane %v3547_v12, 4  ;;  %v3151_v32 = vld [vmem:[#allocation4 + $0x1c] sm:$0x1] }
 0x366   : > { %v7783_v8 = vpack.c.bf16 %v3026_v62, %v3026_v62  ;;  %v9219_v24 = vrot.slane %v3260_v14, 4  ;;  %v3265_v27 = vrot.slane %v3263_v13, 5  ;;  %v3269_v35 = vshll.u32 %v3232_v57, 16  ;;  %v3157_v47 = vld [vmem:[#allocation4 + $0x24] sm:$0x1]  ;;  %v8123_v62 = vld [vmem:[%s10513_s5 + $0x60] sm:$0xff]  }
 0x367   : > { %v3027_v11 = vsel %vm3011_vm5, %v2989_v55, %v3019_v1  ;;  %v7490_v36 = vrot.slane %v9209_v0, 9  ;;  %v3274_v61 = vshrl.u32 %v3233_v19, 16  ;;  %v3277_v39 = vshll.u32 %v3233_v19, 16  ;;  %v3234_v6 = vld [vmem:[#allocation4 + $0x14] sm:$0x1]  ;;  %7814 = vmatprep.subr.bf16.mxu0 %v8123_v62  ;;  %s10442_s4 = smov 120  }
 0x368   : > { %v3073_v63 = vshrl.u32 %v7783_v8, 16  ;;  %v7784_v15 = vpack.c.bf16 %v3027_v11, %v3027_v11  ;;  %v3076_v37 = vshll.u32 %v7783_v8, 16  ;;  %v3391_v52 = vld [vmem:[#allocation4 + $0x14] sm:$0x1]  ;;  %v3811_v2 = vld [vmem:[#allocation4 + $0x10] sm:$0xf]  ;;  %v3266_v34 = vor.u32 %v3265_v27, %v9219_v24 }
 0x369   : > { %v3276_v53 = vrot.slane %v3274_v61, 4  ;;  %v8124_v1 = vld [vmem:[%s10513_s5 + $0x20] sm:$0xff]   ;;  %v3279_v12 = vrot.slane %v3277_v39, 5  ;;  %v3562_v57 = vrot.slane %v3561_v16, 4  ;;  %v3828_v19 = vshrl.u32 %v3811_v2, 16 }
 0x36a   : > { %v3075_v17 = vrot.slane %v3073_v63, 7  ;;  %v3081_v18 = vshrl.u32 %v7784_v15, 16  ;;  %v3084_v33 = vshll.u32 %v7784_v15, 16  ;;  %v9244_v26 = vld [vmem:[#allocation4 + $0x10] sm:$0xe]  ;;  %v3283_v15 = vshll.u32 %v3234_v6, 16  ;;  %7815 = vmatpush3.bf16.msra.mxu0 %v8124_v1 }
 0x36b   : > { %v9246_v11 = vld [vmem:[#allocation4 + $0x14] sm:$0x1]  ;;  %v3831_v27 = vshll.u32 %v3811_v2, 16  ;;  %v3428_v23 = vrot.slane %v3391_v52, 5  ;;  %v3567_v39 = vsel %vm8603_vm12, %v3562_v57, %v9213_v49  ;;  %v3160_v52 = vld [vmem:[#allocation4 + $0x28] sm:$0xf]  ;;  %v3258_v62 = vsel %vm8603_vm12, %v9193_v54, %v9189_v44 }
 0x36c   : > { %v3078_v30 = vor.u32 %v3076_v37, %v3075_v17  ;;  %v3079_v31 = vrot.slane %v3075_v17, 4  ;;  %v3083_v38 = vrot.slane %v3081_v18, 7  ;;  %v9249_v17 = vrot.slane %v3269_v35, 5  ;;  %v3812_v18 = vld [vmem:[#allocation4 + $0x14] sm:$0x1] }
 0x36d   : > { %v3280_v37 = vor.u32 %v3279_v12, %v3276_v53  ;;  %v3837_v16 = vshll.u32 %v3812_v18, 16  ;;  %v3163_v53 = vld [vmem:[#allocation4 + $0x2c] sm:$0x1]  ;;  %v9277_v12 = vld [vmem:[#allocation4 + $0x8] sm:$0xe] }
 0x36e   : > { %v3149_v40 = vsel %vm8871_vm1, %v3078_v30, %v3148_v21  ;;  %v3152_v41 = vsel %vm8754_vm0, %v3079_v31, %v3151_v32  ;;  %v3086_v45 = vor.u32 %v3084_v33, %v3083_v38  ;;  %v3087_v46 = vrot.slane %v3083_v38, 4  ;;  %v2993_v48 = vpop.f32.mrb[8].mxu1 }
 0x36f   : > { %3150 = vst [vmem:[#allocation4 + $0x18] sm:$0xf] %v3149_v40  ;;  %3153 = vst [vmem:[#allocation4 + $0x1c] sm:$0x1] %v3152_v41  ;;  %v2994_v55 = vadd.f32 %v9152_v25, %v2993_v48  ;;  %v2995_v50 = vpop.f32.mrb[9].mxu1  ;;  %v7528_v30 = vrot.slane %v9244_v26, 9  ;;  %v3553_v41 = vsel %vm8603_vm12, %v9215_v56, %v9207_v42  ;;  %v9275_v56 = vsel %vm8539_vm9, %v7490_v36, %v3428_v23 }
 0x370   : > { %v3155_v5 = vsel %vm8871_vm1, %v3086_v45, %v3154_v4  ;;  %v3158_v8 = vsel %vm8754_vm0, %v3087_v46, %v3157_v47  ;;  %v2996_v43 = vpop.f32.mrb[10].mxu1  ;;  %v4001_v31 = vrot.slane %v9246_v11, 5  ;;  %v3267_v38 = vrot.slane %v3266_v34, 4 }
 0x371   : > { %3156 = vst [vmem:[#allocation4 + $0x20] sm:$0xf] %v3155_v5  ;;  %3159 = vst [vmem:[#allocation4 + $0x24] sm:$0x1] %v3158_v8  ;;  %vm3012_vm6 = vcmp.ge.f32.partialorder %v2994_v55, 0.0  ;;  %v2997_v13 = vadd.f32 %v9152_v25, %v2996_v43  ;;  %v2998_v63 = vpop.f32.mrb[11].mxu1  ;;  %v7504_v2 = vcombine.low %v3553_v41, %v3567_v39 }
 0x372   : > { %v3020_v14 = vmul.f32 0.2, %v2994_v55  ;;  %v9253_v33 = vrot.slane %v3283_v15, 5  ;;  %v9258_v40 = vrot.slane %v3280_v37, 4  ;;  %v9264_v45 = vrot.slane %v3828_v19, 4 }
 0x373   : > { %vm3013_vm13 = vcmp.ge.f32.partialorder %v2997_v13, 0.0  ;;  %v3021_v24 = vmul.f32 0.2, %v2997_v13  ;;  %v3833_v46 = vrot.slane %v3831_v27, 5  ;;  %v3272_v44 = vsel %vm8603_vm12, %v3267_v38, %v9249_v17  ;;  %v8126_v17 = vld [vmem:[%s10513_s5 + $0x28] sm:$0xff]  }
 0x374   : > { %v3028_v21 = vsel %vm3012_vm6, %v2994_v55, %v3020_v14  ;;  %v8125_v14 = vld [vmem:[%s10513_s5 + $0x68] sm:$0xff]   ;;  %v9287_v63 = vrot.slane %v3837_v16, 5  ;;  %v7484_v39 = vcombine.low %v3258_v62, %v3272_v44 }
 0x375   : > { %v7785_v29 = vpack.c.bf16 %v3028_v21, %v3028_v21  ;;  %v3029_v32 = vsel %vm3013_vm13, %v2997_v13, %v3021_v24  ;;  %v3166_v13 = vld [vmem:[#allocation4 + $0x30] sm:$0xf]  ;;  %v3834_v36 = vor.u32 %v3833_v46, %v9264_v45  ;;  %7816 = vmatprep.subr.bf16.mxu0 %v8125_v14  ;;  %v3169_v24 = vld [vmem:[#allocation4 + $0x34] sm:$0x1]  ;;  %vm10452_vm13 = vcmask 64512  }
 0x376   : > { %v7786_v35 = vpack.c.bf16 %v3029_v32, %v3029_v32  ;;  %v8105_v61 = vld [vmem:[#allocation4 + $0x10] ss:$8 sps:$4 sm:$0xff]   ;;  %v3393_v43 = vld [vmem:[#allocation4 + $0x1c] sm:$0x1]  ;;  %7817 = vmatpush3.bf16.msra.mxu0 %v8126_v17 }
 0x377   : > { %v3089_v4 = vshrl.u32 %v7785_v29, 16  ;;  %v3092_v48 = vshll.u32 %v7785_v29, 16  ;;  %3214 = vrot.lane.b32.xlu1 %v8105_v61, %s10444_s2  ;;  %v8107_v50 = vld [vmem:[#allocation4 + $0x10] ss:$8 sps:$4 sm:$0xff]   ;;  %v3432_v54 = vrot.slane %v3393_v43, 5  ;;  %v8128_v43 = vld [vmem:[%s10513_s5 + $0x70] sm:$0xff]  }
 0x378   : > { %v3097_v6 = vshrl.u32 %v7786_v35, 16  ;;  %v3100_v55 = vshll.u32 %v7786_v35, 16  ;;  %v8106_v49 = vld [vmem:[#allocation4 + $0x18] ss:$8 sps:$4 sm:$0xff]   ;;  %v3970_v19 = vld [vmem:[#allocation4 + $0x1c] sm:$0x1]  ;;  %7818 = vmatprep.subr.bf16.mxu0 %v8128_v43 }
 0x379   : > { %v3091_v47 = vrot.slane %v3089_v4, 7  ;;  %v3392_v42 = vld [vmem:[#allocation4 + $0x18] sm:$0xe]  ;;  %3509 = vrot.lane.b32.xlu0 %v8106_v49, %s10514_s3  ;;  %v4005_v32 = vrot.slane %v3970_v19, 5  ;;  %v3236_v41 = vld [vmem:[#allocation4 + $0x1c] sm:$0x1] }
 0x37a   : > { %v3099_v8 = vrot.slane %v3097_v6, 7  ;;  %v7491_v34 = vrot.slane %v3392_v42, 9  ;;  %v3969_v0 = vld [vmem:[#allocation4 + $0x18] sm:$0xe]  ;;  %v8127_v46 = vld [vmem:[%s10513_s5 + $0x80] sm:$0xff]  }
 0x37b   : > { %v3094_v1 = vor.u32 %v3092_v48, %v3091_v47  ;;  %v3095_v5 = vrot.slane %v3091_v47, 4  ;;  %3794 = vrot.lane.b32.xlu1 %v8107_v50, %s10440_s1  ;;  %v3235_v21 = vld [vmem:[#allocation4 + $0x18] sm:$0xf]  ;;  %v7529_v23 = vrot.slane %v3969_v0, 9  ;;  %v7508_v50 = vrot.slane %v9277_v12, 9  ;;  %s10515_s1 = smov 96   ;;  %7943 = vmatprep.subr.bf16.mxu1 %v8127_v46 }
 0x37c   : > { %v3102_v37 = vor.u32 %v3100_v55, %v3099_v8  ;;  %v3103_v18 = vrot.slane %v3099_v8, 4  ;;  %v3433_v29 = vsel %vm8539_vm9, %v7491_v34, %v3432_v54  ;;  %v3288_v38 = vshrl.u32 %v3235_v21, 16  ;;  %v3813_v45 = vld [vmem:[#allocation4 + $0x18] sm:$0xf]  ;;  %v3814_v42 = vld [vmem:[#allocation4 + $0x1c] sm:$0x1]  ;;  %7944 = vmatpush3.bf16.msra.mxu1 %v8127_v46 }
 0x37d   : > { %v3161_v15 = vsel %vm8871_vm1, %v3094_v1, %v3160_v52  ;;  %v3164_v57 = vsel %vm8754_vm0, %v3095_v5, %v3163_v53  ;;  %v3001_v27 = vpop.f32.mrb[12].mxu1  ;;  %3664 = vrot.lane.b32.xlu0 %v7504_v2, %s10442_s4  ;;  %v3291_v6 = vshll.u32 %v3235_v21, 16  ;;  %v9308_v55 = vrot.slane %v3834_v36, 4  ;;  %v3394_v0 = vld [vmem:[#allocation4 + $0x20] sm:$0xe]  ;;  %s10516_s4 = smov 104  }
 0x37e   : > { %3162 = vst [vmem:[#allocation4 + $0x28] sm:$0xf] %v3161_v15  ;;  %3165 = vst [vmem:[#allocation4 + $0x2c] sm:$0x1] %v3164_v57  ;;  %v3167_v16 = vsel %vm8871_vm1, %v3102_v37, %v3166_v13  ;;  %v3170_v4 = vsel %vm8754_vm0, %v3103_v18, %v3169_v24  ;;  %v3002_v35 = vadd.f32 %v9152_v25, %v3001_v27  ;;  %v3003_v61 = vpop.f32.mrb[13].mxu1  ;;  %v3290_v48 = vrot.slane %v3288_v38, 4 }
 0x37f   : > { %3168 = vst [vmem:[#allocation4 + $0x30] sm:$0xf] %v3167_v16  ;;  %3171 = vst [vmem:[#allocation4 + $0x34] sm:$0x1] %v3170_v4  ;;  %v3004_v47 = vpop.f32.mrb[14].mxu1  ;;  %3369 = vrot.lane.b32.xlu1 %v7484_v39, %s10515_s1  ;;  %v7497_v62 = vcombine.low %v9275_v56, %v3433_v29  ;;  %v4006_v2 = vsel %vm8539_vm9, %v7529_v23, %v4005_v32  ;;  %v3293_v1 = vrot.slane %v3291_v6, 5 }
 0x380   : > { %vm3014_vm5 = vcmp.ge.f32.partialorder %v3002_v35, 0.0  ;;  %v3022_v52 = vmul.f32 0.2, %v3002_v35  ;;  %v3005_v53 = vadd.f32 %v9152_v25, %v3004_v47  ;;  %v3006_v49 = vpop.f32.mrb[15].mxu1  ;;  %v3297_v5 = vshll.u32 %v3236_v41, 16  ;;  %v8129_v27 = vld [vmem:[%s10513_s5 + $0x30] sm:$0xff]  }
 0x381   : > { %v3842_v8 = vshrl.u32 %v3813_v45, 16  ;;  %v3845_v14 = vshll.u32 %v3813_v45, 16  ;;  %v3294_v44 = vor.u32 %v3293_v1, %v3290_v48  ;;  %v3851_v54 = vshll.u32 %v3814_v42, 16  ;;  %v3395_v24 = vld [vmem:[#allocation4 + $0x24] sm:$0x1]  ;;  %7819 = vmatpush3.bf16.msra.mxu0 %v8129_v27 }
 0x382   : > { %v3030_v34 = vsel %vm3014_vm5, %v3002_v35, %v3022_v52  ;;  %vm3015_vm6 = vcmp.ge.f32.partialorder %v3005_v53, 0.0  ;;  %v3023_v25 = vmul.f32 0.2, %v3005_v53  ;;  %v4002_v57 = vsel %vm8539_vm9, %v7528_v30, %v4001_v31  ;;  %v9340_v4 = vld [vmem:[#allocation4 + $0x20] sm:$0xe]  ;;  %v8130_v35 = vld [vmem:[%s10513_s5 + $0x78] sm:$0xff]  }
 0x383   : > { %v7787_v13 = vpack.c.bf16 %v3030_v34, %v3030_v34  ;;  %v3844_v56 = vrot.slane %v3842_v8, 4  ;;  %3464 = vrot.lane.b32.xlu1 %v7497_v62, %s10516_s4  ;;  %v3286_v37 = vsel %vm8603_vm12, %v9258_v40, %v9253_v33  ;;  %v3295_v21 = vrot.slane %v3294_v44, 4  ;;  %v3172_v61 = vld [vmem:[#allocation4 + $0x38] sm:$0xf]  ;;  %v3175_v39 = vld [vmem:[#allocation4 + $0x3c] sm:$0x1]  ;;  %7820 = vmatprep.subr.bf16.mxu0 %v8130_v35 }
 0x384   : > { %v3031_v36 = vsel %vm3015_vm6, %v3005_v53, %v3023_v25  ;;  %v3299_v17 = vrot.slane %v3297_v5, 5  ;;  %v7536_v29 = vcombine.low %v4002_v57, %v4006_v2  ;;  %v3840_v30 = vsel %vm8603_vm12, %v9308_v55, %v9287_v63  ;;  %v9346_v47 = vld [vmem:[#allocation4 + $0x24] sm:$0x1]  ;;  %v3528_v49 = vld [vmem:[#allocation4 + $0x18] sm:$0xf]  ;;  %v8131_v62 = vld [vmem:[%s10513_s5 + $0x38] sm:$0xff]  }
 0x385   : > { %v8108_v15 = vld [vmem:[#allocation4 + $0x20] ss:$8 sps:$4 sm:$0xff]   ;;  %v3105_v18 = vshrl.u32 %v7787_v13, 16  ;;  %v7788_v19 = vpack.c.bf16 %v3031_v36, %v3031_v36  ;;  %v3108_v11 = vshll.u32 %v7787_v13, 16  ;;  %v3847_v31 = vrot.slane %v3845_v14, 5  ;;  %v8132_v14 = vld [vmem:[%s10513_s5 + $0x88] sm:$0xff]   ;;  %7821 = vmatpush3.bf16.msra.mxu0 %v8131_v62 }
 0x386   : > { %3216 = vrot.lane.b32.xlu0 %v8108_v15, %s10444_s2  ;;  %v8109_v26 = vld [vmem:[#allocation4 + $0x20] ss:$8 sps:$4 sm:$0xff]   ;;  %v3397_v40 = vld [vmem:[#allocation4 + $0x2c] sm:$0x1]  ;;  %v3300_v38 = vsel %vm8603_vm12, %v3295_v21, %v3299_v17  ;;  %v3853_v16 = vrot.slane %v3851_v54, 5  ;;  %v7492_v45 = vrot.slane %v3394_v0, 9  ;;  %7945 = vmatprep.subr.bf16.mxu1 %v8132_v14 }
 0x387   : > { %v3396_v33 = vld [vmem:[#allocation4 + $0x28] sm:$0xe]  ;;  %v3107_v23 = vrot.slane %v3105_v18, 7  ;;  %v3113_v32 = vshrl.u32 %v7788_v19, 16  ;;  %v3116_v41 = vshll.u32 %v7788_v19, 16  ;;  %4043 = vrot.lane.b32.xlu1 %v7536_v29, %s10508_s15  ;;  %v3848_v63 = vor.u32 %v3847_v31, %v3844_v56  ;;  %7946 = vmatpush3.bf16.msra.mxu1 %v8132_v14  ;;  %s10518_s2 = smov 120  }
 0x388   : > { %v3436_v46 = vrot.slane %v3395_v24, 5  ;;  %v7493_v52 = vrot.slane %v3396_v33, 9  ;;  %v3973_v53 = vld [vmem:[#allocation4 + $0x28] sm:$0xe]  ;;  %v3178_v42 = vld [vmem:[#allocation4 + $0x40] sm:$0xf]  ;;  %v7485_v1 = vcombine.low %v3286_v37, %v3300_v38 }
 0x389   : > { %v3110_v48 = vor.u32 %v3108_v11, %v3107_v23  ;;  %v3111_v6 = vrot.slane %v3107_v23, 4  ;;  %v3115_v55 = vrot.slane %v3113_v32, 7  ;;  %v3181_v2 = vld [vmem:[#allocation4 + $0x44] sm:$0x1]  ;;  %v3849_v5 = vrot.slane %v3848_v63, 4 }
 0x38a   : > { %3796 = vrot.lane.b32.xlu0 %v8109_v26, %s10517_s24  ;;  %v3437_v8 = vsel %vm8539_vm9, %v7492_v45, %v3436_v46  ;;  %v3440_v43 = vrot.slane %v3397_v40, 5  ;;  %v3974_v34 = vld [vmem:[#allocation4 + $0x2c] sm:$0x1]  ;;  %v3529_v25 = vld [vmem:[#allocation4 + $0x1c] sm:$0x1]  ;;  %v7530_v37 = vrot.slane %v9340_v4, 9 }
 0x38b   : > { %v3173_v13 = vsel %vm8871_vm1, %v3110_v48, %v3172_v61  ;;  %v3176_v44 = vsel %vm8754_vm0, %v3111_v6, %v3175_v39  ;;  %v3118_v56 = vor.u32 %v3116_v41, %v3115_v55  ;;  %v3119_v54 = vrot.slane %v3115_v55, 4  ;;  %v3530_v0 = vld [vmem:[#allocation4 + $0x20] sm:$0xf]  ;;  %v3531_v36 = vld [vmem:[#allocation4 + $0x24] sm:$0x1] }
 0x38c   : > { %3174 = vst [vmem:[#allocation4 + $0x38] sm:$0xf] %v3173_v13  ;;  %3177 = vst [vmem:[#allocation4 + $0x3c] sm:$0x1] %v3176_v44  ;;  %v3854_v15 = vsel %vm8603_vm12, %v3849_v5, %v3853_v16  ;;  %v3441_v57 = vsel %vm8539_vm9, %v7493_v52, %v3440_v43  ;;  %v7531_v18 = vrot.slane %v3973_v53, 9  ;;  %v4009_v24 = vrot.slane %v9346_v47, 5 }
 0x38d   : > { %v3179_v19 = vsel %vm8871_vm1, %v3118_v56, %v3178_v42  ;;  %v3182_v21 = vsel %vm8754_vm0, %v3119_v54, %v3181_v2  ;;  %v7524_v17 = vcombine.low %v3840_v30, %v3854_v15  ;;  %v3815_v27 = vld [vmem:[#allocation4 + $0x20] sm:$0xf]  ;;  %v7498_v11 = vcombine.low %v3437_v8, %v3441_v57  ;;  %v8110_v38 = vld [vmem:[#allocation4 + $0x28] ss:$8 sps:$4 sm:$0xff]   ;;  %v3816_v41 = vld [vmem:[#allocation4 + $0x24] sm:$0x1] }
 0x38e   : > { %3183 = vst [vmem:[#allocation4 + $0x44] sm:$0x1] %v3182_v21  ;;  %3180 = vst [vmem:[#allocation4 + $0x40] sm:$0xf] %v3179_v19  ;;  %3371 = vrot.lane.b32.xlu0 %v7485_v1, %s10515_s1  ;;  %v4013_v26 = vrot.slane %v3974_v34, 5  ;;  %v3569_v29 = vshrl.u32 %v3528_v49, 16  ;;  %v4010_v46 = vsel %vm8539_vm9, %v7530_v37, %v4009_v24 }
 0x38f   : > { %v3572_v31 = vshll.u32 %v3528_v49, 16  ;;  %3951 = vrot.lane.b32.xlu1 %v7524_v17, %s10507_s13  ;;  %v3578_v33 = vshll.u32 %v3529_v25, 16  ;;  %v3583_v40 = vshrl.u32 %v3530_v0, 16  ;;  %v3586_v23 = vshll.u32 %v3530_v0, 16  ;;  %v3817_v63 = vld [vmem:[#allocation4 + $0x28] sm:$0xf] }
 0x390   : > { %v3592_v32 = vshll.u32 %v3531_v36, 16  ;;  %v4014_v30 = vsel %vm8539_vm9, %v7531_v18, %v4013_v26  ;;  %v3571_v16 = vrot.slane %v3569_v29, 4  ;;  %v3856_v35 = vshrl.u32 %v3815_v27, 16  ;;  %v9375_v45 = vld [vmem:[#allocation4 + $0xc] sm:$0x1] }
 0x391   : > { %v3574_v4 = vrot.slane %v3572_v31, 5  ;;  %v3585_v61 = vrot.slane %v3583_v40, 4  ;;  %v3588_v39 = vrot.slane %v3586_v23, 5  ;;  %v3818_v48 = vld [vmem:[#allocation4 + $0x2c] sm:$0x1]  ;;  %v3859_v55 = vshll.u32 %v3815_v27, 16 }
 0x392   : > { %3466 = vrot.lane.b32.xlu0 %v7498_v11, %s10516_s4  ;;  %v3858_v6 = vrot.slane %v3856_v35, 4  ;;  %v3237_v52 = vld [vmem:[#allocation4 + $0x20] sm:$0xf]  ;;  %v7537_v53 = vcombine.low %v4010_v46, %v4014_v30  ;;  %v3580_v49 = vrot.slane %v3578_v33, 5  ;;  %v3594_v42 = vrot.slane %v3592_v32, 5  ;;  %v8133_v23 = vld [vmem:[%s10409_s7 + $0x40] sm:$0xff]  }
 0x393   : > { %v3575_v47 = vor.u32 %v3574_v4, %v3571_v16  ;;  %3511 = vrot.lane.b32.xlu1 %v8110_v38, %s10514_s3  ;;  %v3589_v62 = vor.u32 %v3588_v39, %v3585_v61  ;;  %v3238_v2 = vld [vmem:[#allocation4 + $0x24] sm:$0x1]  ;;  %v3861_v5 = vrot.slane %v3859_v55, 5  ;;  %v3865_v8 = vshll.u32 %v3816_v41, 16  ;;  %v3239_v34 = vld [vmem:[#allocation4 + $0x28] sm:$0xf]  ;;  %7852 = vmatprep.subr.bf16.mxu0 %v8133_v23 }
 0x394   : > { %v3870_v43 = vshrl.u32 %v3817_v63, 16  ;;  %v3873_v14 = vshll.u32 %v3817_v63, 16  ;;  %v3879_v13 = vshll.u32 %v3818_v48, 16  ;;  %v3302_v44 = vshrl.u32 %v3237_v52, 16  ;;  %v3240_v36 = vld [vmem:[#allocation4 + $0x2c] sm:$0x1] }
 0x395   : > { %v3576_v1 = vrot.slane %v3575_v47, 4  ;;  %v3590_v25 = vrot.slane %v3589_v62, 4  ;;  %v3862_v54 = vor.u32 %v3861_v5, %v3858_v6  ;;  %v3715_v15 = vrot.slane %v9375_v45, 5  ;;  %v8111_v17 = vld [vmem:[#allocation4 + $0x30] ss:$8 sps:$4 sm:$0xff]  }
 0x396   : > { %4045 = vrot.lane.b32.xlu0 %v7537_v53, %s10508_s15  ;;  %v3872_v0 = vrot.slane %v3870_v43, 4  ;;  %v3867_v37 = vrot.slane %v3865_v8, 5  ;;  %v3875_v18 = vrot.slane %v3873_v14, 5  ;;  %v3304_v19 = vrot.slane %v3302_v44, 4  ;;  %v3532_v40 = vld [vmem:[#allocation4 + $0x28] sm:$0xf] }
 0x397   : > { %v3581_v56 = vsel %vm8603_vm12, %v3576_v1, %v3580_v49  ;;  %v3595_v57 = vsel %vm8603_vm12, %v3590_v25, %v3594_v42  ;;  %v3863_v24 = vrot.slane %v3862_v54, 4  ;;  %v3305_v27 = vshll.u32 %v3237_v52, 16  ;;  %v3533_v16 = vld [vmem:[#allocation4 + $0x2c] sm:$0x1]  ;;  %v3534_v4 = vld [vmem:[#allocation4 + $0x30] sm:$0xf] }
 0x398   : > { %v7505_v21 = vcombine.low %v3581_v56, %v3595_v57  ;;  %v3311_v11 = vshll.u32 %v3238_v2, 16  ;;  %v3876_v26 = vor.u32 %v3875_v18, %v3872_v0  ;;  %v3881_v29 = vrot.slane %v3879_v13, 5  ;;  %v8112_v35 = vld [vmem:[#allocation4 + $0x30] ss:$8 sps:$4 sm:$0xff]   ;;  %v3535_v47 = vld [vmem:[#allocation4 + $0x34] sm:$0x1] }
 0x399   : > { %v3316_v31 = vshrl.u32 %v3239_v34, 16  ;;  %v3319_v33 = vshll.u32 %v3239_v34, 16  ;;  %v3868_v32 = vsel %vm8603_vm12, %v3863_v24, %v3867_v37  ;;  %v3307_v38 = vrot.slane %v3305_v27, 5  ;;  %v3398_v42 = vld [vmem:[#allocation4 + $0x30] sm:$0xe] }
 0x39a   : > { %3666 = vrot.lane.b32.xlu1 %v7505_v21, %s10518_s2  ;;  %3798 = vrot.lane.b32.xlu0 %v8111_v17, %s10517_s24  ;;  %v3325_v30 = vshll.u32 %v3240_v36, 16  ;;  %v3877_v61 = vrot.slane %v3876_v26, 4  ;;  %v3313_v39 = vrot.slane %v3311_v11, 5  ;;  %v3597_v48 = vshrl.u32 %v3532_v40, 16  ;;  %v3399_v2 = vld [vmem:[#allocation4 + $0x34] sm:$0x1] }
 0x39b   : > { %v3318_v41 = vrot.slane %v3316_v31, 4  ;;  %v3321_v63 = vrot.slane %v3319_v33, 5  ;;  %v3308_v46 = vor.u32 %v3307_v38, %v3304_v19  ;;  %v3600_v6 = vshll.u32 %v3532_v40, 16  ;;  %v3400_v34 = vld [vmem:[#allocation4 + $0x38] sm:$0xe] }
 0x39c   : > { %v3606_v55 = vshll.u32 %v3533_v16, 16  ;;  %v3882_v52 = vsel %vm8603_vm12, %v3877_v61, %v3881_v29  ;;  %v3611_v49 = vshrl.u32 %v3534_v4, 16  ;;  %v3614_v62 = vshll.u32 %v3534_v4, 16  ;;  %v3401_v56 = vld [vmem:[#allocation4 + $0x3c] sm:$0x1] }
 0x39d   : > { %v3322_v53 = vor.u32 %v3321_v63, %v3318_v41  ;;  %v7525_v1 = vcombine.low %v3868_v32, %v3882_v52  ;;  %v3309_v5 = vrot.slane %v3308_v46, 4  ;;  %v3599_v8 = vrot.slane %v3597_v48, 4  ;;  %v3241_v37 = vld [vmem:[#allocation4 + $0x30] sm:$0xf]  ;;  %v8113_v19 = vld [vmem:[#allocation4 + $0x38] ss:$8 sps:$4 sm:$0xff]  }
 0x39e   : > { %3218 = vrot.lane.b32.xlu1 %v8112_v35, %s10519_s26  ;;  %v3602_v43 = vrot.slane %v3600_v6, 5  ;;  %v3327_v14 = vrot.slane %v3325_v30, 5  ;;  %v3613_v13 = vrot.slane %v3611_v49, 4  ;;  %v3616_v44 = vrot.slane %v3614_v62, 5  ;;  %v3243_v27 = vld [vmem:[#allocation4 + $0x38] sm:$0xf] }
 0x39f   : > { %v3323_v25 = vrot.slane %v3322_v53, 4  ;;  %3953 = vrot.lane.b32.xlu0 %v7525_v1, %s10507_s13  ;;  %v3314_v54 = vsel %vm8603_vm12, %v3309_v5, %v3313_v39  ;;  %v3620_v36 = vshll.u32 %v3535_v47, 16  ;;  %v7494_v57 = vrot.slane %v3398_v42, 9  ;;  %v3242_v33 = vld [vmem:[#allocation4 + $0x34] sm:$0x1] }
 0x3a0   : > { %v3603_v0 = vor.u32 %v3602_v43, %v3599_v8  ;;  %v3617_v21 = vor.u32 %v3616_v44, %v3613_v13  ;;  %v3444_v17 = vrot.slane %v3399_v2, 5  ;;  %v7495_v24 = vrot.slane %v3400_v34, 9  ;;  %v3244_v32 = vld [vmem:[#allocation4 + $0x3c] sm:$0x1]  ;;  %v3536_v39 = vld [vmem:[#allocation4 + $0x38] sm:$0xf] }
 0x3a1   : > { %v3328_v18 = vsel %vm8603_vm12, %v3323_v25, %v3327_v14  ;;  %v3608_v29 = vrot.slane %v3606_v55, 5  ;;  %v3448_v31 = vrot.slane %v3401_v56, 5  ;;  %v3622_v23 = vrot.slane %v3620_v36, 5  ;;  %v3537_v41 = vld [vmem:[#allocation4 + $0x3c] sm:$0x1] }
 0x3a2   : > { %v7486_v11 = vcombine.low %v3314_v54, %v3328_v18  ;;  %v3604_v26 = vrot.slane %v3603_v0, 4  ;;  %v3618_v40 = vrot.slane %v3617_v21, 4  ;;  %v3330_v38 = vshrl.u32 %v3241_v37, 16  ;;  %v3538_v6 = vld [vmem:[#allocation4 + $0x40] sm:$0xf] }
 0x3a3   : > { %v3333_v30 = vshll.u32 %v3241_v37, 16  ;;  %3513 = vrot.lane.b32.xlu0 %v8113_v19, %s10514_s3  ;;  %v3445_v4 = vsel %vm8539_vm9, %v7494_v57, %v3444_v17  ;;  %v3449_v35 = vsel %vm8539_vm9, %v7495_v24, %v3448_v31  ;;  %v3344_v61 = vshrl.u32 %v3243_v27, 16  ;;  %v8114_v55 = vld [vmem:[#allocation4 + $0x40] ss:$8 sps:$4 sm:$0xff]   ;;  %v3539_v1 = vld [vmem:[#allocation4 + $0x44] sm:$0x1] }
 0x3a4   : > { %3373 = vrot.lane.b32.xlu1 %v7486_v11, %s10515_s1  ;;  %v3609_v16 = vsel %vm8603_vm12, %v3604_v26, %v3608_v29  ;;  %v3623_v63 = vsel %vm8603_vm12, %v3618_v40, %v3622_v23  ;;  %v3332_v46 = vrot.slane %v3330_v38, 4  ;;  %v3339_v48 = vshll.u32 %v3242_v33, 16  ;;  %v3819_v13 = vld [vmem:[#allocation4 + $0x30] sm:$0xf]  ;;  %v3820_v36 = vld [vmem:[#allocation4 + $0x34] sm:$0x1] }
 0x3a5   : > { %v3335_v47 = vrot.slane %v3333_v30, 5  ;;  %v7506_v52 = vcombine.low %v3609_v16, %v3623_v63  ;;  %v7499_v53 = vcombine.low %v3445_v4, %v3449_v35  ;;  %v3346_v49 = vrot.slane %v3344_v61, 4  ;;  %v3821_v21 = vld [vmem:[#allocation4 + $0x38] sm:$0xf]  ;;  %v3822_v33 = vld [vmem:[#allocation4 + $0x3c] sm:$0x1] }
 0x3a6   : > { %v3347_v62 = vshll.u32 %v3243_v27, 16  ;;  %v3353_v2 = vshll.u32 %v3244_v32, 16  ;;  %v3625_v5 = vshrl.u32 %v3536_v39, 16  ;;  %v3628_v8 = vshll.u32 %v3536_v39, 16  ;;  %v3823_v16 = vld [vmem:[#allocation4 + $0x40] sm:$0xf] }
 0x3a7   : > { %v3336_v42 = vor.u32 %v3335_v47, %v3332_v46  ;;  %3668 = vrot.lane.b32.xlu0 %v7506_v52, %s10518_s2  ;;  %v3634_v34 = vshll.u32 %v3537_v41, 16  ;;  %v3639_v25 = vshrl.u32 %v3538_v6, 16  ;;  %v3642_v14 = vshll.u32 %v3538_v6, 16  ;;  %v3683_v41 = vld [vmem:[#allocation4 + $0x10] sm:$0xe] }
 0x3a8   : > { %3800 = vrot.lane.b32.xlu1 %v8114_v55, %s10517_s24  ;;  %v3349_v43 = vrot.slane %v3347_v62, 5  ;;  %v3341_v56 = vrot.slane %v3339_v48, 5  ;;  %v3627_v54 = vrot.slane %v3625_v5, 4  ;;  %v3630_v0 = vrot.slane %v3628_v8, 5  ;;  %v3824_v6 = vld [vmem:[#allocation4 + $0x44] sm:$0x1] }
 0x3a9   : > { %v3337_v44 = vrot.slane %v3336_v42, 4  ;;  %v3355_v37 = vrot.slane %v3353_v2, 5  ;;  %v3641_v18 = vrot.slane %v3639_v25, 4  ;;  %v3644_v19 = vrot.slane %v3642_v14, 5  ;;  %v3975_v55 = vld [vmem:[#allocation4 + $0x30] sm:$0xe] }
 0x3aa   : > { %v3350_v57 = vor.u32 %v3349_v43, %v3346_v49  ;;  %v3631_v17 = vor.u32 %v3630_v0, %v3627_v54  ;;  %v3636_v24 = vrot.slane %v3634_v34, 5  ;;  %v3648_v27 = vshll.u32 %v3539_v1, 16  ;;  %v3976_v42 = vld [vmem:[#allocation4 + $0x34] sm:$0x1]  ;;  %v3977_v2 = vld [vmem:[#allocation4 + $0x38] sm:$0xe] }
 0x3ab   : > { %v3884_v11 = vshrl.u32 %v3819_v13, 16  ;;  %v3342_v26 = vsel %vm8603_vm12, %v3337_v44, %v3341_v56  ;;  %v3645_v31 = vor.u32 %v3644_v19, %v3641_v18  ;;  %v3887_v40 = vshll.u32 %v3819_v13, 16  ;;  %v3978_v43 = vld [vmem:[#allocation4 + $0x3c] sm:$0x1]  ;;  %v3979_v34 = vld [vmem:[#allocation4 + $0x40] sm:$0xe] }
 0x3ac   : > { %3468 = vrot.lane.b32.xlu1 %v7499_v53, %s10516_s4  ;;  %v3351_v29 = vrot.slane %v3350_v57, 4  ;;  %v3632_v23 = vrot.slane %v3631_v17, 4  ;;  %v3893_v38 = vshll.u32 %v3820_v36, 16  ;;  %v3898_v30 = vshrl.u32 %v3821_v21, 16  ;;  %v3980_v44 = vld [vmem:[#allocation4 + $0x44] sm:$0x1] }
 0x3ad   : > { %v3886_v32 = vrot.slane %v3884_v11, 4  ;;  %v3646_v35 = vrot.slane %v3645_v31, 4  ;;  %v3650_v61 = vrot.slane %v3648_v27, 5  ;;  %v3889_v39 = vrot.slane %v3887_v40, 5  ;;  %v3685_v40 = vld [vmem:[#allocation4 + $0x18] sm:$0xe] }
 0x3ae   : > { %v3356_v4 = vsel %vm8603_vm12, %v3351_v29, %v3355_v37  ;;  %v3637_v46 = vsel %vm8603_vm12, %v3632_v23, %v3636_v24  ;;  %v3900_v47 = vrot.slane %v3898_v30, 4  ;;  %v3901_v48 = vshll.u32 %v3821_v21, 16  ;;  %v3684_v37 = vld [vmem:[#allocation4 + $0x14] sm:$0x1]  ;;  %v3686_v23 = vld [vmem:[#allocation4 + $0x1c] sm:$0x1] }
 0x3af   : > { %v7487_v63 = vcombine.low %v3342_v26, %v3356_v4  ;;  %v3651_v52 = vsel %vm8603_vm12, %v3646_v35, %v3650_v61  ;;  %v3890_v53 = vor.u32 %v3889_v39, %v3886_v32  ;;  %v3907_v49 = vshll.u32 %v3822_v33, 16  ;;  %v3689_v4 = vld [vmem:[#allocation4 + $0x28] sm:$0xe]  ;;  %v3690_v35 = vld [vmem:[#allocation4 + $0x2c] sm:$0x1] }
 0x3b0   : > { %v3912_v62 = vshrl.u32 %v3823_v16, 16  ;;  %v7507_v1 = vcombine.low %v3637_v46, %v3651_v52  ;;  %v3903_v5 = vrot.slane %v3901_v48, 5  ;;  %v3915_v8 = vshll.u32 %v3823_v16, 16  ;;  %v3691_v61 = vld [vmem:[#allocation4 + $0x30] sm:$0xe] }
 0x3b1   : > { %3375 = vrot.lane.b32.xlu0 %v7487_v63, %s10515_s1  ;;  %v3895_v25 = vrot.slane %v3893_v38, 5  ;;  %v3921_v13 = vshll.u32 %v3824_v6, 16  ;;  %v7509_v56 = vrot.slane %v3683_v41, 9  ;;  %v3891_v54 = vrot.slane %v3890_v53, 4  ;;  %v3692_v12 = vld [vmem:[#allocation4 + $0x34] sm:$0x1] }
 0x3b2   : > { %v3914_v14 = vrot.slane %v3912_v62, 4  ;;  %3670 = vrot.lane.b32.xlu1 %v7507_v1, %s10518_s2  ;;  %v3904_v0 = vor.u32 %v3903_v5, %v3900_v47  ;;  %v3909_v36 = vrot.slane %v3907_v49, 5  ;;  %v3917_v57 = vrot.slane %v3915_v8, 5  ;;  %v3693_v46 = vld [vmem:[#allocation4 + $0x38] sm:$0xe] }
 0x3b3   : > { %v7532_v18 = vrot.slane %v3975_v55, 9  ;;  %v4017_v19 = vrot.slane %v3976_v42, 5  ;;  %v7533_v21 = vrot.slane %v3977_v2, 9  ;;  %v4021_v17 = vrot.slane %v3978_v43, 5  ;;  %v3694_v47 = vld [vmem:[#allocation4 + $0x3c] sm:$0x1] }
 0x3b4   : > { %v3905_v24 = vrot.slane %v3904_v0, 4  ;;  %v3918_v27 = vor.u32 %v3917_v57, %v3914_v14  ;;  %v7534_v11 = vrot.slane %v3979_v34, 9  ;;  %v4025_v26 = vrot.slane %v3980_v44, 5  ;;  %v3695_v55 = vld [vmem:[#allocation4 + $0x40] sm:$0xe] }
 0x3b5   : > { %v3938_v29 = vsel %vm8603_vm12, %v9211_v9, %v9195_v58  ;;  %v4030_v31 = vsel %vm8539_vm9, %v7535_v3, %v4029_v51  ;;  %v3719_v33 = vrot.slane %v3684_v37, 5  ;;  %v3896_v32 = vsel %vm8603_vm12, %v3891_v54, %v3895_v25  ;;  %v3687_v58 = vld [vmem:[#allocation4 + $0x20] sm:$0xe]  ;;  %v3688_v9 = vld [vmem:[#allocation4 + $0x24] sm:$0x1] }
 0x3b6   : > { %v3910_v38 = vsel %vm8603_vm12, %v3905_v24, %v3909_v36  ;;  %v3919_v30 = vrot.slane %v3918_v27, 4  ;;  %v3923_v16 = vrot.slane %v3921_v13, 5  ;;  %v4022_v60 = vsel %vm8539_vm9, %v7533_v21, %v4021_v17  ;;  %v3696_v42 = vld [vmem:[#allocation4 + $0x44] sm:$0x1] }
 0x3b7   : > { %v7526_v7 = vcombine.low %v3896_v32, %v3910_v38  ;;  %v3716_v3 = vsel %vm8539_vm9, %v7508_v50, %v3715_v15  ;;  %v3720_v51 = vsel %vm8539_vm9, %v7509_v56, %v3719_v33  ;;  %v4018_v41 = vsel %vm8539_vm9, %v7532_v18, %v4017_v19  ;;  %v8135_v38 = vld [vmem:[%s10409_s7 + $0x48] sm:$0xff]  }
 0x3b8   : > { %v3924_v39 = vsel %vm8603_vm12, %v3919_v30, %v3923_v16  ;;  %v4026_v45 = vsel %vm8539_vm9, %v7534_v11, %v4025_v26  ;;  %v7516_v63 = vcombine.low %v3716_v3, %v3720_v51  ;;  %v7510_v15 = vrot.slane %v3685_v40, 9  ;;  %v9493_v30 = vld [vmem:[#allocation2] sm:$0xff]  ;;  %v8138_v3 = vld [vmem:[%s10409_s7 + $0x10] sm:$0xff]   ;;  %v8139_v51 = vld [vmem:[%s10409_s7 + $0x58] sm:$0xff]  }
 0x3b9   : > { %3955 = vrot.lane.b32.xlu0 %v7526_v7, %s10507_s13  ;;  %v7527_v50 = vcombine.low %v3924_v39, %v3938_v29  ;;  %v3723_v48 = vrot.slane %v3686_v23, 5  ;;  %v7511_v6 = vrot.slane %v3687_v58, 9  ;;  %v7538_v52 = vcombine.low %v4018_v41, %v4022_v60  ;;  %v8134_v23 = vld [vmem:[%s10409_s7] sm:$0xff]   ;;  %v8136_v58 = vld [vmem:[%s10409_s7 + $0x8] sm:$0xff]   ;;  %v8137_v7 = vld [vmem:[%s10409_s7 + $0x50] sm:$0xff]  }
 0x3ba   : > { %3762 = vst.msk [vmem:[#allocation2 + $0x10] sm:$0xff] %vm10452_vm13, %v7516_v63  ;;  %v3727_v53 = vrot.slane %v3688_v9, 5  ;;  %v7512_v49 = vrot.slane %v3689_v4, 9  ;;  %v3731_v62 = vrot.slane %v3690_v35, 5  ;;  %v7539_v2 = vcombine.low %v4026_v45, %v4030_v31  ;;  %v8141_v39 = vld [vmem:[%s10409_s7 + $0x60] sm:$0xff]  }
 0x3bb   : > { %3957 = vrot.lane.b32.xlu1 %v7527_v50, %s10507_s13  ;;  %v7513_v1 = vrot.slane %v3691_v61, 9  ;;  %v3735_v5 = vrot.slane %v3692_v12, 5  ;;  %v7514_v8 = vrot.slane %v3693_v46, 9  ;;  %v3724_v43 = vsel %vm8539_vm9, %v7510_v15, %v3723_v48  ;;  %v8140_v61 = vld [vmem:[%s10409_s7 + $0x18] sm:$0xff]   ;;  %v8142_v12 = vld [vmem:[%s10409_s7 + $0x20] sm:$0xff]   ;;  %v8143_v46 = vld [vmem:[%s10409_s7 + $0x68] sm:$0xff]  }
 0x3bc   : > { %v3728_v34 = vsel %vm8539_vm9, %v7511_v6, %v3727_v53  ;;  %v3739_v25 = vrot.slane %v3694_v47, 5  ;;  %v7515_v14 = vrot.slane %v3695_v55, 9  ;;  %v3732_v44 = vsel %vm8539_vm9, %v7512_v49, %v3731_v62  ;;  %v8144_v50 = vld [vmem:[%s10409_s7 + $0x28] sm:$0xff]   ;;  %v8145_v15 = vld [vmem:[%s10409_s7 + $0x70] sm:$0xff]   ;;  %v8147_v53 = vld [vmem:[%s10409_s7 + $0x78] sm:$0xff]  }
 0x3bd   : > { %4047 = vrot.lane.b32.xlu0 %v7538_v52, %s10508_s15  ;;  %v7517_v13 = vcombine.low %v3724_v43, %v3728_v34  ;;  %v3736_v56 = vsel %vm8539_vm9, %v7513_v1, %v3735_v5  ;;  %v3743_v54 = vrot.slane %v3696_v42, 5  ;;  %vm3224_vm5 = vcmask 786112   ;;  %v8146_v55 = vld [vmem:[%s10409_s7 + $0x30] sm:$0xff]   ;;  %v9543_v52 = vld [vmem:[#allocation2 + $0x20] sm:$0xff]  ;;  %v8148_v42 = vld [vmem:[%s10409_s7 + $0x38] sm:$0xff]  }
 0x3be   : > { %v7518_v0 = vcombine.low %v3732_v44, %v3736_v56  ;;  %v3740_v36 = vsel %vm8539_vm9, %v7514_v8, %v3739_v25  ;;  %vm10465_vm6 = vcmask 130112  }
 0x3bf   : > { %4049 = vrot.lane.b32.xlu1 %v7539_v2, %s10508_s15  ;;  %3763 = vst.msk [vmem:[#allocation2 + $0x30] sm:$0xff] %vm10452_vm13, %v7517_v13  ;;  %v3744_v57 = vsel %vm8539_vm9, %v7515_v14, %v3743_v54  ;;  %v8149_v2 = vld [vmem:[%s10411_s9 + $0x40] sm:$0xff]  }
 0x3c0   : > { %3764 = vst.msk [vmem:[#allocation2 + $0x50] sm:$0xff] %vm10452_vm13, %v7518_v0  ;;  %v7519_v37 = vcombine.low %v3740_v36, %v3744_v57  ;;  %v9564_v14 = vld [vmem:[#allocation2 + $0x40] sm:$0xff] }
 0x3c1   : > { %v4068_v0 = vld [vmem:[#allocation2 + $0x60] sm:$0xff] }
 0x3c2   : > { %3765 = vst.msk [vmem:[#allocation2 + $0x70] sm:$0xff] %vm10452_vm13, %v7519_v37  ;;  %vm10461_vm13 = vcmask 1048512   ;;  %v8150_v37 = vld [vmem:[%s10411_s9] sm:$0xff]  }
 0x3cf   : > { %v3213_v18 = vpop.permute.xlu0 %3212 }
 0x3d0   : > { %3225 = vst.msk [vmem:[#allocation2 + $0x8] sm:$0xff] %vm3224_vm5, %v3213_v18  ;;  %v8151_v18 = vld [vmem:[%s10411_s9 + $0x48] sm:$0xff]  }
 0x3d2   : > { %v3508_v19 = vpop.permute.xlu1 %3507 }
 0x3d5   : > { %v3463_v21 = vpop.permute.xlu0 %3462 }
 0x3e9   : > { %v3215_v17 = vpop.permute.xlu1 %3214 }
 0x3ea   : > { %3226 = vst.msk [vmem:[#allocation2 + $0x28] sm:$0xff] %vm3224_vm5, %v3215_v17  ;;  %v8152_v17 = vld [vmem:[%s10411_s9 + $0x8] sm:$0xff]  }
 0x3eb   : > { %v3510_v24 = vpop.permute.xlu0 %3509 }
 0x3ed   : > { %v3795_v27 = vpop.permute.xlu1 %3794 }
 0x3ee   : > { %3807 = vst.msk [vmem:[#allocation2 + $0x10] sm:$0xff] %vm10465_vm6, %v3795_v27  ;;  %v8154_v27 = vld [vmem:[%s10411_s9 + $0x10] sm:$0xff]  }
 0x3ef   : > { %v3665_v11 = vpop.permute.xlu0 %3664 }
 0x3f1   : > { %v3370_v26 = vpop.permute.xlu1 %3369 }
 0x3f2   : > { %3382 = vst.msk [vmem:[#allocation2 + $0x8] sm:$0xff] %vm3381_vm3, %v3370_v26  ;;  %v8156_v26 = vld [vmem:[%s10411_s9 + $0x18] sm:$0xff]  }
 0x3f3   : > { %3475 = vst.msk [vmem:[#allocation2 + $0x8] sm:$0xff] %vm3474_vm14, %v3463_v21 }
 0x3f4   : > { %3520 = vst.msk [vmem:[#allocation2 + $0x8] sm:$0xff] %vm10462_vm4, %v3508_v19 }
 0x3f5   : > { %3677 = vst.msk [vmem:[#allocation2 + $0x8] sm:$0xff] %vm10461_vm13, %v3665_v11  ;;  %v3465_v29 = vpop.permute.xlu1 %3464  ;;  %v8155_v11 = vld [vmem:[%s10411_s9 + $0x58] sm:$0xff]  }
 0x3f8   : > { %v3217_v31 = vpop.permute.xlu0 %3216 }
 0x3f9   : > { %3227 = vst.msk [vmem:[#allocation2 + $0x48] sm:$0xff] %vm3224_vm5, %v3217_v31  ;;  %v4044_v33 = vpop.permute.xlu1 %4043  ;;  %v8158_v31 = vld [vmem:[%s10411_s9 + $0x20] sm:$0xff]  }
 0x3fc   : > { %v3797_v40 = vpop.permute.xlu0 %3796  ;;  %v9487_v32 = vld [vmem:[#allocation2 + $0x8] sm:$0xff] }
 0x3fd   : > { %3808 = vst.msk [vmem:[#allocation2 + $0x30] sm:$0xff] %vm10465_vm6, %v3797_v40  ;;  %4267 = vmatprep.mubr.bf16.mxu0 %v9487_v32  ;;  %v8160_v40 = vld [vmem:[%s10411_s9 + $0x28] sm:$0xff]  }
 0x3fe   : > { %4268 = vmatmul.mubr.bf16.vlgmr.msra.gmra.mrb[16].mxu0 %v9493_v30 }
 0x3ff   : > { %7853 = vmatpush3.bf16.msra.mxu0 %v8134_v23  ;;  %v8161_v23 = vld [vmem:[%s10411_s9 + $0x70] sm:$0xff]  }
 0x400   : > { %v3372_v16 = vpop.permute.xlu0 %3371  ;;  %7854 = vmatprep.subr.bf16.mxu0 %v8135_v38  ;;  %v8162_v38 = vld [vmem:[%s10411_s9 + $0x30] sm:$0xff]  }
 0x401   : > { %3383 = vst.msk [vmem:[#allocation2 + $0x28] sm:$0xff] %vm3381_vm3, %v3372_v16  ;;  %v3952_v9 = vpop.permute.xlu1 %3951  ;;  %v8163_v16 = vld [vmem:[%s10411_s9 + $0x78] sm:$0xff]  }
 0x402   : > { %3476 = vst.msk [vmem:[#allocation2 + $0x28] sm:$0xff] %vm3474_vm14, %v3465_v29  ;;  %v8157_v29 = vld [vmem:[%s10411_s9 + $0x60] sm:$0xff]  }
 0x403   : > { %3963 = vst.msk [vmem:[#allocation2 + $0x10] sm:$0xff] %vm10463_vm8, %v3952_v9  ;;  %7855 = vmatpush3.bf16.msra.mxu0 %v8136_v58  ;;  %v8164_v58 = vld [vmem:[%s10411_s9 + $0x38] sm:$0xff]  }
 0x404   : > { %3521 = vst.msk [vmem:[#allocation2 + $0x28] sm:$0xff] %vm10462_vm4, %v3510_v24  ;;  %v3467_v60 = vpop.permute.xlu0 %3466  ;;  %7856 = vmatprep.subr.bf16.mxu0 %v8137_v7  ;;  %v8153_v24 = vld [vmem:[%s10411_s9 + $0x50] sm:$0xff]  }
 0x405   : > { %4055 = vst.msk [vmem:[#allocation2 + $0x10] sm:$0xff] %vm10460_vm10, %v4044_v33  ;;  %v3512_v4 = vpop.permute.xlu1 %3511  ;;  %v8159_v33 = vld [vmem:[%s10411_s9 + $0x68] sm:$0xff]  }
 0x407   : > { %7857 = vmatpush3.bf16.msra.mxu0 %v8138_v3 }
 0x408   : > { %v4046_v35 = vpop.permute.xlu0 %4045  ;;  %7858 = vmatprep.subr.bf16.mxu0 %v8139_v51 }
 0x40b   : > { %7859 = vmatpush3.bf16.msra.mxu0 %v8140_v61 }
 0x40c   : > { %v4061_v41 = vld [vmem:[#allocation2 + $0x10] sm:$0xff]  ;;  %v3667_v45 = vpop.permute.xlu1 %3666  ;;  %v3799_v63 = vpop.permute.xlu0 %3798  ;;  %7860 = vmatprep.subr.bf16.mxu0 %v8141_v39 }
 0x40d   : > { %7947 = vmatprep.mubr.msk.bf16.mxu1 %vm4222_vm2, %v4061_v41  ;;  %3678 = vst.msk [vmem:[#allocation2 + $0x28] sm:$0xff] %vm10461_vm13, %v3667_v45  ;;  %v9638_v41 = vld [vmem:[%s10408_s6] ss:$0 sm:$0xff] }
 0x40e   : > { %3809 = vst.msk [vmem:[#allocation2 + $0x50] sm:$0xff] %vm10465_vm6, %v3799_v63 }
 0x40f   : > { %7861 = vmatpush3.bf16.msra.mxu0 %v8142_v12 }
 0x410   : > { %v3219_v47 = vpop.permute.xlu1 %3218  ;;  %7862 = vmatprep.subr.bf16.mxu0 %v8143_v46 }
 0x411   : > { %3228 = vst.msk [vmem:[#allocation2 + $0x68] sm:$0xff] %vm3224_vm5, %v3219_v47  ;;  %v3954_v48 = vpop.permute.xlu0 %3953 }
 0x412   : > { %3964 = vst.msk [vmem:[#allocation2 + $0x30] sm:$0xff] %vm10463_vm8, %v3954_v48  ;;  %v4585_v48 = vld [vmem:[#allocation4] sm:$0xf] }
 0x413   : > { %4056 = vst.msk [vmem:[#allocation2 + $0x30] sm:$0xff] %vm10460_vm10, %v4046_v35  ;;  %7863 = vmatpush3.bf16.msra.mxu0 %v8144_v50 }
 0x414   : > { %v9537_v6 = vld [vmem:[#allocation2 + $0x28] sm:$0xff]  ;;  %7864 = vmatprep.subr.bf16.mxu0 %v8145_v15 }
 0x415   : > { %4275 = vmatprep.mubr.bf16.mxu0 %v9537_v6  ;;  %v3514_v62 = vpop.permute.xlu0 %3513 }
 0x416   : > { %v3374_v49 = vpop.permute.xlu1 %3373  ;;  %4276 = vmatmul.mubr.bf16.gmra.mrb[20].mxu0 %v9543_v52 }
 0x417   : > { %3384 = vst.msk [vmem:[#allocation2 + $0x48] sm:$0xff] %vm3381_vm3, %v3374_v49  ;;  %7865 = vmatpush3.bf16.msra.mxu0 %v8146_v55 }
 0x418   : > { %3477 = vst.msk [vmem:[#allocation2 + $0x48] sm:$0xff] %vm3474_vm14, %v3467_v60  ;;  %7866 = vmatprep.subr.bf16.mxu0 %v8147_v53 }
 0x419   : > { %3522 = vst.msk [vmem:[#allocation2 + $0x48] sm:$0xff] %vm10462_vm4, %v3512_v4  ;;  %v3669_v5 = vpop.permute.xlu0 %3668 }
 0x41a   : > { %v3801_v1 = vpop.permute.xlu1 %3800  ;;  %3679 = vst.msk [vmem:[#allocation2 + $0x48] sm:$0xff] %vm10461_vm13, %v3669_v5  ;;  %v4064_v8 = vld [vmem:[#allocation2 + $0x30] sm:$0xff] }
 0x41b   : > { %3810 = vst.msk [vmem:[#allocation2 + $0x70] sm:$0xff] %vm10465_vm6, %v3801_v1  ;;  %7948 = vmatmul.mubr.msk.bf16.vlgmr.msra.gmra.mrb[16].mxu1 %vm4222_vm2, %v4064_v8  ;;  %7867 = vmatpush3.bf16.msra.mxu0 %v8148_v42  ;;  %v4602_v1 = vshrl.u32 %v4585_v48, 16 }
 0x41c   : > { %7903 = vmatprep.subr.bf16.mxu0 %v8149_v2 }
 0x41e   : > { %v3469_v43 = vpop.permute.xlu1 %3468 }
 0x421   : > { %v9561_v34 = vld [vmem:[#allocation2 + $0x48] sm:$0xff] }
 0x422   : > { %4283 = vmatprep.mubr.bf16.mxu0 %v9561_v34 }
 0x423   : > { %v3376_v25 = vpop.permute.xlu0 %3375  ;;  %4284 = vmatmul.mubr.bf16.gmra.mrb[24].mxu0 %v9564_v14 }
 0x424   : > { %3385 = vst.msk [vmem:[#allocation2 + $0x68] sm:$0xff] %vm3381_vm3, %v3376_v25  ;;  %v3671_v13 = vpop.permute.xlu1 %3670 }
 0x425   : > { %3478 = vst.msk [vmem:[#allocation2 + $0x68] sm:$0xff] %vm3474_vm14, %v3469_v43  ;;  %v4605_v43 = vshll.u32 %v4585_v48, 16 }
 0x426   : > { %3523 = vst.msk [vmem:[#allocation2 + $0x68] sm:$0xff] %vm10462_vm4, %v3514_v62 }
 0x427   : > { %3680 = vst.msk [vmem:[#allocation2 + $0x68] sm:$0xff] %vm10461_vm13, %v3671_v13 }
 0x42b   : > { %v3956_v44 = vpop.permute.xlu0 %3955 }
 0x42c   : > { %3965 = vst.msk [vmem:[#allocation2 + $0x50] sm:$0xff] %vm10463_vm8, %v3956_v44 }
 0x42d   : > { %v3958_v56 = vpop.permute.xlu1 %3957 }
 0x42e   : > { %v4069_v54 = vld [vmem:[#allocation2 + $0x68] sm:$0xff]  ;;  %3966 = vst.msk [vmem:[#allocation2 + $0x70] sm:$0xff] %vm10463_vm8, %v3958_v56  ;;  %vm10528_vm8 = vcmask 720512  }
 0x42f   : > { %4291 = vmatprep.mubr.bf16.mxu0 %v4069_v54  ;;  %v4048_v36 = vpop.permute.xlu0 %4047 }
 0x430   : > { %4292 = vmatmul.mubr.bf16.gmra.mrb[28].mxu0 %v4068_v0  ;;  %4057 = vst.msk [vmem:[#allocation2 + $0x50] sm:$0xff] %vm10460_vm10, %v4048_v36 }
 0x431   : > { %5664 = vmatprep.mubr.bf16.mxu0 %v9487_v32  ;;  %v4050_v57 = vpop.permute.xlu1 %4049 }
 0x432   : > { %4058 = vst.msk [vmem:[#allocation2 + $0x70] sm:$0xff] %vm10460_vm10, %v4050_v57 }
 0x437   : > { %v4067_v19 = vld [vmem:[#allocation2 + $0x50] sm:$0xff] }
 0x438   : > { %5665 = vmatmul.mubr.bf16.vlgmr.msra.gmra.mrb[32].mxu0 %v9493_v30  ;;  %7951 = vmatprep.mubr.msk.bf16.mxu1 %vm4222_vm2, %v4067_v19  ;;  %v4604_v19 = vrot.slane %v4602_v1, 4  ;;  %v4741_v1 = vld [vmem:[#allocation4] sm:$0xe] }
 0x439   : > { %5672 = vmatprep.mubr.bf16.mxu0 %v9537_v6  ;;  %v4070_v21 = vld [vmem:[#allocation2 + $0x70] sm:$0xff]  ;;  %7904 = vmatpush3.bf16.msra.mxu0 %v8150_v37 }
 0x43a   : > { %7952 = vmatmul.mubr.msk.bf16.gmra.mrb[20].mxu1 %vm4222_vm2, %v4070_v21  ;;  %7905 = vmatprep.subr.bf16.mxu0 %v8151_v18  ;;  %v4607_v21 = vrot.slane %v4605_v43, 5 }
 0x43d   : > { %7906 = vmatpush3.bf16.msra.mxu0 %v8152_v17 }
 0x43e   : > { %7907 = vmatprep.subr.bf16.mxu0 %v8153_v24 }
 0x440   : > { %5673 = vmatmul.mubr.bf16.gmra.mrb[36].mxu0 %v9543_v52 }
 0x441   : > { %5680 = vmatprep.mubr.bf16.mxu0 %v9561_v34  ;;  %7908 = vmatpush3.bf16.msra.mxu0 %v8154_v27 }
 0x442   : > { %7909 = vmatprep.subr.bf16.mxu0 %v8155_v11 }
 0x445   : > { %7910 = vmatpush3.bf16.msra.mxu0 %v8156_v26 }
 0x446   : > { %7911 = vmatprep.subr.bf16.mxu0 %v8157_v29 }
 0x448   : > { %5681 = vmatmul.mubr.bf16.gmra.mrb[40].mxu0 %v9564_v14 }
 0x449   : > { %5688 = vmatprep.mubr.bf16.mxu0 %v4069_v54  ;;  %7912 = vmatpush3.bf16.msra.mxu0 %v8158_v31 }
 0x44a   : > { %7913 = vmatprep.subr.bf16.mxu0 %v8159_v33 }
 0x44d   : > { %7914 = vmatpush3.bf16.msra.mxu0 %v8160_v40 }
 0x44e   : > { %7915 = vmatprep.subr.bf16.mxu0 %v8161_v23 }
 0x450   : > { %5689 = vmatmul.mubr.bf16.gmra.mrb[44].mxu0 %v4068_v0 }
 0x451   : > { %7090 = vmatprep.mubr.bf16.mxu0 %v9487_v32  ;;  %7916 = vmatpush3.bf16.msra.mxu0 %v8162_v38 }
 0x452   : > { %7917 = vmatprep.subr.bf16.mxu0 %v8163_v16 }
 0x455   : > { %7918 = vmatpush3.bf16.msra.mxu0 %v8164_v58  ;;  %v4505_v58 = vld [vmem:[#allocation4 + $0x18] sm:$0xf] }
 0x456   : > { %7123 = vmatprep.subr.bf16.mxu0 %v8271_v10 }
 0x458   : > { %7091 = vmatmul.mubr.bf16.vlgmr.msra.gmra.mrb[48].mxu0 %v9493_v30 }
 0x459   : > { %7098 = vmatprep.mubr.bf16.mxu0 %v9537_v6 }
 0x460   : > { %7099 = vmatmul.mubr.bf16.gmra.mrb[52].mxu0 %v9543_v52 }
 0x461   : > { %7106 = vmatprep.mubr.bf16.mxu0 %v9561_v34 }
 0x468   : > { %7107 = vmatmul.mubr.bf16.gmra.mrb[56].mxu0 %v9564_v14 }
 0x469   : > { %7114 = vmatprep.mubr.bf16.mxu0 %v4069_v54 }
 0x470   : > { %7115 = vmatmul.mubr.bf16.gmra.mrb[60].mxu0 %v4068_v0 }
 0x4d1   : > { %v7822_v32 = vpop.f32.mrb[16].mxu0 }
 0x4d2   : > { %v7823_v9 = vpop.f32.mrb[17].mxu0 }
 0x4d3   : > { %v7824_v7 = vadd.f32 %v7823_v9, %v7822_v32  ;;  %v7825_v60 = vpop.f32.mrb[18].mxu0  ;;  %v4493_v32 = vld [vmem:[#allocation4 + $0x8] sm:$0xf] }
 0x4d4   : > { %v7826_v3 = vpop.f32.mrb[19].mxu0 }
 0x4d5   : > { %v7827_v51 = vadd.f32 %v7826_v3, %v7825_v60  ;;  %v4270_v46 = vadd.f32 %v7824_v7, %v9638_v41  ;;  %v4508_v60 = vld [vmem:[#allocation4 + $0x1c] sm:$0x1] }
 0x4d7   : > { %v4273_v52 = vadd.f32 %v7827_v51, %v9638_v41 }
 0x4e9   : > { %v7828_v4 = vpop.f32.mrb[20].mxu0 }
 0x4ea   : > { %v7829_v35 = vpop.f32.mrb[21].mxu0 }
 0x4eb   : > { %v7830_v61 = vadd.f32 %v7829_v35, %v7828_v4  ;;  %v7831_v30 = vpop.f32.mrb[22].mxu0 }
 0x4ec   : > { %v7832_v39 = vpop.f32.mrb[23].mxu0 }
 0x4ed   : > { %v7833_v45 = vadd.f32 %v7832_v39, %v7831_v30  ;;  %v4278_v63 = vadd.f32 %v7830_v61, %v9638_v41  ;;  %v4496_v39 = vld [vmem:[#allocation4 + $0xc] sm:$0x1] }
 0x4ee   : > { %v7949_v12 = vpop.f32.mrb[16].mxu1 }
 0x4ef   : > { %v4343_v47 = vadd.f32 %v7949_v12, %v4278_v63  ;;  %v4334_v50 = vpop.f32.mrb[17].mxu1  ;;  %v4281_v15 = vadd.f32 %v7833_v45, %v9638_v41  ;;  %v4586_v12 = vld [vmem:[#allocation4 + $0x4] sm:$0x1] }
 0x4f0   : > { %v4335_v6 = vadd.f32 %v4334_v50, %v4270_v46  ;;  %v7950_v55 = vpop.f32.mrb[18].mxu1  ;;  %v4511_v50 = vld [vmem:[#allocation4 + $0x20] sm:$0xf]  ;;  %v4611_v43 = vshll.u32 %v4586_v12, 16 }
 0x4f1   : > { %vm4367_vm2 = vcmp.ge.f32.partialorder %v4343_v47, 0.0  ;;  %v4375_v53 = vmul.f32 0.2, %v4343_v47  ;;  %v4346_v49 = vadd.f32 %v7950_v55, %v4281_v15  ;;  %v4337_v62 = vpop.f32.mrb[19].mxu1  ;;  %v4514_v15 = vld [vmem:[#allocation4 + $0x24] sm:$0x1] }
 0x4f2   : > { %vm4365_vm10 = vcmp.ge.f32.partialorder %v4335_v6, 0.0  ;;  %v4373_v42 = vmul.f32 0.2, %v4335_v6  ;;  %v4338_v2 = vadd.f32 %v4337_v62, %v4273_v52  ;;  %v5183_v62 = vld [vmem:[#allocation4 + $0x48] sm:$0xf] }
 0x4f3   : > { %v4383_v5 = vsel %vm4367_vm2, %v4343_v47, %v4375_v53  ;;  %vm4368_vm13 = vcmp.ge.f32.partialorder %v4346_v49, 0.0  ;;  %v4376_v8 = vmul.f32 0.2, %v4346_v49  ;;  %v4499_v53 = vld [vmem:[#allocation4 + $0x10] sm:$0xf] }
 0x4f4   : > { %v7791_v34 = vpack.c.bf16 %v4383_v5, %v4383_v5  ;;  %v4381_v25 = vsel %vm4365_vm10, %v4335_v6, %v4373_v42  ;;  %vm4366_vm4 = vcmp.ge.f32.partialorder %v4338_v2, 0.0  ;;  %v4374_v14 = vmul.f32 0.2, %v4338_v2  ;;  %v4742_v5 = vld [vmem:[#allocation4 + $0x4] sm:$0x1] }
 0x4f5   : > { %v7789_v13 = vpack.c.bf16 %v4381_v25, %v4381_v25  ;;  %v4384_v44 = vsel %vm4368_vm13, %v4346_v49, %v4376_v8  ;;  %v4502_v49 = vld [vmem:[#allocation4 + $0x14] sm:$0x1]  ;;  %v4608_v8 = vor.u32 %v4607_v21, %v4604_v19  ;;  %v5284_v25 = vshrl.u32 %v5183_v62, 16 }
 0x4f6   : > { %v4430_v56 = vshrl.u32 %v7791_v34, 16  ;;  %v7792_v54 = vpack.c.bf16 %v4384_v44, %v4384_v44  ;;  %v4382_v0 = vsel %vm4366_vm4, %v4338_v2, %v4374_v14  ;;  %v7834_v36 = vpop.f32.mrb[24].mxu0  ;;  %v4433_v24 = vshll.u32 %v7791_v34, 16  ;;  %v5184_v34 = vld [vmem:[#allocation4 + $0x4c] sm:$0x1] }
 0x4f7   : > { %v4414_v57 = vshrl.u32 %v7789_v13, 16  ;;  %v7790_v37 = vpack.c.bf16 %v4382_v0, %v4382_v0  ;;  %v7835_v18 = vpop.f32.mrb[25].mxu0  ;;  %v4417_v31 = vshll.u32 %v7789_v13, 16  ;;  %v9664_v14 = vld [vmem:[#allocation4 + $0x48] sm:$0xe]  ;;  %v7579_v44 = vrot.slane %v4741_v1, 9 }
 0x4f8   : > { %v4432_v17 = vrot.slane %v4430_v56, 7  ;;  %v4438_v27 = vshrl.u32 %v7792_v54, 16  ;;  %v9644_v11 = vadd.f32 %v7835_v18, %v7834_v36  ;;  %v7837_v26 = vpop.f32.mrb[26].mxu0  ;;  %v4441_v33 = vshll.u32 %v7792_v54, 16 }
 0x4f9   : > { %v4416_v29 = vrot.slane %v4414_v57, 7  ;;  %v4422_v40 = vshrl.u32 %v7790_v37, 16  ;;  %v7838_v23 = vpop.f32.mrb[27].mxu0  ;;  %v4425_v35 = vshll.u32 %v7790_v37, 16  ;;  %v4775_v56 = vrot.slane %v4742_v5, 5 }
 0x4fa   : > { %v4435_v38 = vor.u32 %v4433_v24, %v4432_v17  ;;  %v4436_v16 = vrot.slane %v4432_v17, 4  ;;  %v4440_v9 = vrot.slane %v4438_v27, 7  ;;  %v9646_v7 = vadd.f32 %v7838_v23, %v7837_v26 }
 0x4fb   : > { %v4419_v3 = vor.u32 %v4417_v31, %v4416_v29  ;;  %v4420_v51 = vrot.slane %v4416_v29, 4  ;;  %v4424_v4 = vrot.slane %v4422_v40, 7  ;;  %v9666_v0 = vrot.slane %v4608_v8, 4 }
 0x4fc   : > { %v4506_v61 = vsel %vm8871_vm1, %v4435_v38, %v4505_v58  ;;  %v4509_v30 = vsel %vm8754_vm0, %v4436_v16, %v4508_v60  ;;  %v4443_v45 = vor.u32 %v4441_v33, %v4440_v9  ;;  %v4444_v63 = vrot.slane %v4440_v9, 4 }
 0x4fd   : > { %4507 = vst [vmem:[#allocation4 + $0x18] sm:$0xf] %v4506_v61  ;;  %4510 = vst [vmem:[#allocation4 + $0x1c] sm:$0x1] %v4509_v30  ;;  %v4494_v46 = vsel %vm8871_vm1, %v4419_v3, %v4493_v32  ;;  %v4497_v47 = vsel %vm8754_vm0, %v4420_v51, %v4496_v39  ;;  %v4427_v48 = vor.u32 %v4425_v35, %v4424_v4  ;;  %v4428_v6 = vrot.slane %v4424_v4, 4 }
 0x4fe   : > { %4495 = vst [vmem:[#allocation4 + $0x8] sm:$0xf] %v4494_v46  ;;  %4498 = vst [vmem:[#allocation4 + $0xc] sm:$0x1] %v4497_v47  ;;  %v4512_v55 = vsel %vm8871_vm1, %v4443_v45, %v4511_v50  ;;  %v4515_v52 = vsel %vm8754_vm0, %v4444_v63, %v4514_v15  ;;  %v9668_v36 = vrot.slane %v4611_v43, 5  ;;  %v5287_v57 = vshll.u32 %v5183_v62, 16 }
 0x4ff   : > { %4513 = vst [vmem:[#allocation4 + $0x20] sm:$0xf] %v4512_v55  ;;  %4516 = vst [vmem:[#allocation4 + $0x24] sm:$0x1] %v4515_v52  ;;  %v4500_v42 = vsel %vm8871_vm1, %v4427_v48, %v4499_v53  ;;  %v4503_v2 = vsel %vm8754_vm0, %v4428_v6, %v4502_v49  ;;  %v5293_v37 = vshll.u32 %v5184_v34, 16  ;;  %v7626_v19 = vrot.slane %v9664_v14, 9 }
 0x500   : > { %4501 = vst [vmem:[#allocation4 + $0x10] sm:$0xf] %v4500_v42  ;;  %4504 = vst [vmem:[#allocation4 + $0x14] sm:$0x1] %v4503_v2  ;;  %v9671_v27 = vrot.slane %v5284_v25, 4  ;;  %v9674_v31 = vrot.slane %v5287_v57, 5  ;;  %v4776_v51 = vsel %vm8539_vm9, %v7579_v44, %v4775_v56  ;;  %v4614_v4 = vsel %vm8603_vm12, %v9666_v0, %v9668_v36 }
 0x501   : > { %v9676_v33 = vrot.slane %v5293_v37, 5  ;;  %v4286_v35 = vadd.f32 %v9644_v11, %v9638_v41  ;;  %v4289_v47 = vadd.f32 %v9646_v7, %v9638_v41 }
 0x503   : > { %v7840_v13 = vpop.f32.mrb[28].mxu0 }
 0x504   : > { %v7841_v54 = vpop.f32.mrb[29].mxu0  ;;  %v5037_v38 = vld [vmem:[#allocation4 + $0x18] sm:$0xe]  ;;  %v5038_v16 = vld [vmem:[#allocation4 + $0x1c] sm:$0x1] }
 0x505   : > { %v7842_v18 = vadd.f32 %v7841_v54, %v7840_v13  ;;  %v7843_v17 = vpop.f32.mrb[30].mxu0  ;;  %v8165_v24 = vld [vmem:[#allocation4] ss:$8 sps:$4 sm:$0xff]   ;;  %v7601_v3 = vrot.slane %v5037_v38, 9  ;;  %v5075_v39 = vrot.slane %v5038_v16, 5 }
 0x506   : > { %v7844_v21 = vpop.f32.mrb[31].mxu0  ;;  %v8166_v29 = vld [vmem:[#allocation4 + $0x18] ss:$8 sps:$4 sm:$0xff]   ;;  %4569 = vrot.lane.b32.xlu0 %v8165_v24, %s10503_s25  ;;  %v5040_v60 = vld [vmem:[#allocation4 + $0x24] sm:$0x1] }
 0x507   : > { %v7845_v26 = vadd.f32 %v7844_v21, %v7843_v17  ;;  %4863 = vrot.lane.b32.xlu1 %v8166_v29, %s10510_s0  ;;  %v8167_v40 = vld [vmem:[#allocation4 + $0x8] ss:$8 sps:$4 sm:$0xff]   ;;  %v4294_v58 = vadd.f32 %v7842_v18, %v9638_v41  ;;  %v5039_v9 = vld [vmem:[#allocation4 + $0x20] sm:$0xe]  ;;  %v5079_v63 = vrot.slane %v5040_v60, 5  ;;  %v5076_v53 = vsel %vm8539_vm9, %v7601_v3, %v5075_v39 }
 0x508   : > { %v8168_v23 = vld [vmem:[#allocation4 + $0x10] ss:$8 sps:$4 sm:$0xff]   ;;  %v7602_v45 = vrot.slane %v5039_v9, 9  ;;  %v4743_v12 = vld [vmem:[#allocation4 + $0x8] sm:$0xe] }
 0x509   : > { %v8169_v30 = vld [vmem:[#allocation4 + $0x10] ss:$8 sps:$4 sm:$0xff]   ;;  %v4297_v46 = vadd.f32 %v7845_v26, %v9638_v41  ;;  %v4744_v48 = vld [vmem:[#allocation4 + $0xc] sm:$0x1]  ;;  %v7580_v11 = vrot.slane %v4743_v12, 9 }
 0x50a   : > { %4861 = vrot.lane.b32.xlu0 %v8167_v40, %s10510_s0  ;;  %v4745_v6 = vld [vmem:[#allocation4 + $0x10] sm:$0xe]  ;;  %v5080_v49 = vsel %vm8539_vm9, %v7602_v45, %v5079_v63  ;;  %v4779_v62 = vrot.slane %v4744_v48, 5  ;;  %v4746_v42 = vld [vmem:[#allocation4 + $0x14] sm:$0x1] }
 0x50b   : > { %v7868_v32 = vpop.f32.mrb[32].mxu0  ;;  %4571 = vrot.lane.b32.xlu1 %v8168_v23, %s10503_s25  ;;  %v7581_v2 = vrot.slane %v4745_v6, 9  ;;  %v7608_v5 = vcombine.low %v5076_v53, %v5080_v49  ;;  %v4747_v8 = vld [vmem:[#allocation4 + $0x18] sm:$0xe]  ;;  %v4748_v43 = vld [vmem:[#allocation4 + $0x1c] sm:$0x1] }
 0x50c   : > { %v7869_v61 = vpop.f32.mrb[33].mxu0  ;;  %v4783_v34 = vrot.slane %v4746_v42, 5  ;;  %v4780_v44 = vsel %vm8539_vm9, %v7580_v11, %v4779_v62  ;;  %v7582_v56 = vrot.slane %v4747_v8, 9  ;;  %v4787_v54 = vrot.slane %v4748_v43, 5  ;;  %v4529_v42 = vld [vmem:[#allocation4 + $0x38] sm:$0xf] }
 0x50d   : > { %v9692_v50 = vadd.f32 %v7869_v61, %v7868_v32  ;;  %v7871_v15 = vpop.f32.mrb[34].mxu0  ;;  %v7953_v55 = vpop.f32.mrb[20].mxu1  ;;  %v7587_v17 = vcombine.low %v4776_v51, %v4780_v44 }
 0x50e   : > { %v7872_v52 = vpop.f32.mrb[35].mxu0  ;;  %v4359_v41 = vadd.f32 %v7953_v55, %v4294_v58  ;;  %v4350_v7 = vpop.f32.mrb[21].mxu1  ;;  %5153 = vrot.lane.b32.xlu0 %v8169_v30, %s10505_s16  ;;  %v4784_v26 = vsel %vm8539_vm9, %v7581_v2, %v4783_v34  ;;  %v4788_v38 = vsel %vm8539_vm9, %v7582_v56, %v4787_v54  ;;  %v5033_v30 = vld [vmem:[#allocation4 + $0x8] sm:$0xe]  ;;  %v9715_v55 = vld [vmem:[#allocation4 + $0x10] sm:$0xe] }
 0x50f   : > { %v9699_v1 = vadd.f32 %v7872_v52, %v7871_v15  ;;  %v4351_v25 = vadd.f32 %v4350_v7, %v4286_v35  ;;  %v7954_v13 = vpop.f32.mrb[22].mxu1  ;;  %5111 = vrot.lane.b32.xlu1 %v7608_v5, %s10511_s22  ;;  %v7588_v61 = vcombine.low %v4784_v26, %v4788_v38  ;;  %v7599_v62 = vrot.slane %v5033_v30, 9  ;;  %v4532_v2 = vld [vmem:[#allocation4 + $0x3c] sm:$0x1] }
 0x510   : > { %vm4371_vm10 = vcmp.ge.f32.partialorder %v4359_v41, 0.0  ;;  %v4379_v57 = vmul.f32 0.2, %v4359_v41  ;;  %v4362_v37 = vadd.f32 %v7954_v13, %v4297_v46  ;;  %v4353_v18 = vpop.f32.mrb[23].mxu1  ;;  %v4520_v13 = vld [vmem:[#allocation4 + $0x2c] sm:$0x1] }
 0x511   : > { %vm4369_vm4 = vcmp.ge.f32.partialorder %v4351_v25, 0.0  ;;  %v4377_v21 = vmul.f32 0.2, %v4351_v25  ;;  %v4354_v24 = vadd.f32 %v4353_v18, %v4289_v47  ;;  %v5034_v47 = vld [vmem:[#allocation4 + $0xc] sm:$0x1]  ;;  %v7600_v56 = vrot.slane %v9715_v55, 9 }
 0x512   : > { %v4387_v29 = vsel %vm4371_vm10, %v4359_v41, %v4379_v57  ;;  %vm4372_vm13 = vcmp.ge.f32.partialorder %v4362_v37, 0.0  ;;  %v4380_v40 = vmul.f32 0.2, %v4362_v37  ;;  %4817 = vrot.lane.b32.xlu0 %v7587_v17, %s10506_s12  ;;  %v5067_v8 = vrot.slane %v5034_v47, 5  ;;  %v4538_v18 = vld [vmem:[#allocation4 + $0x44] sm:$0x1] }
 0x513   : > { %v7874_v23 = vpop.f32.mrb[36].mxu0  ;;  %v7795_v16 = vpack.c.bf16 %v4387_v29, %v4387_v29  ;;  %v4385_v58 = vsel %vm4369_vm4, %v4351_v25, %v4377_v21  ;;  %vm4370_vm2 = vcmp.ge.f32.partialorder %v4354_v24, 0.0  ;;  %v4378_v32 = vmul.f32 0.2, %v4354_v24  ;;  %4819 = vrot.lane.b32.xlu1 %v7588_v61, %s10506_s12  ;;  %v4517_v25 = vld [vmem:[#allocation4 + $0x28] sm:$0xf] }
 0x514   : > { %v7875_v9 = vpop.f32.mrb[37].mxu0  ;;  %v7793_v60 = vpack.c.bf16 %v4385_v58, %v4385_v58  ;;  %v4388_v3 = vsel %vm4372_vm13, %v4362_v37, %v4380_v40  ;;  %v4535_v37 = vld [vmem:[#allocation4 + $0x40] sm:$0xf]  ;;  %v5068_v26 = vsel %vm8539_vm9, %v7599_v62, %v5067_v8  ;;  %v4526_v58 = vld [vmem:[#allocation4 + $0x34] sm:$0x1]  ;;  %vm10521_vm10 = vcmask 523712  }
 0x515   : > { %v9710_v51 = vadd.f32 %v7875_v9, %v7874_v23  ;;  %v7877_v35 = vpop.f32.mrb[38].mxu0  ;;  %v4462_v39 = vshrl.u32 %v7795_v16, 16  ;;  %v4465_v45 = vshll.u32 %v7795_v16, 16  ;;  %v7796_v63 = vpack.c.bf16 %v4388_v3, %v4388_v3  ;;  %v4523_v16 = vld [vmem:[#allocation4 + $0x30] sm:$0xf] }
 0x516   : > { %v4386_v12 = vsel %vm4370_vm2, %v4354_v24, %v4378_v32  ;;  %v7878_v46 = vpop.f32.mrb[39].mxu0  ;;  %v4446_v15 = vshrl.u32 %v7793_v60, 16  ;;  %v4449_v48 = vshll.u32 %v7793_v60, 16  ;;  %v5036_v24 = vld [vmem:[#allocation4 + $0x14] sm:$0x1]  ;;  %vm10522_vm4 = vcmask 589312  }
 0x517   : > { %v7794_v11 = vpack.c.bf16 %v4386_v12, %v4386_v12  ;;  %v9712_v6 = vadd.f32 %v7878_v46, %v7877_v35  ;;  %v4464_v52 = vrot.slane %v4462_v39, 7  ;;  %v4470_v53 = vshrl.u32 %v7796_v63, 16  ;;  %v5325_v9 = vld [vmem:[#allocation4 + $0x10] sm:$0xe]  ;;  %v5326_v60 = vld [vmem:[#allocation4 + $0x14] sm:$0x1] }
 0x518   : > { %v4473_v49 = vshll.u32 %v7796_v63, 16  ;;  %v4448_v41 = vrot.slane %v4446_v15, 7  ;;  %v5328_v63 = vld [vmem:[#allocation4 + $0x1c] sm:$0x1]  ;;  %v5071_v15 = vrot.slane %v5036_v24, 5  ;;  %vm10523_vm13 = vcmask 654912  }
 0x519   : > { %v4454_v7 = vshrl.u32 %v7794_v11, 16  ;;  %v4457_v5 = vshll.u32 %v7794_v11, 16  ;;  %v4467_v43 = vor.u32 %v4465_v45, %v4464_v52  ;;  %v4468_v34 = vrot.slane %v4464_v52, 4  ;;  %v5327_v45 = vld [vmem:[#allocation4 + $0x18] sm:$0xe] }
 0x51a   : > { %v4472_v44 = vrot.slane %v4470_v53, 7  ;;  %v4451_v54 = vor.u32 %v4449_v48, %v4448_v41  ;;  %v4452_v57 = vrot.slane %v4448_v41, 4  ;;  %v4587_v11 = vld [vmem:[#allocation4 + $0x8] sm:$0xf]  ;;  %v7619_v53 = vrot.slane %v5325_v9, 9 }
 0x51b   : > { %v4456_v17 = vrot.slane %v4454_v7, 7  ;;  %v7880_v21 = vpop.f32.mrb[40].mxu0  ;;  %v4530_v29 = vsel %vm8871_vm1, %v4467_v43, %v4529_v42  ;;  %v4533_v40 = vsel %vm8754_vm0, %v4468_v34, %v4532_v2  ;;  %v4588_v62 = vld [vmem:[#allocation4 + $0xc] sm:$0x1]  ;;  %v4881_v42 = vld [vmem:[#allocation4 + $0x18] sm:$0xf]  ;;  %v5072_v2 = vsel %vm8539_vm9, %v7600_v56, %v5071_v15 }
 0x51c   : > { %v4475_v23 = vor.u32 %v4473_v49, %v4472_v44  ;;  %v4476_v38 = vrot.slane %v4472_v44, 4  ;;  %v7881_v32 = vpop.f32.mrb[41].mxu0  ;;  %4531 = vst [vmem:[#allocation4 + $0x38] sm:$0xf] %v4530_v29  ;;  %4534 = vst [vmem:[#allocation4 + $0x3c] sm:$0x1] %v4533_v40  ;;  %v4518_v3 = vsel %vm8871_vm1, %v4451_v54, %v4517_v25  ;;  %v4521_v35 = vsel %vm8754_vm0, %v4452_v57, %v4520_v13 }
 0x51d   : > { %v4459_v61 = vor.u32 %v4457_v5, %v4456_v17  ;;  %v4460_v30 = vrot.slane %v4456_v17, 4  ;;  %v7883_v39 = vpop.f32.mrb[42].mxu0  ;;  %4519 = vst [vmem:[#allocation4 + $0x28] sm:$0xf] %v4518_v3  ;;  %4522 = vst [vmem:[#allocation4 + $0x2c] sm:$0x1] %v4521_v35  ;;  %v9732_v47 = vadd.f32 %v7881_v32, %v7880_v21  ;;  %v7607_v43 = vcombine.low %v5068_v26, %v5072_v2 }
 0x51e   : > { %v4536_v12 = vsel %vm8871_vm1, %v4475_v23, %v4535_v37  ;;  %v4539_v46 = vsel %vm8754_vm0, %v4476_v38, %v4538_v18  ;;  %v7884_v48 = vpop.f32.mrb[43].mxu0  ;;  %v5359_v49 = vrot.slane %v5326_v60, 5  ;;  %v7620_v41 = vrot.slane %v5327_v45, 9  ;;  %v4882_v8 = vld [vmem:[#allocation4 + $0x1c] sm:$0x1] }
 0x51f   : > { %4537 = vst [vmem:[#allocation4 + $0x40] sm:$0xf] %v4536_v12  ;;  %4540 = vst [vmem:[#allocation4 + $0x44] sm:$0x1] %v4539_v46  ;;  %v4524_v55 = vsel %vm8871_vm1, %v4459_v61, %v4523_v16  ;;  %v4527_v52 = vsel %vm8754_vm0, %v4460_v30, %v4526_v58  ;;  %v5363_v7 = vrot.slane %v5328_v63, 5  ;;  %v9740_v5 = vadd.f32 %v7884_v48, %v7883_v39 }
 0x520   : > { %4525 = vst [vmem:[#allocation4 + $0x30] sm:$0xf] %v4524_v55  ;;  %4528 = vst [vmem:[#allocation4 + $0x34] sm:$0x1] %v4527_v52  ;;  %v5360_v34 = vsel %vm8539_vm9, %v7619_v53, %v5359_v49  ;;  %v4616_v25 = vshrl.u32 %v4587_v11, 16  ;;  %v4619_v13 = vshll.u32 %v4587_v11, 16  ;;  %5109 = vrot.lane.b32.xlu0 %v7607_v43, %s10511_s22  ;;  %v5290_v60 = vor.u32 %v9674_v31, %v9671_v27 }
 0x521   : > { %v4883_v44 = vld [vmem:[#allocation4 + $0x20] sm:$0xf]  ;;  %v4884_v54 = vld [vmem:[#allocation4 + $0x24] sm:$0x1]  ;;  %v5364_v57 = vsel %vm8539_vm9, %v7620_v41, %v5363_v7  ;;  %v4625_v37 = vshll.u32 %v4588_v62, 16  ;;  %v4922_v18 = vshrl.u32 %v4881_v42, 16 }
 0x522   : > { %v4925_v17 = vshll.u32 %v4881_v42, 16  ;;  %v4877_v56 = vld [vmem:[#allocation4 + $0x8] sm:$0xf]  ;;  %v7627_v21 = vcombine.low %v5360_v34, %v5364_v57  ;;  %v4618_v24 = vrot.slane %v4616_v25, 4  ;;  %v4621_v29 = vrot.slane %v4619_v13, 5 }
 0x523   : > { %v4931_v26 = vshll.u32 %v4882_v8, 16  ;;  %v7886_v40 = vpop.f32.mrb[44].mxu0  ;;  %v4878_v23 = vld [vmem:[#allocation4 + $0xc] sm:$0x1]  ;;  %v4924_v38 = vrot.slane %v4922_v18, 4  ;;  %v4936_v58 = vshrl.u32 %v4883_v44, 16 }
 0x524   : > { %v4927_v16 = vrot.slane %v4925_v17, 5  ;;  %v7887_v32 = vpop.f32.mrb[45].mxu0  ;;  %v4879_v9 = vld [vmem:[#allocation4 + $0x10] sm:$0xf]  ;;  %5401 = vrot.lane.b32.xlu1 %v7627_v21, %s10515_s1  ;;  %v4622_v3 = vor.u32 %v4621_v29, %v4618_v24  ;;  %v4627_v35 = vrot.slane %v4625_v37, 5  ;;  %v4939_v61 = vshll.u32 %v4883_v44, 16 }
 0x525   : > { %v4945_v30 = vshll.u32 %v4884_v54, 16  ;;  %v7889_v39 = vpop.f32.mrb[46].mxu0  ;;  %v4938_v63 = vrot.slane %v4936_v58, 4  ;;  %v9750_v12 = vadd.f32 %v7887_v32, %v7886_v40  ;;  %v4880_v46 = vld [vmem:[#allocation4 + $0x14] sm:$0x1]  ;;  %v4894_v15 = vshrl.u32 %v4877_v56, 16 }
 0x526   : > { %v4928_v45 = vor.u32 %v4927_v16, %v4924_v38  ;;  %v7890_v48 = vpop.f32.mrb[47].mxu0  ;;  %v4623_v11 = vrot.slane %v4622_v3, 4  ;;  %v4933_v55 = vrot.slane %v4931_v26, 5  ;;  %v4941_v52 = vrot.slane %v4939_v61, 5  ;;  %v5169_v41 = vld [vmem:[#allocation4 + $0x10] sm:$0xf] }
 0x527   : > { %v4897_v53 = vshll.u32 %v4877_v56, 16  ;;  %v4896_v62 = vrot.slane %v4894_v15, 4  ;;  %v4903_v42 = vshll.u32 %v4878_v23, 16  ;;  %v4908_v2 = vshrl.u32 %v4879_v9, 16  ;;  %v5170_v57 = vld [vmem:[#allocation4 + $0x14] sm:$0x1] }
 0x528   : > { %v4929_v49 = vrot.slane %v4928_v45, 4  ;;  %v4628_v7 = vsel %vm8603_vm12, %v4623_v11, %v4627_v35  ;;  %v4942_v8 = vor.u32 %v4941_v52, %v4938_v63  ;;  %v4911_v34 = vshll.u32 %v4879_v9, 16  ;;  %v5171_v21 = vld [vmem:[#allocation4 + $0x18] sm:$0xf]  ;;  %v5172_v26 = vld [vmem:[#allocation4 + $0x1c] sm:$0x1] }
 0x529   : > { %v4899_v43 = vrot.slane %v4897_v53, 5  ;;  %v7575_v25 = vcombine.low %v4614_v4, %v4628_v7  ;;  %v4947_v44 = vrot.slane %v4945_v30, 5  ;;  %v4910_v54 = vrot.slane %v4908_v2, 4  ;;  %v4589_v32 = vld [vmem:[#allocation4 + $0x10] sm:$0xf] }
 0x52a   : > { %v4934_v13 = vsel %vm8603_vm12, %v4929_v49, %v4933_v55  ;;  %v4943_v37 = vrot.slane %v4942_v8, 4  ;;  %v4913_v17 = vrot.slane %v4911_v34, 5  ;;  %v4917_v56 = vshll.u32 %v4880_v46, 16  ;;  %v4590_v45 = vld [vmem:[#allocation4 + $0x14] sm:$0x1] }
 0x52b   : > { %v4900_v18 = vor.u32 %v4899_v43, %v4896_v62  ;;  %4725 = vrot.lane.b32.xlu0 %v7575_v25, %s10509_s30  ;;  %v4905_v24 = vrot.slane %v4903_v42, 5  ;;  %v9762_v29 = vadd.f32 %v7890_v48, %v7889_v39  ;;  %v5186_v40 = vshrl.u32 %v5169_v41, 16  ;;  %v7919_v36 = vpop.f32.mrb[48].mxu0  ;;  %v4591_v49 = vld [vmem:[#allocation4 + $0x18] sm:$0xf] }
 0x52c   : > { %v5189_v0 = vshll.u32 %v5169_v41, 16  ;;  %v4948_v4 = vsel %vm8603_vm12, %v4943_v37, %v4947_v44  ;;  %v4914_v38 = vor.u32 %v4913_v17, %v4910_v54  ;;  %v5195_v16 = vshll.u32 %v5170_v57, 16  ;;  %v7920_v58 = vpop.f32.mrb[49].mxu0  ;;  %v4592_v62 = vld [vmem:[#allocation4 + $0x1c] sm:$0x1] }
 0x52d   : > { %v4901_v23 = vrot.slane %v4900_v18, 4  ;;  %v7596_v9 = vcombine.low %v4934_v13, %v4948_v4  ;;  %v4919_v3 = vrot.slane %v4917_v56, 5  ;;  %v5188_v35 = vrot.slane %v5186_v40, 4  ;;  %v7922_v30 = vpop.f32.mrb[50].mxu0  ;;  %v8170_v2 = vld [vmem:[#allocation4 + $0x20] ss:$8 sps:$4 sm:$0xff]  }
 0x52e   : > { %v5191_v61 = vrot.slane %v5189_v0, 5  ;;  %v4915_v63 = vrot.slane %v4914_v38, 4  ;;  %v5200_v46 = vshrl.u32 %v5171_v21, 16  ;;  %v5203_v15 = vshll.u32 %v5171_v21, 16  ;;  %v7923_v48 = vpop.f32.mrb[51].mxu0 }
 0x52f   : > { %v4906_v39 = vsel %vm8603_vm12, %v4901_v23, %v4905_v24  ;;  %5019 = vrot.lane.b32.xlu1 %v7596_v9, %s10504_s29  ;;  %v5209_v55 = vshll.u32 %v5172_v26, 16  ;;  %v9769_v52 = vadd.f32 %v7920_v58, %v7919_v36  ;;  %v9771_v53 = vadd.f32 %v7923_v48, %v7922_v30  ;;  %v9775_v44 = vld [vmem:[#allocation4 + $0x20] sm:$0xe]  ;;  %v5331_v54 = vld [vmem:[#allocation4 + $0x28] sm:$0xe] }
 0x530   : > { %v5192_v11 = vor.u32 %v5191_v61, %v5188_v35  ;;  %v4920_v42 = vsel %vm8603_vm12, %v4915_v63, %v4919_v3  ;;  %v5202_v41 = vrot.slane %v5200_v46, 4  ;;  %v5205_v7 = vrot.slane %v5203_v15, 5  ;;  %v5332_v56 = vld [vmem:[#allocation4 + $0x2c] sm:$0x1]  ;;  %v8171_v24 = vld [vmem:[#allocation4 + $0x20] ss:$8 sps:$4 sm:$0xff]  }
 0x531   : > { %v4630_v8 = vshrl.u32 %v4589_v32, 16  ;;  %v7595_v43 = vcombine.low %v4906_v39, %v4920_v42  ;;  %v5197_v25 = vrot.slane %v5195_v16, 5  ;;  %v4633_v13 = vshll.u32 %v4589_v32, 16  ;;  %v5330_v0 = vld [vmem:[#allocation4 + $0x24] sm:$0x1] }
 0x532   : > { %v5193_v34 = vrot.slane %v5192_v11, 4  ;;  %v5206_v57 = vor.u32 %v5205_v7, %v5202_v41  ;;  %v4639_v18 = vshll.u32 %v4590_v45, 16  ;;  %v4644_v17 = vshrl.u32 %v4591_v49, 16  ;;  %v4751_v32 = vld [vmem:[#allocation4 + $0x28] sm:$0xe] }
 0x533   : > { %v4632_v37 = vrot.slane %v4630_v8, 4  ;;  %5017 = vrot.lane.b32.xlu0 %v7595_v43, %s10504_s29  ;;  %5155 = vrot.lane.b32.xlu1 %v8170_v2, %s10505_s16  ;;  %v5211_v21 = vrot.slane %v5209_v55, 5  ;;  %v4635_v26 = vrot.slane %v4633_v13, 5  ;;  %v4647_v40 = vshll.u32 %v4591_v49, 16  ;;  %v7925_v36 = vpop.f32.mrb[52].mxu0  ;;  %v8177_v55 = vld [vmem:[%s10409_s7 + $0x80] sm:$0xff]  }
 0x534   : > { %v5198_v4 = vsel %vm8603_vm12, %v5193_v34, %v5197_v25  ;;  %v5207_v23 = vrot.slane %v5206_v57, 4  ;;  %v4646_v38 = vrot.slane %v4644_v17, 4  ;;  %v4653_v16 = vshll.u32 %v4592_v62, 16  ;;  %v7926_v58 = vpop.f32.mrb[53].mxu0  ;;  %v4749_v30 = vld [vmem:[#allocation4 + $0x20] sm:$0xe]  ;;  %7955 = vmatprep.subr.bf16.mxu1 %v8177_v55 }
 0x535   : > { %v4636_v9 = vor.u32 %v4635_v26, %v4632_v37  ;;  %v4641_v3 = vrot.slane %v4639_v18, 5  ;;  %v4649_v35 = vrot.slane %v4647_v40, 5  ;;  %v7928_v61 = vpop.f32.mrb[54].mxu0  ;;  %v4752_v45 = vld [vmem:[#allocation4 + $0x2c] sm:$0x1]  ;;  %v9784_v39 = vrot.slane %v5290_v60, 4  ;;  %7956 = vmatpush3.bf16.msra.mxu1 %v8177_v55 }
 0x536   : > { %v5212_v63 = vsel %vm8603_vm12, %v5207_v23, %v5211_v21  ;;  %v7621_v46 = vrot.slane %v9775_v44, 9  ;;  %v7622_v15 = vrot.slane %v5331_v54, 9  ;;  %v9789_v48 = vadd.f32 %v7926_v58, %v7925_v36  ;;  %v7929_v11 = vpop.f32.mrb[55].mxu0  ;;  %v4750_v60 = vld [vmem:[#allocation4 + $0x24] sm:$0x1]  ;;  %v8178_v8 = vld [vmem:[%s10409_s7 + $0x88] sm:$0xff]  }
 0x537   : > { %v7615_v49 = vcombine.low %v5198_v4, %v5212_v63  ;;  %4573 = vrot.lane.b32.xlu1 %v8171_v24, %s10503_s25  ;;  %v4637_v62 = vrot.slane %v4636_v9, 4  ;;  %v4650_v27 = vor.u32 %v4649_v35, %v4646_v38  ;;  %v5371_v31 = vrot.slane %v5332_v56, 5  ;;  %v9795_v7 = vld [vmem:[#allocation4 + $0x30] sm:$0xe]  ;;  %v4754_v13 = vld [vmem:[#allocation4 + $0x34] sm:$0x1]  ;;  %7957 = vmatprep.subr.bf16.mxu1 %v8178_v8 }
 0x538   : > { %v4655_v42 = vrot.slane %v4653_v16, 5  ;;  %v5367_v2 = vrot.slane %v5330_v0, 5  ;;  %v7584_v41 = vrot.slane %v4751_v32, 9  ;;  %v4795_v25 = vrot.slane %v4752_v45, 5  ;;  %v9803_v44 = vld [vmem:[#allocation4 + $0x38] sm:$0xe] }
 0x539   : > { %5309 = vrot.lane.b32.xlu0 %v7615_v49, %s10519_s26  ;;  %v4642_v43 = vsel %vm8603_vm12, %v4637_v62, %v4641_v3  ;;  %v4651_v34 = vrot.slane %v4650_v27, 4  ;;  %v8172_v54 = vld [vmem:[#allocation4 + $0x28] ss:$8 sps:$4 sm:$0xff]   ;;  %v7583_v57 = vrot.slane %v4749_v30, 9  ;;  %v4791_v37 = vrot.slane %v4750_v60, 5  ;;  %7958 = vmatpush3.bf16.msra.mxu1 %v8178_v8  ;;  %v8179_v63 = vld [vmem:[%s10409_s7 + $0x90] sm:$0xff]  }
 0x53a   : > { %v9805_v18 = vadd.f32 %v7929_v11, %v7928_v61  ;;  %v9807_v17 = vld [vmem:[#allocation4 + $0x3c] sm:$0x1]  ;;  %v5372_v21 = vsel %vm8539_vm9, %v7622_v15, %v5371_v31  ;;  %v7585_v24 = vrot.slane %v9795_v7, 9  ;;  %v4799_v26 = vrot.slane %v4754_v13, 5  ;;  %v9814_v0 = vld [vmem:[#allocation4 + $0x28] sm:$0xe]  ;;  %7959 = vmatprep.subr.bf16.mxu1 %v8179_v63 }
 0x53b   : > { %v4656_v56 = vsel %vm8603_vm12, %v4651_v34, %v4655_v42  ;;  %v7931_v40 = vpop.f32.mrb[56].mxu0  ;;  %v4796_v4 = vsel %vm8539_vm9, %v7584_v41, %v4795_v25  ;;  %v7586_v23 = vrot.slane %v9803_v44, 9  ;;  %v5042_v16 = vld [vmem:[#allocation4 + $0x2c] sm:$0x1]  ;;  %v5043_v58 = vld [vmem:[#allocation4 + $0x30] sm:$0xe]  ;;  %v5368_v9 = vsel %vm8539_vm9, %v7621_v46, %v5367_v2 }
 0x53c   : > { %v7576_v36 = vcombine.low %v4642_v43, %v4656_v56  ;;  %v7932_v38 = vpop.f32.mrb[57].mxu0  ;;  %v5044_v32 = vld [vmem:[#allocation4 + $0x34] sm:$0x1]  ;;  %v4803_v3 = vrot.slane %v9807_v17, 5  ;;  %v7604_v30 = vrot.slane %v5043_v58, 9  ;;  %v7628_v15 = vcombine.low %v5368_v9, %v5372_v21 }
 0x53d   : > { %4865 = vrot.lane.b32.xlu0 %v8172_v54, %s10510_s0  ;;  %v9823_v35 = vadd.f32 %v7932_v38, %v7931_v40  ;;  %v7934_v61 = vpop.f32.mrb[58].mxu0  ;;  %v4593_v45 = vld [vmem:[#allocation4 + $0x20] sm:$0xf]  ;;  %v4792_v55 = vsel %vm8539_vm9, %v7583_v57, %v4791_v37  ;;  %v5087_v46 = vrot.slane %v5044_v32, 5  ;;  %v4594_v62 = vld [vmem:[#allocation4 + $0x24] sm:$0x1]  ;;  %7960 = vmatpush3.bf16.msra.mxu1 %v8179_v63  ;;  %v4800_v37 = vsel %vm8539_vm9, %v7585_v24, %v4799_v26 }
 0x53e   : > { %4727 = vrot.lane.b32.xlu1 %v7576_v36, %s10509_s30  ;;  %v8173_v11 = vld [vmem:[#allocation4 + $0x38] ss:$8 sps:$4 sm:$0xff]   ;;  %v7935_v49 = vpop.f32.mrb[59].mxu0  ;;  %v4595_v27 = vld [vmem:[#allocation4 + $0x28] sm:$0xf]  ;;  %v7589_v31 = vcombine.low %v4792_v55, %v4796_v4  ;;  %v4658_v2 = vshrl.u32 %v4593_v45, 16 }
 0x53f   : > { %v9831_v60 = vadd.f32 %v7935_v49, %v7934_v61  ;;  %v4596_v42 = vld [vmem:[#allocation4 + $0x2c] sm:$0x1]  ;;  %v4661_v41 = vshll.u32 %v4593_v45, 16  ;;  %v7603_v7 = vrot.slane %v9814_v0, 9  ;;  %v4667_v8 = vshll.u32 %v4594_v62, 16  ;;  %v8181_v62 = vld [vmem:[%s10409_s7 + $0xa0] sm:$0xff]  }
 0x540   : > { %v4672_v43 = vshrl.u32 %v4595_v27, 16  ;;  %v4675_v34 = vshll.u32 %v4595_v27, 16  ;;  %v5083_v25 = vrot.slane %v5042_v16, 5  ;;  %v4660_v13 = vrot.slane %v4658_v2, 4  ;;  %v8174_v57 = vld [vmem:[#allocation4 + $0x40] ss:$8 sps:$4 sm:$0xff]  }
 0x541   : > { %5403 = vrot.lane.b32.xlu0 %v7628_v15, %s10515_s1  ;;  %v4663_v44 = vrot.slane %v4661_v41, 5  ;;  %v4681_v54 = vshll.u32 %v4596_v42, 16  ;;  %v4669_v17 = vrot.slane %v4667_v8, 5  ;;  %v5045_v40 = vld [vmem:[#allocation4 + $0x38] sm:$0xe]  ;;  %v9840_v0 = vsel %vm8539_vm9, %v7604_v30, %v5087_v46  ;;  %v8180_v24 = vld [vmem:[%s10409_s7 + $0x98] sm:$0xff]  }
 0x542   : > { %4867 = vrot.lane.b32.xlu1 %v8173_v11, %s10510_s0  ;;  %v4674_v56 = vrot.slane %v4672_v43, 4  ;;  %v4677_v21 = vrot.slane %v4675_v34, 5  ;;  %v5046_v38 = vld [vmem:[#allocation4 + $0x3c] sm:$0x1]  ;;  %v5047_v16 = vld [vmem:[#allocation4 + $0x40] sm:$0xe]  ;;  %v4804_v30 = vsel %vm8539_vm9, %v7586_v23, %v4803_v3  ;;  %v5084_v15 = vsel %vm8539_vm9, %v7603_v7, %v5083_v25  ;;  %7961 = vmatprep.subr.bf16.mxu1 %v8180_v24 }
 0x543   : > { %v4664_v36 = vor.u32 %v4663_v44, %v4660_v13  ;;  %v4683_v4 = vrot.slane %v4681_v54, 5  ;;  %v7605_v58 = vrot.slane %v5045_v40, 9  ;;  %v5048_v9 = vld [vmem:[#allocation4 + $0x44] sm:$0x1]  ;;  %v5091_v61 = vrot.slane %v5046_v38, 5  ;;  %v7937_v63 = vpop.f32.mrb[60].mxu0  ;;  %7962 = vmatpush3.bf16.msra.mxu1 %v8180_v24 }
 0x544   : > { %v4678_v32 = vor.u32 %v4677_v21, %v4674_v56  ;;  %v7606_v45 = vrot.slane %v5047_v16, 9  ;;  %v8175_v26 = vld [vmem:[#allocation4 + $0x30] ss:$8 sps:$4 sm:$0xff]   ;;  %v5095_v55 = vrot.slane %v5048_v9, 5  ;;  %v7938_v46 = vpop.f32.mrb[61].mxu0  ;;  %v7590_v27 = vcombine.low %v4800_v37, %v4804_v30  ;;  %7963 = vmatprep.subr.bf16.mxu1 %v8181_v62  ;;  %s7805_s0 = sshll.u32 %s8370_s21, 10 }
 0x545   : > { %4821 = vrot.lane.b32.xlu0 %v7589_v31, %s10506_s12  ;;  %v4665_v11 = vrot.slane %v4664_v36, 4  ;;  %v5173_v49 = vld [vmem:[#allocation4 + $0x20] sm:$0xf]  ;;  %v7609_v31 = vcombine.low %v5084_v15, %v9840_v0  ;;  %v9855_v2 = vadd.f32 %v7938_v46, %v7937_v63  ;;  %v7940_v23 = vpop.f32.mrb[62].mxu0  ;;  %v5174_v3 = vld [vmem:[#allocation4 + $0x24] sm:$0x1]  ;;  %v9859_v7 = vsel %vm8539_vm9, %v7605_v58, %v5091_v61 }
 0x546   : > { %5159 = vrot.lane.b32.xlu1 %v8174_v57, %s10505_s16  ;;  %v4679_v42 = vrot.slane %v4678_v32, 4  ;;  %v5175_v41 = vld [vmem:[#allocation4 + $0x28] sm:$0xf]  ;;  %v9863_v8 = vsel %vm8539_vm9, %v7606_v45, %v5095_v55  ;;  %v5176_v43 = vld [vmem:[#allocation4 + $0x2c] sm:$0x1]  ;;  %v5214_v34 = vshrl.u32 %v5173_v49, 16 }
 0x547   : > { %v5217_v25 = vshll.u32 %v5173_v49, 16  ;;  %v7941_v13 = vpop.f32.mrb[63].mxu0  ;;  %v4670_v44 = vsel %vm8603_vm12, %v4665_v11, %v4669_v17  ;;  %v5223_v57 = vshll.u32 %v5174_v3, 16  ;;  %v5228_v37 = vshrl.u32 %v5175_v41, 16  ;;  %v4597_v56 = vld [vmem:[#allocation4 + $0x30] sm:$0xf]  ;;  %7964 = vmatpush3.bf16.msra.mxu1 %v8181_v62 }
 0x548   : > { %v4684_v54 = vsel %vm8603_vm12, %v4679_v42, %v4683_v4  ;;  %v4598_v21 = vld [vmem:[#allocation4 + $0x34] sm:$0x1]  ;;  %v7610_v40 = vcombine.low %v9859_v7, %v9863_v8  ;;  %v5216_v0 = vrot.slane %v5214_v34, 4  ;;  %v5231_v38 = vshll.u32 %v5175_v41, 16  ;;  %v4599_v16 = vld [vmem:[#allocation4 + $0x38] sm:$0xf] }
 0x549   : > { %4575 = vrot.lane.b32.xlu0 %v8175_v26, %s10503_s25  ;;  %v5219_v36 = vrot.slane %v5217_v25, 5  ;;  %v7577_v17 = vcombine.low %v4670_v44, %v4684_v54  ;;  %v5230_v58 = vrot.slane %v5228_v37, 4  ;;  %v5237_v32 = vshll.u32 %v5176_v43, 16  ;;  %v4600_v45 = vld [vmem:[#allocation4 + $0x3c] sm:$0x1] }
 0x54a   : > { %4823 = vrot.lane.b32.xlu1 %v7590_v27, %s10506_s12  ;;  %v9873_v4 = vadd.f32 %v7941_v13, %v7940_v23  ;;  %v5233_v61 = vrot.slane %v5231_v38, 5  ;;  %v4686_v63 = vshrl.u32 %v4597_v56, 16  ;;  %v4689_v24 = vshll.u32 %v4597_v56, 16  ;;  %v4885_v55 = vld [vmem:[#allocation4 + $0x28] sm:$0xf]  ;;  %v8182_v23 = vld [vmem:[%s10409_s7 + $0xa8] sm:$0xff]  }
 0x54b   : > { %v5220_v9 = vor.u32 %v5219_v36, %v5216_v0  ;;  %v5225_v26 = vrot.slane %v5223_v57, 5  ;;  %v4695_v30 = vshll.u32 %v4598_v21, 16  ;;  %v4700_v15 = vshrl.u32 %v4599_v16, 16  ;;  %v4886_v3 = vld [vmem:[#allocation4 + $0x2c] sm:$0x1]  ;;  %7965 = vmatprep.subr.bf16.mxu1 %v8182_v23 }
 0x54c   : > { %v4703_v11 = vshll.u32 %v4599_v16, 16  ;;  %v5234_v49 = vor.u32 %v5233_v61, %v5230_v58  ;;  %v4688_v27 = vrot.slane %v4686_v63, 4  ;;  %v4691_v42 = vrot.slane %v4689_v24, 5  ;;  %v4887_v43 = vld [vmem:[#allocation4 + $0x30] sm:$0xf]  ;;  %7966 = vmatpush3.bf16.msra.mxu1 %v8182_v23 }
 0x54d   : > { %5113 = vrot.lane.b32.xlu0 %v7609_v31, %s10511_s22  ;;  %v5221_v46 = vrot.slane %v5220_v9, 4  ;;  %v5239_v41 = vrot.slane %v5237_v32, 5  ;;  %v4702_v62 = vrot.slane %v4700_v15, 4  ;;  %v4709_v8 = vshll.u32 %v4600_v45, 16  ;;  %v8176_v34 = vld [vmem:[#allocation4 + $0x30] ss:$8 sps:$4 sm:$0xff]  }
 0x54e   : > { %4729 = vrot.lane.b32.xlu1 %v7577_v17, %s10509_s30  ;;  %v4705_v7 = vrot.slane %v4703_v11, 5  ;;  %v5235_v25 = vrot.slane %v5234_v49, 4  ;;  %v4692_v13 = vor.u32 %v4691_v42, %v4688_v27  ;;  %v4697_v31 = vrot.slane %v4695_v30, 5  ;;  %v4888_v37 = vld [vmem:[#allocation4 + $0x34] sm:$0x1] }
 0x54f   : > { %v4950_v44 = vshrl.u32 %v4885_v55, 16  ;;  %v5226_v54 = vsel %vm8603_vm12, %v5221_v46, %v5225_v26  ;;  %v4953_v56 = vshll.u32 %v4885_v55, 16  ;;  %v4959_v21 = vshll.u32 %v4886_v3, 16  ;;  %v4889_v17 = vld [vmem:[#allocation4 + $0x38] sm:$0xf] }
 0x550   : > { %v4706_v57 = vor.u32 %v4705_v7, %v4702_v62  ;;  %v5240_v0 = vsel %vm8603_vm12, %v5235_v25, %v5239_v41  ;;  %v4693_v36 = vrot.slane %v4692_v13, 4  ;;  %v4964_v16 = vshrl.u32 %v4887_v43, 16  ;;  %v4891_v30 = vld [vmem:[#allocation4 + $0x40] sm:$0xf]  ;;  %v4890_v55 = vld [vmem:[#allocation4 + $0x3c] sm:$0x1] }
 0x551   : > { %5157 = vrot.lane.b32.xlu0 %v8176_v34, %s10505_s16  ;;  %v4952_v38 = vrot.slane %v4950_v44, 4  ;;  %v7616_v58 = vcombine.low %v5226_v54, %v5240_v0  ;;  %v4711_v9 = vrot.slane %v4709_v8, 5  ;;  %v4955_v61 = vrot.slane %v4953_v56, 5  ;;  %v4892_v3 = vld [vmem:[#allocation4 + $0x44] sm:$0x1]  ;;  %s10576_s16 = smov %s10575_s17 }
 0x552   : > { %5115 = vrot.lane.b32.xlu1 %v7610_v40, %s10511_s22  ;;  %v4707_v32 = vrot.slane %v4706_v57, 4  ;;  %v4698_v45 = vsel %vm8603_vm12, %v4693_v36, %v4697_v31  ;;  %v4966_v63 = vrot.slane %v4964_v16, 4  ;;  %v4967_v24 = vshll.u32 %v4887_v43, 16  ;;  %v5177_v23 = vld [vmem:[#allocation4 + $0x30] sm:$0xf]  ;;  %s10348_s22 = scalar_lea.hbm %s10575_s17, %s7805_s0 }
 0x553   : > { %v4973_v26 = vshll.u32 %v4888_v37, 16  ;;  %v4956_v11 = vor.u32 %v4955_v61, %v4952_v38  ;;  %v4978_v46 = vshrl.u32 %v4889_v17, 16  ;;  %v4981_v49 = vshll.u32 %v4889_v17, 16  ;;  %v5178_v43 = vld [vmem:[#allocation4 + $0x34] sm:$0x1] }
 0x554   : > { %v4712_v15 = vsel %vm8603_vm12, %v4707_v32, %v4711_v9  ;;  %v4961_v27 = vrot.slane %v4959_v21, 5  ;;  %v4969_v42 = vrot.slane %v4967_v24, 5  ;;  %v4992_v8 = vshrl.u32 %v4891_v30, 16  ;;  %v5179_v44 = vld [vmem:[#allocation4 + $0x38] sm:$0xf] }
 0x555   : > { %5311 = vrot.lane.b32.xlu0 %v7616_v58, %s10519_s26  ;;  %v7578_v40 = vcombine.low %v4698_v45, %v4712_v15  ;;  %v4957_v41 = vrot.slane %v4956_v11, 4  ;;  %v4980_v62 = vrot.slane %v4978_v46, 4  ;;  %v4983_v7 = vrot.slane %v4981_v49, 5  ;;  %v5180_v38 = vld [vmem:[#allocation4 + $0x3c] sm:$0x1] }
 0x556   : > { %v4970_v34 = vor.u32 %v4969_v42, %v4966_v63  ;;  %v4975_v25 = vrot.slane %v4973_v26, 5  ;;  %v4987_v13 = vshll.u32 %v4890_v55, 16  ;;  %v4995_v31 = vshll.u32 %v4891_v30, 16  ;;  %v5181_v61 = vld [vmem:[#allocation4 + $0x40] sm:$0xf] }
 0x557   : > { %4731 = vrot.lane.b32.xlu1 %v7578_v40, %s10509_s30  ;;  %v4984_v54 = vor.u32 %v4983_v7, %v4980_v62  ;;  %v4994_v57 = vrot.slane %v4992_v8, 4  ;;  %v5001_v37 = vshll.u32 %v4892_v3, 16  ;;  %v5242_v56 = vshrl.u32 %v5177_v23, 16  ;;  %v5182_v30 = vld [vmem:[#allocation4 + $0x44] sm:$0x1] }
 0x558   : > { %v4962_v21 = vsel %vm8603_vm12, %v4957_v41, %v4961_v27  ;;  %v4971_v0 = vrot.slane %v4970_v34, 4  ;;  %v4997_v36 = vrot.slane %v4995_v31, 5  ;;  %v5245_v16 = vshll.u32 %v5177_v23, 16  ;;  %v8183_v15 = vld [vmem:[%s10409_s7 + $0xb0] ss:$0 sps:$4 sm:$0xff]  }
 0x559   : > { %v4985_v17 = vrot.slane %v4984_v54, 4  ;;  %v5244_v58 = vrot.slane %v5242_v56, 4  ;;  %v5251_v32 = vshll.u32 %v5178_v43, 16  ;;  %v5256_v9 = vshrl.u32 %v5179_v44, 16  ;;  %v5333_v23 = vld [vmem:[#allocation4 + $0x30] sm:$0xe]  ;;  %7999 = vmatprep.subr.msk.bf16.mxu1 %vm2939_vm7, %v8183_v15 }
 0x55a   : > { %v4976_v45 = vsel %vm8603_vm12, %v4971_v0, %v4975_v25  ;;  %v4998_v63 = vor.u32 %v4997_v36, %v4994_v57  ;;  %v5247_v24 = vrot.slane %v5245_v16, 5  ;;  %v5259_v26 = vshll.u32 %v5179_v44, 16  ;;  %v5340_v41 = vld [vmem:[#allocation4 + $0x4c] sm:$0x1]  ;;  %v5334_v34 = vld [vmem:[#allocation4 + $0x34] sm:$0x1] }
 0x55b   : > { %v7597_v11 = vcombine.low %v4962_v21, %v4976_v45  ;;  %v4989_v55 = vrot.slane %v4987_v13, 5  ;;  %v5003_v46 = vrot.slane %v5001_v37, 5  ;;  %v5258_v49 = vrot.slane %v5256_v9, 4  ;;  %v5335_v54 = vld [vmem:[#allocation4 + $0x38] sm:$0xe] }
 0x55c   : > { %v4999_v40 = vrot.slane %v4998_v63, 4  ;;  %v5248_v27 = vor.u32 %v5247_v24, %v5244_v58  ;;  %v5261_v42 = vrot.slane %v5259_v26, 5  ;;  %v5265_v3 = vshll.u32 %v5180_v38, 16  ;;  %v5336_v57 = vld [vmem:[#allocation4 + $0x3c] sm:$0x1] }
 0x55d   : > { %5021 = vrot.lane.b32.xlu0 %v7597_v11, %s10504_s29  ;;  %v4990_v62 = vsel %vm8603_vm12, %v4985_v17, %v4989_v55  ;;  %v5270_v7 = vshrl.u32 %v5181_v61, 16  ;;  %v5273_v8 = vshll.u32 %v5181_v61, 16  ;;  %v5279_v43 = vshll.u32 %v5182_v30, 16  ;;  %v5337_v36 = vld [vmem:[#allocation4 + $0x40] sm:$0xe] }
 0x55e   : > { %v5004_v25 = vsel %vm8603_vm12, %v4999_v40, %v5003_v46  ;;  %v5249_v13 = vrot.slane %v5248_v27, 4  ;;  %v5253_v31 = vrot.slane %v5251_v32, 5  ;;  %v5262_v44 = vor.u32 %v5261_v42, %v5258_v49  ;;  %v5338_v9 = vld [vmem:[#allocation4 + $0x44] sm:$0x1] }
 0x55f   : > { %v7598_v37 = vcombine.low %v4990_v62, %v5004_v25  ;;  %v5272_v56 = vrot.slane %v5270_v7, 4  ;;  %v5275_v21 = vrot.slane %v5273_v8, 5  ;;  %v7623_v0 = vrot.slane %v5333_v23, 9 }
 0x560   : > { %v5254_v38 = vsel %vm8603_vm12, %v5249_v13, %v5253_v31  ;;  %v5263_v16 = vrot.slane %v5262_v44, 4  ;;  %v5267_v17 = vrot.slane %v5265_v3, 5  ;;  %v5375_v58 = vrot.slane %v5334_v34, 5 }
 0x561   : > { %5023 = vrot.lane.b32.xlu1 %v7598_v37, %s10504_s29  ;;  %v5276_v61 = vor.u32 %v5275_v21, %v5272_v56  ;;  %v5281_v45 = vrot.slane %v5279_v43, 5  ;;  %v5296_v32 = vsel %vm8603_vm12, %v9784_v39, %v9676_v33  ;;  %v5387_v63 = vrot.slane %v5340_v41, 5  ;;  %s8287_s29 = smov [#allocation5]  }
 0x562   : > { %v5268_v24 = vsel %vm8603_vm12, %v5263_v16, %v5267_v17  ;;  %v7624_v26 = vrot.slane %v5335_v54, 9  ;;  %v5379_v30 = vrot.slane %v5336_v57, 5  ;;  %v5630_v11 = vsel %vm2939_vm7, %v8183_v15, 0 }
 0x563   : > { %v7617_v55 = vcombine.low %v5254_v38, %v5268_v24  ;;  %v5277_v46 = vrot.slane %v5276_v61, 4  ;;  %v7625_v49 = vrot.slane %v5337_v36, 9  ;;  %v5383_v40 = vrot.slane %v5338_v9, 5  ;;  %7968 = vmatpush3.bf16.msra.mxu1 %v5630_v11 }
 0x564   : > { %v5376_v27 = vsel %vm8539_vm9, %v7623_v0, %v5375_v58  ;;  %7977 = vmatprep.subr.bf16.mxu1 %v8271_v10  ;;  %v5380_v42 = vsel %vm8539_vm9, %v7624_v26, %v5379_v30  ;;  %v5388_v23 = vsel %vm8539_vm9, %v7626_v19, %v5387_v63  ;;  %vm10520_vm7 = vcmask 458112  }
 0x565   : > { %5313 = vrot.lane.b32.xlu0 %v7617_v55, %s10519_s26  ;;  %v5282_v33 = vsel %vm8603_vm12, %v5277_v46, %v5281_v45  ;;  %v7629_v15 = vcombine.low %v5376_v27, %v5380_v42  ;;  %v5384_v3 = vsel %vm8539_vm9, %v7625_v49, %v5383_v40  ;;  %vm10524_vm2 = vcmask 720512  }
 0x566   : > { %v7618_v39 = vcombine.low %v5282_v33, %v5296_v32  ;;  %v7630_v41 = vcombine.low %v5384_v3, %v5388_v23  ;;  %v9975_v3 = vld [vmem:[%s10410_s8] ss:$0 sm:$0xff] }
 0x567   : > { %v5675_v23 = vadd.f32 %v9710_v51, %v9975_v3 }
 0x568   : > { %5315 = vrot.lane.b32.xlu1 %v7618_v39, %s10519_s26 }
 0x569   : > { %5405 = vrot.lane.b32.xlu0 %v7629_v15, %s10515_s1 }
 0x56c   : > { %5407 = vrot.lane.b32.xlu1 %v7630_v41, %s10515_s1  ;;  %s8211_s1 = sshll.u32 %s8287_s29, 4  ;;  %s8212_s1 = int_to_ptr.vmem [resolvable:$false] %s8211_s1 }
 0x56d   : > { %s8213_s26 = scalar_lea.vmem %s8212_s1, 2048 }
 0x578   : > { %v4570_v62 = vpop.permute.xlu0 %4569 }
 0x579   : > { %4581 = vst.msk [vmem:[#allocation2 + $0x10] sm:$0xff] %vm10464_vm11, %v4570_v62  ;;  %v4864_v7 = vpop.permute.xlu1 %4863  ;;  %v5667_v62 = vadd.f32 %v9692_v50, %v9975_v3 }
 0x57c   : > { %v4862_v43 = vpop.permute.xlu0 %4861 }
 0x57d   : > { %v4572_v8 = vpop.permute.xlu1 %4571 }
 0x57e   : > { %4582 = vst.msk [vmem:[#allocation2 + $0x30] sm:$0xff] %vm10464_vm11, %v4572_v8 }
 0x580   : > { %v5154_v34 = vpop.permute.xlu0 %5153 }
 0x581   : > { %v5112_v14 = vpop.permute.xlu1 %5111 }
 0x584   : > { %v4818_v25 = vpop.permute.xlu0 %4817 }
 0x585   : > { %v4820_v13 = vpop.permute.xlu1 %4819 }
 0x592   : > { %v5110_v19 = vpop.permute.xlu0 %5109 }
 0x596   : > { %v5402_v31 = vpop.permute.xlu1 %5401 }
 0x59d   : > { %v4726_v44 = vpop.permute.xlu0 %4725 }
 0x59e   : > { %4737 = vst.msk [vmem:[#allocation2 + $0x10] sm:$0xff] %vm10466_vm15, %v4726_v44 }
 0x59f   : > { %4829 = vst.msk [vmem:[#allocation2 + $0x10] sm:$0xff] %vm10520_vm7, %v4818_v25 }
 0x5a0   : > { %4873 = vst.msk [vmem:[#allocation2 + $0x10] sm:$0xff] %vm10521_vm10, %v4862_v43  ;;  %vm5616_vm10 = vcmask 850944  }
 0x5a1   : > { %v5020_v54 = vpop.permute.xlu1 %5019 }
 0x5a5   : > { %v5018_v57 = vpop.permute.xlu0 %5017  ;;  %v5156_v37 = vpop.permute.xlu1 %5155 }
 0x5a6   : > { %5029 = vst.msk [vmem:[#allocation2 + $0x10] sm:$0xff] %vm10522_vm4, %v5018_v57  ;;  %vm10525_vm4 = vcmask 523712  }
 0x5a7   : > { %5121 = vst.msk [vmem:[#allocation2 + $0x10] sm:$0xff] %vm10523_vm13, %v5110_v19  ;;  %vm10526_vm13 = vcmask 589312   ;;  %v6572_v19 = vld [vmem:[#allocation4 + $0x48] sm:$0xf] }
 0x5a8   : > { %5165 = vst.msk [vmem:[#allocation2 + $0x10] sm:$0xff] %vm10524_vm2, %v5154_v34  ;;  %vm10527_vm2 = vcmask 654912   ;;  %v5678_v34 = vadd.f32 %v9712_v6, %v9975_v3 }
 0x5a9   : > { %v4574_v56 = vpop.permute.xlu1 %4573 }
 0x5aa   : > { %4583 = vst.msk [vmem:[#allocation2 + $0x50] sm:$0xff] %vm10464_vm11, %v4574_v56 }
 0x5ab   : > { %v5310_v21 = vpop.permute.xlu0 %5309 }
 0x5ac   : > { %5321 = vst.msk [vmem:[#allocation2 + $0x10] sm:$0xff] %vm3224_vm5, %v5310_v21 }
 0x5ad   : > { %5413 = vst.msk [vmem:[#allocation2 + $0x10] sm:$0xff] %vm3381_vm3, %v5402_v31 }
 0x5af   : > { %v4866_v0 = vpop.permute.xlu0 %4865 }
 0x5b0   : > { %v4728_v36 = vpop.permute.xlu1 %4727 }
 0x5b1   : > { %4738 = vst.msk [vmem:[#allocation2 + $0x30] sm:$0xff] %vm10466_vm15, %v4728_v36 }
 0x5b2   : > { %4830 = vst.msk [vmem:[#allocation2 + $0x30] sm:$0xff] %vm10520_vm7, %v4820_v13  ;;  %v5670_v13 = vadd.f32 %v9699_v1, %v9975_v3 }
 0x5b3   : > { %4874 = vst.msk [vmem:[#allocation2 + $0x30] sm:$0xff] %vm10525_vm4, %v4864_v7  ;;  %v5404_v38 = vpop.permute.xlu0 %5403  ;;  %v5982_v7 = vld [vmem:[#allocation4] sm:$0xf] }
 0x5b4   : > { %5030 = vst.msk [vmem:[#allocation2 + $0x30] sm:$0xff] %vm10526_vm13, %v5020_v54  ;;  %v4868_v16 = vpop.permute.xlu1 %4867  ;;  %v5419_v17 = vld [vmem:[#allocation2 + $0x10] sm:$0xff]  ;;  %vm10530_vm13 = vmmov %vm10525_vm4  ;;  %v5999_v54 = vshrl.u32 %v5982_v7, 16 }
 0x5b5   : > { %5122 = vst.msk [vmem:[#allocation2 + $0x30] sm:$0xff] %vm10527_vm2, %v5112_v14  ;;  %7969 = vmatprep.mubr.msk.bf16.mxu1 %vm5616_vm10, %v5419_v17  ;;  %vm10531_vm2 = vcmask 589312   ;;  %v6676_v17 = vshll.u32 %v6572_v19, 16 }
 0x5b6   : > { %5166 = vst.msk [vmem:[#allocation2 + $0x30] sm:$0xff] %vm10528_vm8, %v5156_v37  ;;  %vm10529_vm8 = vmmov %vm10520_vm7  ;;  %v6002_v37 = vshll.u32 %v5982_v7, 16 }
 0x5b7   : > { %v4822_v58 = vpop.permute.xlu0 %4821 }
 0x5b8   : > { %v5160_v9 = vpop.permute.xlu1 %5159 }
 0x5bb   : > { %v4576_v61 = vpop.permute.xlu0 %4575 }
 0x5bc   : > { %4584 = vst.msk [vmem:[#allocation2 + $0x70] sm:$0xff] %vm10464_vm11, %v4576_v61  ;;  %v4824_v45 = vpop.permute.xlu1 %4823  ;;  %vm10534_vm11 = vmmov %vm10531_vm2 }
 0x5bf   : > { %v5114_v32 = vpop.permute.xlu0 %5113 }
 0x5c0   : > { %v4730_v63 = vpop.permute.xlu1 %4729 }
 0x5c1   : > { %4739 = vst.msk [vmem:[#allocation2 + $0x50] sm:$0xff] %vm10466_vm15, %v4730_v63  ;;  %v6001_v63 = vrot.slane %v5999_v54, 4 }
 0x5c2   : > { %4831 = vst.msk [vmem:[#allocation2 + $0x50] sm:$0xff] %vm10520_vm7, %v4822_v58  ;;  %vm10532_vm7 = vcmask 654912  }
 0x5c3   : > { %4875 = vst.msk [vmem:[#allocation2 + $0x50] sm:$0xff] %vm10525_vm4, %v4866_v0  ;;  %v5158_v24 = vpop.permute.xlu0 %5157  ;;  %vm10533_vm4 = vcmask 720512   ;;  %vm10535_vm6 = vmmov %vm10532_vm7  ;;  %v6673_v0 = vshrl.u32 %v6572_v19, 16  ;;  %v5893_v19 = vld [vmem:[#allocation4 + $0xc] sm:$0x1] }
 0x5c4   : > { %v5116_v26 = vpop.permute.xlu1 %5115 }
 0x5c7   : > { %v5312_v30 = vpop.permute.xlu0 %5311 }
 0x5c8   : > { %5322 = vst.msk [vmem:[#allocation2 + $0x30] sm:$0xff] %vm3224_vm5, %v5312_v30 }
 0x5c9   : > { %5414 = vst.msk [vmem:[#allocation2 + $0x30] sm:$0xff] %vm3381_vm3, %v5404_v38  ;;  %v4732_v11 = vpop.permute.xlu1 %4731 }
 0x5ca   : > { %4740 = vst.msk [vmem:[#allocation2 + $0x70] sm:$0xff] %vm10466_vm15, %v4732_v11  ;;  %vm10536_vm15 = vmmov %vm10533_vm4 }
 0x5cb   : > { %4832 = vst.msk [vmem:[#allocation2 + $0x70] sm:$0xff] %vm10529_vm8, %v4824_v45 }
 0x5cc   : > { %4876 = vst.msk [vmem:[#allocation2 + $0x70] sm:$0xff] %vm10530_vm13, %v4868_v16 }
 0x5cf   : > { %v5022_v55 = vpop.permute.xlu0 %5021 }
 0x5d0   : > { %v5422_v46 = vld [vmem:[#allocation2 + $0x30] sm:$0xff]  ;;  %5031 = vst.msk [vmem:[#allocation2 + $0x50] sm:$0xff] %vm10531_vm2, %v5022_v55  ;;  %v6675_v55 = vrot.slane %v6673_v0, 4 }
 0x5d1   : > { %7970 = vmatmul.mubr.msk.bf16.vlgmr.msra.gmra.mrb[24].mxu1 %vm5616_vm10, %v5422_v46  ;;  %5123 = vst.msk [vmem:[#allocation2 + $0x50] sm:$0xff] %vm10532_vm7, %v5114_v32  ;;  %v5902_v46 = vld [vmem:[#allocation4 + $0x18] sm:$0xf] }
 0x5d2   : > { %5167 = vst.msk [vmem:[#allocation2 + $0x50] sm:$0xff] %vm10533_vm4, %v5158_v24  ;;  %v6004_v24 = vrot.slane %v6002_v37, 5  ;;  %v5911_v37 = vld [vmem:[#allocation4 + $0x24] sm:$0x1]  ;;  %vm10542_vm4 = vcmask 195712  }
 0x5d3   : > { %v5024_v49 = vpop.permute.xlu1 %5023 }
 0x5d4   : > { %5032 = vst.msk [vmem:[#allocation2 + $0x70] sm:$0xff] %vm10534_vm11, %v5024_v49  ;;  %v5905_v49 = vld [vmem:[#allocation4 + $0x1c] sm:$0x1] }
 0x5d5   : > { %5124 = vst.msk [vmem:[#allocation2 + $0x70] sm:$0xff] %vm10535_vm6, %v5116_v26 }
 0x5d6   : > { %5168 = vst.msk [vmem:[#allocation2 + $0x70] sm:$0xff] %vm10536_vm15, %v5160_v9 }
 0x5d7   : > { %v5314_v40 = vpop.permute.xlu0 %5313 }
 0x5d8   : > { %5323 = vst.msk [vmem:[#allocation2 + $0x50] sm:$0xff] %vm3224_vm5, %v5314_v40 }
 0x5da   : > { %v5316_v27 = vpop.permute.xlu1 %5315 }
 0x5db   : > { %5324 = vst.msk [vmem:[#allocation2 + $0x70] sm:$0xff] %vm3224_vm5, %v5316_v27  ;;  %v5406_v33 = vpop.permute.xlu0 %5405 }
 0x5dc   : > { %5415 = vst.msk [vmem:[#allocation2 + $0x50] sm:$0xff] %vm3381_vm3, %v5406_v33 }
 0x5de   : > { %v5408_v39 = vpop.permute.xlu1 %5407 }
 0x5df   : > { %5416 = vst.msk [vmem:[#allocation2 + $0x70] sm:$0xff] %vm3381_vm3, %v5408_v39  ;;  %v6678_v39 = vrot.slane %v6676_v17, 5 }
 0x5e3   : > { %v5425_v42 = vld [vmem:[#allocation2 + $0x50] sm:$0xff] }
 0x5e4   : > { %7973 = vmatprep.mubr.msk.bf16.mxu1 %vm5616_vm10, %v5425_v42 }
 0x5e6   : > { %v5428_v15 = vld [vmem:[#allocation2 + $0x70] sm:$0xff] }
 0x5e7   : > { %7974 = vmatmul.mubr.msk.bf16.gmra.mrb[28].mxu1 %vm5616_vm10, %v5428_v15 }
 0x6a4   : > { %v7971_v41 = vpop.f32.mrb[24].mxu1 }
 0x6a5   : > { %v5740_v8 = vadd.f32 %v7971_v41, %v5675_v23  ;;  %v5731_v43 = vpop.f32.mrb[25].mxu1  ;;  %v5890_v23 = vld [vmem:[#allocation4 + $0x8] sm:$0xf] }
 0x6a6   : > { %v5732_v14 = vadd.f32 %v5731_v43, %v5667_v62  ;;  %v7972_v25 = vpop.f32.mrb[26].mxu1 }
 0x6a7   : > { %vm5764_vm11 = vcmp.ge.f32.partialorder %v5740_v8, 0.0  ;;  %v5772_v31 = vmul.f32 0.2, %v5740_v8  ;;  %v5743_v44 = vadd.f32 %v7972_v25, %v5678_v34  ;;  %v5734_v51 = vpop.f32.mrb[27].mxu1 }
 0x6a8   : > { %vm5762_vm15 = vcmp.ge.f32.partialorder %v5732_v14, 0.0  ;;  %v5770_v57 = vmul.f32 0.2, %v5732_v14  ;;  %v5735_v50 = vadd.f32 %v5734_v51, %v5670_v13  ;;  %v6573_v51 = vld [vmem:[#allocation4 + $0x4c] sm:$0x1] }
 0x6a9   : > { %v5780_v56 = vsel %vm5764_vm11, %v5740_v8, %v5772_v31  ;;  %vm5765_vm3 = vcmp.ge.f32.partialorder %v5743_v44, 0.0  ;;  %v5773_v21 = vmul.f32 0.2, %v5743_v44  ;;  %vm10544_vm11 = vcmask 1048512  }
 0x6aa   : > { %v7799_v6 = vpack.c.bf16 %v5780_v56, %v5780_v56  ;;  %v5778_v36 = vsel %vm5762_vm15, %v5732_v14, %v5770_v57  ;;  %vm5763_vm5 = vcmp.ge.f32.partialorder %v5735_v50, 0.0  ;;  %v5771_v38 = vmul.f32 0.2, %v5735_v50  ;;  %v5983_v14 = vld [vmem:[#allocation4 + $0x4] sm:$0x1] }
 0x6ab   : > { %v7797_v16 = vpack.c.bf16 %v5778_v36, %v5778_v36  ;;  %v5781_v1 = vsel %vm5765_vm3, %v5743_v44, %v5773_v21  ;;  %v5896_v36 = vld [vmem:[#allocation4 + $0x10] sm:$0xf]  ;;  %vm10545_vm15 = vcmask 261312  }
 0x6ac   : > { %v5827_v58 = vshrl.u32 %v7799_v6, 16  ;;  %v7800_v9 = vpack.c.bf16 %v5781_v1, %v5781_v1  ;;  %v5779_v61 = vsel %vm5763_vm5, %v5735_v50, %v5771_v38  ;;  %v5830_v30 = vshll.u32 %v7799_v6, 16  ;;  %v5908_v50 = vld [vmem:[#allocation4 + $0x20] sm:$0xf]  ;;  %v5899_v38 = vld [vmem:[#allocation4 + $0x14] sm:$0x1]  ;;  %vm10547_vm5 = vmmov %vm10542_vm4 }
 0x6ad   : > { %v5811_v45 = vshrl.u32 %v7797_v16, 16  ;;  %v7798_v32 = vpack.c.bf16 %v5779_v61, %v5779_v61  ;;  %v5814_v27 = vshll.u32 %v7797_v16, 16  ;;  %v6005_v16 = vor.u32 %v6004_v24, %v6001_v63 }
 0x6ae   : > { %v5829_v26 = vrot.slane %v5827_v58, 7  ;;  %v5835_v11 = vshrl.u32 %v7800_v9, 16  ;;  %v5838_v62 = vshll.u32 %v7800_v9, 16  ;;  %v6008_v1 = vshll.u32 %v5983_v14, 16 }
 0x6af   : > { %v5813_v40 = vrot.slane %v5811_v45, 7  ;;  %v5819_v33 = vshrl.u32 %v7798_v32, 16  ;;  %v5822_v34 = vshll.u32 %v7798_v32, 16  ;;  %v6679_v9 = vor.u32 %v6678_v39, %v6675_v55  ;;  %v10001_v45 = vld [vmem:[#allocation4] sm:$0xe] }
 0x6b0   : > { %v5832_v42 = vor.u32 %v5830_v30, %v5829_v26  ;;  %v5833_v15 = vrot.slane %v5829_v26, 4  ;;  %v5837_v41 = vrot.slane %v5835_v11, 7  ;;  %v6682_v61 = vshll.u32 %v6573_v51, 16  ;;  %v10003_v32 = vld [vmem:[#allocation4 + $0x48] sm:$0xe] }
 0x6b1   : > { %v5816_v7 = vor.u32 %v5814_v27, %v5813_v40  ;;  %v5817_v8 = vrot.slane %v5813_v40, 4  ;;  %v5821_v43 = vrot.slane %v5819_v33, 7  ;;  %v10005_v26 = vrot.slane %v6005_v16, 4 }
 0x6b2   : > { %v5903_v25 = vsel %vm8871_vm1, %v5832_v42, %v5902_v46  ;;  %v5906_v13 = vsel %vm8754_vm0, %v5833_v15, %v5905_v49  ;;  %v5840_v31 = vor.u32 %v5838_v62, %v5837_v41  ;;  %v5841_v44 = vrot.slane %v5837_v41, 4  ;;  %v10014_v46 = vld [vmem:[#allocation4 + $0x4c] sm:$0x1]  ;;  %v8192_v49 = vld [vmem:[%s10411_s9 + $0x80] sm:$0xff]  }
 0x6b3   : > { %5904 = vst [vmem:[#allocation4 + $0x18] sm:$0xf] %v5903_v25  ;;  %5907 = vst [vmem:[#allocation4 + $0x1c] sm:$0x1] %v5906_v13  ;;  %v5891_v54 = vsel %vm8871_vm1, %v5816_v7, %v5890_v23  ;;  %v5894_v57 = vsel %vm8754_vm0, %v5817_v8, %v5893_v19  ;;  %v5824_v56 = vor.u32 %v5822_v34, %v5821_v43  ;;  %v5825_v21 = vrot.slane %v5821_v43, 4 }
 0x6b4   : > { %5892 = vst [vmem:[#allocation4 + $0x8] sm:$0xf] %v5891_v54  ;;  %5895 = vst [vmem:[#allocation4 + $0xc] sm:$0x1] %v5894_v57  ;;  %v5909_v0 = vsel %vm8871_vm1, %v5840_v31, %v5908_v50  ;;  %v5912_v6 = vsel %vm8754_vm0, %v5841_v44, %v5911_v37  ;;  %v10007_v63 = vrot.slane %v6008_v1, 5  ;;  %v7675_v24 = vrot.slane %v10001_v45, 9  ;;  %7988 = vmatpush1.bf16.msra.mxu1 %v8192_v49 }
 0x6b5   : > { %5910 = vst [vmem:[#allocation4 + $0x20] sm:$0xf] %v5909_v0  ;;  %5913 = vst [vmem:[#allocation4 + $0x24] sm:$0x1] %v5912_v6  ;;  %v5897_v17 = vsel %vm8871_vm1, %v5824_v56, %v5896_v36  ;;  %v5900_v58 = vsel %vm8754_vm0, %v5825_v21, %v5899_v38  ;;  %v10010_v30 = vrot.slane %v6679_v9, 4  ;;  %v10012_v11 = vrot.slane %v6682_v61, 5  ;;  %7124 = vmatpush1.bf16.msra.mxu0 %v8192_v49 }
 0x6b6   : > { %5898 = vst [vmem:[#allocation4 + $0x10] sm:$0xf] %v5897_v17  ;;  %5901 = vst [vmem:[#allocation4 + $0x14] sm:$0x1] %v5900_v58  ;;  %v7722_v55 = vrot.slane %v10003_v32, 9  ;;  %v5691_v40 = vadd.f32 %v9750_v12, %v9975_v3  ;;  %v5683_v39 = vadd.f32 %v9732_v47, %v9975_v3  ;;  %v5694_v62 = vadd.f32 %v9762_v29, %v9975_v3 }
 0x6b7   : > { %v6776_v43 = vrot.slane %v10014_v46, 5  ;;  %7978 = vmatprep.subr.bf16.mxu1 %v8271_v10  ;;  %7125 = vmatprep.subr.bf16.mxu0 %v8271_v10  ;;  %v5686_v47 = vadd.f32 %v9740_v5, %v9975_v3 }
 0x6ba   : > { %v6426_v27 = vld [vmem:[#allocation4 + $0x18] sm:$0xe]  ;;  %v7975_v33 = vpop.f32.mrb[28].mxu1  ;;  %v6427_v7 = vld [vmem:[#allocation4 + $0x1c] sm:$0x1] }
 0x6bb   : > { %v8184_v42 = vld [vmem:[#allocation4] ss:$8 sps:$4 sm:$0xff]   ;;  %v7697_v15 = vrot.slane %v6426_v27, 9  ;;  %v5756_v23 = vadd.f32 %v7975_v33, %v5691_v40  ;;  %v5747_v41 = vpop.f32.mrb[29].mxu1  ;;  %v6464_v25 = vrot.slane %v6427_v7, 5 }
 0x6bc   : > { %v6428_v8 = vld [vmem:[#allocation4 + $0x20] sm:$0xe]  ;;  %v5748_v12 = vadd.f32 %v5747_v41, %v5683_v39  ;;  %v7976_v34 = vpop.f32.mrb[30].mxu1  ;;  %5966 = vrot.lane.b32.xlu0 %v8184_v42, %s10516_s4  ;;  %v6429_v3 = vld [vmem:[#allocation4 + $0x24] sm:$0x1] }
 0x6bd   : > { %v8185_v14 = vld [vmem:[#allocation4 + $0x10] ss:$8 sps:$4 sm:$0xff]   ;;  %vm5768_vm6 = vcmp.ge.f32.partialorder %v5756_v23, 0.0  ;;  %v5776_v13 = vmul.f32 0.2, %v5756_v23  ;;  %v5759_v29 = vadd.f32 %v7976_v34, %v5694_v62  ;;  %v5750_v19 = vpop.f32.mrb[31].mxu1  ;;  %v6465_v54 = vsel %vm8539_vm9, %v7697_v15, %v6464_v25 }
 0x6be   : > { %vm5766_vm10 = vcmp.ge.f32.partialorder %v5748_v12, 0.0  ;;  %v5774_v31 = vmul.f32 0.2, %v5748_v12  ;;  %v5751_v44 = vadd.f32 %v5750_v19, %v5686_v47  ;;  %5968 = vrot.lane.b32.xlu1 %v8185_v14, %s10516_s4  ;;  %v8186_v51 = vld [vmem:[#allocation4 + $0x10] ss:$8 sps:$4 sm:$0xff]   ;;  %v7698_v50 = vrot.slane %v6428_v8, 9 }
 0x6bf   : > { %v5784_v57 = vsel %vm5768_vm6, %v5756_v23, %v5776_v13  ;;  %vm5769_vm8 = vcmp.ge.f32.partialorder %v5759_v29, 0.0  ;;  %v5777_v5 = vmul.f32 0.2, %v5759_v29  ;;  %v6422_v0 = vld [vmem:[#allocation4 + $0x8] sm:$0xe]  ;;  %v6468_v38 = vrot.slane %v6429_v3, 5  ;;  %vm10548_vm6 = vmmov %vm10545_vm15 }
 0x6c0   : > { %v7803_v37 = vpack.c.bf16 %v5784_v57, %v5784_v57  ;;  %v5782_v56 = vsel %vm5766_vm10, %v5748_v12, %v5774_v31  ;;  %vm5767_vm13 = vcmp.ge.f32.partialorder %v5751_v44, 0.0  ;;  %v5775_v21 = vmul.f32 0.2, %v5751_v44  ;;  %6542 = vrot.lane.b32.xlu0 %v8186_v51, %s10508_s15  ;;  %v6423_v61 = vld [vmem:[#allocation4 + $0xc] sm:$0x1]  ;;  %v8193_v62 = vld [vmem:[%s10411_s9 + $0x88] sm:$0xff]  }
 0x6c1   : > { %v7801_v6 = vpack.c.bf16 %v5782_v56, %v5782_v56  ;;  %v5785_v36 = vsel %vm5769_vm8, %v5759_v29, %v5777_v5  ;;  %v7695_v16 = vrot.slane %v6422_v0, 9  ;;  %v6469_v33 = vsel %vm8539_vm9, %v7698_v50, %v6468_v38  ;;  %v10038_v39 = vld [vmem:[#allocation4 + $0x10] sm:$0xe]  ;;  %v5926_v7 = vld [vmem:[#allocation4 + $0x38] sm:$0xf]  ;;  %7989 = vmatpush1.bf16.msra.mxu1 %v8193_v62  ;;  %7126 = vmatpush1.bf16.msra.mxu0 %v8193_v62 }
 0x6c2   : > { %v5859_v1 = vshrl.u32 %v7803_v37, 16  ;;  %v5862_v17 = vshll.u32 %v7803_v37, 16  ;;  %v7804_v58 = vpack.c.bf16 %v5785_v36, %v5785_v36  ;;  %v5783_v9 = vsel %vm5767_vm13, %v5751_v44, %v5775_v21  ;;  %v5929_v8 = vld [vmem:[#allocation4 + $0x3c] sm:$0x1]  ;;  %v6425_v14 = vld [vmem:[#allocation4 + $0x14] sm:$0x1]  ;;  %7979 = vmatprep.subr.bf16.mxu1 %v8271_v10  ;;  %7127 = vmatprep.subr.bf16.mxu0 %v8271_v10 }
 0x6c3   : > { %v5843_v49 = vshrl.u32 %v7801_v6, 16  ;;  %v5846_v40 = vshll.u32 %v7801_v6, 16  ;;  %v7802_v27 = vpack.c.bf16 %v5783_v9, %v5783_v9  ;;  %v7704_v41 = vcombine.low %v6465_v54, %v6469_v33  ;;  %v5914_v19 = vld [vmem:[#allocation4 + $0x28] sm:$0xf]  ;;  %v5917_v31 = vld [vmem:[#allocation4 + $0x2c] sm:$0x1] }
 0x6c4   : > { %v5861_v42 = vrot.slane %v5859_v1, 7  ;;  %v5867_v15 = vshrl.u32 %v7804_v58, 16  ;;  %v5870_v23 = vshll.u32 %v7804_v58, 16  ;;  %v6456_v25 = vrot.slane %v6423_v61, 5  ;;  %v6142_v54 = vld [vmem:[#allocation4 + $0x10] sm:$0xe] }
 0x6c5   : > { %v5845_v12 = vrot.slane %v5843_v49, 7  ;;  %v5851_v34 = vshrl.u32 %v7802_v27, 16  ;;  %v5854_v47 = vshll.u32 %v7802_v27, 16  ;;  %6500 = vrot.lane.b32.xlu1 %v7704_v41, %s10507_s13  ;;  %v7696_v51 = vrot.slane %v10038_v39, 9  ;;  %v5932_v3 = vld [vmem:[#allocation4 + $0x40] sm:$0xf] }
 0x6c6   : > { %v5864_v13 = vor.u32 %v5862_v17, %v5861_v42  ;;  %v5865_v29 = vrot.slane %v5861_v42, 4  ;;  %v5869_v44 = vrot.slane %v5867_v15, 7  ;;  %v5935_v50 = vld [vmem:[#allocation4 + $0x44] sm:$0x1]  ;;  %v6457_v56 = vsel %vm8539_vm9, %v7695_v16, %v6456_v25  ;;  %v6143_v21 = vld [vmem:[#allocation4 + $0x14] sm:$0x1] }
 0x6c7   : > { %v5848_v57 = vor.u32 %v5846_v40, %v5845_v12  ;;  %v5849_v5 = vrot.slane %v5845_v12, 4  ;;  %v5853_v37 = vrot.slane %v5851_v34, 7  ;;  %v6144_v0 = vld [vmem:[#allocation4 + $0x18] sm:$0xe]  ;;  %v5920_v17 = vld [vmem:[#allocation4 + $0x30] sm:$0xf] }
 0x6c8   : > { %v5927_v6 = vsel %vm8871_vm1, %v5864_v13, %v5926_v7  ;;  %v5930_v36 = vsel %vm8754_vm0, %v5865_v29, %v5929_v8  ;;  %v5872_v38 = vor.u32 %v5870_v23, %v5869_v44  ;;  %v5873_v1 = vrot.slane %v5869_v44, 4  ;;  %v5923_v58 = vld [vmem:[#allocation4 + $0x34] sm:$0x1]  ;;  %v6145_v9 = vld [vmem:[#allocation4 + $0x1c] sm:$0x1] }
 0x6c9   : > { %v6270_v61 = vld [vmem:[#allocation4 + $0x18] sm:$0xf]  ;;  %5928 = vst [vmem:[#allocation4 + $0x38] sm:$0xf] %v5927_v6  ;;  %5931 = vst [vmem:[#allocation4 + $0x3c] sm:$0x1] %v5930_v36  ;;  %v5915_v16 = vsel %vm8871_vm1, %v5848_v57, %v5914_v19  ;;  %v5918_v49 = vsel %vm8754_vm0, %v5849_v5, %v5917_v31  ;;  %v5856_v40 = vor.u32 %v5854_v47, %v5853_v37 }
 0x6ca   : > { %v5857_v27 = vrot.slane %v5853_v37, 4  ;;  %v6271_v33 = vld [vmem:[#allocation4 + $0x1c] sm:$0x1]  ;;  %v6272_v39 = vld [vmem:[#allocation4 + $0x20] sm:$0xf]  ;;  %v5933_v42 = vsel %vm8871_vm1, %v5872_v38, %v5932_v3  ;;  %v5936_v15 = vsel %vm8754_vm0, %v5873_v1, %v5935_v50  ;;  %v6460_v23 = vrot.slane %v6425_v14, 5 }
 0x6cb   : > { %5916 = vst [vmem:[#allocation4 + $0x28] sm:$0xf] %v5915_v16  ;;  %5919 = vst [vmem:[#allocation4 + $0x2c] sm:$0x1] %v5918_v49  ;;  %v7677_v41 = vrot.slane %v6142_v54, 9  ;;  %v5921_v62 = vsel %vm8871_vm1, %v5856_v40, %v5920_v17  ;;  %v6180_v8 = vrot.slane %v6143_v21, 5 }
 0x6cc   : > { %5934 = vst [vmem:[#allocation4 + $0x40] sm:$0xf] %v5933_v42  ;;  %5937 = vst [vmem:[#allocation4 + $0x44] sm:$0x1] %v5936_v15  ;;  %v5924_v7 = vsel %vm8754_vm0, %v5857_v27, %v5923_v58  ;;  %v7678_v12 = vrot.slane %v6144_v0, 9  ;;  %v6461_v34 = vsel %vm8539_vm9, %v7696_v51, %v6460_v23  ;;  %v6184_v47 = vrot.slane %v6145_v9, 5 }
 0x6cd   : > { %5922 = vst [vmem:[#allocation4 + $0x30] sm:$0xf] %v5921_v62  ;;  %5925 = vst [vmem:[#allocation4 + $0x34] sm:$0x1] %v5924_v7  ;;  %v6273_v25 = vld [vmem:[#allocation4 + $0x24] sm:$0x1]  ;;  %v7703_v29 = vcombine.low %v6457_v56, %v6461_v34  ;;  %v6181_v19 = vsel %vm8539_vm9, %v7677_v41, %v6180_v8 }
 0x6ce   : > { %v6311_v13 = vshrl.u32 %v6270_v61, 16  ;;  %v6314_v14 = vshll.u32 %v6270_v61, 16  ;;  %v6320_v22 = vshll.u32 %v6271_v33, 16  ;;  %v6325_v31 = vshrl.u32 %v6272_v39, 16  ;;  %v5986_v44 = vld [vmem:[#allocation4 + $0x10] sm:$0xf] }
 0x6cf   : > { %v5987_v28 = vld [vmem:[#allocation4 + $0x14] sm:$0x1]  ;;  %v6185_v54 = vsel %vm8539_vm9, %v7678_v12, %v6184_v47  ;;  %v6328_v3 = vshll.u32 %v6272_v39, 16  ;;  %v5988_v50 = vld [vmem:[#allocation4 + $0x18] sm:$0xf]  ;;  %6498 = vrot.lane.b32.xlu0 %v7703_v29, %s10507_s13  ;;  %v6334_v21 = vshll.u32 %v6273_v25, 16 }
 0x6d0   : > { %v6313_v57 = vrot.slane %v6311_v13, 4  ;;  %v6316_v5 = vrot.slane %v6314_v14, 5  ;;  %v7684_v51 = vcombine.low %v6181_v19, %v6185_v54  ;;  %v6327_v37 = vrot.slane %v6325_v31, 4  ;;  %v5989_v56 = vld [vmem:[#allocation4 + $0x1c] sm:$0x1]  ;;  %v8195_v58 = vld [vmem:[%s10411_s9 + $0x90] sm:$0xff]  }
 0x6d1   : > { %v6266_v0 = vld [vmem:[#allocation4 + $0x8] sm:$0xf]  ;;  %v6330_v36 = vrot.slane %v6328_v3, 5  ;;  %v6027_v38 = vshrl.u32 %v5986_v44, 16  ;;  %v6030_v1 = vshll.u32 %v5986_v44, 16  ;;  %v6322_v9 = vrot.slane %v6320_v22, 5  ;;  %7990 = vmatpush1.bf16.msra.mxu1 %v8195_v58  ;;  %7128 = vmatpush1.bf16.msra.mxu0 %v8195_v58 }
 0x6d2   : > { %v6317_v6 = vor.u32 %v6316_v5, %v6313_v57  ;;  %v6267_v17 = vld [vmem:[#allocation4 + $0xc] sm:$0x1]  ;;  %6216 = vrot.lane.b32.xlu1 %v7684_v51, %s10518_s2  ;;  %v6036_v61 = vshll.u32 %v5987_v28, 16  ;;  %v6041_v16 = vshrl.u32 %v5988_v50, 16  ;;  %v6044_v49 = vshll.u32 %v5988_v50, 16  ;;  %7980 = vmatprep.subr.bf16.mxu1 %v8271_v10 }
 0x6d3   : > { %v6331_v27 = vor.u32 %v6330_v36, %v6327_v37  ;;  %v6029_v33 = vrot.slane %v6027_v38, 4  ;;  %v6032_v39 = vrot.slane %v6030_v1, 5  ;;  %v6268_v42 = vld [vmem:[#allocation4 + $0x10] sm:$0xf]  ;;  %v6336_v15 = vrot.slane %v6334_v21, 5  ;;  %7129 = vmatprep.subr.bf16.mxu0 %v8271_v10  ;;  %v8196_v31 = vld [vmem:[%s10411_s9 + $0x98] sm:$0xff]  }
 0x6d4   : > { %v6318_v40 = vrot.slane %v6317_v6, 4  ;;  %v6043_v23 = vrot.slane %v6041_v16, 4  ;;  %v6046_v41 = vrot.slane %v6044_v49, 5  ;;  %v6050_v62 = vshll.u32 %v5989_v56, 16  ;;  %v6269_v7 = vld [vmem:[#allocation4 + $0x14] sm:$0x1] }
 0x6d5   : > { %v6332_v8 = vrot.slane %v6331_v27, 4  ;;  %v6033_v12 = vor.u32 %v6032_v39, %v6029_v33  ;;  %v6038_v34 = vrot.slane %v6036_v61, 5  ;;  %v6283_v47 = vshrl.u32 %v6266_v0, 16  ;;  %v6558_v25 = vld [vmem:[#allocation4 + $0x10] sm:$0xf]  ;;  %7991 = vmatpush1.bf16.msra.mxu1 %v8196_v31  ;;  %7130 = vmatpush1.bf16.msra.mxu0 %v8196_v31 }
 0x6d6   : > { %v6323_v13 = vsel %vm8603_vm12, %v6318_v40, %v6322_v9  ;;  %v6047_v14 = vor.u32 %v6046_v41, %v6043_v23  ;;  %v6286_v29 = vshll.u32 %v6266_v0, 16  ;;  %v6292_v19 = vshll.u32 %v6267_v17, 16  ;;  %v6559_v22 = vld [vmem:[#allocation4 + $0x14] sm:$0x1]  ;;  %v6560_v5 = vld [vmem:[#allocation4 + $0x18] sm:$0xf]  ;;  %7981 = vmatprep.subr.bf16.mxu1 %v8271_v10  ;;  %7131 = vmatprep.subr.bf16.mxu0 %v8271_v10 }
 0x6d7   : > { %v6337_v44 = vsel %vm8603_vm12, %v6332_v8, %v6336_v15  ;;  %v6034_v28 = vrot.slane %v6033_v12, 4  ;;  %v6285_v54 = vrot.slane %v6283_v47, 4  ;;  %v6297_v57 = vshrl.u32 %v6268_v42, 16  ;;  %v6561_v36 = vld [vmem:[#allocation4 + $0x1c] sm:$0x1]  ;;  %v8198_v38 = vld [vmem:[%s10411_s9 + $0xa0] sm:$0xff]  }
 0x6d8   : > { %v7692_v3 = vcombine.low %v6323_v13, %v6337_v44  ;;  %v6048_v50 = vrot.slane %v6047_v14, 4  ;;  %v6052_v51 = vrot.slane %v6050_v62, 5  ;;  %v6288_v37 = vrot.slane %v6286_v29, 5  ;;  %v8187_v16 = vld [vmem:[#allocation4 + $0x20] ss:$8 sps:$4 sm:$0xff]   ;;  %v8199_v47 = vld [vmem:[%s10411_s9 + $0xa8] sm:$0xff]  }
 0x6d9   : > { %v6039_v21 = vsel %vm8603_vm12, %v6034_v28, %v6038_v34  ;;  %v6299_v56 = vrot.slane %v6297_v57, 4  ;;  %v6300_v0 = vshll.u32 %v6268_v42, 16  ;;  %v6306_v6 = vshll.u32 %v6269_v7, 16  ;;  %v6146_v23 = vld [vmem:[#allocation4 + $0x20] sm:$0xe]  ;;  %7992 = vmatpush1.bf16.msra.mxu1 %v8198_v38  ;;  %7132 = vmatpush1.bf16.msra.mxu0 %v8198_v38 }
 0x6da   : > { %6408 = vrot.lane.b32.xlu0 %v7692_v3, %s10517_s24  ;;  %v6053_v1 = vsel %vm8603_vm12, %v6048_v50, %v6052_v51  ;;  %v6289_v17 = vor.u32 %v6288_v37, %v6285_v54  ;;  %v6575_v58 = vshrl.u32 %v6558_v25, 16  ;;  %v6578_v9 = vshll.u32 %v6558_v25, 16  ;;  %v8188_v41 = vld [vmem:[#allocation4 + $0x20] ss:$8 sps:$4 sm:$0xff]   ;;  %v6147_v34 = vld [vmem:[#allocation4 + $0x24] sm:$0x1]  ;;  %7982 = vmatprep.subr.bf16.mxu1 %v8271_v10 }
 0x6db   : > { %v7672_v61 = vcombine.low %v6039_v21, %v6053_v1  ;;  %v6294_v49 = vrot.slane %v6292_v19, 5  ;;  %v6302_v40 = vrot.slane %v6300_v0, 5  ;;  %v6584_v27 = vshll.u32 %v6559_v22, 16  ;;  %v6148_v14 = vld [vmem:[#allocation4 + $0x28] sm:$0xe]  ;;  %7133 = vmatprep.subr.bf16.mxu0 %v8271_v10  ;;  %v8200_v1 = vld [vmem:[%s10411_s9 + $0xb0] sm:$0xff]  }
 0x6dc   : > { %v6308_v33 = vrot.slane %v6306_v6, 5  ;;  %v6577_v39 = vrot.slane %v6575_v58, 4  ;;  %v6580_v42 = vrot.slane %v6578_v9, 5  ;;  %v6589_v15 = vshrl.u32 %v6560_v5, 16  ;;  %v6149_v29 = vld [vmem:[#allocation4 + $0x2c] sm:$0x1] }
 0x6dd   : > { %6124 = vrot.lane.b32.xlu1 %v7672_v61, %s10514_s3  ;;  %v6290_v62 = vrot.slane %v6289_v17, 4  ;;  %v6303_v7 = vor.u32 %v6302_v40, %v6299_v56  ;;  %v6592_v8 = vshll.u32 %v6560_v5, 16  ;;  %v6598_v12 = vshll.u32 %v6561_v36, 16  ;;  %v6718_v54 = vld [vmem:[#allocation4 + $0x20] sm:$0xe]  ;;  %7993 = vmatpush1.bf16.msra.mxu1 %v8199_v47 }
 0x6de   : > { %6544 = vrot.lane.b32.xlu0 %v8187_v16, %s10508_s15  ;;  %v6581_v25 = vor.u32 %v6580_v42, %v6577_v39  ;;  %v6591_v13 = vrot.slane %v6589_v15, 4  ;;  %v7679_v19 = vrot.slane %v6146_v23, 9  ;;  %v6586_v31 = vrot.slane %v6584_v27, 5  ;;  %v6719_v50 = vld [vmem:[#allocation4 + $0x24] sm:$0x1]  ;;  %7134 = vmatpush1.bf16.msra.mxu0 %v8199_v47 }
 0x6df   : > { %v6304_v22 = vrot.slane %v6303_v7, 4  ;;  %v6594_v44 = vrot.slane %v6592_v8, 5  ;;  %v6188_v28 = vrot.slane %v6147_v34, 5  ;;  %v7680_v5 = vrot.slane %v6148_v14, 9  ;;  %v8189_v56 = vld [vmem:[#allocation4 + $0x40] ss:$8 sps:$4 sm:$0xff]   ;;  %7983 = vmatprep.subr.bf16.mxu1 %v8271_v10  ;;  %7135 = vmatprep.subr.bf16.mxu0 %v8271_v10 }
 0x6e0   : > { %v6582_v57 = vrot.slane %v6581_v25, 4  ;;  %v6192_v3 = vrot.slane %v6149_v29, 5  ;;  %v7717_v51 = vrot.slane %v6718_v54, 9  ;;  %v6295_v37 = vsel %vm8603_vm12, %v6290_v62, %v6294_v49  ;;  %v6720_v6 = vld [vmem:[#allocation4 + $0x28] sm:$0xe] }
 0x6e1   : > { %5970 = vrot.lane.b32.xlu1 %v8188_v41, %s10516_s4  ;;  %v6309_v21 = vsel %vm8603_vm12, %v6304_v22, %v6308_v33  ;;  %v6595_v0 = vor.u32 %v6594_v44, %v6591_v13  ;;  %v6721_v36 = vld [vmem:[#allocation4 + $0x2c] sm:$0x1]  ;;  %v6756_v38 = vrot.slane %v6719_v50, 5  ;;  %v6600_v58 = vrot.slane %v6598_v12, 5  ;;  %v6434_v16 = vld [vmem:[#allocation4 + $0x38] sm:$0xe]  ;;  %7994 = vmatpush1.bf16.msra.mxu1 %v8200_v1 }
 0x6e2   : > { %v7691_v17 = vcombine.low %v6295_v37, %v6309_v21  ;;  %v10113_v9 = vsel %vm8539_vm9, %v7679_v19, %v6188_v28  ;;  %v7718_v61 = vrot.slane %v6720_v6, 9  ;;  %v6435_v49 = vld [vmem:[#allocation4 + $0x3c] sm:$0x1]  ;;  %v6587_v40 = vsel %vm8603_vm12, %v6582_v57, %v6586_v31  ;;  %v6436_v42 = vld [vmem:[#allocation4 + $0x40] sm:$0xe]  ;;  %7984 = vmatprep.subr.bf16.mxu1 %v8271_v10  ;;  %7136 = vmatpush1.bf16.msra.mxu0 %v8200_v1  ;;  %v8201_v37 = vld [vmem:[%s10411_s9 + $0xb8] sm:$0xff]  }
 0x6e3   : > { %v6596_v27 = vrot.slane %v6595_v0, 4  ;;  %v10120_v33 = vsel %vm8539_vm9, %v7680_v5, %v6192_v3  ;;  %v6760_v39 = vrot.slane %v6721_v36, 5  ;;  %v6437_v15 = vld [vmem:[#allocation4 + $0x44] sm:$0x1]  ;;  %v7701_v23 = vrot.slane %v6434_v16, 9  ;;  %7137 = vmatprep.subr.bf16.mxu0 %v8271_v10 }
 0x6e4   : > { %6406 = vrot.lane.b32.xlu0 %v7691_v17, %s10517_s24  ;;  %v6480_v41 = vrot.slane %v6435_v49, 5  ;;  %v7702_v62 = vrot.slane %v6436_v42, 9  ;;  %v6484_v7 = vrot.slane %v6437_v15, 5  ;;  %v6722_v8 = vld [vmem:[#allocation4 + $0x30] sm:$0xe]  ;;  %v10128_v47 = vsel %vm8539_vm9, %v7717_v51, %v6756_v38 }
 0x6e5   : > { %6548 = vrot.lane.b32.xlu1 %v8189_v56, %s10508_s15  ;;  %v6601_v12 = vsel %vm8603_vm12, %v6596_v27, %v6600_v58  ;;  %v8190_v34 = vld [vmem:[#allocation4 + $0x30] ss:$8 sps:$4 sm:$0xff]   ;;  %v10132_v25 = vsel %vm8539_vm9, %v7718_v61, %v6760_v39  ;;  %v6723_v13 = vld [vmem:[#allocation4 + $0x34] sm:$0x1]  ;;  %v6725_v29 = vld [vmem:[#allocation4 + $0x3c] sm:$0x1]  ;;  %v7685_v22 = vcombine.low %v10113_v9, %v10120_v33  ;;  %7995 = vmatpush1.bf16.msra.mxu1 %v8201_v37 }
 0x6e6   : > { %v6724_v14 = vld [vmem:[#allocation4 + $0x38] sm:$0xe]  ;;  %v7711_v19 = vcombine.low %v6587_v40, %v6601_v12  ;;  %v7724_v31 = vcombine.low %v10128_v47, %v10132_v25  ;;  %v6430_v44 = vld [vmem:[#allocation4 + $0x28] sm:$0xe]  ;;  %v6431_v28 = vld [vmem:[#allocation4 + $0x2c] sm:$0x1]  ;;  %v10141_v57 = vsel %vm8539_vm9, %v7702_v62, %v6484_v7  ;;  %v6481_v1 = vsel %vm8539_vm9, %v7701_v23, %v6480_v41  ;;  %7985 = vmatprep.subr.bf16.mxu1 %v8271_v10 }
 0x6e7   : > { %v6432_v54 = vld [vmem:[#allocation4 + $0x30] sm:$0xe]  ;;  %v7719_v5 = vrot.slane %v6722_v8, 9  ;;  %v6764_v3 = vrot.slane %v6723_v13, 5  ;;  %v7720_v50 = vrot.slane %v6724_v14, 9  ;;  %v6768_v56 = vrot.slane %v6725_v29, 5  ;;  %7138 = vmatpush1.bf16.msra.mxu0 %v8201_v37 }
 0x6e8   : > { %v6433_v51 = vld [vmem:[#allocation4 + $0x34] sm:$0x1]  ;;  %6698 = vrot.lane.b32.xlu0 %v7711_v19, %s10503_s25  ;;  %v8191_v21 = vld [vmem:[#allocation4 + $0x30] ss:$8 sps:$4 sm:$0xff]   ;;  %v7699_v0 = vrot.slane %v6430_v44, 9  ;;  %v6472_v6 = vrot.slane %v6431_v28, 5  ;;  %v7706_v49 = vcombine.low %v6481_v1, %v10141_v57  ;;  %7139 = vmatprep.subr.bf16.mxu0 %v8271_v10 }
 0x6e9   : > { %v7700_v36 = vrot.slane %v6432_v54, 9  ;;  %v6562_v38 = vld [vmem:[#allocation4 + $0x20] sm:$0xf]  ;;  %5972 = vrot.lane.b32.xlu1 %v8190_v34, %s10516_s4  ;;  %v10153_v17 = vsel %vm8539_vm9, %v7719_v5, %v6764_v3  ;;  %v6476_v58 = vrot.slane %v6433_v51, 5  ;;  %v6563_v9 = vld [vmem:[#allocation4 + $0x24] sm:$0x1]  ;;  %v10158_v40 = vsel %vm8539_vm9, %v7720_v50, %v6768_v56 }
 0x6ea   : > { %v6564_v61 = vld [vmem:[#allocation4 + $0x28] sm:$0xf]  ;;  %v6603_v16 = vshrl.u32 %v6562_v38, 16  ;;  %v6565_v27 = vld [vmem:[#allocation4 + $0x2c] sm:$0x1]  ;;  %v6606_v33 = vshll.u32 %v6562_v38, 16  ;;  %v10163_v15 = vsel %vm8539_vm9, %v7699_v0, %v6472_v6  ;;  %v7725_v12 = vcombine.low %v10153_v17, %v10158_v40 }
 0x6eb   : > { %v6612_v39 = vshll.u32 %v6563_v9, 16  ;;  %v5990_v42 = vld [vmem:[#allocation4 + $0x20] sm:$0xf]  ;;  %v10167_v23 = vsel %vm8539_vm9, %v7700_v36, %v6476_v58  ;;  %v6617_v62 = vshrl.u32 %v6564_v61, 16  ;;  %v5991_v7 = vld [vmem:[#allocation4 + $0x24] sm:$0x1] }
 0x6ec   : > { %v6605_v41 = vrot.slane %v6603_v16, 4  ;;  %v5992_v8 = vld [vmem:[#allocation4 + $0x28] sm:$0xf]  ;;  %6546 = vrot.lane.b32.xlu0 %v8191_v21, %s10508_s15  ;;  %v7705_v34 = vcombine.low %v10163_v15, %v10167_v23  ;;  %v6608_v13 = vrot.slane %v6606_v33, 5  ;;  %v6620_v14 = vshll.u32 %v6564_v61, 16  ;;  %v8202_v29 = vld [vmem:[%s10411_s9 + $0xc0] sm:$0xff]  }
 0x6ed   : > { %6218 = vrot.lane.b32.xlu1 %v7685_v22, %s10518_s2  ;;  %v6619_v19 = vrot.slane %v6617_v62, 4  ;;  %v6626_v44 = vshll.u32 %v6565_v27, 16  ;;  %v5993_v28 = vld [vmem:[#allocation4 + $0x2c] sm:$0x1]  ;;  %v6055_v54 = vshrl.u32 %v5990_v42, 16  ;;  %v6058_v57 = vshll.u32 %v5990_v42, 16  ;;  %7996 = vmatpush1.bf16.msra.mxu1 %v8202_v29 }
 0x6ee   : > { %v6609_v5 = vor.u32 %v6608_v13, %v6605_v41  ;;  %v6622_v3 = vrot.slane %v6620_v14, 5  ;;  %v6064_v50 = vshll.u32 %v5991_v7, 16  ;;  %v6069_v51 = vshrl.u32 %v5992_v8, 16  ;;  %v6274_v37 = vld [vmem:[#allocation4 + $0x28] sm:$0xf]  ;;  %v8203_v21 = vld [vmem:[%s10411_s9 + $0xc8] sm:$0xff]   ;;  %7140 = vmatpush1.bf16.msra.mxu0 %v8202_v29  ;;  %7986 = vmatprep.subr.bf16.mxu1 %v8271_v10 }
 0x6ef   : > { %v6614_v56 = vrot.slane %v6612_v39, 5  ;;  %v6057_v0 = vrot.slane %v6055_v54, 4  ;;  %v6060_v6 = vrot.slane %v6058_v57, 5  ;;  %v6072_v22 = vshll.u32 %v5992_v8, 16  ;;  %7141 = vmatprep.subr.bf16.mxu0 %v8271_v10  ;;  %v6275_v58 = vld [vmem:[#allocation4 + $0x2c] sm:$0x1] }
 0x6f0   : > { %6792 = vrot.lane.b32.xlu0 %v7724_v31, %s10509_s30  ;;  %v6610_v36 = vrot.slane %v6609_v5, 4  ;;  %v6623_v38 = vor.u32 %v6622_v3, %v6619_v19  ;;  %v6628_v1 = vrot.slane %v6626_v44, 5  ;;  %v6071_v17 = vrot.slane %v6069_v51, 4  ;;  %v6276_v40 = vld [vmem:[#allocation4 + $0x30] sm:$0xf] }
 0x6f1   : > { %6504 = vrot.lane.b32.xlu1 %v7706_v49, %s10507_s13  ;;  %v6061_v9 = vor.u32 %v6060_v6, %v6057_v0  ;;  %v6074_v61 = vrot.slane %v6072_v22, 5  ;;  %v6078_v16 = vshll.u32 %v5993_v28, 16  ;;  %v6339_v27 = vshrl.u32 %v6274_v37, 16  ;;  %v6277_v15 = vld [vmem:[#allocation4 + $0x34] sm:$0x1]  ;;  %7997 = vmatpush1.bf16.msra.mxu1 %v8203_v21 }
 0x6f2   : > { %v6615_v33 = vsel %vm8603_vm12, %v6610_v36, %v6614_v56  ;;  %v6624_v39 = vrot.slane %v6623_v38, 4  ;;  %v6066_v42 = vrot.slane %v6064_v50, 5  ;;  %v6342_v47 = vshll.u32 %v6274_v37, 16  ;;  %7142 = vmatpush1.bf16.msra.mxu0 %v8203_v21  ;;  %v6278_v62 = vld [vmem:[#allocation4 + $0x38] sm:$0xf]  ;;  %7987 = vmatprep.subr.bf16.mxu1 %v8271_v10 }
 0x6f3   : > { %v6062_v25 = vrot.slane %v6061_v9, 4  ;;  %v6075_v31 = vor.u32 %v6074_v61, %v6071_v17  ;;  %v6341_v23 = vrot.slane %v6339_v27, 4  ;;  %v6348_v41 = vshll.u32 %v6275_v58, 16  ;;  %7143 = vmatprep.subr.bf16.mxu0 %v8271_v10  ;;  %v6279_v14 = vld [vmem:[#allocation4 + $0x3c] sm:$0x1] }
 0x6f4   : > { %6794 = vrot.lane.b32.xlu0 %v7725_v12, %s10509_s30  ;;  %v6629_v49 = vsel %vm8603_vm12, %v6624_v39, %v6628_v1  ;;  %v6080_v7 = vrot.slane %v6078_v16, 5  ;;  %v6344_v8 = vrot.slane %v6342_v47, 5  ;;  %v6353_v13 = vshrl.u32 %v6276_v40, 16  ;;  %v6280_v54 = vld [vmem:[#allocation4 + $0x40] sm:$0xf] }
 0x6f5   : > { %6502 = vrot.lane.b32.xlu1 %v7705_v34, %s10507_s13  ;;  %v7712_v29 = vcombine.low %v6615_v33, %v6629_v49  ;;  %v6067_v19 = vsel %vm8603_vm12, %v6062_v25, %v6066_v42  ;;  %v6076_v44 = vrot.slane %v6075_v31, 4  ;;  %v6356_v28 = vshll.u32 %v6276_v40, 16  ;;  %v6281_v12 = vld [vmem:[#allocation4 + $0x44] sm:$0x1]  ;;  %v6566_v56 = vld [vmem:[#allocation4 + $0x30] sm:$0xf] }
 0x6f6   : > { %v6345_v57 = vor.u32 %v6344_v8, %v6341_v23  ;;  %v6355_v10 = vrot.slane %v6353_v13, 4  ;;  %v6362_v5 = vshll.u32 %v6277_v15, 16  ;;  %v6367_v3 = vshrl.u32 %v6278_v62, 16  ;;  %v6567_v36 = vld [vmem:[#allocation4 + $0x34] sm:$0x1]  ;;  %v8206_v33 = vld [vmem:[%s10411_s9 + $0xd0] sm:$0xff]  }
 0x6f7   : > { %v6081_v50 = vsel %vm8603_vm12, %v6076_v44, %v6080_v7  ;;  %v6358_v51 = vrot.slane %v6356_v28, 5  ;;  %v6370_v37 = vshll.u32 %v6278_v62, 16  ;;  %v6376_v21 = vshll.u32 %v6279_v14, 16  ;;  %v6568_v9 = vld [vmem:[#allocation4 + $0x38] sm:$0xf]  ;;  %7998 = vmatpush1.bf16.msra.mxu1 %v8206_v33  ;;  %7144 = vmatpush1.bf16.msra.mxu0 %v8206_v33 }
 0x6f8   : > { %6700 = vrot.lane.b32.xlu0 %v7712_v29, %s10503_s25  ;;  %v7673_v34 = vcombine.low %v6067_v19, %v6081_v50  ;;  %v6346_v0 = vrot.slane %v6345_v57, 4  ;;  %v6350_v6 = vrot.slane %v6348_v41, 5  ;;  %v6369_v22 = vrot.slane %v6367_v3, 4  ;;  %v6569_v23 = vld [vmem:[#allocation4 + $0x3c] sm:$0x1] }
 0x6f9   : > { %v6359_v38 = vor.u32 %v6358_v51, %v6355_v10  ;;  %v6364_v1 = vrot.slane %v6362_v5, 5  ;;  %v6372_v17 = vrot.slane %v6370_v37, 5  ;;  %v6381_v58 = vshrl.u32 %v6280_v54, 16  ;;  %v6570_v14 = vld [vmem:[#allocation4 + $0x40] sm:$0xf] }
 0x6fa   : > { %6126 = vrot.lane.b32.xlu1 %v7673_v34, %s10514_s3  ;;  %v6378_v61 = vrot.slane %v6376_v21, 5  ;;  %v6384_v16 = vshll.u32 %v6280_v54, 16  ;;  %v6390_v40 = vshll.u32 %v6281_v12, 16  ;;  %v6631_v27 = vshrl.u32 %v6566_v56, 16  ;;  %v6571_v54 = vld [vmem:[#allocation4 + $0x44] sm:$0x1] }
 0x6fb   : > { %v6360_v39 = vrot.slane %v6359_v38, 4  ;;  %v6373_v42 = vor.u32 %v6372_v17, %v6369_v22  ;;  %v6383_v15 = vrot.slane %v6381_v58, 4  ;;  %v6634_v47 = vshll.u32 %v6566_v56, 16  ;;  %v5984_v57 = vld [vmem:[#allocation4 + $0x8] sm:$0xf] }
 0x6fc   : > { %v6351_v25 = vsel %vm8603_vm12, %v6346_v0, %v6350_v6  ;;  %v6386_v31 = vrot.slane %v6384_v16, 5  ;;  %v6633_v41 = vrot.slane %v6631_v27, 4  ;;  %v6640_v62 = vshll.u32 %v6567_v36, 16  ;;  %v5985_v6 = vld [vmem:[#allocation4 + $0xc] sm:$0x1] }
 0x6fd   : > { %v6365_v49 = vsel %vm8603_vm12, %v6360_v39, %v6364_v1  ;;  %v6374_v7 = vrot.slane %v6373_v42, 4  ;;  %v6636_v8 = vrot.slane %v6634_v47, 5  ;;  %v6645_v13 = vshrl.u32 %v6568_v9, 16  ;;  %v6726_v58 = vld [vmem:[#allocation4 + $0x40] sm:$0xe] }
 0x6fe   : > { %v7693_v29 = vcombine.low %v6351_v25, %v6365_v49  ;;  %v6387_v19 = vor.u32 %v6386_v31, %v6383_v15  ;;  %v6392_v44 = vrot.slane %v6390_v40, 5  ;;  %v6648_v28 = vshll.u32 %v6568_v9, 16  ;;  %v6727_v9 = vld [vmem:[#allocation4 + $0x44] sm:$0x1]  ;;  %v6714_v39 = vld [vmem:[#allocation4 + $0x10] sm:$0xe] }
 0x6ff   : > { %v6637_v10 = vor.u32 %v6636_v8, %v6633_v41  ;;  %v6642_v5 = vrot.slane %v6640_v62, 5  ;;  %v6647_v12 = vrot.slane %v6645_v13, 4  ;;  %v6654_v3 = vshll.u32 %v6569_v23, 16  ;;  %v6715_v31 = vld [vmem:[#allocation4 + $0x14] sm:$0x1] }
 0x700   : > { %6410 = vrot.lane.b32.xlu0 %v7693_v29, %s10517_s24  ;;  %v6388_v50 = vrot.slane %v6387_v19, 4  ;;  %v6650_v51 = vrot.slane %v6648_v28, 5  ;;  %v6659_v37 = vshrl.u32 %v6570_v14, 16  ;;  %v6662_v21 = vshll.u32 %v6570_v14, 16  ;;  %v5994_v8 = vld [vmem:[#allocation4 + $0x30] sm:$0xf] }
 0x701   : > { %v6379_v56 = vsel %vm8603_vm12, %v6374_v7, %v6378_v61  ;;  %v6638_v34 = vrot.slane %v6637_v10, 4  ;;  %v6668_v0 = vshll.u32 %v6571_v54, 16  ;;  %v6013_v22 = vshrl.u32 %v5984_v57, 16  ;;  %v10217_v61 = vld [vmem:[#allocation4 + $0x4] sm:$0x1] }
 0x702   : > { %v6393_v36 = vsel %vm8603_vm12, %v6388_v50, %v6392_v44  ;;  %v6651_v38 = vor.u32 %v6650_v51, %v6647_v12  ;;  %v6661_v1 = vrot.slane %v6659_v37, 4  ;;  %v6664_v17 = vrot.slane %v6662_v21, 5  ;;  %v6716_v7 = vld [vmem:[#allocation4 + $0x18] sm:$0xe]  ;;  %v6717_v44 = vld [vmem:[#allocation4 + $0x1c] sm:$0x1] }
 0x703   : > { %v7694_v16 = vcombine.low %v6379_v56, %v6393_v36  ;;  %v6643_v40 = vsel %vm8603_vm12, %v6638_v34, %v6642_v5  ;;  %v6656_v27 = vrot.slane %v6654_v3, 5  ;;  %v6015_v33 = vrot.slane %v6013_v22, 4  ;;  %v5995_v28 = vld [vmem:[#allocation4 + $0x34] sm:$0x1]  ;;  %v5996_v54 = vld [vmem:[#allocation4 + $0x38] sm:$0xf] }
 0x704   : > { %v6652_v42 = vrot.slane %v6651_v38, 4  ;;  %v6665_v15 = vor.u32 %v6664_v17, %v6661_v1  ;;  %v6016_v47 = vshll.u32 %v5984_v57, 16  ;;  %v6022_v25 = vshll.u32 %v5985_v6, 16  ;;  %v8194_v50 = vld [vmem:[#allocation4 + $0x18] ss:$8 sps:$4 sm:$0xff]  }
 0x705   : > { %6412 = vrot.lane.b32.xlu1 %v7694_v16, %s10517_s24  ;;  %v6685_v23 = vsel %vm8603_vm12, %v10010_v30, %v10012_v11  ;;  %v6011_v41 = vsel %vm8603_vm12, %v10005_v26, %v10007_v63  ;;  %v7721_v62 = vrot.slane %v6726_v58, 9  ;;  %v6772_v49 = vrot.slane %v6727_v9, 5  ;;  %v5997_v30 = vld [vmem:[#allocation4 + $0x3c] sm:$0x1]  ;;  %v6150_v1 = vld [vmem:[#allocation4 + $0x30] sm:$0xe] }
 0x706   : > { %v6657_v13 = vsel %vm8603_vm12, %v6652_v42, %v6656_v27  ;;  %v6666_v14 = vrot.slane %v6665_v15, 4  ;;  %v6670_v29 = vrot.slane %v6668_v0, 5  ;;  %v6018_v19 = vrot.slane %v6016_v47, 5  ;;  %v8197_v17 = vld [vmem:[#allocation4 + $0x8] ss:$8 sps:$4 sm:$0xff]  }
 0x707   : > { %v7713_v57 = vcombine.low %v6643_v40, %v6657_v13  ;;  %v6777_v26 = vsel %vm8539_vm9, %v7722_v55, %v6776_v43  ;;  %v7715_v63 = vrot.slane %v6714_v39, 9  ;;  %v6172_v11 = vrot.slane %v10217_v61, 5  ;;  %v6140_v55 = vld [vmem:[#allocation4 + $0x8] sm:$0xe]  ;;  %v6141_v43 = vld [vmem:[#allocation4 + $0xc] sm:$0x1] }
 0x708   : > { %v6671_v10 = vsel %vm8603_vm12, %v6666_v14, %v6670_v29  ;;  %v6019_v5 = vor.u32 %v6018_v19, %v6015_v33  ;;  %v6024_v12 = vrot.slane %v6022_v25, 5  ;;  %v6748_v3 = vrot.slane %v6715_v31, 5  ;;  %v6151_v61 = vld [vmem:[#allocation4 + $0x34] sm:$0x1]  ;;  %v8204_v42 = vld [vmem:[#allocation4 + $0x28] ss:$8 sps:$4 sm:$0xff]  }
 0x709   : > { %6702 = vrot.lane.b32.xlu0 %v7713_v57, %s10503_s25  ;;  %v7714_v51 = vcombine.low %v6671_v10, %v6685_v23  ;;  %v6773_v32 = vsel %vm8539_vm9, %v7721_v62, %v6772_v49  ;;  %v6083_v46 = vshrl.u32 %v5994_v8, 16  ;;  %v6086_v37 = vshll.u32 %v5994_v8, 16  ;;  %v6152_v23 = vld [vmem:[#allocation4 + $0x38] sm:$0xe] }
 0x70a   : > { %v6020_v21 = vrot.slane %v6019_v5, 4  ;;  %v7716_v56 = vrot.slane %v6716_v7, 9  ;;  %v6097_v34 = vshrl.u32 %v5996_v54, 16  ;;  %v6100_v0 = vshll.u32 %v5996_v54, 16  ;;  %v6153_v7 = vld [vmem:[#allocation4 + $0x3c] sm:$0x1] }
 0x70b   : > { %vm10537_vm0 = vcmask 64512   ;;  %6704 = vrot.lane.b32.xlu1 %v7714_v51, %s10503_s25  ;;  %v6752_v6 = vrot.slane %v6717_v44, 5  ;;  %v6085_v22 = vrot.slane %v6083_v46, 4  ;;  %v6088_v36 = vrot.slane %v6086_v37, 5  ;;  %v8205_v19 = vld [vmem:[#allocation4 + $0x38] ss:$8 sps:$4 sm:$0xff]  }
 0x70c   : > { %6263 = vst.msk [vmem:[#allocation2 + $0x38] sm:$0xff] %vm10537_vm0, %v8194_v50  ;;  %v6092_v38 = vshll.u32 %v5995_v28, 16  ;;  %v6025_v58 = vsel %vm8603_vm12, %v6020_v21, %v6024_v12  ;;  %v6099_v9 = vrot.slane %v6097_v34, 4  ;;  %v6102_v16 = vrot.slane %v6100_v0, 5  ;;  %vm10538_vm1 = vmmov %vm10537_vm0  ;;  %s377_s25 = sand.u32 1, %s8261_s18  }
 0x70d   : > { %v6106_v40 = vshll.u32 %v5997_v30, 16  ;;  %v7671_v27 = vcombine.low %v6011_v41, %v6025_v58  ;;  %v7726_v33 = vcombine.low %v6773_v32, %v6777_v26  ;;  %v6089_v39 = vor.u32 %v6088_v36, %v6085_v22  ;;  %6262 = vst.msk [vmem:[#allocation2 + $0x18] sm:$0xff] %vm10538_vm1, %v8197_v17  ;;  %vm10539_vm2 = vmmov %vm10537_vm0  ;;  %s10360_s21 = scalar_lea.sflag [#allocation6], %s377_s25 }
 0x70e   : > { %v6749_v15 = vsel %vm8539_vm9, %v7715_v63, %v6748_v3  ;;  %v6103_v47 = vor.u32 %v6102_v16, %v6099_v9  ;;  %v7676_v25 = vrot.slane %v6140_v55, 9  ;;  %v6176_v31 = vrot.slane %v6141_v43, 5  ;;  %6264 = vst.msk [vmem:[#allocation2 + $0x58] sm:$0xff] %vm10539_vm2, %v8204_v42  ;;  %vm10540_vm7 = vmmov %vm10537_vm0 }
 0x70f   : > { %6122 = vrot.lane.b32.xlu0 %v7671_v27, %s10514_s3  ;;  %6796 = vrot.lane.b32.xlu1 %v7726_v33, %s10509_s30  ;;  %v6753_v41 = vsel %vm8539_vm9, %v7716_v56, %v6752_v6  ;;  %v6090_v62 = vrot.slane %v6089_v39, 4  ;;  %v6094_v49 = vrot.slane %v6092_v38, 5  ;;  %v6108_v13 = vrot.slane %v6106_v40, 5  ;;  %6265 = vst.msk [vmem:[#allocation2 + $0x78] sm:$0xff] %vm10540_vm7, %v8205_v19  ;;  %vm10553_vm1 = vmmov %vm10544_vm11 }
 0x710   : > { %v6104_v8 = vrot.slane %v6103_v47, 4  ;;  %v7681_v14 = vrot.slane %v6150_v1, 9  ;;  %v6196_v29 = vrot.slane %v6151_v61, 5  ;;  %v7723_v44 = vcombine.low %v6749_v15, %v6753_v41 }
 0x711   : > { %v6095_v28 = vsel %vm8603_vm12, %v6090_v62, %v6094_v49  ;;  %v6173_v54 = vsel %vm8539_vm9, %v7675_v24, %v6172_v11  ;;  %v6177_v26 = vsel %vm8539_vm9, %v7676_v25, %v6176_v31  ;;  %v7682_v63 = vrot.slane %v6152_v23, 9 }
 0x712   : > { %v6109_v57 = vsel %vm8603_vm12, %v6104_v8, %v6108_v13  ;;  %v6200_v30 = vrot.slane %v6153_v7, 5  ;;  %v6197_v5 = vsel %vm8539_vm9, %v7681_v14, %v6196_v29  ;;  %v7683_v45 = vcombine.low %v6173_v54, %v6177_v26  ;;  %v7727_v13 = vld [vmem:[%s10412_s10] ss:$0 sm:$0xff]  ;;  %v7198_v54 = vld [vmem:[%s8434_s14 + $0x10] sm:$0xff] }
 0x713   : > { %6790 = vrot.lane.b32.xlu0 %v7723_v44, %s10509_s30  ;;  %v7674_v10 = vcombine.low %v6095_v28, %v6109_v57  ;;  %vm10541_vm12 = vcmask 130112   ;;  %vm10549_vm10 = vcmask 326912   ;;  %vm10551_vm13 = vcmask 392512  }
 0x714   : > { %v6201_v20 = vsel %vm8539_vm9, %v7682_v63, %v6200_v30  ;;  %vm10543_vm9 = vcmask 982912   ;;  %vm10546_vm3 = vmmov %vm10541_vm12  ;;  %vm7045_vm2 = vcmask 392192   ;;  %v7101_v14 = vadd.f32 %v9789_v48, %v7727_v13 }
 0x715   : > { %6128 = vrot.lane.b32.xlu1 %v7674_v10, %s10514_s3  ;;  %v7686_v24 = vcombine.low %v6197_v5, %v6201_v20  ;;  %vm10550_vm8 = vmmov %vm10549_vm10  ;;  %v7104_v28 = vadd.f32 %v9805_v18, %v7727_v13  ;;  %v7199_v10 = vld [vmem:[%s8434_s14 + $0x18] sm:$0xff]  ;;  %v7109_v18 = vadd.f32 %v9823_v35, %v7727_v13  ;;  %v7093_v35 = vadd.f32 %v9769_v52, %v7727_v13 }
 0x716   : > { %vm10552_vm0 = vmmov %vm10543_vm9 }
 0x717   : > { %6214 = vrot.lane.b32.xlu0 %v7683_v45, %s10518_s2  ;;  %vm10554_vm7 = vmmov %vm10546_vm3 }
 0x719   : > { %6220 = vrot.lane.b32.xlu1 %v7686_v24, %s10518_s2  ;;  %s7300_s2 = sshll.u32 %s377_s25, 6 }
 0x71a   : > { %s10319_s27 = scalar_lea.vmem [#allocation5], %s7300_s2 }
 0x71b   : > { %s7234_s23 = sshll.u32 %s10319_s27, 4  ;;  %s10354_s23 = int_to_ptr.vmem [resolvable:$true] %s7234_s23 }
 0x71c   : > { %p8214_p0 = scmp.lt.s32.totalorder %s10354_s23, %s8212_s1 }
 0x72e   : > { %v5967_v11 = vpop.permute.xlu0 %5966 }
 0x72f   : > { %5978 = vst.msk [vmem:[#allocation2 + $0x10] sm:$0xff] %vm3474_vm14, %v5967_v11 }
 0x730   : > { %v5969_v12 = vpop.permute.xlu1 %5968 }
 0x731   : > { %5979 = vst.msk [vmem:[#allocation2 + $0x30] sm:$0xff] %vm3474_vm14, %v5969_v12  ;;  %v7112_v12 = vadd.f32 %v9831_v60, %v7727_v13 }
 0x732   : > { %v6543_v3 = vpop.permute.xlu0 %6542 }
 0x737   : > { %v6501_v50 = vpop.permute.xlu1 %6500 }
 0x741   : > { %v6499_v51 = vpop.permute.xlu0 %6498 }
 0x744   : > { %v6217_v32 = vpop.permute.xlu1 %6216 }
 0x74c   : > { %v6409_v46 = vpop.permute.xlu0 %6408 }
 0x74d   : > { %6419 = vst.msk [vmem:[#allocation2 + $0x38] sm:$0xff] %vm10541_vm12, %v6409_v46  ;;  %vm10556_vm12 = vmmov %vm10548_vm6 }
 0x74e   : > { %6511 = vst.msk [vmem:[#allocation2 + $0x38] sm:$0xff] %vm10542_vm4, %v6501_v50 }
 0x74f   : > { %v6125_v59 = vpop.permute.xlu1 %6124 }
 0x750   : > { %6135 = vst.msk [vmem:[#allocation2 + $0x30] sm:$0xff] %vm10543_vm9, %v6125_v59  ;;  %v6545_v37 = vpop.permute.xlu0 %6544  ;;  %vm10558_vm9 = vmmov %vm10547_vm5  ;;  %v7201_v59 = vld [vmem:[%s8434_s14 + $0x28] sm:$0xff] }
 0x751   : > { %6227 = vst.msk [vmem:[#allocation2 + $0x30] sm:$0xff] %vm10544_vm11, %v6217_v32  ;;  %vm10559_vm11 = vmmov %vm10548_vm6 }
 0x752   : > { %6555 = vst.msk [vmem:[#allocation2 + $0x38] sm:$0xff] %vm10545_vm15, %v6545_v37  ;;  %vm10560_vm15 = vmmov %vm10550_vm8 }
 0x753   : > { %v5971_v55 = vpop.permute.xlu1 %5970 }
 0x754   : > { %5980 = vst.msk [vmem:[#allocation2 + $0x50] sm:$0xff] %vm3474_vm14, %v5971_v55 }
 0x756   : > { %v6407_v43 = vpop.permute.xlu0 %6406 }
 0x757   : > { %6418 = vst.msk [vmem:[#allocation2 + $0x18] sm:$0xff] %vm10546_vm3, %v6407_v43  ;;  %v6549_v21 = vpop.permute.xlu1 %6548 }
 0x758   : > { %6510 = vst.msk [vmem:[#allocation2 + $0x18] sm:$0xff] %vm10547_vm5, %v6499_v51  ;;  %v6812_v40 = vld [vmem:[#allocation2 + $0x30] sm:$0xff]  ;;  %vm10562_vm5 = vmmov %vm10550_vm8 }
 0x759   : > { %6554 = vst.msk [vmem:[#allocation2 + $0x18] sm:$0xff] %vm10548_vm6, %v6543_v3  ;;  %vm10563_vm6 = vmmov %vm10552_vm0  ;;  %v7200_v3 = vld [vmem:[%s8434_s14 + $0x20] sm:$0xff] }
 0x75a   : > { %v6699_v56 = vpop.permute.xlu0 %6698 }
 0x75b   : > { %6710 = vst.msk [vmem:[#allocation2 + $0x18] sm:$0xff] %vm10549_vm10, %v6699_v56  ;;  %v5973_v34 = vpop.permute.xlu1 %5972 }
 0x75c   : > { %5981 = vst.msk [vmem:[#allocation2 + $0x70] sm:$0xff] %vm3474_vm14, %v5973_v34  ;;  %vm10555_vm14 = vmmov %vm10542_vm4  ;;  %v7096_v34 = vadd.f32 %v9771_v53, %v7727_v13 }
 0x75d   : > { %vm10557_vm4 = vmmov %vm10546_vm3 }
 0x75e   : > { %v6547_v0 = vpop.permute.xlu0 %6546  ;;  %vm10561_vm3 = vmmov %vm10551_vm13 }
 0x75f   : > { %v6219_v6 = vpop.permute.xlu1 %6218  ;;  %vm10564_vm10 = vmmov %vm10561_vm3 }
 0x762   : > { %v6793_v22 = vpop.permute.xlu0 %6792 }
 0x763   : > { %v6505_v36 = vpop.permute.xlu1 %6504 }
 0x766   : > { %v6795_v38 = vpop.permute.xlu0 %6794 }
 0x767   : > { %v6503_v1 = vpop.permute.xlu1 %6502 }
 0x76a   : > { %v6701_v17 = vpop.permute.xlu0 %6700 }
 0x76b   : > { %6711 = vst.msk [vmem:[#allocation2 + $0x38] sm:$0xff] %vm10550_vm8, %v6701_v17  ;;  %vm10565_vm8 = vmmov %vm10561_vm3 }
 0x76c   : > { %6803 = vst.msk [vmem:[#allocation2 + $0x38] sm:$0xff] %vm10551_vm13, %v6793_v22  ;;  %v6127_v58 = vpop.permute.xlu1 %6126  ;;  %vm10566_vm13 = vmmov %vm10552_vm0 }
 0x76d   : > { %6136 = vst.msk [vmem:[#allocation2 + $0x50] sm:$0xff] %vm10552_vm0, %v6127_v58  ;;  %vm10567_vm0 = vmmov %vm10553_vm1 }
 0x76e   : > { %6228 = vst.msk [vmem:[#allocation2 + $0x50] sm:$0xff] %vm10553_vm1, %v6219_v6  ;;  %vm10568_vm1 = vmmov %vm10567_vm0  ;;  %v7196_v6 = vld [vmem:[%s8434_s14] sm:$0xff] }
 0x772   : > { %v6411_v9 = vpop.permute.xlu0 %6410 }
 0x773   : > { %6420 = vst.msk [vmem:[#allocation2 + $0x58] sm:$0xff] %vm10554_vm7, %v6411_v9  ;;  %v6813_v16 = vld [vmem:[#allocation2 + $0x38] sm:$0xff]  ;;  %v7120_v9 = vadd.f32 %v9873_v4, %v7727_v13 }
 0x774   : > { %6512 = vst.msk [vmem:[#allocation2 + $0x58] sm:$0xff] %vm10555_vm14, %v6503_v1  ;;  %7756 = vmatprep.mubr.msk.bf16.mxu1 %vm7045_vm2, %v6813_v16  ;;  %v7197_v16 = vld [vmem:[%s8434_s14 + $0x8] sm:$0xff] }
 0x775   : > { %6556 = vst.msk [vmem:[#allocation2 + $0x58] sm:$0xff] %vm10556_vm12, %v6547_v0  ;;  %7164 = vmatmul.mubr.bf16.vlgmr.msra.gmra.mrb[32].mxu1 %v6812_v40  ;;  %v6816_v25 = vld [vmem:[#allocation2 + $0x50] sm:$0xff]  ;;  %v7117_v0 = vadd.f32 %v9855_v2, %v7727_v13 }
 0x776   : > { %v7202_v40 = vld [vmem:[%s8434_s14 + $0x30] sm:$0xff] }
 0x777   : > { %v6413_v27 = vpop.permute.xlu1 %6412 }
 0x778   : > { %6421 = vst.msk [vmem:[#allocation2 + $0x78] sm:$0xff] %vm10557_vm4, %v6413_v27 }
 0x779   : > { %6513 = vst.msk [vmem:[#allocation2 + $0x78] sm:$0xff] %vm10558_vm9, %v6505_v36 }
 0x77a   : > { %6557 = vst.msk [vmem:[#allocation2 + $0x78] sm:$0xff] %vm10559_vm11, %v6549_v21 }
 0x77b   : > { %v6703_v33 = vpop.permute.xlu0 %6702 }
 0x77c   : > { %6712 = vst.msk [vmem:[#allocation2 + $0x58] sm:$0xff] %vm10560_vm15, %v6703_v33 }
 0x77d   : > { %6804 = vst.msk [vmem:[#allocation2 + $0x58] sm:$0xff] %vm10561_vm3, %v6795_v38  ;;  %v6705_v39 = vpop.permute.xlu1 %6704 }
 0x77e   : > { %6713 = vst.msk [vmem:[#allocation2 + $0x78] sm:$0xff] %vm10562_vm5, %v6705_v39 }
 0x781   : > { %v6123_v61 = vpop.permute.xlu0 %6122  ;;  %v6797_v42 = vpop.permute.xlu1 %6796 }
 0x782   : > { %6134 = vst.msk [vmem:[#allocation2 + $0x10] sm:$0xff] %vm10563_vm6, %v6123_v61 }
 0x783   : > { %6805 = vst.msk [vmem:[#allocation2 + $0x78] sm:$0xff] %vm10564_vm10, %v6797_v42  ;;  %v7203_v42 = vld [vmem:[%s8434_s14 + $0x38] sm:$0xff]  ;;  %s8207_s14 = scalar_lea.vmem %s10354_s23, 1024 }
 0x784   : > { %v6817_v15 = vld [vmem:[#allocation2 + $0x58] sm:$0xff]  ;;  %p8208_p11 = scmp.ne.s32.totalorder %s10354_s23, %s8207_s14  ;;  %p8215_p1 = scmp.lt.s32.totalorder %s8213_s26, %s8207_s14 }
 0x785   : > { %v6791_v47 = vpop.permute.xlu0 %6790  ;;  %7757 = vmatprep.mubr.msk.bf16.mxu1 %vm7045_vm2, %v6817_v15 }
 0x786   : > { %6802 = vst.msk [vmem:[#allocation2 + $0x18] sm:$0xff] %vm10565_vm8, %v6791_v47  ;;  %7172 = vmatmul.mubr.bf16.gmra.mrb[36].mxu1 %v6816_v25  ;;  %p8209_p12 = pnand %p8208_p11, %p8387_p5  ;;  %p8216_p2 = por %p8215_p1, %p8214_p0 }
 0x787   : > { %v6129_v31 = vpop.permute.xlu1 %6128 }
 0x788   : > { %6137 = vst.msk [vmem:[#allocation2 + $0x70] sm:$0xff] %vm10566_vm13, %v6129_v31  ;;  %p8210_p13 = pneg %p8209_p12 }
 0x789   : > { %v6215_v23 = vpop.permute.xlu0 %6214 }
 0x78a   : > { %v6821_v41 = vld [vmem:[#allocation2 + $0x78] sm:$0xff]  ;;  %6226 = vst.msk [vmem:[#allocation2 + $0x10] sm:$0xff] %vm10567_vm0, %v6215_v23  ;;  %p8217_p3 = pnand %p8216_p2, %p8210_p13 }
 0x78b   : > { %7758 = vmatprep.mubr.msk.bf16.mxu1 %vm7045_vm2, %v6821_v41  ;;  %v6221_v62 = vpop.permute.xlu1 %6220 }
 0x78c   : > { %6229 = vst.msk [vmem:[#allocation2 + $0x70] sm:$0xff] %vm10568_vm1, %v6221_v62 }
 0x78d   : > { %v6809_v49 = vld [vmem:[#allocation2 + $0x18] sm:$0xff] }
 0x78e   : > { %7755 = vmatprep.mubr.msk.bf16.mxu0 %vm7045_vm2, %v6809_v49  ;;  %vm10569_vm2 = vcmask 130048  }
 0x78f   : > { %vm10570_vm7 = vmmov %vm10569_vm2 }
 0x790   : > { %vm10571_vm14 = vmmov %vm10569_vm2 }
 0x791   : > { %v6808_v7 = vld [vmem:[#allocation2 + $0x10] sm:$0xff]  ;;  %vm10572_vm12 = vmmov %vm10569_vm2 }
 0x792   : > { %7156 = vmatmul.mubr.bf16.vlgmr.msra.gmra.mrb[64].mxu0 %v6808_v7  ;;  %vm10574_vm4 = vmmov %vm10569_vm2 }
 0x793   : > { %v6820_v8 = vld [vmem:[#allocation2 + $0x70] sm:$0xff]  ;;  %vm10577_vm9 = vmmov %vm10569_vm2 }
 0x794   : > { %7180 = vmatmul.mubr.bf16.gmra.mrb[40].mxu1 %v6820_v8  ;;  %vm10578_vm11 = vmmov %vm10569_vm2 }
 0x795   : > { %vm10579_vm15 = vmmov %vm10569_vm2 }
 0x848   : > { %v7165_v29 = vpop.f32.mrb[32].mxu1 }
 0x849   : > { %v7166_v19 = vadd.f32 %v7165_v29, %v7101_v14  ;;  %v7167_v44 = vpop.f32.mrb[33].mxu1 }
 0x84a   : > { %v7168_v57 = vpop.f32.mrb[34].mxu1 }
 0x84b   : > { %v7190_v26 = vmul.f32 0.2, %v7166_v19  ;;  %v7169_v63 = vadd.f32 %v7168_v57, %v7104_v28  ;;  %v7170_v30 = vpop.f32.mrb[35].mxu1 }
 0x84d   : > { %v7206_v5 = vadd.f32 %v7198_v54, %v7190_v26  ;;  %v7191_v45 = vmul.f32 0.2, %v7169_v63 }
 0x84f   : > { %7214 = vst.msk [vmem:[%s10319_s27 + $0x10] sm:$0xff] %vm10569_vm2, %v7206_v5  ;;  %v7207_v48 = vadd.f32 %v7199_v10, %v7191_v45 }
 0x851   : > { %7215 = vst.msk [vmem:[%s10319_s27 + $0x18] sm:$0xff] %vm10570_vm7, %v7207_v48 }
 0x859   : > { %v7173_v20 = vpop.f32.mrb[36].mxu1 }
 0x85a   : > { %v7174_v24 = vadd.f32 %v7173_v20, %v7109_v18  ;;  %v7175_v11 = vpop.f32.mrb[37].mxu1 }
 0x85b   : > { %v7176_v50 = vpop.f32.mrb[38].mxu1 }
 0x85c   : > { %v7192_v51 = vmul.f32 0.2, %v7174_v24  ;;  %v7177_v32 = vadd.f32 %v7176_v50, %v7112_v12  ;;  %v7178_v46 = vpop.f32.mrb[39].mxu1 }
 0x85e   : > { %v7208_v37 = vadd.f32 %v7200_v3, %v7192_v51  ;;  %v7193_v55 = vmul.f32 0.2, %v7177_v32 }
 0x860   : > { %7216 = vst.msk [vmem:[%s10319_s27 + $0x20] sm:$0xff] %vm10571_vm14, %v7208_v37  ;;  %v7209_v43 = vadd.f32 %v7201_v59, %v7193_v55 }
 0x862   : > { %7217 = vst.msk [vmem:[%s10319_s27 + $0x28] sm:$0xff] %vm10572_vm12, %v7209_v43 }
 0x865   : > { %v7157_v21 = vpop.f32.mrb[64].mxu0 }
 0x866   : > { %v7158_v60 = vadd.f32 %v7157_v21, %v7093_v35  ;;  %v7159_v56 = vpop.f32.mrb[65].mxu0 }
 0x867   : > { %v7160_v22 = vpop.f32.mrb[66].mxu0  ;;  %v7181_v36 = vpop.f32.mrb[40].mxu1 }
 0x868   : > { %v7188_v38 = vmul.f32 0.2, %v7158_v60  ;;  %v7161_v1 = vadd.f32 %v7160_v22, %v7096_v34  ;;  %v7182_v17 = vadd.f32 %v7181_v36, %v7117_v0  ;;  %v7162_v58 = vpop.f32.mrb[67].mxu0  ;;  %v7183_v52 = vpop.f32.mrb[41].mxu1 }
 0x869   : > { %v7184_v53 = vpop.f32.mrb[42].mxu1 }
 0x86a   : > { %v7204_v2 = vadd.f32 %v7196_v6, %v7188_v38  ;;  %v7189_v27 = vmul.f32 0.2, %v7161_v1  ;;  %v7194_v33 = vmul.f32 0.2, %v7182_v17  ;;  %v7185_v39 = vadd.f32 %v7184_v53, %v7120_v9  ;;  %v7186_v61 = vpop.f32.mrb[43].mxu1 }
 0x86c   : > { %7212 = vst.msk [vmem:[%s10319_s27] sm:$0xff] %vm10574_vm4, %v7204_v2  ;;  %v7205_v15 = vadd.f32 %v7197_v16, %v7189_v27  ;;  %v7210_v4 = vadd.f32 %v7202_v40, %v7194_v33  ;;  %v7195_v47 = vmul.f32 0.2, %v7185_v39 }
 0x86e   : > { %7213 = vst.msk [vmem:[%s10319_s27 + $0x8] sm:$0xff] %vm10577_vm9, %v7205_v15  ;;  %v7211_v25 = vadd.f32 %v7203_v42, %v7195_v47 }
 0x86f   : > { %7218 = vst.msk [vmem:[%s10319_s27 + $0x30] sm:$0xff] %vm10578_vm11, %v7210_v4 }
 0x870   : > { %7219 = vst.msk [vmem:[%s10319_s27 + $0x38] sm:$0xff] %vm10579_vm15, %v7211_v25 }
 0x871   : > { %8220 = shalt.err (!%p8217_p3)
}
 0x872   : > { %s8221_s4 = scalar_lea.hbm %s10348_s22, 1024  ;;  %s8225_s28 = scalar_lea.hbm %s10576_s16, 2048 }
 0x873   : > { %p8222_p4 = scmp.ne.s32.totalorder %s10348_s22, %s8221_s4  ;;  %p8226_p9 = scmp.lt.u32.totalorder %s10348_s22, %s10576_s16 }
 0x874   : > { %p8227_p10 = scmp.lt.u32.totalorder %s8225_s28, %s8221_s4  ;;  %p8229_p12 = scmp.lt.u32.totalorder %s8221_s4, %s10348_s22 }
 0x875   : > { %p8223_p7 = pnand %p8222_p4, %p8387_p5 }
 0x876   : > { %p8228_p11 = por %p8227_p10, %p8226_p9 }
 0x877   : > { %p8224_p8 = pneg %p8223_p7 }
 0x878   : > { %p8230_p13 = por %p8229_p12, %p8228_p11 }
 0x87a   : > { %p8231_p0 = pnand %p8230_p13, %p8224_p8 }
 0x87c   : > { %8234 = shalt.err (!%p8231_p0)
}
 0x87d   : > { %s8288_s25 = smov 128  }
 0x87e   : > { %8000 = dma.vmem_to_hbm [thread:$0]  (%p8387_p5), %s10354_s23, 1024, %s10348_s22, %s10360_s21, %s8288_s25, %s8288_s25, %s10517_s24  }
 0x87f PF: > { %s10580_s30 = sld [smem:[#allocation10_spill]]  ;;  %s10581_s3 = sld [smem:[#allocation8_spill]] }
 0x885   : > { %p8006_p1 = scmp.ge.s32.totalorder %s10580_s30, 2  ;;  %s7249_s27 = sand.u32 1, %s10581_s3  }
 0x886   : > { %s7250_s0 = scalar_lea.sflag [#allocation6], %s7249_s27 }
 0x887   : > { %p8003_p2 = pnand %p8006_p1, %p8391_p6 }
 0x889   : > { %8252 = dma.done.wait (!%p8003_p2), %s7250_s0, 1024  }
 0x88a   : > { %8254 = vsyncadd (!%p8003_p2), %s7250_s0, 4294966272  ;;  %s10583_s20 = sld [smem:[#allocation11_spill]]  ;;  %s10584_s5 = sld [smem:[#allocation9_spill]] }
 0x88b   : > { %s10585_s19 = sld [smem:[#allocation12_spill]]  ;;  %s10586_s17 = smov %s8261_s18 }
 0x890   : > { %p21_p3 = scmp.ge.s32.totalorder %s10583_s20, 4   ;;  %s10587_s18 = smov %s10584_s5 }
 0x892   :  { %23 = sbr.rel (!%p21_p3) target bundleno = 11 (0xb), region = 105 }
 0x899   :  { %7255 = vsyncpa [#allocation6], 1 }
 0x89a   :  { %7257 = vsyncpa [#allocation6 + $0x1], 1 }

</bundles_post_ra>
